<compile_context>
chip_gen: v7x
topology: tpu7x:2x2x1
jax: 0.10.0
libtpu: 0.0.40
codegen_flags: <defaults>
</compile_context>

<pallas_src>
import functools

import numpy as np
import jax
import jax.numpy as jnp
from jax import lax
from jax.experimental import pallas as pl
from jax.experimental.pallas import tpu as pltpu

NEG_SLOPE = 0.2     # GATConv negative_slope
EPS = 1e-12         # F.normalize eps
NEG_INF = -1e30     # additive mask value (bf16-representable)


# ---------------------------------------------------------------------------------
# Kernel 1: per-layer projection  z = normalize(x) @ W, plus dest/src scores er/el.
# Row-tiled ("parallel"); el is emitted lane-dense (1, N) so the attention kernel
# never has to transpose a sublane vector.
# ---------------------------------------------------------------------------------
def _project_kernel(x_ref, w_ref, al_ref, ar_ref, z_ref, er_ref, el_ref):
    f32 = jnp.float32
    x = x_ref[...].astype(f32)                                    # (TM, Fin)
    ss = jnp.sum(x * x, axis=-1, keepdims=True)
    xn = x * lax.rsqrt(jnp.maximum(ss, f32(EPS * EPS)))           # F.normalize(x, dim=1)
    # TODO(synk): feat_drop is identity (eval-mode semantics).
    z = jnp.dot(xn.astype(jnp.bfloat16), w_ref[...],
                preferred_element_type=f32)                       # (TM, Fo), f32 accum
    er_ref[...] = jnp.sum(z * ar_ref[...], axis=-1, keepdims=True)          # dest scores (TM, 1)
    el_ref[...] = lax.dot_general(al_ref[...], z, (((1,), (1,)), ((), ())),
                                  preferred_element_type=f32)     # src scores (1, TM)
    z_ref[...] = z.astype(jnp.bfloat16)


# ---------------------------------------------------------------------------------
# Kernel 2: flash-style GAT edge softmax + aggregation + residual + per-node
# semantic score.  grid = (dest-row tiles "parallel", src-col tiles "arbitrary").
# ---------------------------------------------------------------------------------
def _gat_attn_kernel(bias_ref, er_ref, el_ref, z_ref, hprev_ref, b_ref,
                     sw1_ref, sb1_ref, sw2_ref,
                     h_ref, s_ref, m_sc, l_sc, acc_sc):
    f32 = jnp.float32
    k = pl.program_id(1)

    @pl.when(k == 0)
    def _():
        m_sc[...] = jnp.full_like(m_sc, -jnp.inf)
        l_sc[...] = jnp.zeros_like(l_sc)
        acc_sc[...] = jnp.zeros_like(acc_sc)

    # e[i, j] = leaky_relu(er[i] + el[j]) + bias[i, j]  (bias: 0 on edge, -1e30 off)
    e = er_ref[...] + el_ref[...]                                 # (TM, TK) f32
    e = jnp.maximum(e, NEG_SLOPE * e)                             # leaky relu (slope < 1)
    e = e + bias_ref[...].astype(f32)                             # per-tile bf16 -> f32 cast

    m_prev = m_sc[...]
    m_new = jnp.maximum(m_prev, jnp.max(e, axis=-1, keepdims=True))
    corr = jnp.exp(m_prev - m_new)
    p = jnp.exp(e - m_new)                                        # masked entries underflow to 0
    # TODO(synk): attn_drop is identity (eval-mode semantics).
    l_sc[...] = corr * l_sc[...] + jnp.sum(p, axis=-1, keepdims=True)
    acc_sc[...] = corr * acc_sc[...] + jnp.dot(p.astype(jnp.bfloat16), z_ref[...],
                                               preferred_element_type=f32)
    m_sc[...] = m_new

    @pl.when(k == pl.num_programs(1) - 1)
    def _():
        y = acc_sc[...] * pl.reciprocal(l_sc[...], approx=True) + b_ref[...]
        h_new = hprev_ref[...] + y                                # residual accumulation
        h_ref[...] = h_new
        # SemanticAttention per-node score for this layer (avoids the (3N, Fo)
        # concat / (3N, H) temporaries; reduced to one scalar by _beta_kernel).
        t = jnp.tanh(jnp.dot(h_new.astype(jnp.bfloat16), sw1_ref[...],
                             preferred_element_type=f32) + sb1_ref[...])   # (TM, H)
        s_ref[...] = jnp.sum(t * sw2_ref[...], axis=-1, keepdims=True)     # (TM, 1)


# ---------------------------------------------------------------------------------
# Kernel 3: reduce per-node semantic scores to 3 betas (tiny, gridless).
# ---------------------------------------------------------------------------------
def _beta_kernel(s0_ref, s1_ref, s2_ref, b0_ref, b1_ref, b2_ref, *, n_valid):
    f32 = jnp.float32

    def masked_mean(ref):
        s = ref[...]                                              # (Npad, 1)
        row = lax.broadcasted_iota(jnp.int32, s.shape, 0)
        s = jnp.where(row < n_valid, s, f32(0.0))                 # ignore padded rows
        return jnp.sum(s, axis=0, keepdims=True) * f32(1.0 / n_valid)   # (1, 1)

    w0, w1, w2 = masked_mean(s0_ref), masked_mean(s1_ref), masked_mean(s2_ref)
    m = jnp.maximum(jnp.maximum(w0, w1), w2)
    e0, e1, e2 = jnp.exp(w0 - m), jnp.exp(w1 - m), jnp.exp(w2 - m)
    inv = pl.reciprocal(e0 + e1 + e2, approx=True)
    zeros = jnp.zeros(b0_ref.shape, f32)                          # lane-broadcast the scalars
    b0_ref[...] = e0 * inv + zeros
    b1_ref[...] = e1 * inv + zeros
    b2_ref[...] = e2 * inv + zeros


# ---------------------------------------------------------------------------------
# Kernel 4: beta-weighted combine of the 3 layer outputs + final normalize.
# Row-tiled ("parallel").
# ---------------------------------------------------------------------------------
def _combine_kernel(b0_ref, b1_ref, b2_ref, h0_ref, h1_ref, h2_ref, out_ref):
    f32 = jnp.float32
    out = (b0_ref[...] * h0_ref[...] + b1_ref[...] * h1_ref[...]
           + b2_ref[...] * h2_ref[...])                           # (TM, Fo)
    ss = jnp.sum(out * out, axis=-1, keepdims=True)
    out_ref[...] = (out * lax.rsqrt(jnp.maximum(ss, f32(EPS * EPS)))).astype(out_ref.dtype)


# ---------------------------------------------------------------------------------
# Wrapper helpers
# ---------------------------------------------------------------------------------
def _compiler_params(dim_sems, block_bytes):
    """vmem limit derived from the per-tile working set, capped per chip."""
    try:
        cap = int(pltpu.get_tpu_info().vmem_capacity_bytes)
    except Exception:
        cap = 64 << 20                                   # conservative (v7x-sized) fallback
    limit = int(min(max(4 * int(block_bytes), 16 << 20), cap // 2))
    return pltpu.CompilerParams(dimension_semantics=dim_sems, vmem_limit_bytes=limit)


def _project(x, w_bf16, al, ar, *, tm):
    n, fin = x.shape
    fo = w_bf16.shape[1]
    blk = tm * fin * 4 + fin * fo * 2 + 2 * fo * 4 + tm * fo * 2 + 2 * tm * 4
    return pl.pallas_call(
        _project_kernel,
        out_shape=(jax.ShapeDtypeStruct((n, fo), jnp.bfloat16),   # z (MXU operand dtype)
                   jax.ShapeDtypeStruct((n, 1), jnp.float32),     # er (dest scores)
                   jax.ShapeDtypeStruct((1, n), jnp.float32)),    # el (src scores, lane-dense)
        grid=(n // tm,),
        in_specs=[pl.BlockSpec((tm, fin), lambda i: (i, 0)),
                  pl.BlockSpec((fin, fo), lambda i: (0, 0)),
                  pl.BlockSpec((1, fo), lambda i: (0, 0)),
                  pl.BlockSpec((1, fo), lambda i: (0, 0))],
        out_specs=(pl.BlockSpec((tm, fo), lambda i: (i, 0)),
                   pl.BlockSpec((tm, 1), lambda i: (i, 0)),
                   pl.BlockSpec((1, tm), lambda i: (0, i))),
        compiler_params=_compiler_params(("parallel",), blk),
    )(x, w_bf16, al, ar)


def _gat_attention(bias, er, el, z, h_prev, b, sw1, sb1, sw2, *, tm, tk):
    n = bias.shape[0]
    fo = z.shape[1]
    hid = sw1.shape[1]
    blk = (tm * tk * 2 + tk * fo * 2 + tm * 4 + tk * 4 + tm * fo * 4     # streamed inputs
           + fo * 4 + fo * hid * 2 + 2 * hid * 4                         # small resident inputs
           + tm * fo * 4 + tm * 4                                        # outputs
           + 2 * tm * 4 + tm * fo * 4)                                   # scratch
    return pl.pallas_call(
        _gat_attn_kernel,
        out_shape=(jax.ShapeDtypeStruct((n, fo), jnp.float32),    # h_acc (residual-added)
                   jax.ShapeDtypeStruct((n, 1), jnp.float32)),    # per-node semantic score
        grid=(n // tm, n // tk),                                  # reduction (src) axis last
        in_specs=[pl.BlockSpec((tm, tk), lambda i, k: (i, k)),    # bf16 bias tile (streamed)
                  pl.BlockSpec((tm, 1), lambda i, k: (i, 0)),     # er rows
                  pl.BlockSpec((1, tk), lambda i, k: (0, k)),     # el cols
                  pl.BlockSpec((tk, fo), lambda i, k: (k, 0)),    # z cols (bf16 "V")
                  pl.BlockSpec((tm, fo), lambda i, k: (i, 0)),    # residual input rows
                  pl.BlockSpec((1, fo), lambda i, k: (0, 0)),     # GATConv bias
                  pl.BlockSpec((fo, hid), lambda i, k: (0, 0)),   # semantic W1 (bf16)
                  pl.BlockSpec((1, hid), lambda i, k: (0, 0)),    # semantic b1
                  pl.BlockSpec((1, hid), lambda i, k: (0, 0))],   # semantic w2 (row)
        out_specs=(pl.BlockSpec((tm, fo), lambda i, k: (i, 0)),
                   pl.BlockSpec((tm, 1), lambda i, k: (i, 0))),
        scratch_shapes=[pltpu.VMEM((tm, 1), jnp.float32),         # running max m
                        pltpu.VMEM((tm, 1), jnp.float32),         # running denom l
                        pltpu.VMEM((tm, fo), jnp.float32)],       # running accumulator
        compiler_params=_compiler_params(("parallel", "arbitrary"), blk),
    )(bias, er, el, z, h_prev, b, sw1, sb1, sw2)


def _semantic_betas(s0, s1, s2, fo, n_valid):
    vmem = pl.BlockSpec(memory_space=pltpu.MemorySpace.VMEM)
    return pl.pallas_call(
        functools.partial(_beta_kernel, n_valid=n_valid),
        out_shape=tuple(jax.ShapeDtypeStruct((1, fo), jnp.float32) for _ in range(3)),
        in_specs=[vmem, vmem, vmem],
        out_specs=tuple(vmem for _ in range(3)),
    )(s0, s1, s2)


def _combine(b0, b1, b2, h0, h1, h2, *, tm):
    n, fo = h0.shape
    blk = 3 * fo * 4 + 4 * tm * fo * 4
    # TODO(synk): optionally pad Fo=64 to 128 lanes for unmasked stores on v6e/v7x.
    return pl.pallas_call(
        _combine_kernel,
        out_shape=jax.ShapeDtypeStruct((n, fo), jnp.float32),
        grid=(n // tm,),
        in_specs=[pl.BlockSpec((1, fo), lambda i: (0, 0)),
                  pl.BlockSpec((1, fo), lambda i: (0, 0)),
                  pl.BlockSpec((1, fo), lambda i: (0, 0)),
                  pl.BlockSpec((tm, fo), lambda i: (i, 0)),
                  pl.BlockSpec((tm, fo), lambda i: (i, 0)),
                  pl.BlockSpec((tm, fo), lambda i: (i, 0))],
        out_specs=pl.BlockSpec((tm, fo), lambda i: (i, 0)),
        compiler_params=_compiler_params(("parallel",), blk),
    )(b0, b1, b2, h0, h1, h2)


def make_bias(adj):
    """adj[i, j] = 1 iff edge from src j to dst i  ->  bf16 additive softmax bias.
    If the graph is static, build this ONCE outside the jitted forward and reuse."""
    return jnp.where(adj > 0, 0.0, NEG_INF).astype(jnp.bfloat16)


def _round_up(x, m):
    return ((x + m - 1) // m) * m


def mmgat_forward(h, bias, params, *, tile=None):
    """Forward pass of MMGATLayer (eval mode).  bias = make_bias(adj)."""
    n, _ = h.shape
    gat = params["gat"]
    sem = params["sem"]
    fo = gat[0]["W"].shape[1]

    # 256-wide tiles fill the v6e/v7x MXU; also fine on v5e's 4x128^2 MXU.
    t = tile or (128 if n <= 128 else 256)
    n_pad = _round_up(n, t)
    if n_pad != n:
        h = jnp.pad(h, ((0, n_pad - n), (0, 0)))
        bias = jnp.pad(bias, ((0, n_pad - n), (0, n_pad - n)), constant_values=NEG_INF)

    sw1 = sem["W1"].astype(jnp.bfloat16)     # (Fo, H)
    sb1 = sem["b1"]                          # (1, H)
    sw2 = sem["W2"].T                        # (1, H) lane-dense

    x = h
    h_prev = jnp.zeros((n_pad, fo), jnp.float32)
    h_list, s_list = [], []
    for lp in gat:
        z, er, el = _project(x, lp["W"].astype(jnp.bfloat16), lp["al"], lp["ar"], tm=t)
        h_new, s = _gat_attention(bias, er, el, z, h_prev, lp["b"],
                                  sw1, sb1, sw2, tm=t, tk=t)
        h_list.append(h_new)
        s_list.append(s)
        h_prev = h_new
        x = h_new

    b0, b1, b2 = _semantic_betas(s_list[0], s_list[1], s_list[2], fo, n)
    out = _combine(b0, b1, b2, *h_list, tm=t)[:n]
    beta = jnp.concatenate([b0[:, :1], b1[:, :1], b2[:, :1]], axis=0)   # (3, 1)
    return out, beta


# ---------------------------------------------------------------------------------
# Deterministic parameter init (xavier-style, not a checkpoint load).
# ---------------------------------------------------------------------------------
def init_params(key, in_feats, out_feats, hidden):
    params = {"gat": [], "sem": {}}
    fin = in_feats
    gain = float(np.sqrt(2.0))
    for _ in range(3):
        key, k1, k2, k3 = jax.random.split(key, 4)
        W = jax.random.normal(k1, (fin, out_feats), jnp.float32) * gain * np.sqrt(2.0 / (fin + out_feats))
        al = jax.random.normal(k2, (1, out_feats), jnp.float32) * gain * np.sqrt(2.0 / (1 + out_feats))
        ar = jax.random.normal(k3, (1, out_feats), jnp.float32) * gain * np.sqrt(2.0 / (1 + out_feats))
        b = jnp.zeros((1, out_feats), jnp.float32)
        params["gat"].append({"W": W, "al": al, "ar": ar, "b": b})
        fin = out_feats
    key, k1, k2 = jax.random.split(key, 3)
    W1 = jax.random.normal(k1, (out_feats, hidden), jnp.float32) * np.sqrt(2.0 / (out_feats + hidden))
    b1 = jnp.zeros((1, hidden), jnp.float32)
    W2 = jax.random.normal(k2, (hidden, 1), jnp.float32) * np.sqrt(2.0 / (hidden + 1))
    params["sem"] = {"W1": W1, "b1": b1, "W2": W2}
    return params


# ---------------------------------------------------------------------------------
# Pure-JAX f32 reference (original module math) for the correctness check.
# ---------------------------------------------------------------------------------
def reference(h, adj, params):
    def normalize(x):
        nrm = jnp.sqrt(jnp.sum(x * x, axis=-1, keepdims=True))
        return x / jnp.maximum(nrm, EPS)

    mask = (adj > 0).astype(jnp.float32)
    h_acc = None
    h_list = []
    x = h
    for lp in params["gat"]:
        xn = normalize(x)
        z = xn @ lp["W"]
        el = jnp.sum(z * lp["al"], -1, keepdims=True)   # (N, 1) src
        er = jnp.sum(z * lp["ar"], -1, keepdims=True)   # (N, 1) dst
        e = er + el.T
        e = jnp.where(e > 0, e, NEG_SLOPE * e)
        e = jnp.where(adj > 0, e, -1e30)
        p = jnp.exp(e - jnp.max(e, -1, keepdims=True)) * mask
        alpha = p / jnp.sum(p, -1, keepdims=True)
        y = alpha @ z + lp["b"]
        h_acc = y if h_acc is None else h_acc + y
        x = h_acc
        h_list.append(h_acc)
    z3 = jnp.stack(h_list, axis=1)                      # (N, 3, 64)
    sem = params["sem"]
    w = jnp.tanh(z3 @ sem["W1"] + sem["b1"]) @ sem["W2"]  # (N, 3, 1)
    w = w.mean(0)                                       # (3, 1)
    beta = jax.nn.softmax(w, axis=0)
    out = (beta[None] * z3).sum(1)
    return normalize(out), beta


if __name__ == "__main__":
    N, IN_FEATS, OUT_FEATS, HIDDEN = 500, 32, 64, 16    # SemanticAttention(64, 16)

    key = jax.random.PRNGKey(0)
    key, k_h, k_adj, k_p = jax.random.split(key, 4)

    h = jax.random.normal(k_h, (N, IN_FEATS), jnp.float32)
    adj = jax.random.bernoulli(k_adj, 0.1, (N, N)).astype(jnp.float32)
    adj = jnp.maximum(adj, jnp.eye(N, dtype=jnp.float32))   # self loops: every dst has >= 1 in-edge
    params = init_params(k_p, IN_FEATS, OUT_FEATS, HIDDEN)

    bias = make_bias(adj)                 # static graph: built once, reused across calls
    fwd = jax.jit(mmgat_forward)
    out, beta = fwd(h, bias, params)
    out = jax.block_until_ready(out)
    beta = jax.block_until_ready(beta)

    # Reference is pure f32; the kernels use bf16 MXU operands with f32 accumulation,
    # so compare at a bf16-appropriate tolerance.
    out_ref, beta_ref = reference(h, adj, params)
    np.testing.assert_allclose(np.asarray(out), np.asarray(out_ref), rtol=1e-2, atol=1e-2)
    np.testing.assert_allclose(np.asarray(beta), np.asarray(beta_ref), rtol=1e-2, atol=1e-2)

    assert out.shape == (N, OUT_FEATS) and beta.shape == (3, 1)
    print("KERNEL_OK")
</pallas_src>

<mosaic_0001>
module attributes {stable_mosaic.version = 11 : i64} {
  func.func @_project_kernel(%arg0: i32, %arg1: memref<256x32xf32, #tpu.memory_space<vmem>>, %arg2: memref<32x64xbf16, #tpu.memory_space<vmem>>, %arg3: memref<1x64xf32, #tpu.memory_space<vmem>>, %arg4: memref<1x64xf32, #tpu.memory_space<vmem>>, %arg5: memref<256x64xbf16, #tpu.memory_space<vmem>>, %arg6: memref<256x1xf32, #tpu.memory_space<vmem>>, %arg7: memref<1x256xf32, #tpu.memory_space<vmem>>) attributes {dimension_semantics = [#tpu.dimension_semantics<parallel>], iteration_bounds = array<i64: 2>, scalar_prefetch = 0 : i64, scratch_operands = 0 : i64, tpu.core_type = #tpu.core_type<tc>, window_params = [{transform_indices = @transform_0, window_bounds = array<i64: 256, 32>}, {pipeline_mode = #tpu.pipeline_mode<synchronous>, transform_indices = @transform_1, window_bounds = array<i64: 32, 64>}, {pipeline_mode = #tpu.pipeline_mode<synchronous>, transform_indices = @transform_2, window_bounds = array<i64: 1, 64>}, {pipeline_mode = #tpu.pipeline_mode<synchronous>, transform_indices = @transform_3, window_bounds = array<i64: 1, 64>}, {transform_indices = @transform_4, window_bounds = array<i64: 256, 64>}, {transform_indices = @transform_5, window_bounds = array<i64: 256, 1>}, {transform_indices = @transform_6, window_bounds = array<i64: 1, 256>}]} {
    %c0 = arith.constant 0 : index
    %c0_0 = arith.constant 0 : index
    %0 = vector.load %arg1[%c0, %c0_0] : memref<256x32xf32, #tpu.memory_space<vmem>>, vector<256x32xf32>
    %1 = arith.mulf %0, %0 : vector<256x32xf32>
    %cst = arith.constant dense<0.000000e+00> : vector<256xf32>
    %2 = vector.multi_reduction <add>, %1, %cst [1] : vector<256x32xf32> to vector<256xf32>
    %3 = vector.shape_cast %2 : vector<256xf32> to vector<256x1xf32>
    %cst_1 = arith.constant 1.000000e-24 : f32
    %4 = vector.broadcast %cst_1 : f32 to vector<256x1xf32>
    %5 = arith.maximumf %3, %4 : vector<256x1xf32>
    %6 = math.rsqrt %5 : vector<256x1xf32>
    %7 = vector.broadcast %6 : vector<256x1xf32> to vector<256x32xf32>
    %8 = arith.mulf %0, %7 : vector<256x32xf32>
    %9 = arith.truncf %8 : vector<256x32xf32> to vector<256x32xbf16>
    %c0_2 = arith.constant 0 : index
    %c0_3 = arith.constant 0 : index
    %10 = vector.load %arg2[%c0_2, %c0_3] : memref<32x64xbf16, #tpu.memory_space<vmem>>, vector<32x64xbf16>
    %cst_4 = arith.constant dense<0.000000e+00> : vector<256x64xf32>
    %11 = tpu.matmul %9, %10, %cst_4 {dimension_numbers = #tpu.dot_dimension_numbers<[1], [0], [0], [1], [0, 0, 1, 1], [], []>} : vector<256x32xbf16>, vector<32x64xbf16>, vector<256x64xf32> -> vector<256x64xf32>
    %c0_5 = arith.constant 0 : index
    %c0_6 = arith.constant 0 : index
    %12 = vector.load %arg4[%c0_5, %c0_6] : memref<1x64xf32, #tpu.memory_space<vmem>>, vector<1x64xf32>
    %13 = vector.broadcast %12 : vector<1x64xf32> to vector<256x64xf32>
    %14 = arith.mulf %11, %13 : vector<256x64xf32>
    %cst_7 = arith.constant dense<0.000000e+00> : vector<256xf32>
    %15 = vector.multi_reduction <add>, %14, %cst_7 [1] : vector<256x64xf32> to vector<256xf32>
    %16 = vector.shape_cast %15 : vector<256xf32> to vector<256x1xf32>
    %c0_8 = arith.constant 0 : index
    %c0_9 = arith.constant 0 : index
    %17 = vector.load %arg6[%c0_8, %c0_9] : memref<256x1xf32, #tpu.memory_space<vmem>>, vector<256x1xf32>
    tpu.vector_store %arg6[%c0_8, %c0_9], %16 {strides = array<i32>} : memref<256x1xf32, #tpu.memory_space<vmem>>, vector<256x1xf32>,
    %c0_10 = arith.constant 0 : index
    %c0_11 = arith.constant 0 : index
    %18 = vector.load %arg3[%c0_10, %c0_11] : memref<1x64xf32, #tpu.memory_space<vmem>>, vector<1x64xf32>
    %cst_12 = arith.constant dense<0.000000e+00> : vector<1x256xf32>
    %19 = tpu.matmul %18, %11, %cst_12 {dimension_numbers = #tpu.dot_dimension_numbers<[1], [1], [0], [0], [0, 0, 1, 0], [], []>} : vector<1x64xf32>, vector<256x64xf32>, vector<1x256xf32> -> vector<1x256xf32>
    %c0_13 = arith.constant 0 : index
    %c0_14 = arith.constant 0 : index
    %20 = vector.load %arg7[%c0_13, %c0_14] : memref<1x256xf32, #tpu.memory_space<vmem>>, vector<1x256xf32>
    tpu.vector_store %arg7[%c0_13, %c0_14], %19 {strides = array<i32>} : memref<1x256xf32, #tpu.memory_space<vmem>>, vector<1x256xf32>,
    %21 = arith.truncf %11 : vector<256x64xf32> to vector<256x64xbf16>
    %c0_15 = arith.constant 0 : index
    %c0_16 = arith.constant 0 : index
    %22 = vector.load %arg5[%c0_15, %c0_16] : memref<256x64xbf16, #tpu.memory_space<vmem>>, vector<256x64xbf16>
    tpu.vector_store %arg5[%c0_15, %c0_16], %21 {strides = array<i32>} : memref<256x64xbf16, #tpu.memory_space<vmem>>, vector<256x64xbf16>,
    return
  }
  func.func @transform_0(%arg0: i32) -> (i32, i32) {
    %c0_i32 = arith.constant 0 : i32
    %c0_i32_0 = arith.constant 0 : i32
    return %arg0, %c0_i32 : i32, i32
  }
  func.func @transform_1(%arg0: i32) -> (i32, i32) {
    %c0_i32 = arith.constant 0 : i32
    %c0_i32_0 = arith.constant 0 : i32
    %c0_i32_1 = arith.constant 0 : i32
    return %c0_i32, %c0_i32_0 : i32, i32
  }
  func.func @transform_2(%arg0: i32) -> (i32, i32) {
    %c0_i32 = arith.constant 0 : i32
    %c0_i32_0 = arith.constant 0 : i32
    %c0_i32_1 = arith.constant 0 : i32
    return %c0_i32, %c0_i32_0 : i32, i32
  }
  func.func @transform_3(%arg0: i32) -> (i32, i32) {
    %c0_i32 = arith.constant 0 : i32
    %c0_i32_0 = arith.constant 0 : i32
    %c0_i32_1 = arith.constant 0 : i32
    return %c0_i32, %c0_i32_0 : i32, i32
  }
  func.func @transform_4(%arg0: i32) -> (i32, i32) {
    %c0_i32 = arith.constant 0 : i32
    %c0_i32_0 = arith.constant 0 : i32
    return %arg0, %c0_i32 : i32, i32
  }
  func.func @transform_5(%arg0: i32) -> (i32, i32) {
    %c0_i32 = arith.constant 0 : i32
    %c0_i32_0 = arith.constant 0 : i32
    return %arg0, %c0_i32 : i32, i32
  }
  func.func @transform_6(%arg0: i32) -> (i32, i32) {
    %c0_i32 = arith.constant 0 : i32
    %c0_i32_0 = arith.constant 0 : i32
    return %c0_i32, %arg0 : i32, i32
  }
}

module attributes {stable_mosaic.version = 11 : i64} {
  func.func @_project_kernel(%arg0: i32, %arg1: memref<256x64xf32, #tpu.memory_space<vmem>>, %arg2: memref<64x64xbf16, #tpu.memory_space<vmem>>, %arg3: memref<1x64xf32, #tpu.memory_space<vmem>>, %arg4: memref<1x64xf32, #tpu.memory_space<vmem>>, %arg5: memref<256x64xbf16, #tpu.memory_space<vmem>>, %arg6: memref<256x1xf32, #tpu.memory_space<vmem>>, %arg7: memref<1x256xf32, #tpu.memory_space<vmem>>) attributes {dimension_semantics = [#tpu.dimension_semantics<parallel>], iteration_bounds = array<i64: 2>, scalar_prefetch = 0 : i64, scratch_operands = 0 : i64, tpu.core_type = #tpu.core_type<tc>, window_params = [{transform_indices = @transform_0, window_bounds = array<i64: 256, 64>}, {pipeline_mode = #tpu.pipeline_mode<synchronous>, transform_indices = @transform_1, window_bounds = array<i64: 64, 64>}, {pipeline_mode = #tpu.pipeline_mode<synchronous>, transform_indices = @transform_2, window_bounds = array<i64: 1, 64>}, {pipeline_mode = #tpu.pipeline_mode<synchronous>, transform_indices = @transform_3, window_bounds = array<i64: 1, 64>}, {transform_indices = @transform_4, window_bounds = array<i64: 256, 64>}, {transform_indices = @transform_5, window_bounds = array<i64: 256, 1>}, {transform_indices = @transform_6, window_bounds = array<i64: 1, 256>}]} {
    %c0 = arith.constant 0 : index
    %c0_0 = arith.constant 0 : index
    %0 = vector.load %arg1[%c0, %c0_0] : memref<256x64xf32, #tpu.memory_space<vmem>>, vector<256x64xf32>
    %1 = arith.mulf %0, %0 : vector<256x64xf32>
    %cst = arith.constant dense<0.000000e+00> : vector<256xf32>
    %2 = vector.multi_reduction <add>, %1, %cst [1] : vector<256x64xf32> to vector<256xf32>
    %3 = vector.shape_cast %2 : vector<256xf32> to vector<256x1xf32>
    %cst_1 = arith.constant 1.000000e-24 : f32
    %4 = vector.broadcast %cst_1 : f32 to vector<256x1xf32>
    %5 = arith.maximumf %3, %4 : vector<256x1xf32>
    %6 = math.rsqrt %5 : vector<256x1xf32>
    %7 = vector.broadcast %6 : vector<256x1xf32> to vector<256x64xf32>
    %8 = arith.mulf %0, %7 : vector<256x64xf32>
    %9 = arith.truncf %8 : vector<256x64xf32> to vector<256x64xbf16>
    %c0_2 = arith.constant 0 : index
    %c0_3 = arith.constant 0 : index
    %10 = vector.load %arg2[%c0_2, %c0_3] : memref<64x64xbf16, #tpu.memory_space<vmem>>, vector<64x64xbf16>
    %cst_4 = arith.constant dense<0.000000e+00> : vector<256x64xf32>
    %11 = tpu.matmul %9, %10, %cst_4 {dimension_numbers = #tpu.dot_dimension_numbers<[1], [0], [0], [1], [0, 0, 1, 1], [], []>} : vector<256x64xbf16>, vector<64x64xbf16>, vector<256x64xf32> -> vector<256x64xf32>
    %c0_5 = arith.constant 0 : index
    %c0_6 = arith.constant 0 : index
    %12 = vector.load %arg4[%c0_5, %c0_6] : memref<1x64xf32, #tpu.memory_space<vmem>>, vector<1x64xf32>
    %13 = vector.broadcast %12 : vector<1x64xf32> to vector<256x64xf32>
    %14 = arith.mulf %11, %13 : vector<256x64xf32>
    %cst_7 = arith.constant dense<0.000000e+00> : vector<256xf32>
    %15 = vector.multi_reduction <add>, %14, %cst_7 [1] : vector<256x64xf32> to vector<256xf32>
    %16 = vector.shape_cast %15 : vector<256xf32> to vector<256x1xf32>
    %c0_8 = arith.constant 0 : index
    %c0_9 = arith.constant 0 : index
    %17 = vector.load %arg6[%c0_8, %c0_9] : memref<256x1xf32, #tpu.memory_space<vmem>>, vector<256x1xf32>
    tpu.vector_store %arg6[%c0_8, %c0_9], %16 {strides = array<i32>} : memref<256x1xf32, #tpu.memory_space<vmem>>, vector<256x1xf32>,
    %c0_10 = arith.constant 0 : index
    %c0_11 = arith.constant 0 : index
    %18 = vector.load %arg3[%c0_10, %c0_11] : memref<1x64xf32, #tpu.memory_space<vmem>>, vector<1x64xf32>
    %cst_12 = arith.constant dense<0.000000e+00> : vector<1x256xf32>
    %19 = tpu.matmul %18, %11, %cst_12 {dimension_numbers = #tpu.dot_dimension_numbers<[1], [1], [0], [0], [0, 0, 1, 0], [], []>} : vector<1x64xf32>, vector<256x64xf32>, vector<1x256xf32> -> vector<1x256xf32>
    %c0_13 = arith.constant 0 : index
    %c0_14 = arith.constant 0 : index
    %20 = vector.load %arg7[%c0_13, %c0_14] : memref<1x256xf32, #tpu.memory_space<vmem>>, vector<1x256xf32>
    tpu.vector_store %arg7[%c0_13, %c0_14], %19 {strides = array<i32>} : memref<1x256xf32, #tpu.memory_space<vmem>>, vector<1x256xf32>,
    %21 = arith.truncf %11 : vector<256x64xf32> to vector<256x64xbf16>
    %c0_15 = arith.constant 0 : index
    %c0_16 = arith.constant 0 : index
    %22 = vector.load %arg5[%c0_15, %c0_16] : memref<256x64xbf16, #tpu.memory_space<vmem>>, vector<256x64xbf16>
    tpu.vector_store %arg5[%c0_15, %c0_16], %21 {strides = array<i32>} : memref<256x64xbf16, #tpu.memory_space<vmem>>, vector<256x64xbf16>,
    return
  }
  func.func @transform_0(%arg0: i32) -> (i32, i32) {
    %c0_i32 = arith.constant 0 : i32
    %c0_i32_0 = arith.constant 0 : i32
    return %arg0, %c0_i32 : i32, i32
  }
  func.func @transform_1(%arg0: i32) -> (i32, i32) {
    %c0_i32 = arith.constant 0 : i32
    %c0_i32_0 = arith.constant 0 : i32
    %c0_i32_1 = arith.constant 0 : i32
    return %c0_i32, %c0_i32_0 : i32, i32
  }
  func.func @transform_2(%arg0: i32) -> (i32, i32) {
    %c0_i32 = arith.constant 0 : i32
    %c0_i32_0 = arith.constant 0 : i32
    %c0_i32_1 = arith.constant 0 : i32
    return %c0_i32, %c0_i32_0 : i32, i32
  }
  func.func @transform_3(%arg0: i32) -> (i32, i32) {
    %c0_i32 = arith.constant 0 : i32
    %c0_i32_0 = arith.constant 0 : i32
    %c0_i32_1 = arith.constant 0 : i32
    return %c0_i32, %c0_i32_0 : i32, i32
  }
  func.func @transform_4(%arg0: i32) -> (i32, i32) {
    %c0_i32 = arith.constant 0 : i32
    %c0_i32_0 = arith.constant 0 : i32
    return %arg0, %c0_i32 : i32, i32
  }
  func.func @transform_5(%arg0: i32) -> (i32, i32) {
    %c0_i32 = arith.constant 0 : i32
    %c0_i32_0 = arith.constant 0 : i32
    return %arg0, %c0_i32 : i32, i32
  }
  func.func @transform_6(%arg0: i32) -> (i32, i32) {
    %c0_i32 = arith.constant 0 : i32
    %c0_i32_0 = arith.constant 0 : i32
    return %c0_i32, %arg0 : i32, i32
  }
}

module attributes {stable_mosaic.version = 11 : i64} {
  func.func @_gat_attn_kernel(%arg0: i32, %arg1: i32, %arg2: memref<256x256xbf16, #tpu.memory_space<vmem>>, %arg3: memref<256x1xf32, #tpu.memory_space<vmem>>, %arg4: memref<1x256xf32, #tpu.memory_space<vmem>>, %arg5: memref<256x64xbf16, #tpu.memory_space<vmem>>, %arg6: memref<256x64xf32, #tpu.memory_space<vmem>>, %arg7: memref<1x64xf32, #tpu.memory_space<vmem>>, %arg8: memref<64x16xbf16, #tpu.memory_space<vmem>>, %arg9: memref<1x16xf32, #tpu.memory_space<vmem>>, %arg10: memref<1x16xf32, #tpu.memory_space<vmem>>, %arg11: memref<256x64xf32, #tpu.memory_space<vmem>>, %arg12: memref<256x1xf32, #tpu.memory_space<vmem>>, %arg13: memref<256x1xf32, #tpu.memory_space<vmem>>, %arg14: memref<256x1xf32, #tpu.memory_space<vmem>>, %arg15: memref<256x64xf32, #tpu.memory_space<vmem>>) attributes {dimension_semantics = [#tpu.dimension_semantics<parallel>, #tpu.dimension_semantics<arbitrary>], iteration_bounds = array<i64: 2, 2>, scalar_prefetch = 0 : i64, scratch_operands = 3 : i64, tpu.core_type = #tpu.core_type<tc>, window_params = [{transform_indices = @transform_0, window_bounds = array<i64: 256, 256>}, {transform_indices = @transform_1, window_bounds = array<i64: 256, 1>}, {transform_indices = @transform_2, window_bounds = array<i64: 1, 256>}, {transform_indices = @transform_3, window_bounds = array<i64: 256, 64>}, {transform_indices = @transform_4, window_bounds = array<i64: 256, 64>}, {pipeline_mode = #tpu.pipeline_mode<synchronous>, transform_indices = @transform_5, window_bounds = array<i64: 1, 64>}, {pipeline_mode = #tpu.pipeline_mode<synchronous>, transform_indices = @transform_6, window_bounds = array<i64: 64, 16>}, {pipeline_mode = #tpu.pipeline_mode<synchronous>, transform_indices = @transform_7, window_bounds = array<i64: 1, 16>}, {pipeline_mode = #tpu.pipeline_mode<synchronous>, transform_indices = @transform_8, window_bounds = array<i64: 1, 16>}, {transform_indices = @transform_9, window_bounds = array<i64: 256, 64>}, {transform_indices = @transform_10, window_bounds = array<i64: 256, 1>}]} {
    %c0_i32 = arith.constant 0 : i32
    %0 = arith.cmpi eq, %arg1, %c0_i32 : i32
    %1 = arith.extui %0 : i1 to i32
    %c0_i32_0 = arith.constant 0 : i32
    %2 = arith.cmpi ne, %1, %c0_i32_0 : i32
    scf.if %2 {
      %cst_24 = arith.constant 0xFF800000 : f32
      %41 = vector.broadcast %cst_24 : f32 to vector<256x1xf32>
      %c0_25 = arith.constant 0 : index
      %c0_26 = arith.constant 0 : index
      %42 = vector.load %arg13[%c0_25, %c0_26] : memref<256x1xf32, #tpu.memory_space<vmem>>, vector<256x1xf32>
      tpu.vector_store %arg13[%c0_25, %c0_26], %41 {strides = array<i32>} : memref<256x1xf32, #tpu.memory_space<vmem>>, vector<256x1xf32>,
      %cst_27 = arith.constant 0.000000e+00 : f32
      %43 = vector.broadcast %cst_27 : f32 to vector<256x1xf32>
      %c0_28 = arith.constant 0 : index
      %c0_29 = arith.constant 0 : index
      %44 = vector.load %arg14[%c0_28, %c0_29] : memref<256x1xf32, #tpu.memory_space<vmem>>, vector<256x1xf32>
      tpu.vector_store %arg14[%c0_28, %c0_29], %43 {strides = array<i32>} : memref<256x1xf32, #tpu.memory_space<vmem>>, vector<256x1xf32>,
      %cst_30 = arith.constant 0.000000e+00 : f32
      %45 = vector.broadcast %cst_30 : f32 to vector<256x64xf32>
      %c0_31 = arith.constant 0 : index
      %c0_32 = arith.constant 0 : index
      %46 = vector.load %arg15[%c0_31, %c0_32] : memref<256x64xf32, #tpu.memory_space<vmem>>, vector<256x64xf32>
      tpu.vector_store %arg15[%c0_31, %c0_32], %45 {strides = array<i32>} : memref<256x64xf32, #tpu.memory_space<vmem>>, vector<256x64xf32>,
    } else {
    }
    %c0 = arith.constant 0 : index
    %c0_1 = arith.constant 0 : index
    %3 = vector.load %arg3[%c0, %c0_1] : memref<256x1xf32, #tpu.memory_space<vmem>>, vector<256x1xf32>
    %c0_2 = arith.constant 0 : index
    %c0_3 = arith.constant 0 : index
    %4 = vector.load %arg4[%c0_2, %c0_3] : memref<1x256xf32, #tpu.memory_space<vmem>>, vector<1x256xf32>
    %5 = vector.broadcast %3 : vector<256x1xf32> to vector<256x256xf32>
    %6 = vector.broadcast %4 : vector<1x256xf32> to vector<256x256xf32>
    %7 = arith.addf %5, %6 : vector<256x256xf32>
    %cst = arith.constant 2.000000e-01 : f32
    %8 = vector.broadcast %cst : f32 to vector<256x256xf32>
    %9 = arith.mulf %8, %7 : vector<256x256xf32>
    %10 = arith.maximumf %7, %9 : vector<256x256xf32>
    %c0_4 = arith.constant 0 : index
    %c0_5 = arith.constant 0 : index
    %11 = vector.load %arg2[%c0_4, %c0_5] : memref<256x256xbf16, #tpu.memory_space<vmem>>, vector<256x256xbf16>
    %12 = arith.extf %11 : vector<256x256xbf16> to vector<256x256xf32>
    %13 = arith.addf %10, %12 : vector<256x256xf32>
    %c0_6 = arith.constant 0 : index
    %c0_7 = arith.constant 0 : index
    %14 = vector.load %arg13[%c0_6, %c0_7] : memref<256x1xf32, #tpu.memory_space<vmem>>, vector<256x1xf32>
    %cst_8 = arith.constant dense<0xFF800000> : vector<256xf32>
    %15 = vector.multi_reduction <maximumf>, %13, %cst_8 [1] : vector<256x256xf32> to vector<256xf32>
    %16 = vector.shape_cast %15 : vector<256xf32> to vector<256x1xf32>
    %17 = arith.maximumf %14, %16 : vector<256x1xf32>
    %18 = arith.subf %14, %17 : vector<256x1xf32>
    %19 = math.exp %18 : vector<256x1xf32>
    %20 = vector.broadcast %17 : vector<256x1xf32> to vector<256x256xf32>
    %21 = arith.subf %13, %20 : vector<256x256xf32>
    %22 = math.exp %21 : vector<256x256xf32>
    %c0_9 = arith.constant 0 : index
    %c0_10 = arith.constant 0 : index
    %23 = vector.load %arg14[%c0_9, %c0_10] : memref<256x1xf32, #tpu.memory_space<vmem>>, vector<256x1xf32>
    %24 = arith.mulf %19, %23 : vector<256x1xf32>
    %cst_11 = arith.constant dense<0.000000e+00> : vector<256xf32>
    %25 = vector.multi_reduction <add>, %22, %cst_11 [1] : vector<256x256xf32> to vector<256xf32>
    %26 = vector.shape_cast %25 : vector<256xf32> to vector<256x1xf32>
    %27 = arith.addf %24, %26 : vector<256x1xf32>
    %c0_12 = arith.constant 0 : index
    %c0_13 = arith.constant 0 : index
    %28 = vector.load %arg14[%c0_12, %c0_13] : memref<256x1xf32, #tpu.memory_space<vmem>>, vector<256x1xf32>
    tpu.vector_store %arg14[%c0_12, %c0_13], %27 {strides = array<i32>} : memref<256x1xf32, #tpu.memory_space<vmem>>, vector<256x1xf32>,
    %c0_14 = arith.constant 0 : index
    %c0_15 = arith.constant 0 : index
    %29 = vector.load %arg15[%c0_14, %c0_15] : memref<256x64xf32, #tpu.memory_space<vmem>>, vector<256x64xf32>
    %30 = vector.broadcast %19 : vector<256x1xf32> to vector<256x64xf32>
    %31 = arith.mulf %30, %29 : vector<256x64xf32>
    %32 = arith.truncf %22 : vector<256x256xf32> to vector<256x256xbf16>
    %c0_16 = arith.constant 0 : index
    %c0_17 = arith.constant 0 : index
    %33 = vector.load %arg5[%c0_16, %c0_17] : memref<256x64xbf16, #tpu.memory_space<vmem>>, vector<256x64xbf16>
    %cst_18 = arith.constant dense<0.000000e+00> : vector<256x64xf32>
    %34 = tpu.matmul %32, %33, %cst_18 {dimension_numbers = #tpu.dot_dimension_numbers<[1], [0], [0], [1], [0, 0, 1, 1], [], []>} : vector<256x256xbf16>, vector<256x64xbf16>, vector<256x64xf32> -> vector<256x64xf32>
    %35 = arith.addf %31, %34 : vector<256x64xf32>
    %c0_19 = arith.constant 0 : index
    %c0_20 = arith.constant 0 : index
    %36 = vector.load %arg15[%c0_19, %c0_20] : memref<256x64xf32, #tpu.memory_space<vmem>>, vector<256x64xf32>
    tpu.vector_store %arg15[%c0_19, %c0_20], %35 {strides = array<i32>} : memref<256x64xf32, #tpu.memory_space<vmem>>, vector<256x64xf32>,
    %c0_21 = arith.constant 0 : index
    %c0_22 = arith.constant 0 : index
    %37 = vector.load %arg13[%c0_21, %c0_22] : memref<256x1xf32, #tpu.memory_space<vmem>>, vector<256x1xf32>
    tpu.vector_store %arg13[%c0_21, %c0_22], %17 {strides = array<i32>} : memref<256x1xf32, #tpu.memory_space<vmem>>, vector<256x1xf32>,
    %c1_i32 = arith.constant 1 : i32
    %38 = arith.cmpi eq, %arg1, %c1_i32 : i32
    %39 = arith.extui %38 : i1 to i32
    %c0_i32_23 = arith.constant 0 : i32
    %40 = arith.cmpi ne, %39, %c0_i32_23 : i32
    scf.if %40 {
      %c0_24 = arith.constant 0 : index
      %c0_25 = arith.constant 0 : index
      %41 = vector.load %arg15[%c0_24, %c0_25] : memref<256x64xf32, #tpu.memory_space<vmem>>, vector<256x64xf32>
      %c0_26 = arith.constant 0 : index
      %c0_27 = arith.constant 0 : index
      %42 = vector.load %arg14[%c0_26, %c0_27] : memref<256x1xf32, #tpu.memory_space<vmem>>, vector<256x1xf32>
      %43 = tpu.reciprocal %42 {approx = true} : vector<256x1xf32> -> vector<256x1xf32>
      %44 = vector.broadcast %43 : vector<256x1xf32> to vector<256x64xf32>
      %45 = arith.mulf %41, %44 : vector<256x64xf32>
      %c0_28 = arith.constant 0 : index
      %c0_29 = arith.constant 0 : index
      %46 = vector.load %arg7[%c0_28, %c0_29] : memref<1x64xf32, #tpu.memory_space<vmem>>, vector<1x64xf32>
      %47 = vector.broadcast %46 : vector<1x64xf32> to vector<256x64xf32>
      %48 = arith.addf %45, %47 : vector<256x64xf32>
      %c0_30 = arith.constant 0 : index
      %c0_31 = arith.constant 0 : index
      %49 = vector.load %arg6[%c0_30, %c0_31] : memref<256x64xf32, #tpu.memory_space<vmem>>, vector<256x64xf32>
      %50 = arith.addf %49, %48 : vector<256x64xf32>
      %c0_32 = arith.constant 0 : index
      %c0_33 = arith.constant 0 : index
      %51 = vector.load %arg11[%c0_32, %c0_33] : memref<256x64xf32, #tpu.memory_space<vmem>>, vector<256x64xf32>
      tpu.vector_store %arg11[%c0_32, %c0_33], %50 {strides = array<i32>} : memref<256x64xf32, #tpu.memory_space<vmem>>, vector<256x64xf32>,
      %52 = arith.truncf %50 : vector<256x64xf32> to vector<256x64xbf16>
      %c0_34 = arith.constant 0 : index
      %c0_35 = arith.constant 0 : index
      %53 = vector.load %arg8[%c0_34, %c0_35] : memref<64x16xbf16, #tpu.memory_space<vmem>>, vector<64x16xbf16>
      %cst_36 = arith.constant dense<0.000000e+00> : vector<256x16xf32>
      %54 = tpu.matmul %52, %53, %cst_36 {dimension_numbers = #tpu.dot_dimension_numbers<[1], [0], [0], [1], [0, 0, 1, 1], [], []>} : vector<256x64xbf16>, vector<64x16xbf16>, vector<256x16xf32> -> vector<256x16xf32>
      %c0_37 = arith.constant 0 : index
      %c0_38 = arith.constant 0 : index
      %55 = vector.load %arg9[%c0_37, %c0_38] : memref<1x16xf32, #tpu.memory_space<vmem>>, vector<1x16xf32>
      %56 = vector.broadcast %55 : vector<1x16xf32> to vector<256x16xf32>
      %57 = arith.addf %54, %56 : vector<256x16xf32>
      %58 = math.tanh %57 : vector<256x16xf32>
      %c0_39 = arith.constant 0 : index
      %c0_40 = arith.constant 0 : index
      %59 = vector.load %arg10[%c0_39, %c0_40] : memref<1x16xf32, #tpu.memory_space<vmem>>, vector<1x16xf32>
      %60 = vector.broadcast %59 : vector<1x16xf32> to vector<256x16xf32>
      %61 = arith.mulf %58, %60 : vector<256x16xf32>
      %cst_41 = arith.constant dense<0.000000e+00> : vector<256xf32>
      %62 = vector.multi_reduction <add>, %61, %cst_41 [1] : vector<256x16xf32> to vector<256xf32>
      %63 = vector.shape_cast %62 : vector<256xf32> to vector<256x1xf32>
      %c0_42 = arith.constant 0 : index
      %c0_43 = arith.constant 0 : index
      %64 = vector.load %arg12[%c0_42, %c0_43] : memref<256x1xf32, #tpu.memory_space<vmem>>, vector<256x1xf32>
      tpu.vector_store %arg12[%c0_42, %c0_43], %63 {strides = array<i32>} : memref<256x1xf32, #tpu.memory_space<vmem>>, vector<256x1xf32>,
    } else {
    }
    return
  }
  func.func @transform_0(%arg0: i32, %arg1: i32) -> (i32, i32) {
    %c0_i32 = arith.constant 0 : i32
    return %arg0, %arg1 : i32, i32
  }
  func.func @transform_1(%arg0: i32, %arg1: i32) -> (i32, i32) {
    %c0_i32 = arith.constant 0 : i32
    %c0_i32_0 = arith.constant 0 : i32
    return %arg0, %c0_i32 : i32, i32
  }
  func.func @transform_2(%arg0: i32, %arg1: i32) -> (i32, i32) {
    %c0_i32 = arith.constant 0 : i32
    %c0_i32_0 = arith.constant 0 : i32
    return %c0_i32, %arg1 : i32, i32
  }
  func.func @transform_3(%arg0: i32, %arg1: i32) -> (i32, i32) {
    %c0_i32 = arith.constant 0 : i32
    %c0_i32_0 = arith.constant 0 : i32
    return %arg1, %c0_i32 : i32, i32
  }
  func.func @transform_4(%arg0: i32, %arg1: i32) -> (i32, i32) {
    %c0_i32 = arith.constant 0 : i32
    %c0_i32_0 = arith.constant 0 : i32
    return %arg0, %c0_i32 : i32, i32
  }
  func.func @transform_5(%arg0: i32, %arg1: i32) -> (i32, i32) {
    %c0_i32 = arith.constant 0 : i32
    %c0_i32_0 = arith.constant 0 : i32
    %c0_i32_1 = arith.constant 0 : i32
    return %c0_i32, %c0_i32_0 : i32, i32
  }
  func.func @transform_6(%arg0: i32, %arg1: i32) -> (i32, i32) {
    %c0_i32 = arith.constant 0 : i32
    %c0_i32_0 = arith.constant 0 : i32
    %c0_i32_1 = arith.constant 0 : i32
    return %c0_i32, %c0_i32_0 : i32, i32
  }
  func.func @transform_7(%arg0: i32, %arg1: i32) -> (i32, i32) {
    %c0_i32 = arith.constant 0 : i32
    %c0_i32_0 = arith.constant 0 : i32
    %c0_i32_1 = arith.constant 0 : i32
    return %c0_i32, %c0_i32_0 : i32, i32
  }
  func.func @transform_8(%arg0: i32, %arg1: i32) -> (i32, i32) {
    %c0_i32 = arith.constant 0 : i32
    %c0_i32_0 = arith.constant 0 : i32
    %c0_i32_1 = arith.constant 0 : i32
    return %c0_i32, %c0_i32_0 : i32, i32
  }
  func.func @transform_9(%arg0: i32, %arg1: i32) -> (i32, i32) {
    %c0_i32 = arith.constant 0 : i32
    %c0_i32_0 = arith.constant 0 : i32
    return %arg0, %c0_i32 : i32, i32
  }
  func.func @transform_10(%arg0: i32, %arg1: i32) -> (i32, i32) {
    %c0_i32 = arith.constant 0 : i32
    %c0_i32_0 = arith.constant 0 : i32
    return %arg0, %c0_i32 : i32, i32
  }
}

module attributes {stable_mosaic.version = 11 : i64} {
  func.func @_beta_kernel(%arg0: memref<512x1xf32, #tpu.memory_space<vmem>>, %arg1: memref<512x1xf32, #tpu.memory_space<vmem>>, %arg2: memref<512x1xf32, #tpu.memory_space<vmem>>, %arg3: memref<1x64xf32, #tpu.memory_space<vmem>>, %arg4: memref<1x64xf32, #tpu.memory_space<vmem>>, %arg5: memref<1x64xf32, #tpu.memory_space<vmem>>) attributes {dimension_semantics = [], scalar_prefetch = 0 : i64, scratch_operands = 0 : i64, tpu.core_type = #tpu.core_type<tc>} {
    %c0 = arith.constant 0 : index
    %c0_0 = arith.constant 0 : index
    %0 = vector.load %arg0[%c0, %c0_0] : memref<512x1xf32, #tpu.memory_space<vmem>>, vector<512x1xf32>
    %1 = tpu.iota {dimensions = array<i32: 0>} : vector<512x1xi32>
    %c500_i32 = arith.constant 500 : i32
    %2 = vector.broadcast %c500_i32 : i32 to vector<512x1xi32>
    %3 = arith.cmpi slt, %1, %2 : vector<512x1xi32>
    %cst = arith.constant 0.000000e+00 : f32
    %4 = vector.broadcast %cst : f32 to vector<512x1xf32>
    %5 = arith.select %3, %0, %4 : vector<512x1xi1>, vector<512x1xf32>
    %cst_1 = arith.constant dense<0.000000e+00> : vector<1xf32>
    %6 = vector.multi_reduction <add>, %5, %cst_1 [0] : vector<512x1xf32> to vector<1xf32>
    %7 = vector.shape_cast %6 : vector<1xf32> to vector<1x1xf32>
    %cst_2 = arith.constant 2.000000e-03 : f32
    %8 = vector.broadcast %cst_2 : f32 to vector<1x1xf32>
    %9 = arith.mulf %7, %8 : vector<1x1xf32>
    %c0_3 = arith.constant 0 : index
    %c0_4 = arith.constant 0 : index
    %10 = vector.load %arg1[%c0_3, %c0_4] : memref<512x1xf32, #tpu.memory_space<vmem>>, vector<512x1xf32>
    %11 = tpu.iota {dimensions = array<i32: 0>} : vector<512x1xi32>
    %c500_i32_5 = arith.constant 500 : i32
    %12 = vector.broadcast %c500_i32_5 : i32 to vector<512x1xi32>
    %13 = arith.cmpi slt, %11, %12 : vector<512x1xi32>
    %cst_6 = arith.constant 0.000000e+00 : f32
    %14 = vector.broadcast %cst_6 : f32 to vector<512x1xf32>
    %15 = arith.select %13, %10, %14 : vector<512x1xi1>, vector<512x1xf32>
    %cst_7 = arith.constant dense<0.000000e+00> : vector<1xf32>
    %16 = vector.multi_reduction <add>, %15, %cst_7 [0] : vector<512x1xf32> to vector<1xf32>
    %17 = vector.shape_cast %16 : vector<1xf32> to vector<1x1xf32>
    %cst_8 = arith.constant 2.000000e-03 : f32
    %18 = vector.broadcast %cst_8 : f32 to vector<1x1xf32>
    %19 = arith.mulf %17, %18 : vector<1x1xf32>
    %c0_9 = arith.constant 0 : index
    %c0_10 = arith.constant 0 : index
    %20 = vector.load %arg2[%c0_9, %c0_10] : memref<512x1xf32, #tpu.memory_space<vmem>>, vector<512x1xf32>
    %21 = tpu.iota {dimensions = array<i32: 0>} : vector<512x1xi32>
    %c500_i32_11 = arith.constant 500 : i32
    %22 = vector.broadcast %c500_i32_11 : i32 to vector<512x1xi32>
    %23 = arith.cmpi slt, %21, %22 : vector<512x1xi32>
    %cst_12 = arith.constant 0.000000e+00 : f32
    %24 = vector.broadcast %cst_12 : f32 to vector<512x1xf32>
    %25 = arith.select %23, %20, %24 : vector<512x1xi1>, vector<512x1xf32>
    %cst_13 = arith.constant dense<0.000000e+00> : vector<1xf32>
    %26 = vector.multi_reduction <add>, %25, %cst_13 [0] : vector<512x1xf32> to vector<1xf32>
    %27 = vector.shape_cast %26 : vector<1xf32> to vector<1x1xf32>
    %cst_14 = arith.constant 2.000000e-03 : f32
    %28 = vector.broadcast %cst_14 : f32 to vector<1x1xf32>
    %29 = arith.mulf %27, %28 : vector<1x1xf32>
    %30 = arith.maximumf %9, %19 : vector<1x1xf32>
    %31 = arith.maximumf %30, %29 : vector<1x1xf32>
    %32 = arith.subf %9, %31 : vector<1x1xf32>
    %33 = math.exp %32 : vector<1x1xf32>
    %34 = arith.subf %19, %31 : vector<1x1xf32>
    %35 = math.exp %34 : vector<1x1xf32>
    %36 = arith.subf %29, %31 : vector<1x1xf32>
    %37 = math.exp %36 : vector<1x1xf32>
    %38 = arith.addf %33, %35 : vector<1x1xf32>
    %39 = arith.addf %38, %37 : vector<1x1xf32>
    %40 = tpu.reciprocal %39 {approx = true} : vector<1x1xf32> -> vector<1x1xf32>
    %cst_15 = arith.constant 0.000000e+00 : f32
    %41 = vector.broadcast %cst_15 : f32 to vector<1x64xf32>
    %42 = arith.mulf %33, %40 : vector<1x1xf32>
    %43 = vector.broadcast %42 : vector<1x1xf32> to vector<1x64xf32>
    %44 = arith.addf %43, %41 : vector<1x64xf32>
    %c0_16 = arith.constant 0 : index
    %c0_17 = arith.constant 0 : index
    %45 = vector.load %arg3[%c0_16, %c0_17] : memref<1x64xf32, #tpu.memory_space<vmem>>, vector<1x64xf32>
    tpu.vector_store %arg3[%c0_16, %c0_17], %44 {strides = array<i32>} : memref<1x64xf32, #tpu.memory_space<vmem>>, vector<1x64xf32>,
    %46 = arith.mulf %35, %40 : vector<1x1xf32>
    %47 = vector.broadcast %46 : vector<1x1xf32> to vector<1x64xf32>
    %48 = arith.addf %47, %41 : vector<1x64xf32>
    %c0_18 = arith.constant 0 : index
    %c0_19 = arith.constant 0 : index
    %49 = vector.load %arg4[%c0_18, %c0_19] : memref<1x64xf32, #tpu.memory_space<vmem>>, vector<1x64xf32>
    tpu.vector_store %arg4[%c0_18, %c0_19], %48 {strides = array<i32>} : memref<1x64xf32, #tpu.memory_space<vmem>>, vector<1x64xf32>,
    %50 = arith.mulf %37, %40 : vector<1x1xf32>
    %51 = vector.broadcast %50 : vector<1x1xf32> to vector<1x64xf32>
    %52 = arith.addf %51, %41 : vector<1x64xf32>
    %c0_20 = arith.constant 0 : index
    %c0_21 = arith.constant 0 : index
    %53 = vector.load %arg5[%c0_20, %c0_21] : memref<1x64xf32, #tpu.memory_space<vmem>>, vector<1x64xf32>
    tpu.vector_store %arg5[%c0_20, %c0_21], %52 {strides = array<i32>} : memref<1x64xf32, #tpu.memory_space<vmem>>, vector<1x64xf32>,
    return
  }
}

module attributes {stable_mosaic.version = 11 : i64} {
  func.func @_combine_kernel(%arg0: i32, %arg1: memref<1x64xf32, #tpu.memory_space<vmem>>, %arg2: memref<1x64xf32, #tpu.memory_space<vmem>>, %arg3: memref<1x64xf32, #tpu.memory_space<vmem>>, %arg4: memref<256x64xf32, #tpu.memory_space<vmem>>, %arg5: memref<256x64xf32, #tpu.memory_space<vmem>>, %arg6: memref<256x64xf32, #tpu.memory_space<vmem>>, %arg7: memref<256x64xf32, #tpu.memory_space<vmem>>) attributes {dimension_semantics = [#tpu.dimension_semantics<parallel>], iteration_bounds = array<i64: 2>, scalar_prefetch = 0 : i64, scratch_operands = 0 : i64, tpu.core_type = #tpu.core_type<tc>, window_params = [{pipeline_mode = #tpu.pipeline_mode<synchronous>, transform_indices = @transform_0, window_bounds = array<i64: 1, 64>}, {pipeline_mode = #tpu.pipeline_mode<synchronous>, transform_indices = @transform_1, window_bounds = array<i64: 1, 64>}, {pipeline_mode = #tpu.pipeline_mode<synchronous>, transform_indices = @transform_2, window_bounds = array<i64: 1, 64>}, {transform_indices = @transform_3, window_bounds = array<i64: 256, 64>}, {transform_indices = @transform_4, window_bounds = array<i64: 256, 64>}, {transform_indices = @transform_5, window_bounds = array<i64: 256, 64>}, {transform_indices = @transform_6, window_bounds = array<i64: 256, 64>}]} {
    %c0 = arith.constant 0 : index
    %c0_0 = arith.constant 0 : index
    %0 = vector.load %arg1[%c0, %c0_0] : memref<1x64xf32, #tpu.memory_space<vmem>>, vector<1x64xf32>
    %c0_1 = arith.constant 0 : index
    %c0_2 = arith.constant 0 : index
    %1 = vector.load %arg4[%c0_1, %c0_2] : memref<256x64xf32, #tpu.memory_space<vmem>>, vector<256x64xf32>
    %2 = vector.broadcast %0 : vector<1x64xf32> to vector<256x64xf32>
    %3 = arith.mulf %2, %1 : vector<256x64xf32>
    %c0_3 = arith.constant 0 : index
    %c0_4 = arith.constant 0 : index
    %4 = vector.load %arg2[%c0_3, %c0_4] : memref<1x64xf32, #tpu.memory_space<vmem>>, vector<1x64xf32>
    %c0_5 = arith.constant 0 : index
    %c0_6 = arith.constant 0 : index
    %5 = vector.load %arg5[%c0_5, %c0_6] : memref<256x64xf32, #tpu.memory_space<vmem>>, vector<256x64xf32>
    %6 = vector.broadcast %4 : vector<1x64xf32> to vector<256x64xf32>
    %7 = arith.mulf %6, %5 : vector<256x64xf32>
    %8 = arith.addf %3, %7 : vector<256x64xf32>
    %c0_7 = arith.constant 0 : index
    %c0_8 = arith.constant 0 : index
    %9 = vector.load %arg3[%c0_7, %c0_8] : memref<1x64xf32, #tpu.memory_space<vmem>>, vector<1x64xf32>
    %c0_9 = arith.constant 0 : index
    %c0_10 = arith.constant 0 : index
    %10 = vector.load %arg6[%c0_9, %c0_10] : memref<256x64xf32, #tpu.memory_space<vmem>>, vector<256x64xf32>
    %11 = vector.broadcast %9 : vector<1x64xf32> to vector<256x64xf32>
    %12 = arith.mulf %11, %10 : vector<256x64xf32>
    %13 = arith.addf %8, %12 : vector<256x64xf32>
    %14 = arith.mulf %13, %13 : vector<256x64xf32>
    %cst = arith.constant dense<0.000000e+00> : vector<256xf32>
    %15 = vector.multi_reduction <add>, %14, %cst [1] : vector<256x64xf32> to vector<256xf32>
    %16 = vector.shape_cast %15 : vector<256xf32> to vector<256x1xf32>
    %cst_11 = arith.constant 1.000000e-24 : f32
    %17 = vector.broadcast %cst_11 : f32 to vector<256x1xf32>
    %18 = arith.maximumf %16, %17 : vector<256x1xf32>
    %19 = math.rsqrt %18 : vector<256x1xf32>
    %20 = vector.broadcast %19 : vector<256x1xf32> to vector<256x64xf32>
    %21 = arith.mulf %13, %20 : vector<256x64xf32>
    %c0_12 = arith.constant 0 : index
    %c0_13 = arith.constant 0 : index
    %22 = vector.load %arg7[%c0_12, %c0_13] : memref<256x64xf32, #tpu.memory_space<vmem>>, vector<256x64xf32>
    tpu.vector_store %arg7[%c0_12, %c0_13], %21 {strides = array<i32>} : memref<256x64xf32, #tpu.memory_space<vmem>>, vector<256x64xf32>,
    return
  }
  func.func @transform_0(%arg0: i32) -> (i32, i32) {
    %c0_i32 = arith.constant 0 : i32
    %c0_i32_0 = arith.constant 0 : i32
    %c0_i32_1 = arith.constant 0 : i32
    return %c0_i32, %c0_i32_0 : i32, i32
  }
  func.func @transform_1(%arg0: i32) -> (i32, i32) {
    %c0_i32 = arith.constant 0 : i32
    %c0_i32_0 = arith.constant 0 : i32
    %c0_i32_1 = arith.constant 0 : i32
    return %c0_i32, %c0_i32_0 : i32, i32
  }
  func.func @transform_2(%arg0: i32) -> (i32, i32) {
    %c0_i32 = arith.constant 0 : i32
    %c0_i32_0 = arith.constant 0 : i32
    %c0_i32_1 = arith.constant 0 : i32
    return %c0_i32, %c0_i32_0 : i32, i32
  }
  func.func @transform_3(%arg0: i32) -> (i32, i32) {
    %c0_i32 = arith.constant 0 : i32
    %c0_i32_0 = arith.constant 0 : i32
    return %arg0, %c0_i32 : i32, i32
  }
  func.func @transform_4(%arg0: i32) -> (i32, i32) {
    %c0_i32 = arith.constant 0 : i32
    %c0_i32_0 = arith.constant 0 : i32
    return %arg0, %c0_i32 : i32, i32
  }
  func.func @transform_5(%arg0: i32) -> (i32, i32) {
    %c0_i32 = arith.constant 0 : i32
    %c0_i32_0 = arith.constant 0 : i32
    return %arg0, %c0_i32 : i32, i32
  }
  func.func @transform_6(%arg0: i32) -> (i32, i32) {
    %c0_i32 = arith.constant 0 : i32
    %c0_i32_0 = arith.constant 0 : i32
    return %arg0, %c0_i32 : i32, i32
  }
}

</mosaic_0001>

<bundles_post_ra>
// kernel: mmgat_forward.8
= control target key start
LH: loop header
LB: loop body
LE: loop exit
PB: predicated region body
PF: predicated region fallthrough
CT: control target
= control target key end

     0   :  { %s1806_s21 = smov 0   ;;  %s2457_s0 = inlined_call_operand.vmem [shape: f32[512,32], index: 0, kind: input, shape index: {}]   ;;  %s2458_s1 = inlined_call_operand.vmem [shape: bf16[32,64], index: 1, kind: input, shape index: {}]   ;;  %s2459_s2 = inlined_call_operand.vmem [shape: f32[1,64], index: 2, kind: input, shape index: {}]   ;;  %s2460_s3 = inlined_call_operand.vmem [shape: f32[1,64], index: 3, kind: input, shape index: {}]   ;;  %s2461_s4 = inlined_call_operand.vmem [shape: bf16[512,64], index: 4, kind: output, shape index: {0}]   ;;  %s2462_s5 = inlined_call_operand.vmem [shape: f32[512,1], index: 5, kind: output, shape index: {1}]   ;;  %s2463_s6 = inlined_call_operand.vmem [shape: f32[1,512], index: 6, kind: output, shape index: {2}]  }
   0x1 LB: > { %s1421_s22 = sadd.s32 4294967295, %s1768_s21   ;;  %p1425_p0 = scmp.ge.s32.totalorder %s1768_s21, 1  ;;  %s1768_s21 = sphi %s1806_s21, %s17_s21  }
   0x2   : > { %p218_p1 = scmp.lt.s32.totalorder %s1768_s21, 3 }
   0x4   : > { %p219_p2 = pnand %p1425_p0, %p218_p1 }
   0x5   : > { %s1426_s23 = sshll.u32 (!%p219_p2), %s1421_s22, 5  ;;  %vm345_vm0 = vcmask (!%p219_p2), 261120   ;;  %v1696_v54 = vld [vmem:[%s2458_s1] sm:$0xff] (!%p219_p2)   ;;  %v1697_v61 = vld [vmem:[%s2458_s1 + $0x8] sm:$0xff] (!%p219_p2)   ;;  %vm818_vm1 = vcmask (!%p219_p2), 523264   ;;  %vm1270_vm2 = vcmask (!%p219_p2), 519168  }
   0x6   : > { %222 = sbr.rel (%p219_p2) target bundleno = 718 (0x2ce), region = 36  ;;  %p258_p3 = scmp.lt.s32.totalorder (!%p219_p2), %s1426_s23, 63  ;;  %1603 = vmatprep.subr.bf16.mxu0 (!%p219_p2), %v1696_v54  ;;  %vm2258_vm3 = vmpackc.low (!%p219_p2), %vm818_vm1, %vm818_vm1  ;;  %vm915_vm4 = vcmask (!%p219_p2), 7168  }
   0x7   : > { %1604 = vmatpush3.bf16.msra.mxu0 (!%p219_p2), %v1696_v54  ;;  %s1432_s19 = sshll.u32 (!%p219_p2), %s1421_s22, 1 }
   0x8   : > { %1605 = vmatprep.subr.bf16.mxu0 (!%p219_p2), %v1697_v61  ;;  %p276_p4 = scmp.lt.s32.totalorder (!%p219_p2), %s1432_s19, 3 }
   0xb   : > { %1606 = vmatpush3.bf16.msra.mxu0 (!%p219_p2), %v1697_v61 }
   0xd   : > { %s2467_s23 = smov (!%p258_p3, %s1426_s23), 63  ;;  %s2469_s19 = smov (!%p276_p4, %s1432_s19), 3 }
   0xe   : > { %s1427_s24 = sshll.u32 %s2467_s23, 3  ;;  %s1429_s10 = sshll.u32 %s2467_s23, 2 }
   0xf   : > { %s1824_s27 = scalar_lea.vmem %s2457_s0, %s1427_s24  ;;  %s2088_s15 = scalar_lea.vmem %s2461_s4, %s1429_s10 }
  0x10   : > { %v1827_v0 = vld [vmem:[%s1824_s27 + $0x10] sm:$0xff]  ;;  %v1830_v1 = vld [vmem:[%s1824_s27] sm:$0xff]  ;;  %v1833_v2 = vld [vmem:[%s1824_s27 + $0x18] sm:$0xff]  ;;  %s2383_s18 = scalar_lea.vmem %s2462_s5, %s1427_s24  ;;  %s278_s24 = scalar_lea.vmem %s2463_s6, %s2469_s19 }
  0x11   : > { %v315_v3 = vmul.f32 %v1827_v0, %v1827_v0  ;;  %v313_v4 = vmul.f32 %v1830_v1, %v1830_v1  ;;  %v316_v5 = vmul.f32 %v1833_v2, %v1833_v2  ;;  %v1842_v6 = vld [vmem:[%s1824_s27 + $0x8] sm:$0xff]  ;;  %v1850_v9 = vld [vmem:[%s1824_s27 + $0x20] sm:$0xff]  ;;  %v1861_v16 = vld [vmem:[%s1824_s27 + $0x38] sm:$0xff] }
  0x12   : > { %v314_v7 = vmul.f32 %v1842_v6, %v1842_v6  ;;  %v1847_v8 = vld [vmem:[%s1824_s27 + $0x28] sm:$0xff]  ;;  %v317_v15 = vmul.f32 %v1850_v9, %v1850_v9  ;;  %v1864_v17 = vld [vmem:[%s1824_s27 + $0x30] sm:$0xff]  ;;  %v320_v20 = vmul.f32 %v1861_v16, %v1861_v16  ;;  %v1876_v23 = vld [vmem:[%s1824_s27 + $0x40] sm:$0xff] }
  0x13   : > { %v352_v10 = vsel %vm345_vm0, %v315_v3, 0.0  ;;  %v346_v11 = vsel %vm345_vm0, %v313_v4, 0.0  ;;  %v355_v12 = vsel %vm345_vm0, %v316_v5, 0.0  ;;  %v318_v14 = vmul.f32 %v1847_v8, %v1847_v8  ;;  %v1873_v22 = vld [vmem:[%s1824_s27 + $0x48] sm:$0xff]  ;;  %v1885_v28 = vld [vmem:[%s1824_s27 + $0x58] sm:$0xff]  ;;  %v1888_v29 = vld [vmem:[%s1824_s27 + $0x50] sm:$0xff] }
  0x14   : > { %353 = vadd.xlane.f32.xlu1 %v352_v10  ;;  %347 = vadd.xlane.f32.xlu0 %v346_v11  ;;  %v349_v13 = vsel %vm345_vm0, %v314_v7, 0.0  ;;  %v358_v19 = vsel %vm345_vm0, %v317_v15, 0.0  ;;  %v319_v21 = vmul.f32 %v1864_v17, %v1864_v17  ;;  %v367_v24 = vsel %vm345_vm0, %v320_v20, 0.0  ;;  %v1897_v34 = vld [vmem:[%s1824_s27 + $0x68] sm:$0xff]  ;;  %v1900_v35 = vld [vmem:[%s1824_s27 + $0x60] sm:$0xff]  ;;  %v1909_v40 = vld [vmem:[%s1824_s27 + $0x78] sm:$0xff] }
  0x15   : > { %v361_v18 = vsel %vm345_vm0, %v318_v14, 0.0  ;;  %v322_v26 = vmul.f32 %v1873_v22, %v1873_v22  ;;  %v321_v27 = vmul.f32 %v1876_v23, %v1876_v23  ;;  %v324_v32 = vmul.f32 %v1885_v28, %v1885_v28  ;;  %v1912_v41 = vld [vmem:[%s1824_s27 + $0x70] sm:$0xff]  ;;  %v1921_v46 = vld [vmem:[%s1824_s27 + $0x88] sm:$0xff]  ;;  %v1924_v47 = vld [vmem:[%s1824_s27 + $0x80] sm:$0xff] }
  0x16   : > { %v364_v25 = vsel %vm345_vm0, %v319_v21, 0.0  ;;  %v323_v33 = vmul.f32 %v1888_v29, %v1888_v29  ;;  %v326_v38 = vmul.f32 %v1897_v34, %v1897_v34  ;;  %v325_v39 = vmul.f32 %v1900_v35, %v1900_v35  ;;  %v1933_v52 = vld [vmem:[%s1824_s27 + $0x98] sm:$0xff]  ;;  %v1936_v53 = vld [vmem:[%s1824_s27 + $0x90] sm:$0xff]  ;;  %v1948_v59 = vld [vmem:[%s1824_s27 + $0xa8] sm:$0xff] }
  0x17   : > { %v373_v30 = vsel %vm345_vm0, %v322_v26, 0.0  ;;  %v370_v31 = vsel %vm345_vm0, %v321_v27, 0.0  ;;  %v379_v36 = vsel %vm345_vm0, %v324_v32, 0.0  ;;  %v328_v44 = vmul.f32 %v1909_v40, %v1909_v40  ;;  %v1951_v60 = vld [vmem:[%s1824_s27 + $0xa0] sm:$0xff]  ;;  %v1963_v5 = vld [vmem:[%s1824_s27 + $0xb8] sm:$0xff]  ;;  %v1966_v7 = vld [vmem:[%s1824_s27 + $0xb0] sm:$0xff] }
  0x18   : > { %356 = vadd.xlane.f32.xlu1 %v355_v12  ;;  %350 = vadd.xlane.f32.xlu0 %v349_v13  ;;  %v376_v37 = vsel %vm345_vm0, %v323_v33, 0.0  ;;  %v385_v42 = vsel %vm345_vm0, %v326_v38, 0.0  ;;  %v382_v43 = vsel %vm345_vm0, %v325_v39, 0.0  ;;  %v327_v45 = vmul.f32 %v1912_v41, %v1912_v41  ;;  %v1975_v14 = vld [vmem:[%s1824_s27 + $0xc8] sm:$0xff]  ;;  %v1978_v15 = vld [vmem:[%s1824_s27 + $0xc0] sm:$0xff] }
  0x19   : > { %v391_v48 = vsel %vm345_vm0, %v328_v44, 0.0  ;;  %v330_v50 = vmul.f32 %v1921_v46, %v1921_v46  ;;  %v329_v51 = vmul.f32 %v1924_v47, %v1924_v47  ;;  %v332_v57 = vmul.f32 %v1933_v52, %v1933_v52  ;;  %v1999_v32 = vld [vmem:[%s1824_s27 + $0xe8] sm:$0xff]  ;;  %v2002_v33 = vld [vmem:[%s1824_s27 + $0xe0] sm:$0xff] }
  0x1a   : > { %v388_v49 = vsel %vm345_vm0, %v327_v45, 0.0  ;;  %v331_v58 = vmul.f32 %v1936_v53, %v1936_v53  ;;  %v334_v3 = vmul.f32 %v1948_v59, %v1948_v59  ;;  %v333_v4 = vmul.f32 %v1951_v60, %v1951_v60 }
  0x1b   : > { %v397_v55 = vsel %vm345_vm0, %v330_v50, 0.0  ;;  %v394_v56 = vsel %vm345_vm0, %v329_v51, 0.0  ;;  %v403_v62 = vsel %vm345_vm0, %v332_v57, 0.0  ;;  %v336_v12 = vmul.f32 %v1963_v5, %v1963_v5 }
  0x1c   : > { %362 = vadd.xlane.f32.xlu1 %v361_v18  ;;  %359 = vadd.xlane.f32.xlu0 %v358_v19  ;;  %v400_v63 = vsel %vm345_vm0, %v331_v58, 0.0  ;;  %v409_v10 = vsel %vm345_vm0, %v334_v3, 0.0  ;;  %v406_v11 = vsel %vm345_vm0, %v333_v4, 0.0  ;;  %v335_v13 = vmul.f32 %v1966_v7, %v1966_v7 }
  0x1d   : > { %v415_v18 = vsel %vm345_vm0, %v336_v12, 0.0  ;;  %v338_v20 = vmul.f32 %v1975_v14, %v1975_v14  ;;  %v337_v21 = vmul.f32 %v1978_v15, %v1978_v15  ;;  %v342_v38 = vmul.f32 %v1999_v32, %v1999_v32 }
  0x1e   : > { %v412_v19 = vsel %vm345_vm0, %v335_v13, 0.0  ;;  %v341_v39 = vmul.f32 %v2002_v33, %v2002_v33 }
  0x1f   : > { %v421_v26 = vsel %vm345_vm0, %v338_v20, 0.0  ;;  %v418_v27 = vsel %vm345_vm0, %v337_v21, 0.0  ;;  %v433_v44 = vsel %vm345_vm0, %v342_v38, 0.0 }
  0x20   : > { %368 = vadd.xlane.f32.xlu1 %v367_v24  ;;  %365 = vadd.xlane.f32.xlu0 %v364_v25  ;;  %v1987_v24 = vld [vmem:[%s1824_s27 + $0xd8] sm:$0xff]  ;;  %v1990_v25 = vld [vmem:[%s1824_s27 + $0xd0] sm:$0xff]  ;;  %v430_v45 = vsel %vm345_vm0, %v341_v39, 0.0 }
  0x24   : > { %374 = vadd.xlane.f32.xlu1 %v373_v30  ;;  %371 = vadd.xlane.f32.xlu0 %v370_v31  ;;  %v340_v30 = vmul.f32 %v1987_v24, %v1987_v24  ;;  %v339_v31 = vmul.f32 %v1990_v25, %v1990_v25 }
  0x28   : > { %380 = vadd.xlane.f32.xlu1 %v379_v36  ;;  %377 = vadd.xlane.f32.xlu0 %v376_v37  ;;  %v427_v36 = vsel %vm345_vm0, %v340_v30, 0.0  ;;  %v424_v37 = vsel %vm345_vm0, %v339_v31, 0.0 }
  0x2c   : > { %386 = vadd.xlane.f32.xlu1 %v385_v42  ;;  %383 = vadd.xlane.f32.xlu0 %v382_v43  ;;  %v2011_v42 = vld [vmem:[%s1824_s27 + $0xf8] sm:$0xff]  ;;  %v2014_v43 = vld [vmem:[%s1824_s27 + $0xf0] sm:$0xff] }
  0x30   : > { %392 = vadd.xlane.f32.xlu1 %v391_v48  ;;  %389 = vadd.xlane.f32.xlu0 %v388_v49  ;;  %v344_v48 = vmul.f32 %v2011_v42, %v2011_v42  ;;  %v343_v49 = vmul.f32 %v2014_v43, %v2014_v43 }
  0x32   : > { %v439_v50 = vsel %vm345_vm0, %v344_v48, 0.0  ;;  %v436_v51 = vsel %vm345_vm0, %v343_v49, 0.0 }
  0x34   : > { %398 = vadd.xlane.f32.xlu1 %v397_v55  ;;  %395 = vadd.xlane.f32.xlu0 %v394_v56 }
  0x38   : > { %404 = vadd.xlane.f32.xlu1 %v403_v62  ;;  %401 = vadd.xlane.f32.xlu0 %v400_v63 }
  0x3c   : > { %410 = vadd.xlane.f32.xlu1 %v409_v10  ;;  %407 = vadd.xlane.f32.xlu0 %v406_v11 }
  0x40   : > { %416 = vadd.xlane.f32.xlu1 %v415_v18  ;;  %413 = vadd.xlane.f32.xlu0 %v412_v19 }
  0x44   : > { %422 = vadd.xlane.f32.xlu1 %v421_v26  ;;  %419 = vadd.xlane.f32.xlu0 %v418_v27 }
  0x48   : > { %428 = vadd.xlane.f32.xlu1 %v427_v36  ;;  %425 = vadd.xlane.f32.xlu0 %v424_v37 }
  0x4c   : > { %434 = vadd.xlane.f32.xlu1 %v433_v44  ;;  %431 = vadd.xlane.f32.xlu0 %v430_v45 }
  0x50   : > { %440 = vadd.xlane.f32.xlu1 %v439_v50  ;;  %437 = vadd.xlane.f32.xlu0 %v436_v51 }
  0xa1   : > { %v354_v54 = vpop.xlane.xlu1 %353  ;;  %v348_v55 = vpop.xlane.xlu0 %347 }
  0xa2   : > { %v444_v56 = vmax.f32 %v354_v54, 1e-24  ;;  %v442_v57 = vmax.f32 %v348_v55, 1e-24 }
  0xa4   : > { %1698 = vrsqrt.f32 %v444_v56 }
  0xa5   : > { %v357_v58 = vpop.xlane.xlu1 %356  ;;  %v351_v61 = vpop.xlane.xlu0 %350  ;;  %1700 = vrsqrt.f32 %v442_v57 }
  0xa6   : > { %v445_v62 = vmax.f32 %v357_v58, 1e-24  ;;  %v443_v63 = vmax.f32 %v351_v61, 1e-24 }
  0xa8   : > { %1702 = vrsqrt.f32 %v445_v62 }
  0xa9   : > { %1704 = vrsqrt.f32 %v443_v63  ;;  %v363_v3 = vpop.xlane.xlu1 %362  ;;  %v360_v4 = vpop.xlane.xlu0 %359 }
  0xaa   : > { %v447_v10 = vmax.f32 %v363_v3, 1e-24  ;;  %v446_v11 = vmax.f32 %v360_v4, 1e-24 }
  0xac   : > { %1706 = vrsqrt.f32 %v447_v10 }
  0xad   : > { %1708 = vrsqrt.f32 %v446_v11  ;;  %v369_v12 = vpop.xlane.xlu1 %368  ;;  %v366_v13 = vpop.xlane.xlu0 %365 }
  0xae   : > { %v449_v18 = vmax.f32 %v369_v12, 1e-24  ;;  %v448_v19 = vmax.f32 %v366_v13, 1e-24  ;;  %v1699_v20 = vpop.eup %1698 }
  0xaf   : > { %v1701_v21 = vpop.eup %1700  ;;  %v508_v38 = vmul.f32 %v1699_v20, %v1827_v0 }
  0xb0   : > { %1710 = vrsqrt.f32 %v449_v18  ;;  %v506_v44 = vmul.f32 %v1701_v21, %v1830_v1 }
  0xb1   : > { %1712 = vrsqrt.f32 %v448_v19  ;;  %v375_v26 = vpop.xlane.xlu1 %374  ;;  %v372_v27 = vpop.xlane.xlu0 %371 }
  0xb2   : > { %v1703_v30 = vpop.eup %1702  ;;  %v451_v31 = vmax.f32 %v375_v26, 1e-24  ;;  %v450_v36 = vmax.f32 %v372_v27, 1e-24 }
  0xb3   : > { %v1705_v37 = vpop.eup %1704  ;;  %v509_v39 = vmul.f32 %v1703_v30, %v1833_v2 }
  0xb4   : > { %1714 = vrsqrt.f32 %v451_v31  ;;  %v507_v45 = vmul.f32 %v1705_v37, %v1842_v6 }
  0xb5   : > { %1716 = vrsqrt.f32 %v450_v36  ;;  %v381_v48 = vpop.xlane.xlu1 %380  ;;  %v378_v49 = vpop.xlane.xlu0 %377  ;;  %v539_v50 = vpack.c.bf16 %v509_v39, %v508_v38 }
  0xb6   : > { %v1707_v51 = vpop.eup %1706  ;;  %v453_v54 = vmax.f32 %v381_v48, 1e-24  ;;  %v452_v55 = vmax.f32 %v378_v49, 1e-24  ;;  %v538_v56 = vpack.c.bf16 %v507_v45, %v506_v44 }
  0xb7   : > { %v1709_v57 = vpop.eup %1708  ;;  %v511_v58 = vmul.f32 %v1707_v51, %v1847_v8 }
  0xb8   : > { %1718 = vrsqrt.f32 %v453_v54  ;;  %1607 = vmatprep.mubr.msk.bf16.mxu0 %vm345_vm0, %v538_v56  ;;  %v510_v0 = vmul.f32 %v1709_v57, %v1850_v9 }
  0xb9   : > { %1720 = vrsqrt.f32 %v452_v55  ;;  %1608 = vmatmul.mubr.msk.bf16.vlgmr.msra.gmra.mrb[0].mxu0 %vm345_vm0, %v539_v50  ;;  %v387_v1 = vpop.xlane.xlu1 %386  ;;  %v384_v2 = vpop.xlane.xlu0 %383 }
  0xba   : > { %v1711_v6 = vpop.eup %1710  ;;  %v455_v61 = vmax.f32 %v387_v1, 1e-24  ;;  %v454_v62 = vmax.f32 %v384_v2, 1e-24  ;;  %v540_v63 = vpack.c.bf16 %v511_v58, %v510_v0 }
  0xbb   : > { %v1713_v3 = vpop.eup %1712  ;;  %v513_v4 = vmul.f32 %v1711_v6, %v1861_v16 }
  0xbc   : > { %1722 = vrsqrt.f32 %v455_v61  ;;  %1611 = vmatprep.mubr.msk.bf16.mxu0 %vm345_vm0, %v540_v63  ;;  %v512_v8 = vmul.f32 %v1713_v3, %v1864_v17 }
  0xbd   : > { %1724 = vrsqrt.f32 %v454_v62  ;;  %v393_v10 = vpop.xlane.xlu1 %392  ;;  %v390_v9 = vpop.xlane.xlu0 %389 }
  0xbe   : > { %v1715_v11 = vpop.eup %1714  ;;  %v457_v12 = vmax.f32 %v393_v10, 1e-24  ;;  %v456_v13 = vmax.f32 %v390_v9, 1e-24  ;;  %v541_v18 = vpack.c.bf16 %v513_v4, %v512_v8 }
  0xbf   : > { %v1717_v19 = vpop.eup %1716  ;;  %v515_v20 = vmul.f32 %v1715_v11, %v1873_v22 }
  0xc0   : > { %1726 = vrsqrt.f32 %v457_v12  ;;  %v514_v21 = vmul.f32 %v1717_v19, %v1876_v23 }
  0xc1   : > { %1728 = vrsqrt.f32 %v456_v13  ;;  %1612 = vmatmul.mubr.msk.bf16.gmra.mrb[4].mxu0 %vm345_vm0, %v541_v18  ;;  %v399_v16 = vpop.xlane.xlu1 %398  ;;  %v396_v26 = vpop.xlane.xlu0 %395 }
  0xc2   : > { %v1719_v27 = vpop.eup %1718  ;;  %v459_v17 = vmax.f32 %v399_v16, 1e-24  ;;  %v458_v30 = vmax.f32 %v396_v26, 1e-24  ;;  %v542_v31 = vpack.c.bf16 %v515_v20, %v514_v21 }
  0xc3   : > { %v1721_v36 = vpop.eup %1720  ;;  %v517_v37 = vmul.f32 %v1719_v27, %v1885_v28 }
  0xc4   : > { %1730 = vrsqrt.f32 %v459_v17  ;;  %1615 = vmatprep.mubr.msk.bf16.mxu0 %vm345_vm0, %v542_v31  ;;  %v516_v22 = vmul.f32 %v1721_v36, %v1888_v29 }
  0xc5   : > { %1732 = vrsqrt.f32 %v458_v30  ;;  %v405_v38 = vpop.xlane.xlu1 %404  ;;  %v402_v23 = vpop.xlane.xlu0 %401 }
  0xc6   : > { %v1723_v39 = vpop.eup %1722  ;;  %v461_v44 = vmax.f32 %v405_v38, 1e-24  ;;  %v460_v45 = vmax.f32 %v402_v23, 1e-24  ;;  %v543_v48 = vpack.c.bf16 %v517_v37, %v516_v22 }
  0xc7   : > { %v1725_v49 = vpop.eup %1724  ;;  %v519_v50 = vmul.f32 %v1723_v39, %v1897_v34 }
  0xc8   : > { %1734 = vrsqrt.f32 %v461_v44  ;;  %v518_v51 = vmul.f32 %v1725_v49, %v1900_v35 }
  0xc9   : > { %1736 = vrsqrt.f32 %v460_v45  ;;  %1616 = vmatmul.mubr.msk.bf16.gmra.mrb[8].mxu0 %vm345_vm0, %v543_v48  ;;  %v411_v28 = vpop.xlane.xlu1 %410  ;;  %v408_v54 = vpop.xlane.xlu0 %407 }
  0xca   : > { %v1727_v55 = vpop.eup %1726  ;;  %v463_v29 = vmax.f32 %v411_v28, 1e-24  ;;  %v544_v56 = vpack.c.bf16 %v519_v50, %v518_v51  ;;  %v462_v57 = vmax.f32 %v408_v54, 1e-24 }
  0xcb   : > { %v1729_v58 = vpop.eup %1728  ;;  %v521_v0 = vmul.f32 %v1727_v55, %v1909_v40 }
  0xcc   : > { %1738 = vrsqrt.f32 %v463_v29  ;;  %1619 = vmatprep.mubr.msk.bf16.mxu0 %vm345_vm0, %v544_v56  ;;  %v520_v34 = vmul.f32 %v1729_v58, %v1912_v41 }
  0xcd   : > { %1740 = vrsqrt.f32 %v462_v57  ;;  %v417_v1 = vpop.xlane.xlu1 %416  ;;  %v414_v35 = vpop.xlane.xlu0 %413 }
  0xce   : > { %v1731_v2 = vpop.eup %1730  ;;  %v465_v6 = vmax.f32 %v417_v1, 1e-24  ;;  %v545_v61 = vpack.c.bf16 %v521_v0, %v520_v34  ;;  %v464_v62 = vmax.f32 %v414_v35, 1e-24 }
  0xcf   : > { %v1733_v63 = vpop.eup %1732  ;;  %v523_v3 = vmul.f32 %v1731_v2, %v1921_v46 }
  0xd0   : > { %1742 = vrsqrt.f32 %v465_v6  ;;  %v522_v4 = vmul.f32 %v1733_v63, %v1924_v47 }
  0xd1   : > { %1620 = vmatmul.mubr.msk.bf16.gmra.mrb[12].mxu0 %vm345_vm0, %v545_v61  ;;  %1744 = vrsqrt.f32 %v464_v62  ;;  %v423_v40 = vpop.xlane.xlu1 %422  ;;  %v420_v8 = vpop.xlane.xlu0 %419 }
  0xd2   : > { %v1735_v10 = vpop.eup %1734  ;;  %v546_v41 = vpack.c.bf16 %v523_v3, %v522_v4  ;;  %v467_v9 = vmax.f32 %v423_v40, 1e-24  ;;  %v466_v11 = vmax.f32 %v420_v8, 1e-24 }
  0xd3   : > { %v1737_v12 = vpop.eup %1736  ;;  %v525_v13 = vmul.f32 %v1735_v10, %v1933_v52 }
  0xd4   : > { %1623 = vmatprep.mubr.msk.bf16.mxu0 %vm345_vm0, %v546_v41  ;;  %v524_v18 = vmul.f32 %v1737_v12, %v1936_v53  ;;  %1746 = vrsqrt.f32 %v467_v9 }
  0xd5   : > { %1748 = vrsqrt.f32 %v466_v11  ;;  %v429_v46 = vpop.xlane.xlu1 %428  ;;  %v426_v47 = vpop.xlane.xlu0 %425 }
  0xd6   : > { %v1739_v19 = vpop.eup %1738  ;;  %v547_v20 = vpack.c.bf16 %v525_v13, %v524_v18  ;;  %v469_v21 = vmax.f32 %v429_v46, 1e-24  ;;  %v468_v16 = vmax.f32 %v426_v47, 1e-24 }
  0xd7   : > { %v1741_v26 = vpop.eup %1740  ;;  %v527_v27 = vmul.f32 %v1739_v19, %v1948_v59 }
  0xd8   : > { %1750 = vrsqrt.f32 %v469_v21  ;;  %v526_v17 = vmul.f32 %v1741_v26, %v1951_v60 }
  0xd9   : > { %1624 = vmatmul.mubr.msk.bf16.gmra.mrb[16].mxu0 %vm345_vm0, %v547_v20  ;;  %1752 = vrsqrt.f32 %v468_v16  ;;  %v435_v52 = vpop.xlane.xlu1 %434  ;;  %v432_v30 = vpop.xlane.xlu0 %431 }
  0xda   : > { %v1743_v53 = vpop.eup %1742  ;;  %v548_v31 = vpack.c.bf16 %v527_v27, %v526_v17  ;;  %v471_v36 = vmax.f32 %v435_v52, 1e-24  ;;  %v470_v37 = vmax.f32 %v432_v30, 1e-24 }
  0xdb   : > { %v1745_v22 = vpop.eup %1744  ;;  %v529_v38 = vmul.f32 %v1743_v53, %v1963_v5 }
  0xdc   : > { %1627 = vmatprep.mubr.msk.bf16.mxu0 %vm345_vm0, %v548_v31  ;;  %v528_v23 = vmul.f32 %v1745_v22, %v1966_v7  ;;  %1754 = vrsqrt.f32 %v471_v36 }
  0xdd   : > { %1756 = vrsqrt.f32 %v470_v37  ;;  %v441_v59 = vpop.xlane.xlu1 %440  ;;  %v438_v60 = vpop.xlane.xlu0 %437 }
  0xde   : > { %v1747_v39 = vpop.eup %1746  ;;  %v549_v44 = vpack.c.bf16 %v529_v38, %v528_v23  ;;  %v473_v45 = vmax.f32 %v441_v59, 1e-24  ;;  %v472_v48 = vmax.f32 %v438_v60, 1e-24 }
  0xdf   : > { %v1749_v49 = vpop.eup %1748  ;;  %v531_v50 = vmul.f32 %v1747_v39, %v1975_v14 }
  0xe0   : > { %1758 = vrsqrt.f32 %v473_v45  ;;  %v530_v51 = vmul.f32 %v1749_v49, %v1978_v15 }
  0xe1   : > { %1628 = vmatmul.mubr.msk.bf16.gmra.mrb[20].mxu0 %vm345_vm0, %v549_v44  ;;  %1760 = vrsqrt.f32 %v472_v48 }
  0xe2   : > { %v1751_v5 = vpop.eup %1750  ;;  %v550_v28 = vpack.c.bf16 %v531_v50, %v530_v51 }
  0xe3   : > { %v1753_v7 = vpop.eup %1752  ;;  %v533_v54 = vmul.f32 %v1751_v5, %v1987_v24 }
  0xe4   : > { %1631 = vmatprep.mubr.msk.bf16.mxu0 %vm345_vm0, %v550_v28  ;;  %v532_v55 = vmul.f32 %v1753_v7, %v1990_v25 }
  0xe6   : > { %v1755_v29 = vpop.eup %1754  ;;  %v551_v56 = vpack.c.bf16 %v533_v54, %v532_v55 }
  0xe7   : > { %v1757_v57 = vpop.eup %1756  ;;  %v535_v14 = vmul.f32 %v1755_v29, %v1999_v32  ;;  %v2075_v32 = vld [vmem:[%s2459_s2] sm:$0x1] }
  0xe8   : > { %v534_v15 = vmul.f32 %v1757_v57, %v2002_v33  ;;  %1601 = vmatprep.mubr.msk.f32.mxu1 %vm818_vm1, %v2075_v32  ;;  %v2083_v33 = vld [vmem:[%s2460_s3] ss:$0 sm:$0xff] }
  0xe9   : > { %1632 = vmatmul.mubr.msk.bf16.gmra.mrb[24].mxu0 %vm345_vm0, %v551_v56 }
  0xea   : > { %v1759_v58 = vpop.eup %1758  ;;  %v552_v0 = vpack.c.bf16 %v535_v14, %v534_v15 }
  0xeb   : > { %v1761_v34 = vpop.eup %1760  ;;  %v537_v1 = vmul.f32 %v1759_v58, %v2011_v42 }
  0xec   : > { %1635 = vmatprep.mubr.msk.bf16.mxu0 %vm345_vm0, %v552_v0  ;;  %v536_v24 = vmul.f32 %v1761_v34, %v2014_v43 }
  0xee   : > { %v553_v25 = vpack.c.bf16 %v537_v1, %v536_v24 }
  0xf1   : > { %1636 = vmatmul.mubr.msk.bf16.gmra.mrb[28].mxu0 %vm345_vm0, %v553_v25 }
 0x18c   : > { %v2090_v42 = vpop.f32.mrb[0].mxu0 }
 0x18d   : > { %v1521_v43 = vpack.c.bf16 %v2090_v42, %v2090_v42  ;;  %v2094_v35 = vpop.f32.mrb[1].mxu0  ;;  %v788_v2 = vmul.f32 %v2090_v42, %v2083_v33 }
 0x18e   : > { %v1519_v6 = vpack.c.bf16 %v2094_v35, %v2094_v35  ;;  %v2100_v61 = vpop.f32.mrb[2].mxu0  ;;  %v786_v62 = vmul.f32 %v2083_v33, %v2094_v35 }
 0x18f   : > { %1273 = vst.msk [vmem:[%s2088_s15 + $0x8] sm:$0xf] %vm1270_vm2, %v1521_v43  ;;  %v1648_v63 = vpack.c.bf16 %v2100_v61, %v2090_v42  ;;  %v1522_v3 = vpack.c.bf16 %v2100_v61, %v2100_v61  ;;  %v2110_v4 = vpop.f32.mrb[3].mxu0  ;;  %v825_v40 = vsel %vm818_vm1, %v788_v2, 0.0  ;;  %v789_v8 = vmul.f32 %v2100_v61, %v2083_v33 }
 0x190   : > { %1271 = vst.msk [vmem:[%s2088_s15] sm:$0xf] %vm1270_vm2, %v1519_v6  ;;  %v1642_v10 = vpack.c.bf16 %v2110_v4, %v2094_v35  ;;  %v1520_v41 = vpack.c.bf16 %v2110_v4, %v2110_v4  ;;  %826 = vadd.xlane.f32.xlu0 %v825_v40  ;;  %v787_v11 = vmul.f32 %v2083_v33, %v2110_v4  ;;  %v819_v12 = vsel %vm818_vm1, %v786_v62, 0.0 }
 0x191   : > { %1274 = vst.msk [vmem:[%s2088_s15 + $0xc] sm:$0xf] %vm1270_vm2, %v1522_v3  ;;  %v828_v9 = vsel %vm818_vm1, %v789_v8, 0.0 }
 0x192   : > { %1272 = vst.msk [vmem:[%s2088_s15 + $0x4] sm:$0xf] %vm1270_vm2, %v1520_v41  ;;  %829 = vadd.xlane.f32.xlu1 %v828_v9  ;;  %v822_v47 = vsel %vm818_vm1, %v787_v11, 0.0 }
 0x194   : > { %820 = vadd.xlane.f32.xlu0 %v819_v12  ;;  %v2129_v13 = vpop.f32.mrb[4].mxu0 }
 0x195   : > { %v1525_v18 = vpack.c.bf16 %v2129_v13, %v2129_v13  ;;  %v2133_v46 = vpop.f32.mrb[5].mxu0  ;;  %v792_v19 = vmul.f32 %v2129_v13, %v2083_v33 }
 0x196   : > { %v1523_v20 = vpack.c.bf16 %v2133_v46, %v2133_v46  ;;  %823 = vadd.xlane.f32.xlu1 %v822_v47  ;;  %v2140_v21 = vpop.f32.mrb[6].mxu0  ;;  %v790_v16 = vmul.f32 %v2083_v33, %v2133_v46 }
 0x197   : > { %1277 = vst.msk [vmem:[%s2088_s15 + $0x18] sm:$0xf] %vm1270_vm2, %v1525_v18  ;;  %v1660_v26 = vpack.c.bf16 %v2140_v21, %v2129_v13  ;;  %v1526_v27 = vpack.c.bf16 %v2140_v21, %v2140_v21  ;;  %v2150_v17 = vpop.f32.mrb[7].mxu0  ;;  %v837_v52 = vsel %vm818_vm1, %v792_v19, 0.0  ;;  %v793_v30 = vmul.f32 %v2140_v21, %v2083_v33 }
 0x198   : > { %1275 = vst.msk [vmem:[%s2088_s15 + $0x10] sm:$0xf] %vm1270_vm2, %v1523_v20  ;;  %v1654_v53 = vpack.c.bf16 %v2150_v17, %v2133_v46  ;;  %v1524_v31 = vpack.c.bf16 %v2150_v17, %v2150_v17  ;;  %838 = vadd.xlane.f32.xlu0 %v837_v52  ;;  %v791_v37 = vmul.f32 %v2083_v33, %v2150_v17  ;;  %v831_v22 = vsel %vm818_vm1, %v790_v16, 0.0 }
 0x199   : > { %1278 = vst.msk [vmem:[%s2088_s15 + $0x1c] sm:$0xf] %vm1270_vm2, %v1526_v27  ;;  %v840_v36 = vsel %vm818_vm1, %v793_v30, 0.0 }
 0x19a   : > { %1276 = vst.msk [vmem:[%s2088_s15 + $0x14] sm:$0xf] %vm1270_vm2, %v1524_v31  ;;  %841 = vadd.xlane.f32.xlu1 %v840_v36  ;;  %v834_v60 = vsel %vm818_vm1, %v791_v37, 0.0 }
 0x19c   : > { %832 = vadd.xlane.f32.xlu0 %v831_v22  ;;  %v2169_v38 = vpop.f32.mrb[8].mxu0 }
 0x19d   : > { %v1529_v23 = vpack.c.bf16 %v2169_v38, %v2169_v38  ;;  %v2173_v59 = vpop.f32.mrb[9].mxu0  ;;  %v796_v39 = vmul.f32 %v2169_v38, %v2083_v33 }
 0x19e   : > { %v1527_v44 = vpack.c.bf16 %v2173_v59, %v2173_v59  ;;  %835 = vadd.xlane.f32.xlu1 %v834_v60  ;;  %v2180_v45 = vpop.f32.mrb[10].mxu0  ;;  %v794_v48 = vmul.f32 %v2083_v33, %v2173_v59 }
 0x19f   : > { %1281 = vst.msk [vmem:[%s2088_s15 + $0x28] sm:$0xf] %vm1270_vm2, %v1529_v23  ;;  %v1672_v49 = vpack.c.bf16 %v2180_v45, %v2169_v38  ;;  %v1530_v50 = vpack.c.bf16 %v2180_v45, %v2180_v45  ;;  %v2190_v51 = vpop.f32.mrb[11].mxu0  ;;  %v849_v5 = vsel %vm818_vm1, %v796_v39, 0.0  ;;  %v797_v28 = vmul.f32 %v2180_v45, %v2083_v33 }
 0x1a0   : > { %1279 = vst.msk [vmem:[%s2088_s15 + $0x20] sm:$0xf] %vm1270_vm2, %v1527_v44  ;;  %v1666_v7 = vpack.c.bf16 %v2190_v51, %v2173_v59  ;;  %v1528_v54 = vpack.c.bf16 %v2190_v51, %v2190_v51  ;;  %850 = vadd.xlane.f32.xlu0 %v849_v5  ;;  %v795_v29 = vmul.f32 %v2083_v33, %v2190_v51  ;;  %v843_v56 = vsel %vm818_vm1, %v794_v48, 0.0 }
 0x1a1   : > { %1282 = vst.msk [vmem:[%s2088_s15 + $0x2c] sm:$0xf] %vm1270_vm2, %v1530_v50  ;;  %v852_v55 = vsel %vm818_vm1, %v797_v28, 0.0 }
 0x1a2   : > { %1280 = vst.msk [vmem:[%s2088_s15 + $0x24] sm:$0xf] %vm1270_vm2, %v1528_v54  ;;  %853 = vadd.xlane.f32.xlu1 %v852_v55  ;;  %v846_v58 = vsel %vm818_vm1, %v795_v29, 0.0 }
 0x1a4   : > { %844 = vadd.xlane.f32.xlu0 %v843_v56  ;;  %v2209_v57 = vpop.f32.mrb[12].mxu0 }
 0x1a5   : > { %v1533_v14 = vpack.c.bf16 %v2209_v57, %v2209_v57  ;;  %v2213_v15 = vpop.f32.mrb[13].mxu0  ;;  %v800_v0 = vmul.f32 %v2209_v57, %v2083_v33 }
 0x1a6   : > { %v1531_v34 = vpack.c.bf16 %v2213_v15, %v2213_v15  ;;  %847 = vadd.xlane.f32.xlu1 %v846_v58  ;;  %v2220_v1 = vpop.f32.mrb[14].mxu0  ;;  %v798_v24 = vmul.f32 %v2083_v33, %v2213_v15 }
 0x1a7   : > { %1285 = vst.msk [vmem:[%s2088_s15 + $0x38] sm:$0xf] %vm1270_vm2, %v1533_v14  ;;  %v1684_v25 = vpack.c.bf16 %v2220_v1, %v2209_v57  ;;  %v1534_v43 = vpack.c.bf16 %v2220_v1, %v2220_v1  ;;  %v2230_v2 = vpop.f32.mrb[15].mxu0  ;;  %v861_v6 = vsel %vm818_vm1, %v800_v0, 0.0  ;;  %v801_v62 = vmul.f32 %v2220_v1, %v2083_v33 }
 0x1a8   : > { %1283 = vst.msk [vmem:[%s2088_s15 + $0x30] sm:$0xf] %vm1270_vm2, %v1531_v34  ;;  %v1678_v3 = vpack.c.bf16 %v2230_v2, %v2213_v15  ;;  %v1532_v40 = vpack.c.bf16 %v2230_v2, %v2230_v2  ;;  %862 = vadd.xlane.f32.xlu0 %v861_v6  ;;  %v799_v41 = vmul.f32 %v2083_v33, %v2230_v2  ;;  %v855_v9 = vsel %vm818_vm1, %v798_v24, 0.0 }
 0x1a9   : > { %1286 = vst.msk [vmem:[%s2088_s15 + $0x3c] sm:$0xf] %vm1270_vm2, %v1534_v43  ;;  %v864_v8 = vsel %vm818_vm1, %v801_v62, 0.0 }
 0x1aa   : > { %1284 = vst.msk [vmem:[%s2088_s15 + $0x34] sm:$0xf] %vm1270_vm2, %v1532_v40  ;;  %865 = vadd.xlane.f32.xlu1 %v864_v8  ;;  %v858_v47 = vsel %vm818_vm1, %v799_v41, 0.0 }
 0x1ac   : > { %856 = vadd.xlane.f32.xlu0 %v855_v9  ;;  %v1625_v11 = vpop.f32.mrb[16].mxu0 }
 0x1ad   : > { %v1537_v12 = vpack.c.bf16 %v1625_v11, %v1625_v11  ;;  %v716_v18 = vpop.f32.mrb[17].mxu0  ;;  %v804_v19 = vmul.f32 %v1625_v11, %v2083_v33 }
 0x1ae   : > { %v1535_v20 = vpack.c.bf16 %v716_v18, %v716_v18  ;;  %859 = vadd.xlane.f32.xlu1 %v858_v47  ;;  %v1626_v16 = vpop.f32.mrb[18].mxu0  ;;  %v802_v27 = vmul.f32 %v2083_v33, %v716_v18 }
 0x1af   : > { %1289 = vst.msk [vmem:[%s2088_s15 + $0x48] sm:$0xf] %vm1270_vm2, %v1537_v12  ;;  %v1645_v52 = vpack.c.bf16 %v1626_v16, %v1625_v11  ;;  %v1538_v30 = vpack.c.bf16 %v1626_v16, %v1626_v16  ;;  %v719_v31 = vpop.f32.mrb[19].mxu0  ;;  %v873_v36 = vsel %vm818_vm1, %v804_v19, 0.0  ;;  %v805_v37 = vmul.f32 %v1626_v16, %v2083_v33 }
 0x1b0   : > { %1287 = vst.msk [vmem:[%s2088_s15 + $0x40] sm:$0xf] %vm1270_vm2, %v1535_v20  ;;  %v1536_v23 = vpack.c.bf16 %v719_v31, %v719_v31  ;;  %874 = vadd.xlane.f32.xlu0 %v873_v36  ;;  %v1639_v60 = vpack.c.bf16 %v719_v31, %v716_v18  ;;  %v803_v44 = vmul.f32 %v2083_v33, %v719_v31  ;;  %v867_v48 = vsel %vm818_vm1, %v802_v27, 0.0 }
 0x1b1   : > { %1290 = vst.msk [vmem:[%s2088_s15 + $0x4c] sm:$0xf] %vm1270_vm2, %v1538_v30  ;;  %v876_v39 = vsel %vm818_vm1, %v805_v37, 0.0 }
 0x1b2   : > { %1288 = vst.msk [vmem:[%s2088_s15 + $0x44] sm:$0xf] %vm1270_vm2, %v1536_v23  ;;  %877 = vadd.xlane.f32.xlu1 %v876_v39  ;;  %1641 = vmatprep.subr.msk.bf16.mxu1 %vm2258_vm3, %v1639_v60  ;;  %v870_v5 = vsel %vm818_vm1, %v803_v44, 0.0 }
 0x1b3   : > { %1644 = vmatpush3.bf16.xpose.msk.msra.mxu1 %vm2258_vm3, %v1642_v10 }
 0x1b4   : > { %868 = vadd.xlane.f32.xlu0 %v867_v48  ;;  %1647 = vmatprep.subr.msk.bf16.mxu1 %vm2258_vm3, %v1645_v52  ;;  %v1629_v50 = vpop.f32.mrb[20].mxu0 }
 0x1b5   : > { %v1541_v28 = vpack.c.bf16 %v1629_v50, %v1629_v50  ;;  %v732_v54 = vpop.f32.mrb[21].mxu0  ;;  %v808_v55 = vmul.f32 %v1629_v50, %v2083_v33 }
 0x1b6   : > { %871 = vadd.xlane.f32.xlu1 %v870_v5  ;;  %v1539_v35 = vpack.c.bf16 %v732_v54, %v732_v54  ;;  %v1630_v4 = vpop.f32.mrb[22].mxu0  ;;  %v806_v10 = vmul.f32 %v2083_v33, %v732_v54 }
 0x1b7   : > { %1293 = vst.msk [vmem:[%s2088_s15 + $0x58] sm:$0xf] %vm1270_vm2, %v1541_v28  ;;  %v1657_v29 = vpack.c.bf16 %v1630_v4, %v1629_v50  ;;  %v1542_v56 = vpack.c.bf16 %v1630_v4, %v1630_v4  ;;  %v885_v14 = vsel %vm818_vm1, %v808_v55, 0.0  ;;  %v809_v58 = vmul.f32 %v1630_v4, %v2083_v33  ;;  %v735_v0 = vpop.f32.mrb[23].mxu0 }
 0x1b8   : > { %1291 = vst.msk [vmem:[%s2088_s15 + $0x50] sm:$0xf] %vm1270_vm2, %v1539_v35  ;;  %886 = vadd.xlane.f32.xlu0 %v885_v14  ;;  %v1651_v34 = vpack.c.bf16 %v735_v0, %v732_v54  ;;  %v1540_v24 = vpack.c.bf16 %v735_v0, %v735_v0  ;;  %v807_v43 = vmul.f32 %v2083_v33, %v735_v0  ;;  %v879_v62 = vsel %vm818_vm1, %v806_v10, 0.0 }
 0x1b9   : > { %1294 = vst.msk [vmem:[%s2088_s15 + $0x5c] sm:$0xf] %vm1270_vm2, %v1542_v56  ;;  %v888_v6 = vsel %vm818_vm1, %v809_v58, 0.0 }
 0x1ba   : > { %889 = vadd.xlane.f32.xlu1 %v888_v6  ;;  %1292 = vst.msk [vmem:[%s2088_s15 + $0x54] sm:$0xf] %vm1270_vm2, %v1540_v24  ;;  %v882_v40 = vsel %vm818_vm1, %v807_v43, 0.0 }
 0x1bb   : > { %1650 = vmatpush3.bf16.xpose.msk.msra.mxu1 %vm2258_vm3, %v1648_v63 }
 0x1bc   : > { %1653 = vmatprep.subr.msk.bf16.mxu1 %vm2258_vm3, %v1651_v34  ;;  %880 = vadd.xlane.f32.xlu0 %v879_v62  ;;  %v1633_v8 = vpop.f32.mrb[24].mxu0 }
 0x1bd   : > { %v1545_v41 = vpack.c.bf16 %v1633_v8, %v1633_v8  ;;  %v748_v9 = vpop.f32.mrb[25].mxu0  ;;  %v812_v11 = vmul.f32 %v1633_v8, %v2083_v33 }
 0x1be   : > { %883 = vadd.xlane.f32.xlu1 %v882_v40  ;;  %v1543_v12 = vpack.c.bf16 %v748_v9, %v748_v9  ;;  %v1634_v18 = vpop.f32.mrb[26].mxu0  ;;  %v810_v42 = vmul.f32 %v2083_v33, %v748_v9 }
 0x1bf   : > { %1297 = vst.msk [vmem:[%s2088_s15 + $0x68] sm:$0xf] %vm1270_vm2, %v1545_v41  ;;  %v1669_v61 = vpack.c.bf16 %v1634_v18, %v1633_v8  ;;  %v1546_v63 = vpack.c.bf16 %v1634_v18, %v1634_v18  ;;  %v897_v47 = vsel %vm818_vm1, %v812_v11, 0.0  ;;  %v813_v19 = vmul.f32 %v1634_v18, %v2083_v33  ;;  %v751_v20 = vpop.f32.mrb[27].mxu0 }
 0x1c0   : > { %1295 = vst.msk [vmem:[%s2088_s15 + $0x60] sm:$0xf] %vm1270_vm2, %v1543_v12  ;;  %898 = vadd.xlane.f32.xlu0 %v897_v47  ;;  %v1663_v16 = vpack.c.bf16 %v751_v20, %v748_v9  ;;  %v1544_v27 = vpack.c.bf16 %v751_v20, %v751_v20  ;;  %v811_v52 = vmul.f32 %v2083_v33, %v751_v20  ;;  %v891_v31 = vsel %vm818_vm1, %v810_v42, 0.0 }
 0x1c1   : > { %1298 = vst.msk [vmem:[%s2088_s15 + $0x6c] sm:$0xf] %vm1270_vm2, %v1546_v63  ;;  %v900_v30 = vsel %vm818_vm1, %v813_v19, 0.0  ;;  %v1770_v12 = vmov 1966171168   ;;  %v1125_v42 = vlaneseq }
 0x1c2   : > { %901 = vadd.xlane.f32.xlu1 %v900_v30  ;;  %1296 = vst.msk [vmem:[%s2088_s15 + $0x64] sm:$0xf] %vm1270_vm2, %v1544_v27  ;;  %v894_v36 = vsel %vm818_vm1, %v811_v52, 0.0  ;;  %v1123_v18 = vunpack.c.l.s4 %v1770_v12 }
 0x1c3   : > { %1656 = vmatpush3.bf16.xpose.msk.msra.mxu1 %vm2258_vm3, %v1654_v53  ;;  %v1126_v63 = vshrl.u32 %v1125_v42, 7  ;;  %vm1139_vm5 = vcmp.lt.s32.totalorder %v1125_v42, 256 }
 0x1c4   : > { %1659 = vmatprep.subr.msk.bf16.mxu1 %vm2258_vm3, %v1657_v29  ;;  %892 = vadd.xlane.f32.xlu0 %v891_v31  ;;  %v1637_v37 = vpop.f32.mrb[28].mxu0 }
 0x1c5   : > { %v1549_v23 = vpack.c.bf16 %v1637_v37, %v1637_v37  ;;  %v764_v60 = vpop.f32.mrb[29].mxu0  ;;  %v816_v17 = vmul.f32 %v1637_v37, %v2083_v33 }
 0x1c6   : > { %895 = vadd.xlane.f32.xlu1 %v894_v36  ;;  %v1547_v39 = vpack.c.bf16 %v764_v60, %v764_v60  ;;  %v1638_v44 = vpop.f32.mrb[30].mxu0  ;;  %v814_v46 = vmul.f32 %v2083_v33, %v764_v60 }
 0x1c7   : > { %1301 = vst.msk [vmem:[%s2088_s15 + $0x78] sm:$0xf] %vm1270_vm2, %v1549_v23  ;;  %v1681_v53 = vpack.c.bf16 %v1638_v44, %v1637_v37  ;;  %v1550_v48 = vpack.c.bf16 %v1638_v44, %v1638_v44  ;;  %v767_v50 = vpop.f32.mrb[31].mxu0  ;;  %v817_v5 = vmul.f32 %v1638_v44, %v2083_v33  ;;  %v909_v10 = vsel %vm818_vm1, %v816_v17, 0.0 }
 0x1c8   : > { %1299 = vst.msk [vmem:[%s2088_s15 + $0x70] sm:$0xf] %vm1270_vm2, %v1547_v39  ;;  %v815_v28 = vmul.f32 %v2083_v33, %v767_v50  ;;  %v1675_v54 = vpack.c.bf16 %v767_v50, %v764_v60  ;;  %v1548_v55 = vpack.c.bf16 %v767_v50, %v767_v50  ;;  %v903_v35 = vsel %vm818_vm1, %v814_v46, 0.0 }
 0x1c9   : > { %1302 = vst.msk [vmem:[%s2088_s15 + $0x7c] sm:$0xf] %vm1270_vm2, %v1550_v48  ;;  %904 = vadd.xlane.f32.xlu0 %v903_v35  ;;  %v912_v33 = vsel %vm818_vm1, %v817_v5, 0.0 }
 0x1ca   : > { %1300 = vst.msk [vmem:[%s2088_s15 + $0x74] sm:$0xf] %vm1270_vm2, %v1548_v55  ;;  %v906_v4 = vsel %vm818_vm1, %v815_v28, 0.0 }
 0x1cb   : > { %1662 = vmatpush3.bf16.xpose.msk.msra.mxu1 %vm2258_vm3, %v1660_v26  ;;  %907 = vadd.xlane.f32.xlu1 %v906_v4 }
 0x1cc   : > { %1665 = vmatprep.subr.msk.bf16.mxu1 %vm2258_vm3, %v1663_v16 }
 0x1cd   : > { %910 = vadd.xlane.f32.xlu0 %v909_v10 }
 0x1cf   : > { %913 = vadd.xlane.f32.xlu1 %v912_v33 }
 0x1d3   : > { %1668 = vmatpush3.bf16.xpose.msk.msra.mxu1 %vm2258_vm3, %v1666_v7 }
 0x1d4   : > { %1671 = vmatprep.subr.msk.bf16.mxu1 %vm2258_vm3, %v1669_v61  ;;  %v1124_v61 = vunpack.c.0.s8 %v1123_v18 }
 0x1d6   : > { %v1127_v19 = vsub.s32 %v1124_v61, %v1126_v63 }
 0x1db   : > { %1674 = vmatpush3.bf16.xpose.msk.msra.mxu1 %vm2258_vm3, %v1672_v49 }
 0x1dc   : > { %1677 = vmatprep.subr.msk.bf16.mxu1 %vm2258_vm3, %v1675_v54 }
 0x1e3   : > { %1680 = vmatpush3.bf16.xpose.msk.msra.mxu1 %vm2258_vm3, %v1678_v3 }
 0x1e4   : > { %1683 = vmatprep.subr.msk.bf16.mxu1 %vm2258_vm3, %v1681_v53 }
 0x1eb   : > { %1686 = vmatpush3.bf16.xpose.msk.msra.mxu1 %vm2258_vm3, %v1684_v25 }
 0x1f2   : > { %1602 = vmatmul.mubr.msk.f32.vlgmr.msra.gmra.mrb[0].mxu1 %vm818_vm1, %v2075_v32 }
 0x21d   : > { %v827_v13 = vpop.xlane.xlu0 %826 }
 0x21e   : > { %918 = vst.msk [vmem:[%s2383_s18 + $0x10] sm:$0xff] %vm915_vm4, %v827_v13 }
 0x21f   : > { %v830_v32 = vpop.xlane.xlu1 %829 }
 0x220   : > { %919 = vst.msk [vmem:[%s2383_s18 + $0x18] sm:$0xff] %vm915_vm4, %v830_v32 }
 0x221   : > { %v821_v21 = vpop.xlane.xlu0 %820 }
 0x222   : > { %916 = vst.msk [vmem:[%s2383_s18] sm:$0xff] %vm915_vm4, %v821_v21 }
 0x223   : > { %v824_v26 = vpop.xlane.xlu1 %823 }
 0x224   : > { %917 = vst.msk [vmem:[%s2383_s18 + $0x8] sm:$0xff] %vm915_vm4, %v824_v26 }
 0x225   : > { %v839_v38 = vpop.xlane.xlu0 %838 }
 0x226   : > { %922 = vst.msk [vmem:[%s2383_s18 + $0x30] sm:$0xff] %vm915_vm4, %v839_v38 }
 0x227   : > { %v842_v59 = vpop.xlane.xlu1 %841 }
 0x228   : > { %923 = vst.msk [vmem:[%s2383_s18 + $0x38] sm:$0xff] %vm915_vm4, %v842_v59 }
 0x229   : > { %v833_v45 = vpop.xlane.xlu0 %832 }
 0x22a   : > { %920 = vst.msk [vmem:[%s2383_s18 + $0x20] sm:$0xff] %vm915_vm4, %v833_v45 }
 0x22b   : > { %v836_v49 = vpop.xlane.xlu1 %835 }
 0x22c   : > { %921 = vst.msk [vmem:[%s2383_s18 + $0x28] sm:$0xff] %vm915_vm4, %v836_v49 }
 0x22d   : > { %v851_v51 = vpop.xlane.xlu0 %850 }
 0x22e   : > { %926 = vst.msk [vmem:[%s2383_s18 + $0x50] sm:$0xff] %vm915_vm4, %v851_v51 }
 0x22f   : > { %v854_v7 = vpop.xlane.xlu1 %853 }
 0x230   : > { %927 = vst.msk [vmem:[%s2383_s18 + $0x58] sm:$0xff] %vm915_vm4, %v854_v7 }
 0x231   : > { %v845_v57 = vpop.xlane.xlu0 %844 }
 0x232   : > { %924 = vst.msk [vmem:[%s2383_s18 + $0x40] sm:$0xff] %vm915_vm4, %v845_v57 }
 0x233   : > { %v848_v15 = vpop.xlane.xlu1 %847 }
 0x234   : > { %925 = vst.msk [vmem:[%s2383_s18 + $0x48] sm:$0xff] %vm915_vm4, %v848_v15 }
 0x235   : > { %v863_v1 = vpop.xlane.xlu0 %862 }
 0x236   : > { %930 = vst.msk [vmem:[%s2383_s18 + $0x70] sm:$0xff] %vm915_vm4, %v863_v1 }
 0x237   : > { %v866_v25 = vpop.xlane.xlu1 %865 }
 0x238   : > { %931 = vst.msk [vmem:[%s2383_s18 + $0x78] sm:$0xff] %vm915_vm4, %v866_v25 }
 0x239   : > { %v857_v2 = vpop.xlane.xlu0 %856 }
 0x23a   : > { %928 = vst.msk [vmem:[%s2383_s18 + $0x60] sm:$0xff] %vm915_vm4, %v857_v2 }
 0x23b   : > { %v860_v3 = vpop.xlane.xlu1 %859 }
 0x23c   : > { %929 = vst.msk [vmem:[%s2383_s18 + $0x68] sm:$0xff] %vm915_vm4, %v860_v3 }
 0x23d   : > { %v875_v22 = vpop.xlane.xlu0 %874 }
 0x23e   : > { %934 = vst.msk [vmem:[%s2383_s18 + $0x90] sm:$0xff] %vm915_vm4, %v875_v22 }
 0x23f   : > { %v878_v29 = vpop.xlane.xlu1 %877 }
 0x240   : > { %935 = vst.msk [vmem:[%s2383_s18 + $0x98] sm:$0xff] %vm915_vm4, %v878_v29 }
 0x241   : > { %v869_v56 = vpop.xlane.xlu0 %868 }
 0x242   : > { %932 = vst.msk [vmem:[%s2383_s18 + $0x80] sm:$0xff] %vm915_vm4, %v869_v56 }
 0x243   : > { %v872_v14 = vpop.xlane.xlu1 %871 }
 0x244   : > { %933 = vst.msk [vmem:[%s2383_s18 + $0x88] sm:$0xff] %vm915_vm4, %v872_v14 }
 0x245   : > { %v887_v58 = vpop.xlane.xlu0 %886 }
 0x246   : > { %938 = vst.msk [vmem:[%s2383_s18 + $0xb0] sm:$0xff] %vm915_vm4, %v887_v58 }
 0x247   : > { %v890_v0 = vpop.xlane.xlu1 %889 }
 0x248   : > { %939 = vst.msk [vmem:[%s2383_s18 + $0xb8] sm:$0xff] %vm915_vm4, %v890_v0 }
 0x249   : > { %v881_v34 = vpop.xlane.xlu0 %880 }
 0x24a   : > { %936 = vst.msk [vmem:[%s2383_s18 + $0xa0] sm:$0xff] %vm915_vm4, %v881_v34 }
 0x24b   : > { %v884_v24 = vpop.xlane.xlu1 %883 }
 0x24c   : > { %937 = vst.msk [vmem:[%s2383_s18 + $0xa8] sm:$0xff] %vm915_vm4, %v884_v24 }
 0x24d   : > { %v899_v43 = vpop.xlane.xlu0 %898 }
 0x24e   : > { %942 = vst.msk [vmem:[%s2383_s18 + $0xd0] sm:$0xff] %vm915_vm4, %v899_v43 }
 0x24f   : > { %v902_v6 = vpop.xlane.xlu1 %901 }
 0x250   : > { %943 = vst.msk [vmem:[%s2383_s18 + $0xd8] sm:$0xff] %vm915_vm4, %v902_v6 }
 0x251   : > { %v893_v62 = vpop.xlane.xlu0 %892 }
 0x252   : > { %940 = vst.msk [vmem:[%s2383_s18 + $0xc0] sm:$0xff] %vm915_vm4, %v893_v62 }
 0x253   : > { %v896_v40 = vpop.xlane.xlu1 %895 }
 0x254   : > { %941 = vst.msk [vmem:[%s2383_s18 + $0xc8] sm:$0xff] %vm915_vm4, %v896_v40 }
 0x256   : > { %v905_v8 = vpop.xlane.xlu0 %904 }
 0x257   : > { %944 = vst.msk [vmem:[%s2383_s18 + $0xe0] sm:$0xff] %vm915_vm4, %v905_v8 }
 0x258   : > { %v908_v41 = vpop.xlane.xlu1 %907 }
 0x259   : > { %945 = vst.msk [vmem:[%s2383_s18 + $0xe8] sm:$0xff] %vm915_vm4, %v908_v41 }
 0x25a   : > { %v911_v9 = vpop.xlane.xlu0 %910 }
 0x25b   : > { %946 = vst.msk [vmem:[%s2383_s18 + $0xf0] sm:$0xff] %vm915_vm4, %v911_v9 }
 0x25c   : > { %v914_v11 = vpop.xlane.xlu1 %913 }
 0x25d   : > { %947 = vst.msk [vmem:[%s2383_s18 + $0xf8] sm:$0xff] %vm915_vm4, %v914_v11 }
 0x2c5   : > { %v1114_v47 = vpop.f32.mrb[0].mxu1 }
 0x2c6   : > { %v1116_v20 = vpop.f32.mrb[1].mxu1 }
 0x2c7   : > { %v1121_v16 = vcombine.low %v1114_v47, %v1116_v20 }
 0x2c9   : > { %v1128_v27 = vrot.slane %v1121_v16, %v1127_v19 }
 0x2cb   : > { %v1135_v52 = vrot.slane %v1128_v27, %v1127_v19 }
 0x2cd   : > { %1141 = vst.msk [vmem:[%s278_s24] sm:$0x3] %vm1139_vm5, %v1135_v52 }
 0x2ce PF: > { %s17_s21 = sadd.s32 1, %s1768_s21  }
 0x2cf   : > { %p14_p5 = scmp.ge.s32.totalorder %s17_s21, 4  }
 0x2d1   :  { %16 = sbr.rel (!%p14_p5) target bundleno = 1 (0x1), region = 90 }

// kernel: mmgat_forward.10
= control target key start
LH: loop header
LB: loop body
LE: loop exit
PB: predicated region body
PF: predicated region fallthrough
CT: control target
= control target key end

     0   :  { %s1831_s21 = smov 0   ;;  %s2488_s0 = inlined_call_operand.vmem [shape: f32[512,64], index: 0, kind: input, shape index: {}]   ;;  %s2489_s1 = inlined_call_operand.vmem [shape: bf16[64,64], index: 1, kind: input, shape index: {}]   ;;  %s2490_s2 = inlined_call_operand.vmem [shape: f32[1,64], index: 2, kind: input, shape index: {}]   ;;  %s2491_s3 = inlined_call_operand.vmem [shape: f32[1,64], index: 3, kind: input, shape index: {}]   ;;  %s2492_s4 = inlined_call_operand.vmem [shape: bf16[512,64], index: 4, kind: output, shape index: {0}]   ;;  %s2493_s5 = inlined_call_operand.vmem [shape: f32[512,1], index: 5, kind: output, shape index: {1}]   ;;  %s2494_s6 = inlined_call_operand.vmem [shape: f32[1,512], index: 6, kind: output, shape index: {2}]  }
   0x1 LB: > { %s1436_s22 = sadd.s32 4294967295, %s1793_s21   ;;  %p1440_p0 = scmp.ge.s32.totalorder %s1793_s21, 1  ;;  %s1793_s21 = sphi %s1831_s21, %s17_s21  }
   0x2   : > { %p218_p1 = scmp.lt.s32.totalorder %s1793_s21, 3 }
   0x4   : > { %p219_p2 = pnand %p1440_p0, %p218_p1 }
   0x5   : > { %s1441_s23 = sshll.u32 (!%p219_p2), %s1436_s22, 5  ;;  %vm345_vm0 = vcmask (!%p219_p2), 523264   ;;  %v1719_v42 = vld [vmem:[%s2489_s1] sm:$0xff] (!%p219_p2)   ;;  %v1720_v49 = vld [vmem:[%s2489_s1 + $0x8] sm:$0xff] (!%p219_p2)   ;;  %v1721_v56 = vld [vmem:[%s2489_s1 + $0x10] sm:$0xff] (!%p219_p2)   ;;  %vm1285_vm1 = vcmask (!%p219_p2), 519168  }
   0x6   : > { %222 = sbr.rel (%p219_p2) target bundleno = 718 (0x2ce), region = 36  ;;  %p258_p3 = scmp.lt.s32.totalorder (!%p219_p2), %s1441_s23, 63  ;;  %1622 = vmatprep.subr.bf16.mxu0 (!%p219_p2), %v1719_v42  ;;  %v1722_v63 = vld [vmem:[%s2489_s1 + $0x18] sm:$0xff] (!%p219_p2)   ;;  %vm2289_vm2 = vmpackc.low (!%p219_p2), %vm345_vm0, %vm345_vm0  ;;  %vm930_vm3 = vcmask (!%p219_p2), 7168  }
   0x7   : > { %1623 = vmatpush3.bf16.msra.mxu0 (!%p219_p2), %v1719_v42 }
   0x8   : > { %1624 = vmatprep.subr.bf16.mxu0 (!%p219_p2), %v1720_v49 }
   0xb   : > { %1625 = vmatpush3.bf16.msra.mxu0 (!%p219_p2), %v1720_v49 }
   0xc   : > { %1626 = vmatprep.subr.bf16.mxu0 (!%p219_p2), %v1721_v56 }
   0xd   : > { %s2498_s23 = smov (!%p258_p3, %s1441_s23), 63 }
   0xe   : > { %s1442_s24 = sshll.u32 %s2498_s23, 3  ;;  %s1444_s14 = sshll.u32 %s2498_s23, 2 }
   0xf   : > { %s1849_s27 = scalar_lea.vmem %s2488_s0, %s1442_s24  ;;  %1627 = vmatpush3.bf16.msra.mxu0 %v1721_v56  ;;  %s2119_s19 = scalar_lea.vmem %s2492_s4, %s1444_s14 }
  0x10   : > { %v1852_v0 = vld [vmem:[%s1849_s27 + $0x10] sm:$0xff]  ;;  %v1855_v1 = vld [vmem:[%s1849_s27] sm:$0xff]  ;;  %v1858_v2 = vld [vmem:[%s1849_s27 + $0x18] sm:$0xff]  ;;  %1628 = vmatprep.subr.bf16.mxu0 %v1722_v63  ;;  %s2414_s26 = scalar_lea.vmem %s2493_s5, %s1442_s24  ;;  %s1447_s23 = sshll.u32 %s1436_s22, 1 }
  0x11   : > { %v315_v3 = vmul.f32 %v1852_v0, %v1852_v0  ;;  %v313_v4 = vmul.f32 %v1855_v1, %v1855_v1  ;;  %v316_v5 = vmul.f32 %v1858_v2, %v1858_v2  ;;  %v1867_v6 = vld [vmem:[%s1849_s27 + $0x8] sm:$0xff]  ;;  %v1875_v9 = vld [vmem:[%s1849_s27 + $0x20] sm:$0xff]  ;;  %v1886_v16 = vld [vmem:[%s1849_s27 + $0x38] sm:$0xff]  ;;  %p276_p4 = scmp.lt.s32.totalorder %s1447_s23, 3 }
  0x12   : > { %v314_v7 = vmul.f32 %v1867_v6, %v1867_v6  ;;  %v1872_v8 = vld [vmem:[%s1849_s27 + $0x28] sm:$0xff]  ;;  %v317_v15 = vmul.f32 %v1875_v9, %v1875_v9  ;;  %v1889_v17 = vld [vmem:[%s1849_s27 + $0x30] sm:$0xff]  ;;  %v320_v20 = vmul.f32 %v1886_v16, %v1886_v16  ;;  %v1901_v23 = vld [vmem:[%s1849_s27 + $0x40] sm:$0xff] }
  0x13   : > { %v352_v10 = vsel %vm345_vm0, %v315_v3, 0.0  ;;  %v346_v11 = vsel %vm345_vm0, %v313_v4, 0.0  ;;  %v355_v12 = vsel %vm345_vm0, %v316_v5, 0.0  ;;  %v318_v14 = vmul.f32 %v1872_v8, %v1872_v8  ;;  %v1898_v22 = vld [vmem:[%s1849_s27 + $0x48] sm:$0xff]  ;;  %v1910_v28 = vld [vmem:[%s1849_s27 + $0x58] sm:$0xff]  ;;  %v1913_v29 = vld [vmem:[%s1849_s27 + $0x50] sm:$0xff]  ;;  %1629 = vmatpush3.bf16.msra.mxu0 %v1722_v63 }
  0x14   : > { %353 = vadd.xlane.f32.xlu1 %v352_v10  ;;  %347 = vadd.xlane.f32.xlu0 %v346_v11  ;;  %v349_v13 = vsel %vm345_vm0, %v314_v7, 0.0  ;;  %v358_v19 = vsel %vm345_vm0, %v317_v15, 0.0  ;;  %v319_v21 = vmul.f32 %v1889_v17, %v1889_v17  ;;  %v367_v24 = vsel %vm345_vm0, %v320_v20, 0.0  ;;  %v1922_v34 = vld [vmem:[%s1849_s27 + $0x68] sm:$0xff]  ;;  %v1925_v35 = vld [vmem:[%s1849_s27 + $0x60] sm:$0xff]  ;;  %v1934_v40 = vld [vmem:[%s1849_s27 + $0x78] sm:$0xff] }
  0x15   : > { %v361_v18 = vsel %vm345_vm0, %v318_v14, 0.0  ;;  %v322_v26 = vmul.f32 %v1898_v22, %v1898_v22  ;;  %v321_v27 = vmul.f32 %v1901_v23, %v1901_v23  ;;  %v324_v32 = vmul.f32 %v1910_v28, %v1910_v28  ;;  %v1937_v41 = vld [vmem:[%s1849_s27 + $0x70] sm:$0xff]  ;;  %v1949_v47 = vld [vmem:[%s1849_s27 + $0x88] sm:$0xff]  ;;  %v1952_v48 = vld [vmem:[%s1849_s27 + $0x80] sm:$0xff]  ;;  %s2500_s23 = smov (!%p276_p4, %s1447_s23), 3 }
  0x16   : > { %v364_v25 = vsel %vm345_vm0, %v319_v21, 0.0  ;;  %v323_v33 = vmul.f32 %v1913_v29, %v1913_v29  ;;  %v326_v38 = vmul.f32 %v1922_v34, %v1922_v34  ;;  %v325_v39 = vmul.f32 %v1925_v35, %v1925_v35  ;;  %v1964_v54 = vld [vmem:[%s1849_s27 + $0x98] sm:$0xff]  ;;  %v1967_v55 = vld [vmem:[%s1849_s27 + $0x90] sm:$0xff]  ;;  %v1979_v61 = vld [vmem:[%s1849_s27 + $0xa8] sm:$0xff]  ;;  %s278_s28 = scalar_lea.vmem %s2494_s6, %s2500_s23 }
  0x17   : > { %v373_v30 = vsel %vm345_vm0, %v322_v26, 0.0  ;;  %v370_v31 = vsel %vm345_vm0, %v321_v27, 0.0  ;;  %v379_v36 = vsel %vm345_vm0, %v324_v32, 0.0  ;;  %v328_v45 = vmul.f32 %v1934_v40, %v1934_v40  ;;  %v1982_v62 = vld [vmem:[%s1849_s27 + $0xa0] sm:$0xff]  ;;  %v1994_v10 = vld [vmem:[%s1849_s27 + $0xb8] sm:$0xff]  ;;  %v1997_v11 = vld [vmem:[%s1849_s27 + $0xb0] sm:$0xff] }
  0x18   : > { %356 = vadd.xlane.f32.xlu1 %v355_v12  ;;  %350 = vadd.xlane.f32.xlu0 %v349_v13  ;;  %v376_v37 = vsel %vm345_vm0, %v323_v33, 0.0  ;;  %v385_v43 = vsel %vm345_vm0, %v326_v38, 0.0  ;;  %v382_v44 = vsel %vm345_vm0, %v325_v39, 0.0  ;;  %v327_v46 = vmul.f32 %v1937_v41, %v1937_v41  ;;  %v2018_v26 = vld [vmem:[%s1849_s27 + $0xd8] sm:$0xff]  ;;  %v2021_v27 = vld [vmem:[%s1849_s27 + $0xd0] sm:$0xff] }
  0x19   : > { %v391_v50 = vsel %vm345_vm0, %v328_v45, 0.0  ;;  %v330_v52 = vmul.f32 %v1949_v47, %v1949_v47  ;;  %v329_v53 = vmul.f32 %v1952_v48, %v1952_v48  ;;  %v332_v59 = vmul.f32 %v1964_v54, %v1964_v54  ;;  %v2045_v45 = vld [vmem:[%s1849_s27 + $0xf0] sm:$0xff] }
  0x1a   : > { %v388_v51 = vsel %vm345_vm0, %v327_v46, 0.0  ;;  %v331_v60 = vmul.f32 %v1967_v55, %v1967_v55  ;;  %v334_v5 = vmul.f32 %v1979_v61, %v1979_v61  ;;  %v333_v7 = vmul.f32 %v1982_v62, %v1982_v62 }
  0x1b   : > { %v397_v57 = vsel %vm345_vm0, %v330_v52, 0.0  ;;  %v394_v58 = vsel %vm345_vm0, %v329_v53, 0.0  ;;  %v403_v3 = vsel %vm345_vm0, %v332_v59, 0.0  ;;  %v336_v14 = vmul.f32 %v1994_v10, %v1994_v10 }
  0x1c   : > { %362 = vadd.xlane.f32.xlu1 %v361_v18  ;;  %359 = vadd.xlane.f32.xlu0 %v358_v19  ;;  %v400_v4 = vsel %vm345_vm0, %v331_v60, 0.0  ;;  %v409_v12 = vsel %vm345_vm0, %v334_v5, 0.0  ;;  %v406_v13 = vsel %vm345_vm0, %v333_v7, 0.0  ;;  %v335_v15 = vmul.f32 %v1997_v11, %v1997_v11  ;;  %v2006_v18 = vld [vmem:[%s1849_s27 + $0xc8] sm:$0xff]  ;;  %v2009_v19 = vld [vmem:[%s1849_s27 + $0xc0] sm:$0xff] }
  0x1d   : > { %v415_v20 = vsel %vm345_vm0, %v336_v14, 0.0  ;;  %v340_v32 = vmul.f32 %v2018_v26, %v2018_v26  ;;  %v339_v33 = vmul.f32 %v2021_v27, %v2021_v27 }
  0x1e   : > { %v412_v21 = vsel %vm345_vm0, %v335_v15, 0.0 }
  0x1f   : > { %v427_v38 = vsel %vm345_vm0, %v340_v32, 0.0  ;;  %v424_v39 = vsel %vm345_vm0, %v339_v33, 0.0 }
  0x20   : > { %368 = vadd.xlane.f32.xlu1 %v367_v24  ;;  %365 = vadd.xlane.f32.xlu0 %v364_v25  ;;  %v338_v24 = vmul.f32 %v2006_v18, %v2006_v18  ;;  %v337_v25 = vmul.f32 %v2009_v19, %v2009_v19 }
  0x24   : > { %374 = vadd.xlane.f32.xlu1 %v373_v30  ;;  %371 = vadd.xlane.f32.xlu0 %v370_v31  ;;  %v421_v30 = vsel %vm345_vm0, %v338_v24, 0.0  ;;  %v418_v31 = vsel %vm345_vm0, %v337_v25, 0.0 }
  0x28   : > { %380 = vadd.xlane.f32.xlu1 %v379_v36  ;;  %377 = vadd.xlane.f32.xlu0 %v376_v37  ;;  %v2030_v36 = vld [vmem:[%s1849_s27 + $0xe8] sm:$0xff]  ;;  %v2033_v37 = vld [vmem:[%s1849_s27 + $0xe0] sm:$0xff] }
  0x29   : > { %v342_v42 = vmul.f32 %v2030_v36, %v2030_v36 }
  0x2b   : > { %v433_v46 = vsel %vm345_vm0, %v342_v42, 0.0 }
  0x2c   : > { %386 = vadd.xlane.f32.xlu1 %v385_v43  ;;  %383 = vadd.xlane.f32.xlu0 %v382_v44  ;;  %v341_v43 = vmul.f32 %v2033_v37, %v2033_v37  ;;  %v2042_v44 = vld [vmem:[%s1849_s27 + $0xf8] sm:$0xff] }
  0x2e   : > { %v430_v49 = vsel %vm345_vm0, %v341_v43, 0.0 }
  0x30   : > { %392 = vadd.xlane.f32.xlu1 %v391_v50  ;;  %389 = vadd.xlane.f32.xlu0 %v388_v51  ;;  %v344_v50 = vmul.f32 %v2042_v44, %v2042_v44  ;;  %v343_v51 = vmul.f32 %v2045_v45, %v2045_v45 }
  0x32   : > { %v439_v52 = vsel %vm345_vm0, %v344_v50, 0.0  ;;  %v436_v53 = vsel %vm345_vm0, %v343_v51, 0.0 }
  0x34   : > { %398 = vadd.xlane.f32.xlu1 %v397_v57  ;;  %395 = vadd.xlane.f32.xlu0 %v394_v58 }
  0x38   : > { %404 = vadd.xlane.f32.xlu1 %v403_v3  ;;  %401 = vadd.xlane.f32.xlu0 %v400_v4 }
  0x3c   : > { %410 = vadd.xlane.f32.xlu1 %v409_v12  ;;  %407 = vadd.xlane.f32.xlu0 %v406_v13 }
  0x40   : > { %416 = vadd.xlane.f32.xlu1 %v415_v20  ;;  %413 = vadd.xlane.f32.xlu0 %v412_v21 }
  0x44   : > { %422 = vadd.xlane.f32.xlu1 %v421_v30  ;;  %419 = vadd.xlane.f32.xlu0 %v418_v31 }
  0x48   : > { %428 = vadd.xlane.f32.xlu1 %v427_v38  ;;  %425 = vadd.xlane.f32.xlu0 %v424_v39 }
  0x4c   : > { %434 = vadd.xlane.f32.xlu1 %v433_v46  ;;  %431 = vadd.xlane.f32.xlu0 %v430_v49 }
  0x50   : > { %440 = vadd.xlane.f32.xlu1 %v439_v52  ;;  %437 = vadd.xlane.f32.xlu0 %v436_v53 }
  0xa1   : > { %v354_v56 = vpop.xlane.xlu1 %353  ;;  %v348_v57 = vpop.xlane.xlu0 %347 }
  0xa2   : > { %v444_v58 = vmax.f32 %v354_v56, 1e-24  ;;  %v442_v59 = vmax.f32 %v348_v57, 1e-24 }
  0xa4   : > { %1723 = vrsqrt.f32 %v444_v58 }
  0xa5   : > { %v357_v60 = vpop.xlane.xlu1 %356  ;;  %v351_v63 = vpop.xlane.xlu0 %350  ;;  %1725 = vrsqrt.f32 %v442_v59 }
  0xa6   : > { %v445_v3 = vmax.f32 %v357_v60, 1e-24  ;;  %v443_v4 = vmax.f32 %v351_v63, 1e-24 }
  0xa8   : > { %1727 = vrsqrt.f32 %v445_v3 }
  0xa9   : > { %1729 = vrsqrt.f32 %v443_v4  ;;  %v363_v5 = vpop.xlane.xlu1 %362  ;;  %v360_v7 = vpop.xlane.xlu0 %359 }
  0xaa   : > { %v447_v12 = vmax.f32 %v363_v5, 1e-24  ;;  %v446_v13 = vmax.f32 %v360_v7, 1e-24 }
  0xac   : > { %1731 = vrsqrt.f32 %v447_v12 }
  0xad   : > { %1733 = vrsqrt.f32 %v446_v13  ;;  %v369_v14 = vpop.xlane.xlu1 %368  ;;  %v366_v15 = vpop.xlane.xlu0 %365 }
  0xae   : > { %v449_v20 = vmax.f32 %v369_v14, 1e-24  ;;  %v448_v21 = vmax.f32 %v366_v15, 1e-24  ;;  %v1724_v24 = vpop.eup %1723 }
  0xaf   : > { %v1726_v25 = vpop.eup %1725  ;;  %v508_v42 = vmul.f32 %v1724_v24, %v1852_v0 }
  0xb0   : > { %1735 = vrsqrt.f32 %v449_v20  ;;  %v506_v46 = vmul.f32 %v1726_v25, %v1855_v1 }
  0xb1   : > { %1737 = vrsqrt.f32 %v448_v21  ;;  %v375_v30 = vpop.xlane.xlu1 %374  ;;  %v372_v31 = vpop.xlane.xlu0 %371 }
  0xb2   : > { %v1728_v32 = vpop.eup %1727  ;;  %v451_v33 = vmax.f32 %v375_v30, 1e-24  ;;  %v450_v38 = vmax.f32 %v372_v31, 1e-24 }
  0xb3   : > { %v1730_v39 = vpop.eup %1729  ;;  %v509_v43 = vmul.f32 %v1728_v32, %v1858_v2 }
  0xb4   : > { %1739 = vrsqrt.f32 %v451_v33  ;;  %v507_v49 = vmul.f32 %v1730_v39, %v1867_v6 }
  0xb5   : > { %1741 = vrsqrt.f32 %v450_v38  ;;  %v381_v50 = vpop.xlane.xlu1 %380  ;;  %v378_v51 = vpop.xlane.xlu0 %377  ;;  %v539_v52 = vpack.c.bf16 %v509_v43, %v508_v42 }
  0xb6   : > { %v1732_v53 = vpop.eup %1731  ;;  %v453_v56 = vmax.f32 %v381_v50, 1e-24  ;;  %v452_v57 = vmax.f32 %v378_v51, 1e-24  ;;  %v538_v58 = vpack.c.bf16 %v507_v49, %v506_v46 }
  0xb7   : > { %v1734_v59 = vpop.eup %1733  ;;  %v511_v60 = vmul.f32 %v1732_v53, %v1872_v8 }
  0xb8   : > { %1743 = vrsqrt.f32 %v453_v56  ;;  %1630 = vmatprep.mubr.msk.bf16.mxu0 %vm345_vm0, %v538_v58  ;;  %v510_v0 = vmul.f32 %v1734_v59, %v1875_v9 }
  0xb9   : > { %1745 = vrsqrt.f32 %v452_v57  ;;  %1631 = vmatmul.mubr.msk.bf16.vlgmr.msra.gmra.mrb[0].mxu0 %vm345_vm0, %v539_v52  ;;  %v387_v1 = vpop.xlane.xlu1 %386  ;;  %v384_v2 = vpop.xlane.xlu0 %383 }
  0xba   : > { %v1736_v6 = vpop.eup %1735  ;;  %v455_v63 = vmax.f32 %v387_v1, 1e-24  ;;  %v454_v3 = vmax.f32 %v384_v2, 1e-24  ;;  %v540_v4 = vpack.c.bf16 %v511_v60, %v510_v0 }
  0xbb   : > { %v1738_v5 = vpop.eup %1737  ;;  %v513_v7 = vmul.f32 %v1736_v6, %v1886_v16 }
  0xbc   : > { %1747 = vrsqrt.f32 %v455_v63  ;;  %1634 = vmatprep.mubr.msk.bf16.mxu0 %vm345_vm0, %v540_v4  ;;  %v512_v8 = vmul.f32 %v1738_v5, %v1889_v17 }
  0xbd   : > { %1749 = vrsqrt.f32 %v454_v3  ;;  %v393_v12 = vpop.xlane.xlu1 %392  ;;  %v390_v9 = vpop.xlane.xlu0 %389 }
  0xbe   : > { %v1740_v13 = vpop.eup %1739  ;;  %v457_v14 = vmax.f32 %v393_v12, 1e-24  ;;  %v456_v15 = vmax.f32 %v390_v9, 1e-24  ;;  %v541_v20 = vpack.c.bf16 %v513_v7, %v512_v8 }
  0xbf   : > { %v1742_v21 = vpop.eup %1741  ;;  %v515_v24 = vmul.f32 %v1740_v13, %v1898_v22 }
  0xc0   : > { %1751 = vrsqrt.f32 %v457_v14  ;;  %v514_v25 = vmul.f32 %v1742_v21, %v1901_v23 }
  0xc1   : > { %1753 = vrsqrt.f32 %v456_v15  ;;  %1635 = vmatmul.mubr.msk.bf16.gmra.mrb[4].mxu0 %vm345_vm0, %v541_v20  ;;  %v399_v16 = vpop.xlane.xlu1 %398  ;;  %v396_v30 = vpop.xlane.xlu0 %395 }
  0xc2   : > { %v1744_v31 = vpop.eup %1743  ;;  %v459_v17 = vmax.f32 %v399_v16, 1e-24  ;;  %v458_v32 = vmax.f32 %v396_v30, 1e-24  ;;  %v542_v33 = vpack.c.bf16 %v515_v24, %v514_v25 }
  0xc3   : > { %v1746_v38 = vpop.eup %1745  ;;  %v517_v39 = vmul.f32 %v1744_v31, %v1910_v28 }
  0xc4   : > { %1755 = vrsqrt.f32 %v459_v17  ;;  %1638 = vmatprep.mubr.msk.bf16.mxu0 %vm345_vm0, %v542_v33  ;;  %v516_v22 = vmul.f32 %v1746_v38, %v1913_v29 }
  0xc5   : > { %1757 = vrsqrt.f32 %v458_v32  ;;  %v405_v42 = vpop.xlane.xlu1 %404  ;;  %v402_v23 = vpop.xlane.xlu0 %401 }
  0xc6   : > { %v1748_v43 = vpop.eup %1747  ;;  %v461_v46 = vmax.f32 %v405_v42, 1e-24  ;;  %v460_v49 = vmax.f32 %v402_v23, 1e-24  ;;  %v543_v50 = vpack.c.bf16 %v517_v39, %v516_v22 }
  0xc7   : > { %v1750_v51 = vpop.eup %1749  ;;  %v519_v52 = vmul.f32 %v1748_v43, %v1922_v34 }
  0xc8   : > { %1759 = vrsqrt.f32 %v461_v46  ;;  %v518_v53 = vmul.f32 %v1750_v51, %v1925_v35 }
  0xc9   : > { %1761 = vrsqrt.f32 %v460_v49  ;;  %1639 = vmatmul.mubr.msk.bf16.gmra.mrb[8].mxu0 %vm345_vm0, %v543_v50  ;;  %v411_v28 = vpop.xlane.xlu1 %410  ;;  %v408_v56 = vpop.xlane.xlu0 %407 }
  0xca   : > { %v1752_v57 = vpop.eup %1751  ;;  %v463_v29 = vmax.f32 %v411_v28, 1e-24  ;;  %v544_v58 = vpack.c.bf16 %v519_v52, %v518_v53  ;;  %v462_v59 = vmax.f32 %v408_v56, 1e-24 }
  0xcb   : > { %v1754_v60 = vpop.eup %1753  ;;  %v521_v0 = vmul.f32 %v1752_v57, %v1934_v40 }
  0xcc   : > { %1763 = vrsqrt.f32 %v463_v29  ;;  %1642 = vmatprep.mubr.msk.bf16.mxu0 %vm345_vm0, %v544_v58  ;;  %v520_v34 = vmul.f32 %v1754_v60, %v1937_v41 }
  0xcd   : > { %1765 = vrsqrt.f32 %v462_v59  ;;  %v417_v1 = vpop.xlane.xlu1 %416  ;;  %v414_v35 = vpop.xlane.xlu0 %413 }
  0xce   : > { %v1756_v2 = vpop.eup %1755  ;;  %v465_v6 = vmax.f32 %v417_v1, 1e-24  ;;  %v545_v63 = vpack.c.bf16 %v521_v0, %v520_v34  ;;  %v464_v3 = vmax.f32 %v414_v35, 1e-24 }
  0xcf   : > { %v1758_v4 = vpop.eup %1757  ;;  %v523_v5 = vmul.f32 %v1756_v2, %v1949_v47 }
  0xd0   : > { %1767 = vrsqrt.f32 %v465_v6  ;;  %v522_v7 = vmul.f32 %v1758_v4, %v1952_v48 }
  0xd1   : > { %1643 = vmatmul.mubr.msk.bf16.gmra.mrb[12].mxu0 %vm345_vm0, %v545_v63  ;;  %1769 = vrsqrt.f32 %v464_v3  ;;  %v423_v40 = vpop.xlane.xlu1 %422  ;;  %v420_v8 = vpop.xlane.xlu0 %419 }
  0xd2   : > { %v1760_v12 = vpop.eup %1759  ;;  %v546_v41 = vpack.c.bf16 %v523_v5, %v522_v7  ;;  %v467_v9 = vmax.f32 %v423_v40, 1e-24  ;;  %v466_v13 = vmax.f32 %v420_v8, 1e-24 }
  0xd3   : > { %v1762_v14 = vpop.eup %1761  ;;  %v525_v15 = vmul.f32 %v1760_v12, %v1964_v54 }
  0xd4   : > { %1646 = vmatprep.mubr.msk.bf16.mxu0 %vm345_vm0, %v546_v41  ;;  %v524_v20 = vmul.f32 %v1762_v14, %v1967_v55  ;;  %1771 = vrsqrt.f32 %v467_v9 }
  0xd5   : > { %1773 = vrsqrt.f32 %v466_v13  ;;  %v429_v47 = vpop.xlane.xlu1 %428  ;;  %v426_v48 = vpop.xlane.xlu0 %425 }
  0xd6   : > { %v1764_v21 = vpop.eup %1763  ;;  %v547_v24 = vpack.c.bf16 %v525_v15, %v524_v20  ;;  %v469_v25 = vmax.f32 %v429_v47, 1e-24  ;;  %v468_v16 = vmax.f32 %v426_v48, 1e-24 }
  0xd7   : > { %v1766_v30 = vpop.eup %1765  ;;  %v527_v31 = vmul.f32 %v1764_v21, %v1979_v61 }
  0xd8   : > { %1775 = vrsqrt.f32 %v469_v25  ;;  %v526_v17 = vmul.f32 %v1766_v30, %v1982_v62 }
  0xd9   : > { %1647 = vmatmul.mubr.msk.bf16.gmra.mrb[16].mxu0 %vm345_vm0, %v547_v24  ;;  %1777 = vrsqrt.f32 %v468_v16  ;;  %v435_v54 = vpop.xlane.xlu1 %434  ;;  %v432_v32 = vpop.xlane.xlu0 %431 }
  0xda   : > { %v1768_v55 = vpop.eup %1767  ;;  %v548_v33 = vpack.c.bf16 %v527_v31, %v526_v17  ;;  %v471_v38 = vmax.f32 %v435_v54, 1e-24  ;;  %v470_v39 = vmax.f32 %v432_v32, 1e-24 }
  0xdb   : > { %v1770_v22 = vpop.eup %1769  ;;  %v529_v42 = vmul.f32 %v1768_v55, %v1994_v10 }
  0xdc   : > { %1650 = vmatprep.mubr.msk.bf16.mxu0 %vm345_vm0, %v548_v33  ;;  %v528_v23 = vmul.f32 %v1770_v22, %v1997_v11  ;;  %1779 = vrsqrt.f32 %v471_v38 }
  0xdd   : > { %1781 = vrsqrt.f32 %v470_v39  ;;  %v441_v61 = vpop.xlane.xlu1 %440  ;;  %v438_v62 = vpop.xlane.xlu0 %437 }
  0xde   : > { %v1772_v43 = vpop.eup %1771  ;;  %v549_v46 = vpack.c.bf16 %v529_v42, %v528_v23  ;;  %v473_v49 = vmax.f32 %v441_v61, 1e-24  ;;  %v472_v50 = vmax.f32 %v438_v62, 1e-24 }
  0xdf   : > { %v1774_v51 = vpop.eup %1773  ;;  %v531_v52 = vmul.f32 %v1772_v43, %v2006_v18 }
  0xe0   : > { %1783 = vrsqrt.f32 %v473_v49  ;;  %v530_v53 = vmul.f32 %v1774_v51, %v2009_v19 }
  0xe1   : > { %1651 = vmatmul.mubr.msk.bf16.gmra.mrb[20].mxu0 %vm345_vm0, %v549_v46  ;;  %1785 = vrsqrt.f32 %v472_v50 }
  0xe2   : > { %v1776_v10 = vpop.eup %1775  ;;  %v550_v28 = vpack.c.bf16 %v531_v52, %v530_v53 }
  0xe3   : > { %v1778_v11 = vpop.eup %1777  ;;  %v533_v56 = vmul.f32 %v1776_v10, %v2018_v26 }
  0xe4   : > { %1654 = vmatprep.mubr.msk.bf16.mxu0 %vm345_vm0, %v550_v28  ;;  %v532_v57 = vmul.f32 %v1778_v11, %v2021_v27 }
  0xe6   : > { %v1780_v29 = vpop.eup %1779  ;;  %v551_v58 = vpack.c.bf16 %v533_v56, %v532_v57 }
  0xe7   : > { %v1782_v59 = vpop.eup %1781  ;;  %v535_v18 = vmul.f32 %v1780_v29, %v2030_v36  ;;  %v2106_v36 = vld [vmem:[%s2490_s2] sm:$0x1] }
  0xe8   : > { %v534_v19 = vmul.f32 %v1782_v59, %v2033_v37  ;;  %1620 = vmatprep.mubr.msk.f32.mxu1 %vm345_vm0, %v2106_v36  ;;  %v2114_v37 = vld [vmem:[%s2491_s3] ss:$0 sm:$0xff] }
  0xe9   : > { %1655 = vmatmul.mubr.msk.bf16.gmra.mrb[24].mxu0 %vm345_vm0, %v551_v58 }
  0xea   : > { %v1784_v60 = vpop.eup %1783  ;;  %v552_v0 = vpack.c.bf16 %v535_v18, %v534_v19 }
  0xeb   : > { %v1786_v34 = vpop.eup %1785  ;;  %v537_v1 = vmul.f32 %v1784_v60, %v2042_v44 }
  0xec   : > { %1658 = vmatprep.mubr.msk.bf16.mxu0 %vm345_vm0, %v552_v0  ;;  %v536_v26 = vmul.f32 %v1786_v34, %v2045_v45 }
  0xee   : > { %v553_v27 = vpack.c.bf16 %v537_v1, %v536_v26 }
  0xf1   : > { %1659 = vmatmul.mubr.msk.bf16.gmra.mrb[28].mxu0 %vm345_vm0, %v553_v27 }
 0x18c   : > { %v2121_v44 = vpop.f32.mrb[0].mxu0 }
 0x18d   : > { %v1538_v45 = vpack.c.bf16 %v2121_v44, %v2121_v44  ;;  %v2125_v35 = vpop.f32.mrb[1].mxu0  ;;  %v804_v2 = vmul.f32 %v2121_v44, %v2114_v37 }
 0x18e   : > { %v1536_v6 = vpack.c.bf16 %v2125_v35, %v2125_v35  ;;  %v2131_v63 = vpop.f32.mrb[2].mxu0  ;;  %v802_v3 = vmul.f32 %v2114_v37, %v2125_v35 }
 0x18f   : > { %1288 = vst.msk [vmem:[%s2119_s19 + $0x8] sm:$0xf] %vm1285_vm1, %v1538_v45  ;;  %v1671_v4 = vpack.c.bf16 %v2131_v63, %v2121_v44  ;;  %v1539_v5 = vpack.c.bf16 %v2131_v63, %v2131_v63  ;;  %v2141_v7 = vpop.f32.mrb[3].mxu0  ;;  %v840_v40 = vsel %vm345_vm0, %v804_v2, 0.0  ;;  %v805_v8 = vmul.f32 %v2131_v63, %v2114_v37 }
 0x190   : > { %1286 = vst.msk [vmem:[%s2119_s19] sm:$0xf] %vm1285_vm1, %v1536_v6  ;;  %v1665_v12 = vpack.c.bf16 %v2141_v7, %v2125_v35  ;;  %v1537_v41 = vpack.c.bf16 %v2141_v7, %v2141_v7  ;;  %841 = vadd.xlane.f32.xlu0 %v840_v40  ;;  %v803_v13 = vmul.f32 %v2114_v37, %v2141_v7  ;;  %v834_v14 = vsel %vm345_vm0, %v802_v3, 0.0 }
 0x191   : > { %1289 = vst.msk [vmem:[%s2119_s19 + $0xc] sm:$0xf] %vm1285_vm1, %v1539_v5  ;;  %v843_v9 = vsel %vm345_vm0, %v805_v8, 0.0 }
 0x192   : > { %1287 = vst.msk [vmem:[%s2119_s19 + $0x4] sm:$0xf] %vm1285_vm1, %v1537_v41  ;;  %844 = vadd.xlane.f32.xlu1 %v843_v9  ;;  %v837_v48 = vsel %vm345_vm0, %v803_v13, 0.0 }
 0x194   : > { %835 = vadd.xlane.f32.xlu0 %v834_v14  ;;  %v2160_v15 = vpop.f32.mrb[4].mxu0 }
 0x195   : > { %v1542_v20 = vpack.c.bf16 %v2160_v15, %v2160_v15  ;;  %v2164_v47 = vpop.f32.mrb[5].mxu0  ;;  %v808_v21 = vmul.f32 %v2160_v15, %v2114_v37 }
 0x196   : > { %v1540_v24 = vpack.c.bf16 %v2164_v47, %v2164_v47  ;;  %838 = vadd.xlane.f32.xlu1 %v837_v48  ;;  %v2171_v25 = vpop.f32.mrb[6].mxu0  ;;  %v806_v16 = vmul.f32 %v2114_v37, %v2164_v47 }
 0x197   : > { %1292 = vst.msk [vmem:[%s2119_s19 + $0x18] sm:$0xf] %vm1285_vm1, %v1542_v20  ;;  %v1683_v30 = vpack.c.bf16 %v2171_v25, %v2160_v15  ;;  %v1543_v31 = vpack.c.bf16 %v2171_v25, %v2171_v25  ;;  %v2181_v17 = vpop.f32.mrb[7].mxu0  ;;  %v852_v54 = vsel %vm345_vm0, %v808_v21, 0.0  ;;  %v809_v32 = vmul.f32 %v2171_v25, %v2114_v37 }
 0x198   : > { %1290 = vst.msk [vmem:[%s2119_s19 + $0x10] sm:$0xf] %vm1285_vm1, %v1540_v24  ;;  %v1677_v55 = vpack.c.bf16 %v2181_v17, %v2164_v47  ;;  %v1541_v33 = vpack.c.bf16 %v2181_v17, %v2181_v17  ;;  %853 = vadd.xlane.f32.xlu0 %v852_v54  ;;  %v807_v39 = vmul.f32 %v2114_v37, %v2181_v17  ;;  %v846_v22 = vsel %vm345_vm0, %v806_v16, 0.0 }
 0x199   : > { %1293 = vst.msk [vmem:[%s2119_s19 + $0x1c] sm:$0xf] %vm1285_vm1, %v1543_v31  ;;  %v855_v38 = vsel %vm345_vm0, %v809_v32, 0.0 }
 0x19a   : > { %1291 = vst.msk [vmem:[%s2119_s19 + $0x14] sm:$0xf] %vm1285_vm1, %v1541_v33  ;;  %856 = vadd.xlane.f32.xlu1 %v855_v38  ;;  %v849_v62 = vsel %vm345_vm0, %v807_v39, 0.0 }
 0x19c   : > { %847 = vadd.xlane.f32.xlu0 %v846_v22  ;;  %v2200_v42 = vpop.f32.mrb[8].mxu0 }
 0x19d   : > { %v1546_v23 = vpack.c.bf16 %v2200_v42, %v2200_v42  ;;  %v2204_v61 = vpop.f32.mrb[9].mxu0  ;;  %v812_v43 = vmul.f32 %v2200_v42, %v2114_v37 }
 0x19e   : > { %v1544_v46 = vpack.c.bf16 %v2204_v61, %v2204_v61  ;;  %850 = vadd.xlane.f32.xlu1 %v849_v62  ;;  %v2211_v49 = vpop.f32.mrb[10].mxu0  ;;  %v810_v50 = vmul.f32 %v2114_v37, %v2204_v61 }
 0x19f   : > { %1296 = vst.msk [vmem:[%s2119_s19 + $0x28] sm:$0xf] %vm1285_vm1, %v1546_v23  ;;  %v1695_v51 = vpack.c.bf16 %v2211_v49, %v2200_v42  ;;  %v1547_v52 = vpack.c.bf16 %v2211_v49, %v2211_v49  ;;  %v2221_v53 = vpop.f32.mrb[11].mxu0  ;;  %v864_v10 = vsel %vm345_vm0, %v812_v43, 0.0  ;;  %v813_v28 = vmul.f32 %v2211_v49, %v2114_v37 }
 0x1a0   : > { %1294 = vst.msk [vmem:[%s2119_s19 + $0x20] sm:$0xf] %vm1285_vm1, %v1544_v46  ;;  %v1689_v11 = vpack.c.bf16 %v2221_v53, %v2204_v61  ;;  %v1545_v56 = vpack.c.bf16 %v2221_v53, %v2221_v53  ;;  %865 = vadd.xlane.f32.xlu0 %v864_v10  ;;  %v811_v29 = vmul.f32 %v2114_v37, %v2221_v53  ;;  %v858_v58 = vsel %vm345_vm0, %v810_v50, 0.0 }
 0x1a1   : > { %1297 = vst.msk [vmem:[%s2119_s19 + $0x2c] sm:$0xf] %vm1285_vm1, %v1547_v52  ;;  %v867_v57 = vsel %vm345_vm0, %v813_v28, 0.0 }
 0x1a2   : > { %1295 = vst.msk [vmem:[%s2119_s19 + $0x24] sm:$0xf] %vm1285_vm1, %v1545_v56  ;;  %868 = vadd.xlane.f32.xlu1 %v867_v57  ;;  %v861_v60 = vsel %vm345_vm0, %v811_v29, 0.0 }
 0x1a4   : > { %859 = vadd.xlane.f32.xlu0 %v858_v58  ;;  %v2240_v59 = vpop.f32.mrb[12].mxu0 }
 0x1a5   : > { %v1550_v18 = vpack.c.bf16 %v2240_v59, %v2240_v59  ;;  %v2244_v19 = vpop.f32.mrb[13].mxu0  ;;  %v816_v0 = vmul.f32 %v2240_v59, %v2114_v37 }
 0x1a6   : > { %v1548_v34 = vpack.c.bf16 %v2244_v19, %v2244_v19  ;;  %862 = vadd.xlane.f32.xlu1 %v861_v60  ;;  %v2251_v1 = vpop.f32.mrb[14].mxu0  ;;  %v814_v26 = vmul.f32 %v2114_v37, %v2244_v19 }
 0x1a7   : > { %1300 = vst.msk [vmem:[%s2119_s19 + $0x38] sm:$0xf] %vm1285_vm1, %v1550_v18  ;;  %v1707_v27 = vpack.c.bf16 %v2251_v1, %v2240_v59  ;;  %v1551_v45 = vpack.c.bf16 %v2251_v1, %v2251_v1  ;;  %v2261_v2 = vpop.f32.mrb[15].mxu0  ;;  %v876_v6 = vsel %vm345_vm0, %v816_v0, 0.0  ;;  %v817_v3 = vmul.f32 %v2251_v1, %v2114_v37 }
 0x1a8   : > { %1298 = vst.msk [vmem:[%s2119_s19 + $0x30] sm:$0xf] %vm1285_vm1, %v1548_v34  ;;  %v1701_v5 = vpack.c.bf16 %v2261_v2, %v2244_v19  ;;  %v1549_v40 = vpack.c.bf16 %v2261_v2, %v2261_v2  ;;  %877 = vadd.xlane.f32.xlu0 %v876_v6  ;;  %v815_v41 = vmul.f32 %v2114_v37, %v2261_v2  ;;  %v870_v9 = vsel %vm345_vm0, %v814_v26, 0.0 }
 0x1a9   : > { %1301 = vst.msk [vmem:[%s2119_s19 + $0x3c] sm:$0xf] %vm1285_vm1, %v1551_v45  ;;  %v879_v8 = vsel %vm345_vm0, %v817_v3, 0.0 }
 0x1aa   : > { %1299 = vst.msk [vmem:[%s2119_s19 + $0x34] sm:$0xf] %vm1285_vm1, %v1549_v40  ;;  %880 = vadd.xlane.f32.xlu1 %v879_v8  ;;  %v873_v48 = vsel %vm345_vm0, %v815_v41, 0.0 }
 0x1ac   : > { %871 = vadd.xlane.f32.xlu0 %v870_v9  ;;  %v1648_v13 = vpop.f32.mrb[16].mxu0 }
 0x1ad   : > { %v1554_v14 = vpack.c.bf16 %v1648_v13, %v1648_v13  ;;  %v732_v20 = vpop.f32.mrb[17].mxu0  ;;  %v820_v21 = vmul.f32 %v1648_v13, %v2114_v37 }
 0x1ae   : > { %v1552_v24 = vpack.c.bf16 %v732_v20, %v732_v20  ;;  %874 = vadd.xlane.f32.xlu1 %v873_v48  ;;  %v1649_v16 = vpop.f32.mrb[18].mxu0  ;;  %v818_v31 = vmul.f32 %v2114_v37, %v732_v20 }
 0x1af   : > { %1304 = vst.msk [vmem:[%s2119_s19 + $0x48] sm:$0xf] %vm1285_vm1, %v1554_v14  ;;  %v1668_v54 = vpack.c.bf16 %v1649_v16, %v1648_v13  ;;  %v1555_v32 = vpack.c.bf16 %v1649_v16, %v1649_v16  ;;  %v735_v33 = vpop.f32.mrb[19].mxu0  ;;  %v888_v38 = vsel %vm345_vm0, %v820_v21, 0.0  ;;  %v821_v39 = vmul.f32 %v1649_v16, %v2114_v37 }
 0x1b0   : > { %1302 = vst.msk [vmem:[%s2119_s19 + $0x40] sm:$0xf] %vm1285_vm1, %v1552_v24  ;;  %v1553_v23 = vpack.c.bf16 %v735_v33, %v735_v33  ;;  %889 = vadd.xlane.f32.xlu0 %v888_v38  ;;  %v1662_v62 = vpack.c.bf16 %v735_v33, %v732_v20  ;;  %v819_v46 = vmul.f32 %v2114_v37, %v735_v33  ;;  %v882_v50 = vsel %vm345_vm0, %v818_v31, 0.0 }
 0x1b1   : > { %1305 = vst.msk [vmem:[%s2119_s19 + $0x4c] sm:$0xf] %vm1285_vm1, %v1555_v32  ;;  %v891_v43 = vsel %vm345_vm0, %v821_v39, 0.0 }
 0x1b2   : > { %1303 = vst.msk [vmem:[%s2119_s19 + $0x44] sm:$0xf] %vm1285_vm1, %v1553_v23  ;;  %892 = vadd.xlane.f32.xlu1 %v891_v43  ;;  %1664 = vmatprep.subr.msk.bf16.mxu1 %vm2289_vm2, %v1662_v62  ;;  %v885_v10 = vsel %vm345_vm0, %v819_v46, 0.0 }
 0x1b3   : > { %1667 = vmatpush3.bf16.xpose.msk.msra.mxu1 %vm2289_vm2, %v1665_v12 }
 0x1b4   : > { %883 = vadd.xlane.f32.xlu0 %v882_v50  ;;  %1670 = vmatprep.subr.msk.bf16.mxu1 %vm2289_vm2, %v1668_v54  ;;  %v1652_v52 = vpop.f32.mrb[20].mxu0 }
 0x1b5   : > { %v1558_v28 = vpack.c.bf16 %v1652_v52, %v1652_v52  ;;  %v748_v56 = vpop.f32.mrb[21].mxu0  ;;  %v824_v57 = vmul.f32 %v1652_v52, %v2114_v37 }
 0x1b6   : > { %886 = vadd.xlane.f32.xlu1 %v885_v10  ;;  %v1556_v35 = vpack.c.bf16 %v748_v56, %v748_v56  ;;  %v1653_v7 = vpop.f32.mrb[22].mxu0  ;;  %v822_v12 = vmul.f32 %v2114_v37, %v748_v56 }
 0x1b7   : > { %1308 = vst.msk [vmem:[%s2119_s19 + $0x58] sm:$0xf] %vm1285_vm1, %v1558_v28  ;;  %v1680_v29 = vpack.c.bf16 %v1653_v7, %v1652_v52  ;;  %v1559_v58 = vpack.c.bf16 %v1653_v7, %v1653_v7  ;;  %v900_v18 = vsel %vm345_vm0, %v824_v57, 0.0  ;;  %v825_v60 = vmul.f32 %v1653_v7, %v2114_v37  ;;  %v751_v0 = vpop.f32.mrb[23].mxu0 }
 0x1b8   : > { %1306 = vst.msk [vmem:[%s2119_s19 + $0x50] sm:$0xf] %vm1285_vm1, %v1556_v35  ;;  %901 = vadd.xlane.f32.xlu0 %v900_v18  ;;  %v1674_v34 = vpack.c.bf16 %v751_v0, %v748_v56  ;;  %v1557_v26 = vpack.c.bf16 %v751_v0, %v751_v0  ;;  %v823_v45 = vmul.f32 %v2114_v37, %v751_v0  ;;  %v894_v3 = vsel %vm345_vm0, %v822_v12, 0.0 }
 0x1b9   : > { %1309 = vst.msk [vmem:[%s2119_s19 + $0x5c] sm:$0xf] %vm1285_vm1, %v1559_v58  ;;  %v903_v6 = vsel %vm345_vm0, %v825_v60, 0.0 }
 0x1ba   : > { %904 = vadd.xlane.f32.xlu1 %v903_v6  ;;  %1307 = vst.msk [vmem:[%s2119_s19 + $0x54] sm:$0xf] %vm1285_vm1, %v1557_v26  ;;  %v897_v40 = vsel %vm345_vm0, %v823_v45, 0.0 }
 0x1bb   : > { %1673 = vmatpush3.bf16.xpose.msk.msra.mxu1 %vm2289_vm2, %v1671_v4 }
 0x1bc   : > { %1676 = vmatprep.subr.msk.bf16.mxu1 %vm2289_vm2, %v1674_v34  ;;  %895 = vadd.xlane.f32.xlu0 %v894_v3  ;;  %v1656_v8 = vpop.f32.mrb[24].mxu0 }
 0x1bd   : > { %v1562_v41 = vpack.c.bf16 %v1656_v8, %v1656_v8  ;;  %v764_v9 = vpop.f32.mrb[25].mxu0  ;;  %v828_v13 = vmul.f32 %v1656_v8, %v2114_v37 }
 0x1be   : > { %898 = vadd.xlane.f32.xlu1 %v897_v40  ;;  %v1560_v14 = vpack.c.bf16 %v764_v9, %v764_v9  ;;  %v1657_v20 = vpop.f32.mrb[26].mxu0  ;;  %v826_v44 = vmul.f32 %v2114_v37, %v764_v9 }
 0x1bf   : > { %1312 = vst.msk [vmem:[%s2119_s19 + $0x68] sm:$0xf] %vm1285_vm1, %v1562_v41  ;;  %v1692_v63 = vpack.c.bf16 %v1657_v20, %v1656_v8  ;;  %v1563_v4 = vpack.c.bf16 %v1657_v20, %v1657_v20  ;;  %v912_v48 = vsel %vm345_vm0, %v828_v13, 0.0  ;;  %v829_v21 = vmul.f32 %v1657_v20, %v2114_v37  ;;  %v767_v24 = vpop.f32.mrb[27].mxu0 }
 0x1c0   : > { %1310 = vst.msk [vmem:[%s2119_s19 + $0x60] sm:$0xf] %vm1285_vm1, %v1560_v14  ;;  %913 = vadd.xlane.f32.xlu0 %v912_v48  ;;  %v1686_v16 = vpack.c.bf16 %v767_v24, %v764_v9  ;;  %v1561_v31 = vpack.c.bf16 %v767_v24, %v767_v24  ;;  %v827_v54 = vmul.f32 %v2114_v37, %v767_v24  ;;  %v906_v33 = vsel %vm345_vm0, %v826_v44, 0.0 }
 0x1c1   : > { %1313 = vst.msk [vmem:[%s2119_s19 + $0x6c] sm:$0xf] %vm1285_vm1, %v1563_v4  ;;  %v915_v32 = vsel %vm345_vm0, %v829_v21, 0.0  ;;  %v1795_v14 = vmov 1966171168   ;;  %v1140_v44 = vlaneseq }
 0x1c2   : > { %916 = vadd.xlane.f32.xlu1 %v915_v32  ;;  %1311 = vst.msk [vmem:[%s2119_s19 + $0x64] sm:$0xf] %vm1285_vm1, %v1561_v31  ;;  %v909_v38 = vsel %vm345_vm0, %v827_v54, 0.0  ;;  %v1138_v20 = vunpack.c.l.s4 %v1795_v14 }
 0x1c3   : > { %1679 = vmatpush3.bf16.xpose.msk.msra.mxu1 %vm2289_vm2, %v1677_v55  ;;  %v1141_v4 = vshrl.u32 %v1140_v44, 7  ;;  %vm1154_vm4 = vcmp.lt.s32.totalorder %v1140_v44, 256 }
 0x1c4   : > { %1682 = vmatprep.subr.msk.bf16.mxu1 %vm2289_vm2, %v1680_v29  ;;  %907 = vadd.xlane.f32.xlu0 %v906_v33  ;;  %v1660_v39 = vpop.f32.mrb[28].mxu0 }
 0x1c5   : > { %v1566_v23 = vpack.c.bf16 %v1660_v39, %v1660_v39  ;;  %v780_v62 = vpop.f32.mrb[29].mxu0  ;;  %v832_v17 = vmul.f32 %v1660_v39, %v2114_v37 }
 0x1c6   : > { %910 = vadd.xlane.f32.xlu1 %v909_v38  ;;  %v1564_v43 = vpack.c.bf16 %v780_v62, %v780_v62  ;;  %v1661_v46 = vpop.f32.mrb[30].mxu0  ;;  %v830_v47 = vmul.f32 %v2114_v37, %v780_v62 }
 0x1c7   : > { %1316 = vst.msk [vmem:[%s2119_s19 + $0x78] sm:$0xf] %vm1285_vm1, %v1566_v23  ;;  %v1704_v55 = vpack.c.bf16 %v1661_v46, %v1660_v39  ;;  %v1567_v50 = vpack.c.bf16 %v1661_v46, %v1661_v46  ;;  %v783_v52 = vpop.f32.mrb[31].mxu0  ;;  %v833_v10 = vmul.f32 %v1661_v46, %v2114_v37  ;;  %v924_v12 = vsel %vm345_vm0, %v832_v17, 0.0 }
 0x1c8   : > { %1314 = vst.msk [vmem:[%s2119_s19 + $0x70] sm:$0xf] %vm1285_vm1, %v1564_v43  ;;  %v831_v28 = vmul.f32 %v2114_v37, %v783_v52  ;;  %v1698_v56 = vpack.c.bf16 %v783_v52, %v780_v62  ;;  %v1565_v57 = vpack.c.bf16 %v783_v52, %v783_v52  ;;  %v918_v35 = vsel %vm345_vm0, %v830_v47, 0.0 }
 0x1c9   : > { %1317 = vst.msk [vmem:[%s2119_s19 + $0x7c] sm:$0xf] %vm1285_vm1, %v1567_v50  ;;  %919 = vadd.xlane.f32.xlu0 %v918_v35  ;;  %v927_v37 = vsel %vm345_vm0, %v833_v10, 0.0 }
 0x1ca   : > { %1315 = vst.msk [vmem:[%s2119_s19 + $0x74] sm:$0xf] %vm1285_vm1, %v1565_v57  ;;  %v921_v7 = vsel %vm345_vm0, %v831_v28, 0.0 }
 0x1cb   : > { %1685 = vmatpush3.bf16.xpose.msk.msra.mxu1 %vm2289_vm2, %v1683_v30  ;;  %922 = vadd.xlane.f32.xlu1 %v921_v7 }
 0x1cc   : > { %1688 = vmatprep.subr.msk.bf16.mxu1 %vm2289_vm2, %v1686_v16 }
 0x1cd   : > { %925 = vadd.xlane.f32.xlu0 %v924_v12 }
 0x1cf   : > { %928 = vadd.xlane.f32.xlu1 %v927_v37 }
 0x1d3   : > { %1691 = vmatpush3.bf16.xpose.msk.msra.mxu1 %vm2289_vm2, %v1689_v11 }
 0x1d4   : > { %1694 = vmatprep.subr.msk.bf16.mxu1 %vm2289_vm2, %v1692_v63  ;;  %v1139_v63 = vunpack.c.0.s8 %v1138_v20 }
 0x1d6   : > { %v1142_v21 = vsub.s32 %v1139_v63, %v1141_v4 }
 0x1db   : > { %1697 = vmatpush3.bf16.xpose.msk.msra.mxu1 %vm2289_vm2, %v1695_v51 }
 0x1dc   : > { %1700 = vmatprep.subr.msk.bf16.mxu1 %vm2289_vm2, %v1698_v56 }
 0x1e3   : > { %1703 = vmatpush3.bf16.xpose.msk.msra.mxu1 %vm2289_vm2, %v1701_v5 }
 0x1e4   : > { %1706 = vmatprep.subr.msk.bf16.mxu1 %vm2289_vm2, %v1704_v55 }
 0x1eb   : > { %1709 = vmatpush3.bf16.xpose.msk.msra.mxu1 %vm2289_vm2, %v1707_v27 }
 0x1f2   : > { %1621 = vmatmul.mubr.msk.f32.vlgmr.msra.gmra.mrb[0].mxu1 %vm345_vm0, %v2106_v36 }
 0x21d   : > { %v842_v15 = vpop.xlane.xlu0 %841 }
 0x21e   : > { %933 = vst.msk [vmem:[%s2414_s26 + $0x10] sm:$0xff] %vm930_vm3, %v842_v15 }
 0x21f   : > { %v845_v36 = vpop.xlane.xlu1 %844 }
 0x220   : > { %934 = vst.msk [vmem:[%s2414_s26 + $0x18] sm:$0xff] %vm930_vm3, %v845_v36 }
 0x221   : > { %v836_v25 = vpop.xlane.xlu0 %835 }
 0x222   : > { %931 = vst.msk [vmem:[%s2414_s26] sm:$0xff] %vm930_vm3, %v836_v25 }
 0x223   : > { %v839_v30 = vpop.xlane.xlu1 %838 }
 0x224   : > { %932 = vst.msk [vmem:[%s2414_s26 + $0x8] sm:$0xff] %vm930_vm3, %v839_v30 }
 0x225   : > { %v854_v42 = vpop.xlane.xlu0 %853 }
 0x226   : > { %937 = vst.msk [vmem:[%s2414_s26 + $0x30] sm:$0xff] %vm930_vm3, %v854_v42 }
 0x227   : > { %v857_v61 = vpop.xlane.xlu1 %856 }
 0x228   : > { %938 = vst.msk [vmem:[%s2414_s26 + $0x38] sm:$0xff] %vm930_vm3, %v857_v61 }
 0x229   : > { %v848_v49 = vpop.xlane.xlu0 %847 }
 0x22a   : > { %935 = vst.msk [vmem:[%s2414_s26 + $0x20] sm:$0xff] %vm930_vm3, %v848_v49 }
 0x22b   : > { %v851_v51 = vpop.xlane.xlu1 %850 }
 0x22c   : > { %936 = vst.msk [vmem:[%s2414_s26 + $0x28] sm:$0xff] %vm930_vm3, %v851_v51 }
 0x22d   : > { %v866_v53 = vpop.xlane.xlu0 %865 }
 0x22e   : > { %941 = vst.msk [vmem:[%s2414_s26 + $0x50] sm:$0xff] %vm930_vm3, %v866_v53 }
 0x22f   : > { %v869_v11 = vpop.xlane.xlu1 %868 }
 0x230   : > { %942 = vst.msk [vmem:[%s2414_s26 + $0x58] sm:$0xff] %vm930_vm3, %v869_v11 }
 0x231   : > { %v860_v59 = vpop.xlane.xlu0 %859 }
 0x232   : > { %939 = vst.msk [vmem:[%s2414_s26 + $0x40] sm:$0xff] %vm930_vm3, %v860_v59 }
 0x233   : > { %v863_v19 = vpop.xlane.xlu1 %862 }
 0x234   : > { %940 = vst.msk [vmem:[%s2414_s26 + $0x48] sm:$0xff] %vm930_vm3, %v863_v19 }
 0x235   : > { %v878_v1 = vpop.xlane.xlu0 %877 }
 0x236   : > { %945 = vst.msk [vmem:[%s2414_s26 + $0x70] sm:$0xff] %vm930_vm3, %v878_v1 }
 0x237   : > { %v881_v27 = vpop.xlane.xlu1 %880 }
 0x238   : > { %946 = vst.msk [vmem:[%s2414_s26 + $0x78] sm:$0xff] %vm930_vm3, %v881_v27 }
 0x239   : > { %v872_v2 = vpop.xlane.xlu0 %871 }
 0x23a   : > { %943 = vst.msk [vmem:[%s2414_s26 + $0x60] sm:$0xff] %vm930_vm3, %v872_v2 }
 0x23b   : > { %v875_v5 = vpop.xlane.xlu1 %874 }
 0x23c   : > { %944 = vst.msk [vmem:[%s2414_s26 + $0x68] sm:$0xff] %vm930_vm3, %v875_v5 }
 0x23d   : > { %v890_v22 = vpop.xlane.xlu0 %889 }
 0x23e   : > { %949 = vst.msk [vmem:[%s2414_s26 + $0x90] sm:$0xff] %vm930_vm3, %v890_v22 }
 0x23f   : > { %v893_v29 = vpop.xlane.xlu1 %892 }
 0x240   : > { %950 = vst.msk [vmem:[%s2414_s26 + $0x98] sm:$0xff] %vm930_vm3, %v893_v29 }
 0x241   : > { %v884_v58 = vpop.xlane.xlu0 %883 }
 0x242   : > { %947 = vst.msk [vmem:[%s2414_s26 + $0x80] sm:$0xff] %vm930_vm3, %v884_v58 }
 0x243   : > { %v887_v18 = vpop.xlane.xlu1 %886 }
 0x244   : > { %948 = vst.msk [vmem:[%s2414_s26 + $0x88] sm:$0xff] %vm930_vm3, %v887_v18 }
 0x245   : > { %v902_v60 = vpop.xlane.xlu0 %901 }
 0x246   : > { %953 = vst.msk [vmem:[%s2414_s26 + $0xb0] sm:$0xff] %vm930_vm3, %v902_v60 }
 0x247   : > { %v905_v0 = vpop.xlane.xlu1 %904 }
 0x248   : > { %954 = vst.msk [vmem:[%s2414_s26 + $0xb8] sm:$0xff] %vm930_vm3, %v905_v0 }
 0x249   : > { %v896_v34 = vpop.xlane.xlu0 %895 }
 0x24a   : > { %951 = vst.msk [vmem:[%s2414_s26 + $0xa0] sm:$0xff] %vm930_vm3, %v896_v34 }
 0x24b   : > { %v899_v26 = vpop.xlane.xlu1 %898 }
 0x24c   : > { %952 = vst.msk [vmem:[%s2414_s26 + $0xa8] sm:$0xff] %vm930_vm3, %v899_v26 }
 0x24d   : > { %v914_v45 = vpop.xlane.xlu0 %913 }
 0x24e   : > { %957 = vst.msk [vmem:[%s2414_s26 + $0xd0] sm:$0xff] %vm930_vm3, %v914_v45 }
 0x24f   : > { %v917_v6 = vpop.xlane.xlu1 %916 }
 0x250   : > { %958 = vst.msk [vmem:[%s2414_s26 + $0xd8] sm:$0xff] %vm930_vm3, %v917_v6 }
 0x251   : > { %v908_v3 = vpop.xlane.xlu0 %907 }
 0x252   : > { %955 = vst.msk [vmem:[%s2414_s26 + $0xc0] sm:$0xff] %vm930_vm3, %v908_v3 }
 0x253   : > { %v911_v40 = vpop.xlane.xlu1 %910 }
 0x254   : > { %956 = vst.msk [vmem:[%s2414_s26 + $0xc8] sm:$0xff] %vm930_vm3, %v911_v40 }
 0x256   : > { %v920_v8 = vpop.xlane.xlu0 %919 }
 0x257   : > { %959 = vst.msk [vmem:[%s2414_s26 + $0xe0] sm:$0xff] %vm930_vm3, %v920_v8 }
 0x258   : > { %v923_v41 = vpop.xlane.xlu1 %922 }
 0x259   : > { %960 = vst.msk [vmem:[%s2414_s26 + $0xe8] sm:$0xff] %vm930_vm3, %v923_v41 }
 0x25a   : > { %v926_v9 = vpop.xlane.xlu0 %925 }
 0x25b   : > { %961 = vst.msk [vmem:[%s2414_s26 + $0xf0] sm:$0xff] %vm930_vm3, %v926_v9 }
 0x25c   : > { %v929_v13 = vpop.xlane.xlu1 %928 }
 0x25d   : > { %962 = vst.msk [vmem:[%s2414_s26 + $0xf8] sm:$0xff] %vm930_vm3, %v929_v13 }
 0x2c5   : > { %v1129_v48 = vpop.f32.mrb[0].mxu1 }
 0x2c6   : > { %v1131_v24 = vpop.f32.mrb[1].mxu1 }
 0x2c7   : > { %v1136_v16 = vcombine.low %v1129_v48, %v1131_v24 }
 0x2c9   : > { %v1143_v31 = vrot.slane %v1136_v16, %v1142_v21 }
 0x2cb   : > { %v1150_v54 = vrot.slane %v1143_v31, %v1142_v21 }
 0x2cd   : > { %1156 = vst.msk [vmem:[%s278_s28] sm:$0x3] %vm1154_vm4, %v1150_v54 }
 0x2ce PF: > { %s17_s21 = sadd.s32 1, %s1793_s21  }
 0x2cf   : > { %p14_p5 = scmp.ge.s32.totalorder %s17_s21, 4  }
 0x2d1   :  { %16 = sbr.rel (!%p14_p5) target bundleno = 1 (0x1), region = 90 }

// kernel: mmgat_forward.14
= control target key start
LH: loop header
LB: loop body
LE: loop exit
PB: predicated region body
PF: predicated region fallthrough
CT: control target
= control target key end

     0   :  { %vm274_vm0 = vcmask 7168   ;;  %v995_v0 = vmov 0   ;;  %vm954_vm2 = vcmask 516096   ;;  %s1800_s0 = inlined_call_operand.vmem [shape: f32[512,1], index: 0, kind: input, shape index: {}]   ;;  %s1801_s1 = inlined_call_operand.vmem [shape: f32[512,1], index: 1, kind: input, shape index: {}]   ;;  %s1802_s2 = inlined_call_operand.vmem [shape: f32[512,1], index: 2, kind: input, shape index: {}]   ;;  %s1803_s3 = inlined_call_operand.vmem [shape: f32[1,64], index: 3, kind: output, shape index: {0}]   ;;  %s1804_s5 = inlined_call_operand.vmem [shape: f32[1,64], index: 5, kind: output, shape index: {2}]   ;;  %s1805_s4 = inlined_call_operand.vmem [shape: f32[1,64], index: 4, kind: output, shape index: {1}]  }
   0x1   :  { %985 = vset.pattern.permute.xlu0 %v995_v0  ;;  %v17_v1 = vld [vmem:[%s1800_s0] sm:$0xff]  ;;  %v18_v2 = vld [vmem:[%s1800_s0 + $0x8] sm:$0xff]  ;;  %v19_v3 = vld [vmem:[%s1800_s0 + $0x10] sm:$0xff]  ;;  %986 = vset.pattern.permute.xlu1 %v995_v0 }
   0x2   :  { %v20_v4 = vld [vmem:[%s1800_s0 + $0x18] sm:$0xff]  ;;  %v275_v5 = vsel %vm274_vm0, %v17_v1, 0.0  ;;  %v276_v6 = vsel %vm274_vm0, %v18_v2, 0.0  ;;  %v21_v7 = vld [vmem:[%s1800_s0 + $0x20] sm:$0xff]  ;;  %v278_v9 = vsel %vm274_vm0, %v19_v3, 0.0  ;;  %v22_v11 = vld [vmem:[%s1800_s0 + $0x28] sm:$0xff] }
   0x3   :  { %v277_v8 = vadd.f32 %v276_v6, %v275_v5  ;;  %v280_v10 = vsel %vm274_vm0, %v20_v4, 0.0  ;;  %v282_v13 = vsel %vm274_vm0, %v21_v7, 0.0  ;;  %v23_v14 = vld [vmem:[%s1800_s0 + $0x30] sm:$0xff]  ;;  %v284_v16 = vsel %vm274_vm0, %v22_v11, 0.0  ;;  %v24_v17 = vld [vmem:[%s1800_s0 + $0x38] sm:$0xff]  ;;  %v25_v20 = vld [vmem:[%s1800_s0 + $0x40] sm:$0xff] }
   0x4   :  { %v286_v19 = vsel %vm274_vm0, %v23_v14, 0.0  ;;  %v288_v22 = vsel %vm274_vm0, %v24_v17, 0.0  ;;  %v26_v23 = vld [vmem:[%s1800_s0 + $0x48] sm:$0xff]  ;;  %v290_v25 = vsel %vm274_vm0, %v25_v20, 0.0  ;;  %v27_v26 = vld [vmem:[%s1800_s0 + $0x50] sm:$0xff]  ;;  %v28_v29 = vld [vmem:[%s1800_s0 + $0x58] sm:$0xff] }
   0x5   :  { %v279_v12 = vadd.f32 %v278_v9, %v277_v8  ;;  %v292_v28 = vsel %vm274_vm0, %v26_v23, 0.0  ;;  %v294_v31 = vsel %vm274_vm0, %v27_v26, 0.0  ;;  %v29_v32 = vld [vmem:[%s1800_s0 + $0x60] sm:$0xff]  ;;  %v296_v34 = vsel %vm274_vm0, %v28_v29, 0.0  ;;  %v30_v35 = vld [vmem:[%s1800_s0 + $0x68] sm:$0xff]  ;;  %v31_v40 = vld [vmem:[%s1800_s0 + $0x70] sm:$0xff] }
   0x6   :  { %v298_v37 = vsel %vm274_vm0, %v29_v32, 0.0  ;;  %v409_v38 = vld [vmem:[%s1801_s1] sm:$0xff]  ;;  %v410_v39 = vld [vmem:[%s1801_s1 + $0x8] sm:$0xff]  ;;  %v411_v42 = vld [vmem:[%s1801_s1 + $0x10] sm:$0xff]  ;;  %v300_v44 = vsel %vm274_vm0, %v30_v35, 0.0  ;;  %v302_v52 = vsel %vm274_vm0, %v31_v40, 0.0 }
   0x7   :  { %v281_v15 = vadd.f32 %v280_v10, %v279_v12  ;;  %v412_v43 = vld [vmem:[%s1801_s1 + $0x18] sm:$0xff]  ;;  %v537_v45 = vsel %vm274_vm0, %v409_v38, 0.0  ;;  %v538_v46 = vsel %vm274_vm0, %v410_v39, 0.0  ;;  %v540_v47 = vsel %vm274_vm0, %v411_v42, 0.0  ;;  %v413_v50 = vld [vmem:[%s1801_s1 + $0x20] sm:$0xff]  ;;  %v414_v56 = vld [vmem:[%s1801_s1 + $0x28] sm:$0xff] }
   0x8   :  { %v32_v48 = vld [vmem:[%s1800_s0 + $0x78] sm:$0xff]  ;;  %v539_v51 = vadd.f32 %v538_v46, %v537_v45  ;;  %v542_v53 = vsel %vm274_vm0, %v412_v43, 0.0  ;;  %v33_v54 = vld [vmem:[%s1800_s0 + $0x80] sm:$0xff]  ;;  %v544_v59 = vsel %vm274_vm0, %v413_v50, 0.0  ;;  %v34_v60 = vld [vmem:[%s1800_s0 + $0x88] sm:$0xff]  ;;  %v546_v1 = vsel %vm274_vm0, %v414_v56, 0.0 }
   0x9   :  { %v283_v18 = vadd.f32 %v282_v13, %v281_v15  ;;  %v304_v58 = vsel %vm274_vm0, %v32_v48, 0.0  ;;  %v415_v62 = vld [vmem:[%s1801_s1 + $0x30] sm:$0xff]  ;;  %v306_v0 = vsel %vm274_vm0, %v33_v54, 0.0  ;;  %v416_v4 = vld [vmem:[%s1801_s1 + $0x38] sm:$0xff]  ;;  %v308_v6 = vsel %vm274_vm0, %v34_v60, 0.0  ;;  %v417_v10 = vld [vmem:[%s1801_s1 + $0x40] sm:$0xff] }
   0xa   :  { %v541_v57 = vadd.f32 %v540_v47, %v539_v51  ;;  %v35_v2 = vld [vmem:[%s1800_s0 + $0x90] sm:$0xff]  ;;  %v548_v7 = vsel %vm274_vm0, %v415_v62, 0.0  ;;  %v36_v8 = vld [vmem:[%s1800_s0 + $0x98] sm:$0xff]  ;;  %v550_v13 = vsel %vm274_vm0, %v416_v4, 0.0  ;;  %v37_v14 = vld [vmem:[%s1800_s0 + $0xa0] sm:$0xff] }
   0xb   :  { %v285_v21 = vadd.f32 %v284_v16, %v283_v18  ;;  %v310_v12 = vsel %vm274_vm0, %v35_v2, 0.0  ;;  %v418_v16 = vld [vmem:[%s1801_s1 + $0x48] sm:$0xff]  ;;  %v312_v18 = vsel %vm274_vm0, %v36_v8, 0.0  ;;  %v39_v26 = vld [vmem:[%s1800_s0 + $0xb0] sm:$0xff]  ;;  %v40_v32 = vld [vmem:[%s1800_s0 + $0xb8] sm:$0xff] }
   0xc   :  { %v543_v63 = vadd.f32 %v542_v53, %v541_v57  ;;  %v38_v20 = vld [vmem:[%s1800_s0 + $0xa8] sm:$0xff]  ;;  %v41_v38 = vld [vmem:[%s1800_s0 + $0xc0] sm:$0xff]  ;;  %v320_v42 = vsel %vm274_vm0, %v40_v32, 0.0  ;;  %v423_v46 = vld [vmem:[%s1801_s1 + $0x70] sm:$0xff] }
   0xd   :  { %v287_v24 = vadd.f32 %v286_v19, %v285_v21  ;;  %v552_v19 = vsel %vm274_vm0, %v417_v10, 0.0  ;;  %v422_v40 = vld [vmem:[%s1801_s1 + $0x68] sm:$0xff]  ;;  %v671_v48 = vld [vmem:[%s1802_s2] sm:$0xff]  ;;  %v43_v53 = vld [vmem:[%s1800_s0 + $0xd0] sm:$0xff] }
   0xe   :  { %v545_v5 = vadd.f32 %v544_v59, %v543_v63  ;;  %v562_v50 = vsel %vm274_vm0, %v422_v40, 0.0  ;;  %v672_v51 = vld [vmem:[%s1802_s2 + $0x8] sm:$0xff]  ;;  %v674_v59 = vld [vmem:[%s1802_s2 + $0x18] sm:$0xff]  ;;  %v799_v60 = vsel %vm274_vm0, %v671_v48, 0.0  ;;  %v425_v63 = vld [vmem:[%s1801_s1 + $0x80] sm:$0xff] }
   0xf   :  { %v289_v27 = vadd.f32 %v288_v22, %v287_v24  ;;  %v419_v22 = vld [vmem:[%s1801_s1 + $0x50] sm:$0xff]  ;;  %v314_v24 = vsel %vm274_vm0, %v37_v14, 0.0  ;;  %v676_v14 = vld [vmem:[%s1802_s2 + $0x28] sm:$0xff]  ;;  %v678_v32 = vld [vmem:[%s1802_s2 + $0x38] sm:$0xff] }
  0x10   :  { %v547_v11 = vadd.f32 %v546_v1, %v545_v5  ;;  %v800_v1 = vsel %vm274_vm0, %v672_v51, 0.0  ;;  %v675_v5 = vld [vmem:[%s1802_s2 + $0x20] sm:$0xff] }
  0x11   :  { %v291_v30 = vadd.f32 %v290_v25, %v289_v27  ;;  %v554_v25 = vsel %vm274_vm0, %v418_v16, 0.0  ;;  %v46_v16 = vld [vmem:[%s1800_s0 + $0xe8] sm:$0xff] }
  0x12   :  { %v549_v17 = vadd.f32 %v548_v7, %v547_v11  ;;  %v45_v7 = vld [vmem:[%s1800_s0 + $0xe0] sm:$0xff]  ;;  %v804_v11 = vsel %vm274_vm0, %v674_v59, 0.0  ;;  %v681_v59 = vld [vmem:[%s1802_s2 + $0x50] sm:$0xff] }
  0x13   :  { %v293_v33 = vadd.f32 %v292_v28, %v291_v30  ;;  %v420_v28 = vld [vmem:[%s1801_s1 + $0x58] sm:$0xff]  ;;  %v316_v30 = vsel %vm274_vm0, %v38_v20, 0.0  ;;  %v806_v20 = vsel %vm274_vm0, %v675_v5, 0.0 }
  0x14   :  { %v551_v23 = vadd.f32 %v550_v13, %v549_v17  ;;  %v568_v13 = vsel %vm274_vm0, %v425_v63, 0.0  ;;  %v432_v63 = vld [vmem:[%s1801_s1 + $0xb8] sm:$0xff] }
  0x15   :  { %v295_v36 = vadd.f32 %v294_v31, %v293_v33  ;;  %v556_v31 = vsel %vm274_vm0, %v419_v22, 0.0 }
  0x16   :  { %v553_v29 = vadd.f32 %v552_v19, %v551_v23  ;;  %v677_v23 = vld [vmem:[%s1802_s2 + $0x30] sm:$0xff] }
  0x17   :  { %v297_v41 = vadd.f32 %v296_v34, %v295_v36  ;;  %v421_v34 = vld [vmem:[%s1801_s1 + $0x60] sm:$0xff]  ;;  %v318_v36 = vsel %vm274_vm0, %v39_v26, 0.0 }
  0x18   :  { %v555_v35 = vadd.f32 %v554_v25, %v553_v29  ;;  %v560_v43 = vsel %vm274_vm0, %v421_v34, 0.0  ;;  %v47_v25 = vld [vmem:[%s1800_s0 + $0xf0] sm:$0xff]  ;;  %v808_v29 = vsel %vm274_vm0, %v676_v14, 0.0  ;;  %v48_v34 = vld [vmem:[%s1800_s0 + $0xf8] sm:$0xff] }
  0x19   :  { %v299_v49 = vadd.f32 %v298_v37, %v297_v41  ;;  %v558_v37 = vsel %vm274_vm0, %v420_v28, 0.0  ;;  %v336_v48 = vsel %vm274_vm0, %v48_v34, 0.0 }
  0x1a   :  { %v557_v41 = vadd.f32 %v556_v31, %v555_v35 }
  0x1b   :  { %v301_v55 = vadd.f32 %v300_v44, %v299_v49  ;;  %v42_v44 = vld [vmem:[%s1800_s0 + $0xc8] sm:$0xff]  ;;  %v322_v49 = vsel %vm274_vm0, %v41_v38, 0.0  ;;  %v810_v38 = vsel %vm274_vm0, %v677_v23, 0.0 }
  0x1c   :  { %v559_v47 = vadd.f32 %v558_v37, %v557_v41  ;;  %v324_v57 = vsel %vm274_vm0, %v42_v44, 0.0  ;;  %v679_v41 = vld [vmem:[%s1802_s2 + $0x40] sm:$0xff] }
  0x1d   :  { %v303_v61 = vadd.f32 %v302_v52, %v301_v55  ;;  %v673_v52 = vld [vmem:[%s1802_s2 + $0x10] sm:$0xff]  ;;  %v424_v55 = vld [vmem:[%s1801_s1 + $0x78] sm:$0xff] }
  0x1e   :  { %v561_v56 = vadd.f32 %v560_v43, %v559_v47  ;;  %v802_v2 = vsel %vm274_vm0, %v673_v52, 0.0  ;;  %v566_v4 = vsel %vm274_vm0, %v424_v55, 0.0  ;;  %v49_v43 = vld [vmem:[%s1800_s0 + $0x100] sm:$0xff]  ;;  %v812_v47 = vsel %vm274_vm0, %v678_v32, 0.0  ;;  %v50_v52 = vld [vmem:[%s1800_s0 + $0x108] sm:$0xff] }
  0x1f   :  { %v305_v3 = vadd.f32 %v304_v58, %v303_v61  ;;  %v564_v58 = vsel %vm274_vm0, %v423_v46, 0.0  ;;  %v44_v61 = vld [vmem:[%s1800_s0 + $0xd8] sm:$0xff] }
  0x21   :  { %v307_v9 = vadd.f32 %v306_v0, %v305_v3  ;;  %v563_v0 = vadd.f32 %v562_v50, %v561_v56  ;;  %v326_v3 = vsel %vm274_vm0, %v43_v53, 0.0  ;;  %v680_v50 = vld [vmem:[%s1802_s2 + $0x48] sm:$0xff]  ;;  %v814_v56 = vsel %vm274_vm0, %v679_v41, 0.0 }
  0x23   :  { %v309_v15 = vadd.f32 %v308_v6, %v307_v9  ;;  %v801_v6 = vadd.f32 %v800_v1, %v799_v60  ;;  %v426_v9 = vld [vmem:[%s1801_s1 + $0x88] sm:$0xff]  ;;  %v565_v10 = vadd.f32 %v564_v58, %v563_v0  ;;  %v816_v1 = vsel %vm274_vm0, %v680_v50, 0.0 }
  0x24   :  { %v570_v22 = vsel %vm274_vm0, %v426_v9, 0.0 }
  0x25   :  { %v311_v21 = vadd.f32 %v310_v12, %v309_v15  ;;  %v328_v12 = vsel %vm274_vm0, %v44_v61, 0.0  ;;  %v803_v15 = vadd.f32 %v802_v2, %v801_v6  ;;  %v567_v19 = vadd.f32 %v566_v4, %v565_v10  ;;  %v51_v61 = vld [vmem:[%s1800_s0 + $0x110] sm:$0xff]  ;;  %v682_v4 = vld [vmem:[%s1802_s2 + $0x58] sm:$0xff] }
  0x26   :  { %v340_v2 = vsel %vm274_vm0, %v50_v52, 0.0  ;;  %v52_v6 = vld [vmem:[%s1800_s0 + $0x118] sm:$0xff]  ;;  %v818_v10 = vsel %vm274_vm0, %v681_v59, 0.0 }
  0x27   :  { %v313_v27 = vadd.f32 %v312_v18, %v311_v21  ;;  %v427_v18 = vld [vmem:[%s1801_s1 + $0x90] sm:$0xff]  ;;  %v330_v21 = vsel %vm274_vm0, %v45_v7, 0.0  ;;  %v569_v28 = vadd.f32 %v568_v13, %v567_v19  ;;  %v683_v13 = vld [vmem:[%s1802_s2 + $0x60] sm:$0xff]  ;;  %v820_v19 = vsel %vm274_vm0, %v682_v4, 0.0 }
  0x28   :  { %v572_v31 = vsel %vm274_vm0, %v427_v18, 0.0 }
  0x29   :  { %v315_v33 = vadd.f32 %v314_v24, %v313_v27  ;;  %v805_v24 = vadd.f32 %v804_v11, %v803_v15  ;;  %v428_v27 = vld [vmem:[%s1801_s1 + $0x98] sm:$0xff]  ;;  %v571_v37 = vadd.f32 %v570_v22, %v569_v28  ;;  %v342_v11 = vsel %vm274_vm0, %v51_v61, 0.0  ;;  %v53_v15 = vld [vmem:[%s1800_s0 + $0x120] sm:$0xff]  ;;  %v684_v22 = vld [vmem:[%s1802_s2 + $0x68] sm:$0xff] }
  0x2a   :  { %v574_v40 = vsel %vm274_vm0, %v428_v27, 0.0  ;;  %v822_v28 = vsel %vm274_vm0, %v683_v13, 0.0 }
  0x2b   :  { %v317_v39 = vadd.f32 %v316_v30, %v315_v33  ;;  %v332_v30 = vsel %vm274_vm0, %v46_v16, 0.0  ;;  %v807_v33 = vadd.f32 %v806_v20, %v805_v24  ;;  %v573_v46 = vadd.f32 %v572_v31, %v571_v37  ;;  %v54_v24 = vld [vmem:[%s1800_s0 + $0x128] sm:$0xff]  ;;  %v685_v31 = vld [vmem:[%s1802_s2 + $0x70] sm:$0xff] }
  0x2c   :  { %v344_v20 = vsel %vm274_vm0, %v52_v6, 0.0  ;;  %v824_v37 = vsel %vm274_vm0, %v684_v22, 0.0 }
  0x2d   :  { %v319_v45 = vadd.f32 %v318_v36, %v317_v39  ;;  %v429_v36 = vld [vmem:[%s1801_s1 + $0xa0] sm:$0xff]  ;;  %v334_v39 = vsel %vm274_vm0, %v47_v25, 0.0  ;;  %v575_v55 = vadd.f32 %v574_v40, %v573_v46  ;;  %v686_v40 = vld [vmem:[%s1802_s2 + $0x78] sm:$0xff]  ;;  %v826_v46 = vsel %vm274_vm0, %v685_v31, 0.0 }
  0x2f   :  { %v321_v54 = vadd.f32 %v320_v42, %v319_v45  ;;  %v809_v42 = vadd.f32 %v808_v29, %v807_v33  ;;  %v430_v45 = vld [vmem:[%s1801_s1 + $0xa8] sm:$0xff]  ;;  %v346_v29 = vsel %vm274_vm0, %v53_v15, 0.0  ;;  %v55_v33 = vld [vmem:[%s1800_s0 + $0x130] sm:$0xff] }
  0x30   :  { %v578_v58 = vsel %vm274_vm0, %v430_v45, 0.0 }
  0x31   :  { %v323_v62 = vadd.f32 %v322_v49, %v321_v54  ;;  %v576_v49 = vsel %vm274_vm0, %v429_v36, 0.0  ;;  %v811_v51 = vadd.f32 %v810_v38, %v809_v42  ;;  %v431_v54 = vld [vmem:[%s1801_s1 + $0xb0] sm:$0xff]  ;;  %v348_v38 = vsel %vm274_vm0, %v54_v24, 0.0  ;;  %v56_v42 = vld [vmem:[%s1800_s0 + $0x138] sm:$0xff] }
  0x32   :  { %v577_v0 = vadd.f32 %v576_v49, %v575_v55  ;;  %v687_v49 = vld [vmem:[%s1802_s2 + $0x80] sm:$0xff]  ;;  %v828_v55 = vsel %vm274_vm0, %v686_v40, 0.0 }
  0x33   :  { %v325_v8 = vadd.f32 %v324_v57, %v323_v62  ;;  %v338_v57 = vsel %vm274_vm0, %v49_v43, 0.0  ;;  %v813_v60 = vadd.f32 %v812_v47, %v811_v51  ;;  %v350_v47 = vsel %vm274_vm0, %v55_v33, 0.0  ;;  %v57_v51 = vld [vmem:[%s1800_s0 + $0x140] sm:$0xff] }
  0x34   :  { %v579_v9 = vadd.f32 %v578_v58, %v577_v0  ;;  %v688_v58 = vld [vmem:[%s1802_s2 + $0x88] sm:$0xff]  ;;  %v830_v0 = vsel %vm274_vm0, %v687_v49, 0.0 }
  0x35   :  { %v327_v17 = vadd.f32 %v326_v3, %v325_v8  ;;  %v580_v3 = vsel %vm274_vm0, %v431_v54, 0.0  ;;  %v815_v5 = vadd.f32 %v814_v56, %v813_v60  ;;  %v433_v8 = vld [vmem:[%s1801_s1 + $0xc0] sm:$0xff]  ;;  %v352_v56 = vsel %vm274_vm0, %v56_v42, 0.0  ;;  %v58_v60 = vld [vmem:[%s1800_s0 + $0x148] sm:$0xff] }
  0x36   :  { %v581_v18 = vadd.f32 %v580_v3, %v579_v9  ;;  %v689_v3 = vld [vmem:[%s1802_s2 + $0x90] sm:$0xff]  ;;  %v832_v9 = vsel %vm274_vm0, %v688_v58, 0.0 }
  0x37   :  { %v329_v26 = vadd.f32 %v328_v12, %v327_v17  ;;  %v582_v12 = vsel %vm274_vm0, %v432_v63, 0.0  ;;  %v817_v14 = vadd.f32 %v816_v1, %v815_v5  ;;  %v434_v17 = vld [vmem:[%s1801_s1 + $0xc8] sm:$0xff]  ;;  %v354_v1 = vsel %vm274_vm0, %v57_v51, 0.0  ;;  %v59_v5 = vld [vmem:[%s1800_s0 + $0x150] sm:$0xff] }
  0x38   :  { %v583_v27 = vadd.f32 %v582_v12, %v581_v18  ;;  %v690_v12 = vld [vmem:[%s1802_s2 + $0x98] sm:$0xff]  ;;  %v834_v18 = vsel %vm274_vm0, %v689_v3, 0.0 }
  0x39   :  { %v331_v35 = vadd.f32 %v330_v21, %v329_v26  ;;  %v584_v21 = vsel %vm274_vm0, %v433_v8, 0.0  ;;  %v819_v23 = vadd.f32 %v818_v10, %v817_v14  ;;  %v435_v26 = vld [vmem:[%s1801_s1 + $0xd0] sm:$0xff]  ;;  %v356_v10 = vsel %vm274_vm0, %v58_v60, 0.0  ;;  %v60_v14 = vld [vmem:[%s1800_s0 + $0x158] sm:$0xff] }
  0x3a   :  { %v585_v36 = vadd.f32 %v584_v21, %v583_v27  ;;  %v691_v21 = vld [vmem:[%s1802_s2 + $0xa0] sm:$0xff]  ;;  %v836_v27 = vsel %vm274_vm0, %v690_v12, 0.0 }
  0x3b   :  { %v333_v44 = vadd.f32 %v332_v30, %v331_v35  ;;  %v586_v30 = vsel %vm274_vm0, %v434_v17, 0.0  ;;  %v821_v32 = vadd.f32 %v820_v19, %v819_v23  ;;  %v436_v35 = vld [vmem:[%s1801_s1 + $0xd8] sm:$0xff]  ;;  %v358_v19 = vsel %vm274_vm0, %v59_v5, 0.0  ;;  %v61_v23 = vld [vmem:[%s1800_s0 + $0x160] sm:$0xff] }
  0x3c   :  { %v587_v45 = vadd.f32 %v586_v30, %v585_v36  ;;  %v692_v30 = vld [vmem:[%s1802_s2 + $0xa8] sm:$0xff]  ;;  %v838_v36 = vsel %vm274_vm0, %v691_v21, 0.0 }
  0x3d   :  { %v335_v53 = vadd.f32 %v334_v39, %v333_v44  ;;  %v588_v39 = vsel %vm274_vm0, %v435_v26, 0.0  ;;  %v823_v41 = vadd.f32 %v822_v28, %v821_v32  ;;  %v437_v44 = vld [vmem:[%s1801_s1 + $0xe0] sm:$0xff]  ;;  %v360_v28 = vsel %vm274_vm0, %v60_v14, 0.0  ;;  %v62_v32 = vld [vmem:[%s1800_s0 + $0x168] sm:$0xff] }
  0x3e   :  { %v589_v54 = vadd.f32 %v588_v39, %v587_v45  ;;  %v693_v39 = vld [vmem:[%s1802_s2 + $0xb0] sm:$0xff]  ;;  %v840_v45 = vsel %vm274_vm0, %v692_v30, 0.0 }
  0x3f   :  { %v337_v62 = vadd.f32 %v336_v48, %v335_v53  ;;  %v590_v48 = vsel %vm274_vm0, %v436_v35, 0.0  ;;  %v825_v50 = vadd.f32 %v824_v37, %v823_v41  ;;  %v438_v53 = vld [vmem:[%s1801_s1 + $0xe8] sm:$0xff]  ;;  %v362_v37 = vsel %vm274_vm0, %v61_v23, 0.0  ;;  %v63_v41 = vld [vmem:[%s1800_s0 + $0x170] sm:$0xff] }
  0x40   :  { %v591_v63 = vadd.f32 %v590_v48, %v589_v54  ;;  %v694_v48 = vld [vmem:[%s1802_s2 + $0xb8] sm:$0xff]  ;;  %v842_v54 = vsel %vm274_vm0, %v693_v39, 0.0 }
  0x41   :  { %v339_v7 = vadd.f32 %v338_v57, %v337_v62  ;;  %v592_v57 = vsel %vm274_vm0, %v437_v44, 0.0  ;;  %v827_v59 = vadd.f32 %v826_v46, %v825_v50  ;;  %v439_v62 = vld [vmem:[%s1801_s1 + $0xf0] sm:$0xff]  ;;  %v364_v46 = vsel %vm274_vm0, %v62_v32, 0.0  ;;  %v64_v50 = vld [vmem:[%s1800_s0 + $0x178] sm:$0xff] }
  0x42   :  { %v593_v8 = vadd.f32 %v592_v57, %v591_v63  ;;  %v695_v57 = vld [vmem:[%s1802_s2 + $0xc0] sm:$0xff]  ;;  %v844_v63 = vsel %vm274_vm0, %v694_v48, 0.0 }
  0x43   :  { %v341_v16 = vadd.f32 %v340_v2, %v339_v7  ;;  %v594_v2 = vsel %vm274_vm0, %v438_v53, 0.0  ;;  %v829_v4 = vadd.f32 %v828_v55, %v827_v59  ;;  %v440_v7 = vld [vmem:[%s1801_s1 + $0xf8] sm:$0xff]  ;;  %v366_v55 = vsel %vm274_vm0, %v63_v41, 0.0  ;;  %v65_v59 = vld [vmem:[%s1800_s0 + $0x180] sm:$0xff] }
  0x44   :  { %v595_v17 = vadd.f32 %v594_v2, %v593_v8  ;;  %v696_v2 = vld [vmem:[%s1802_s2 + $0xc8] sm:$0xff]  ;;  %v846_v8 = vsel %vm274_vm0, %v695_v57, 0.0 }
  0x45   :  { %v343_v25 = vadd.f32 %v342_v11, %v341_v16  ;;  %v596_v11 = vsel %vm274_vm0, %v439_v62, 0.0  ;;  %v831_v13 = vadd.f32 %v830_v0, %v829_v4  ;;  %v441_v16 = vld [vmem:[%s1801_s1 + $0x100] sm:$0xff]  ;;  %v368_v0 = vsel %vm274_vm0, %v64_v50, 0.0  ;;  %v66_v4 = vld [vmem:[%s1800_s0 + $0x188] sm:$0xff] }
  0x46   :  { %v597_v26 = vadd.f32 %v596_v11, %v595_v17  ;;  %v697_v11 = vld [vmem:[%s1802_s2 + $0xd0] sm:$0xff]  ;;  %v848_v17 = vsel %vm274_vm0, %v696_v2, 0.0 }
  0x47   :  { %v345_v34 = vadd.f32 %v344_v20, %v343_v25  ;;  %v598_v20 = vsel %vm274_vm0, %v440_v7, 0.0  ;;  %v833_v22 = vadd.f32 %v832_v9, %v831_v13  ;;  %v442_v25 = vld [vmem:[%s1801_s1 + $0x108] sm:$0xff]  ;;  %v370_v9 = vsel %vm274_vm0, %v65_v59, 0.0  ;;  %v67_v13 = vld [vmem:[%s1800_s0 + $0x190] sm:$0xff] }
  0x48   :  { %v599_v35 = vadd.f32 %v598_v20, %v597_v26  ;;  %v698_v20 = vld [vmem:[%s1802_s2 + $0xd8] sm:$0xff]  ;;  %v850_v26 = vsel %vm274_vm0, %v697_v11, 0.0 }
  0x49   :  { %v347_v43 = vadd.f32 %v346_v29, %v345_v34  ;;  %v600_v29 = vsel %vm274_vm0, %v441_v16, 0.0  ;;  %v835_v31 = vadd.f32 %v834_v18, %v833_v22  ;;  %v443_v34 = vld [vmem:[%s1801_s1 + $0x110] sm:$0xff]  ;;  %v372_v18 = vsel %vm274_vm0, %v66_v4, 0.0  ;;  %v68_v22 = vld [vmem:[%s1800_s0 + $0x198] sm:$0xff] }
  0x4a   :  { %v601_v44 = vadd.f32 %v600_v29, %v599_v35  ;;  %v699_v29 = vld [vmem:[%s1802_s2 + $0xe0] sm:$0xff]  ;;  %v852_v35 = vsel %vm274_vm0, %v698_v20, 0.0  ;;  %v705_v20 = vld [vmem:[%s1802_s2 + $0x110] sm:$0xff] }
  0x4b   :  { %v349_v52 = vadd.f32 %v348_v38, %v347_v43  ;;  %v602_v38 = vsel %vm274_vm0, %v442_v25, 0.0  ;;  %v837_v40 = vadd.f32 %v836_v27, %v835_v31  ;;  %v444_v43 = vld [vmem:[%s1801_s1 + $0x118] sm:$0xff]  ;;  %v374_v27 = vsel %vm274_vm0, %v67_v13, 0.0  ;;  %v69_v31 = vld [vmem:[%s1800_s0 + $0x1a0] sm:$0xff] }
  0x4c   :  { %v603_v53 = vadd.f32 %v602_v38, %v601_v44  ;;  %v700_v38 = vld [vmem:[%s1802_s2 + $0xe8] sm:$0xff]  ;;  %v854_v44 = vsel %vm274_vm0, %v699_v29, 0.0  ;;  %v706_v29 = vld [vmem:[%s1802_s2 + $0x118] sm:$0xff] }
  0x4d   :  { %v351_v61 = vadd.f32 %v350_v47, %v349_v52  ;;  %v604_v47 = vsel %vm274_vm0, %v443_v34, 0.0  ;;  %v839_v49 = vadd.f32 %v838_v36, %v837_v40  ;;  %v445_v52 = vld [vmem:[%s1801_s1 + $0x120] sm:$0xff]  ;;  %v376_v36 = vsel %vm274_vm0, %v68_v22, 0.0  ;;  %v70_v40 = vld [vmem:[%s1800_s0 + $0x1a8] sm:$0xff]  ;;  %v75_v22 = vld [vmem:[%s1800_s0 + $0x1d0] sm:$0xff] }
  0x4e   :  { %v605_v62 = vadd.f32 %v604_v47, %v603_v53  ;;  %v701_v47 = vld [vmem:[%s1802_s2 + $0xf0] sm:$0xff]  ;;  %v856_v53 = vsel %vm274_vm0, %v700_v38, 0.0 }
  0x4f   :  { %v353_v6 = vadd.f32 %v352_v56, %v351_v61  ;;  %v606_v56 = vsel %vm274_vm0, %v444_v43, 0.0  ;;  %v841_v58 = vadd.f32 %v840_v45, %v839_v49  ;;  %v446_v61 = vld [vmem:[%s1801_s1 + $0x128] sm:$0xff]  ;;  %v378_v45 = vsel %vm274_vm0, %v69_v31, 0.0  ;;  %v71_v49 = vld [vmem:[%s1800_s0 + $0x1b0] sm:$0xff]  ;;  %v76_v31 = vld [vmem:[%s1800_s0 + $0x1d8] sm:$0xff] }
  0x50   :  { %v607_v7 = vadd.f32 %v606_v56, %v605_v62  ;;  %v702_v56 = vld [vmem:[%s1802_s2 + $0xf8] sm:$0xff]  ;;  %v858_v62 = vsel %vm274_vm0, %v701_v47, 0.0  ;;  %v708_v47 = vld [vmem:[%s1802_s2 + $0x128] sm:$0xff] }
  0x51   :  { %v355_v15 = vadd.f32 %v354_v1, %v353_v6  ;;  %v608_v1 = vsel %vm274_vm0, %v445_v52, 0.0  ;;  %v843_v3 = vadd.f32 %v842_v54, %v841_v58  ;;  %v447_v6 = vld [vmem:[%s1801_s1 + $0x130] sm:$0xff]  ;;  %v380_v54 = vsel %vm274_vm0, %v70_v40, 0.0  ;;  %v72_v58 = vld [vmem:[%s1800_s0 + $0x1b8] sm:$0xff] }
  0x52   :  { %v609_v16 = vadd.f32 %v608_v1, %v607_v7  ;;  %v703_v1 = vld [vmem:[%s1802_s2 + $0x100] sm:$0xff]  ;;  %v860_v7 = vsel %vm274_vm0, %v702_v56, 0.0  ;;  %v709_v56 = vld [vmem:[%s1802_s2 + $0x130] sm:$0xff] }
  0x53   :  { %v357_v24 = vadd.f32 %v356_v10, %v355_v15  ;;  %v610_v10 = vsel %vm274_vm0, %v446_v61, 0.0  ;;  %v845_v12 = vadd.f32 %v844_v63, %v843_v3  ;;  %v448_v15 = vld [vmem:[%s1801_s1 + $0x138] sm:$0xff]  ;;  %v382_v63 = vsel %vm274_vm0, %v71_v49, 0.0  ;;  %v73_v3 = vld [vmem:[%s1800_s0 + $0x1c0] sm:$0xff] }
  0x54   :  { %v611_v25 = vadd.f32 %v610_v10, %v609_v16  ;;  %v704_v10 = vld [vmem:[%s1802_s2 + $0x108] sm:$0xff]  ;;  %v862_v16 = vsel %vm274_vm0, %v703_v1, 0.0  ;;  %v77_v49 = vld [vmem:[%s1800_s0 + $0x1e0] sm:$0xff] }
  0x55   :  { %v359_v33 = vadd.f32 %v358_v19, %v357_v24  ;;  %v612_v19 = vsel %vm274_vm0, %v447_v6, 0.0  ;;  %v847_v21 = vadd.f32 %v846_v8, %v845_v12  ;;  %v449_v24 = vld [vmem:[%s1801_s1 + $0x140] sm:$0xff]  ;;  %v384_v8 = vsel %vm274_vm0, %v72_v58, 0.0  ;;  %v74_v12 = vld [vmem:[%s1800_s0 + $0x1c8] sm:$0xff] }
  0x56   :  { %v613_v34 = vadd.f32 %v612_v19, %v611_v25 }
  0x57   :  { %v361_v42 = vadd.f32 %v360_v28, %v359_v33  ;;  %v614_v28 = vsel %vm274_vm0, %v448_v15, 0.0  ;;  %v849_v30 = vadd.f32 %v848_v17, %v847_v21  ;;  %v450_v33 = vld [vmem:[%s1801_s1 + $0x148] sm:$0xff]  ;;  %v81_v17 = vlaneseq }
  0x58   :  { %v615_v43 = vadd.f32 %v614_v28, %v613_v34 }
  0x59   :  { %v363_v51 = vadd.f32 %v362_v37, %v361_v42  ;;  %v616_v37 = vsel %vm274_vm0, %v449_v24, 0.0  ;;  %v851_v39 = vadd.f32 %v850_v26, %v849_v30  ;;  %v451_v42 = vld [vmem:[%s1801_s1 + $0x150] sm:$0xff]  ;;  %v456_v24 = vld [vmem:[%s1801_s1 + $0x178] sm:$0xff]  ;;  %v864_v26 = vsel %vm274_vm0, %v704_v10, 0.0 }
  0x5a   :  { %v617_v52 = vadd.f32 %v616_v37, %v615_v43  ;;  %v390_v37 = vsel %vm274_vm0, %v75_v22, 0.0  ;;  %v630_v38 = vsel %vm274_vm0, %v456_v24, 0.0 }
  0x5b   :  { %v365_v60 = vadd.f32 %v364_v46, %v363_v51  ;;  %v618_v46 = vsel %vm274_vm0, %v450_v33, 0.0  ;;  %v853_v48 = vadd.f32 %v852_v35, %v851_v39  ;;  %v452_v51 = vld [vmem:[%s1801_s1 + $0x158] sm:$0xff]  ;;  %v457_v33 = vld [vmem:[%s1801_s1 + $0x180] sm:$0xff]  ;;  %v866_v35 = vsel %vm274_vm0, %v705_v20, 0.0 }
  0x5c   :  { %v619_v61 = vadd.f32 %v618_v46, %v617_v52  ;;  %v707_v39 = vld [vmem:[%s1802_s2 + $0x120] sm:$0xff]  ;;  %v632_v46 = vsel %vm274_vm0, %v457_v33, 0.0 }
  0x5d   :  { %v367_v5 = vadd.f32 %v366_v55, %v365_v60  ;;  %v620_v55 = vsel %vm274_vm0, %v451_v42, 0.0  ;;  %v855_v57 = vadd.f32 %v854_v44, %v853_v48  ;;  %v453_v60 = vld [vmem:[%s1801_s1 + $0x160] sm:$0xff]  ;;  %v458_v42 = vld [vmem:[%s1801_s1 + $0x188] sm:$0xff]  ;;  %v868_v44 = vsel %vm274_vm0, %v706_v29, 0.0 }
  0x5e   :  { %v621_v6 = vadd.f32 %v620_v55, %v619_v61  ;;  %v634_v55 = vsel %vm274_vm0, %v458_v42, 0.0  ;;  %v872_v61 = vsel %vm274_vm0, %v708_v47, 0.0  ;;  %v465_v33 = vld [vmem:[%s1801_s1 + $0x1c0] sm:$0xff] }
  0x5f   :  { %v369_v14 = vadd.f32 %v368_v0, %v367_v5  ;;  %v622_v0 = vsel %vm274_vm0, %v452_v51, 0.0  ;;  %v857_v2 = vadd.f32 %v856_v53, %v855_v57  ;;  %v454_v5 = vld [vmem:[%s1801_s1 + $0x168] sm:$0xff]  ;;  %v459_v51 = vld [vmem:[%s1801_s1 + $0x190] sm:$0xff]  ;;  %v870_v53 = vsel %vm274_vm0, %v707_v39, 0.0 }
  0x60   :  { %v623_v15 = vadd.f32 %v622_v0, %v621_v6  ;;  %v626_v19 = vsel %vm274_vm0, %v454_v5, 0.0  ;;  %v710_v0 = vld [vmem:[%s1802_s2 + $0x138] sm:$0xff]  ;;  %v874_v5 = vsel %vm274_vm0, %v709_v56, 0.0  ;;  %v79_v6 = vld [vmem:[%s1800_s0 + $0x1f0] sm:$0xff] }
  0x61   :  { %v371_v23 = vadd.f32 %v370_v9, %v369_v14  ;;  %v624_v9 = vsel %vm274_vm0, %v453_v60, 0.0  ;;  %v859_v11 = vadd.f32 %v858_v62, %v857_v2  ;;  %v455_v14 = vld [vmem:[%s1801_s1 + $0x170] sm:$0xff]  ;;  %v394_v62 = vsel %vm274_vm0, %v77_v49, 0.0  ;;  %v78_v2 = vld [vmem:[%s1800_s0 + $0x1e8] sm:$0xff] }
  0x62   :  { %v625_v25 = vadd.f32 %v624_v9, %v623_v15  ;;  %v628_v28 = vsel %vm274_vm0, %v455_v14, 0.0  ;;  %v396_v14 = vsel %vm274_vm0, %v78_v2, 0.0 }
  0x63   :  { %v373_v32 = vadd.f32 %v372_v18, %v371_v23  ;;  %v386_v18 = vsel %vm274_vm0, %v73_v3, 0.0  ;;  %v861_v21 = vadd.f32 %v860_v7, %v859_v11  ;;  %v461_v3 = vld [vmem:[%s1801_s1 + $0x1a0] sm:$0xff]  ;;  %v462_v11 = vld [vmem:[%s1801_s1 + $0x1a8] sm:$0xff] }
  0x64   :  { %v627_v34 = vadd.f32 %v626_v19, %v625_v25  ;;  %v640_v15 = vsel %vm274_vm0, %v461_v3, 0.0  ;;  %v463_v19 = vld [vmem:[%s1801_s1 + $0x1b0] sm:$0xff]  ;;  %v642_v22 = vsel %vm274_vm0, %v462_v11, 0.0 }
  0x65   :  { %v375_v41 = vadd.f32 %v374_v27, %v373_v32  ;;  %v388_v27 = vsel %vm274_vm0, %v74_v12, 0.0  ;;  %v863_v30 = vadd.f32 %v862_v16, %v861_v21  ;;  %v712_v16 = vld [vmem:[%s1802_s2 + $0x148] sm:$0xff] }
  0x66   :  { %v629_v43 = vadd.f32 %v628_v28, %v627_v34  ;;  %v880_v28 = vsel %vm274_vm0, %v712_v16, 0.0 }
  0x67   :  { %v377_v50 = vadd.f32 %v376_v36, %v375_v41  ;;  %v82_v36 = vshrl.u32 %v81_v17, 7  ;;  %v865_v40 = vadd.f32 %v864_v26, %v863_v30  ;;  %v464_v26 = vld [vmem:[%s1801_s1 + $0x1b8] sm:$0xff]  ;;  %v644_v30 = vsel %vm274_vm0, %v463_v19, 0.0 }
  0x68   :  { %v631_v52 = vadd.f32 %v630_v38, %v629_v43  ;;  %v648_v43 = vsel %vm274_vm0, %v465_v33, 0.0  ;;  %v725_v33 = vld [vmem:[%s1802_s2 + $0x1b0] sm:$0xff] }
  0x69   :  { %v379_v59 = vadd.f32 %v378_v45, %v377_v50  ;;  %v392_v45 = vsel %vm274_vm0, %v76_v31, 0.0  ;;  %v867_v48 = vadd.f32 %v866_v35, %v865_v40  ;;  %v714_v31 = vld [vmem:[%s1802_s2 + $0x158] sm:$0xff]  ;;  %v466_v40 = vld [vmem:[%s1801_s1 + $0x1c8] sm:$0xff] }
  0x6a   :  { %v633_v60 = vadd.f32 %v632_v46, %v631_v52  ;;  %v884_v42 = vsel %vm274_vm0, %v714_v31, 0.0  ;;  %v467_v46 = vld [vmem:[%s1801_s1 + $0x1d0] sm:$0xff]  ;;  %v650_v49 = vsel %vm274_vm0, %v466_v40, 0.0 }
  0x6b   :  { %v381_v4 = vadd.f32 %v380_v54, %v379_v59  ;;  %v1622_v54 = vadd.s32 496, %v82_v36  ;;  %v869_v57 = vadd.f32 %v868_v44, %v867_v48  ;;  %v460_v59 = vld [vmem:[%s1801_s1 + $0x198] sm:$0xff]  ;;  %v646_v36 = vsel %vm274_vm0, %v464_v26, 0.0  ;;  %v716_v44 = vld [vmem:[%s1802_s2 + $0x168] sm:$0xff] }
  0x6c   :  { %v638_v7 = vsel %vm274_vm0, %v460_v59, 0.0  ;;  %v888_v56 = vsel %vm274_vm0, %v716_v44, 0.0 }
  0x6d   :  { %v383_v13 = vadd.f32 %v382_v63, %v381_v4  ;;  %v636_v63 = vsel %vm274_vm0, %v459_v51, 0.0  ;;  %v871_v1 = vadd.f32 %v870_v53, %v869_v57  ;;  %v635_v4 = vadd.f32 %v634_v55, %v633_v60  ;;  %v468_v53 = vld [vmem:[%s1801_s1 + $0x1d8] sm:$0xff]  ;;  %v469_v60 = vld [vmem:[%s1801_s1 + $0x1e0] sm:$0xff] }
  0x6e   :  { %vm208_vm1 = vcmp.lt.s32.totalorder %v1622_v54, 500  ;;  %v652_v57 = vsel %vm274_vm0, %v467_v46, 0.0 }
  0x6f   :  { %v385_v23 = vadd.f32 %v384_v8, %v383_v13  ;;  %v711_v8 = vld [vmem:[%s1802_s2 + $0x140] sm:$0xff]  ;;  %v873_v9 = vadd.f32 %v872_v61, %v871_v1  ;;  %v637_v12 = vadd.f32 %v636_v63, %v635_v4  ;;  %v876_v13 = vsel %vm274_vm0, %v710_v0, 0.0  ;;  %v471_v63 = vld [vmem:[%s1801_s1 + $0x1f0] sm:$0xff]  ;;  %v470_v4 = vld [vmem:[%s1801_s1 + $0x1e8] sm:$0xff] }
  0x70   :  { %v878_v21 = vsel %vm274_vm0, %v711_v8, 0.0  ;;  %v654_v0 = vsel %vm274_vm0, %v468_v53, 0.0  ;;  %v719_v1 = vld [vmem:[%s1802_s2 + $0x180] sm:$0xff]  ;;  %v720_v8 = vld [vmem:[%s1802_s2 + $0x188] sm:$0xff] }
  0x71   :  { %v387_v32 = vadd.f32 %v386_v18, %v385_v23  ;;  %v875_v17 = vadd.f32 %v874_v5, %v873_v9  ;;  %v272_v18 = vsel %vm208_vm1, %v79_v6, 0.0  ;;  %v639_v20 = vadd.f32 %v638_v7, %v637_v12  ;;  %v713_v23 = vld [vmem:[%s1802_s2 + $0x150] sm:$0xff] }
  0x72   :  { %v398_v29 = vsel %vm274_vm0, %v272_v18, 0.0  ;;  %v882_v35 = vsel %vm274_vm0, %v713_v23, 0.0  ;;  %v656_v7 = vsel %vm274_vm0, %v469_v60, 0.0  ;;  %v894_v12 = vsel %vm274_vm0, %v719_v1, 0.0 }
  0x73   :  { %v389_v41 = vadd.f32 %v388_v27, %v387_v32  ;;  %v877_v24 = vadd.f32 %v876_v13, %v875_v17  ;;  %v641_v27 = vadd.f32 %v640_v15, %v639_v20  ;;  %v658_v13 = vsel %vm274_vm0, %v470_v4, 0.0  ;;  %v722_v20 = vld [vmem:[%s1802_s2 + $0x198] sm:$0xff] }
  0x74   :  { %v896_v18 = vsel %vm274_vm0, %v720_v8, 0.0 }
  0x75   :  { %v391_v50 = vadd.f32 %v390_v37, %v389_v41  ;;  %v879_v32 = vadd.f32 %v878_v21, %v877_v24  ;;  %v643_v34 = vadd.f32 %v642_v22, %v641_v27  ;;  %v715_v37 = vld [vmem:[%s1802_s2 + $0x160] sm:$0xff] }
  0x76   :  { %v886_v48 = vsel %vm274_vm0, %v715_v37, 0.0  ;;  %v723_v24 = vld [vmem:[%s1802_s2 + $0x1a0] sm:$0xff] }
  0x77   :  { %v393_v58 = vadd.f32 %v392_v45, %v391_v50  ;;  %v881_v38 = vadd.f32 %v880_v28, %v879_v32  ;;  %v645_v41 = vadd.f32 %v644_v30, %v643_v34  ;;  %v717_v50 = vld [vmem:[%s1802_s2 + $0x170] sm:$0xff]  ;;  %v900_v28 = vsel %vm274_vm0, %v722_v20, 0.0 }
  0x78   :  { %v902_v32 = vsel %vm274_vm0, %v723_v24, 0.0 }
  0x79   :  { %v395_v10 = vadd.f32 %v394_v62, %v393_v58  ;;  %v883_v45 = vadd.f32 %v882_v35, %v881_v38  ;;  %v647_v47 = vadd.f32 %v646_v36, %v645_v41  ;;  %v718_v58 = vld [vmem:[%s1802_s2 + $0x178] sm:$0xff]  ;;  %v890_v62 = vsel %vm274_vm0, %v717_v50, 0.0 }
  0x7a   :  { %v892_v6 = vsel %vm274_vm0, %v718_v58, 0.0  ;;  %v726_v38 = vld [vmem:[%s1802_s2 + $0x1b8] sm:$0xff]  ;;  %v906_v41 = vsel %vm274_vm0, %v725_v33, 0.0 }
  0x7b   :  { %v397_v25 = vadd.f32 %v396_v14, %v395_v10  ;;  %v885_v51 = vadd.f32 %v884_v42, %v883_v45  ;;  %v649_v55 = vadd.f32 %v648_v43, %v647_v47  ;;  %v535_v10 = vsel %vm208_vm1, %v471_v63, 0.0  ;;  %v721_v14 = vld [vmem:[%s1802_s2 + $0x190] sm:$0xff]  ;;  %v727_v42 = vld [vmem:[%s1802_s2 + $0x1c0] sm:$0xff]  ;;  %v728_v47 = vld [vmem:[%s1802_s2 + $0x1c8] sm:$0xff] }
  0x7c   :  { %v660_v19 = vsel %vm274_vm0, %v535_v10, 0.0  ;;  %v898_v23 = vsel %vm274_vm0, %v721_v14, 0.0  ;;  %v908_v46 = vsel %vm274_vm0, %v726_v38, 0.0  ;;  %v910_v50 = vsel %vm274_vm0, %v727_v42, 0.0  ;;  %v733_v63 = vld [vmem:[%s1802_s2 + $0x1f0] sm:$0xff] }
  0x7d   :  { %v399_v39 = vadd.f32 %v398_v29, %v397_v25  ;;  %v887_v59 = vadd.f32 %v886_v48, %v885_v51  ;;  %v651_v61 = vadd.f32 %v650_v49, %v649_v55  ;;  %v724_v29 = vld [vmem:[%s1802_s2 + $0x1a8] sm:$0xff]  ;;  %v729_v51 = vld [vmem:[%s1802_s2 + $0x1d0] sm:$0xff] }
  0x7e   :  { %v904_v37 = vsel %vm274_vm0, %v724_v29, 0.0  ;;  %v914_v60 = vsel %vm274_vm0, %v729_v51, 0.0 }
  0x7f   :  { %v402_v52 = vrot.slane %v399_v39, 4  ;;  %v889_v2 = vadd.f32 %v888_v56, %v887_v59  ;;  %v653_v5 = vadd.f32 %v652_v57, %v651_v61  ;;  %v912_v56 = vsel %vm274_vm0, %v728_v47, 0.0  ;;  %v730_v57 = vld [vmem:[%s1802_s2 + $0x1d8] sm:$0xff]  ;;  %v731_v61 = vld [vmem:[%s1802_s2 + $0x1e0] sm:$0xff] }
  0x80   :  { %v918_v4 = vsel %vm274_vm0, %v731_v61, 0.0 }
  0x81   :  { %v403_v3 = vadd.f32 %v402_v52, %v399_v39  ;;  %v891_v9 = vadd.f32 %v890_v62, %v889_v2  ;;  %v655_v11 = vadd.f32 %v654_v0, %v653_v5  ;;  %v916_v0 = vsel %vm274_vm0, %v730_v57, 0.0  ;;  %v732_v2 = vld [vmem:[%s1802_s2 + $0x1e8] sm:$0xff] }
  0x82   :  { %v797_v5 = vsel %vm208_vm1, %v733_v63, 0.0 }
  0x83   :  { %v893_v15 = vadd.f32 %v892_v6, %v891_v9  ;;  %v404_v16 = vrot.slane %v403_v3, 2  ;;  %v657_v17 = vadd.f32 %v656_v7, %v655_v11  ;;  %v920_v7 = vsel %vm274_vm0, %v732_v2, 0.0 }
  0x84   :  { %v922_v9 = vsel %vm274_vm0, %v797_v5, 0.0 }
  0x85   :  { %v895_v21 = vadd.f32 %v894_v12, %v893_v15  ;;  %v659_v22 = vadd.f32 %v658_v13, %v657_v17  ;;  %v405_v26 = vadd.f32 %v404_v16, %v403_v3 }
  0x87   :  { %v897_v25 = vadd.f32 %v896_v18, %v895_v21  ;;  %v661_v27 = vadd.f32 %v660_v19, %v659_v22  ;;  %v406_v35 = vrot.slane %v405_v26, 1 }
  0x89   :  { %v899_v30 = vadd.f32 %v898_v23, %v897_v25  ;;  %v664_v31 = vrot.slane %v661_v27, 4  ;;  %v407_v44 = vadd.f32 %v406_v35, %v405_v26 }
  0x8b   :  { %v901_v34 = vadd.f32 %v900_v28, %v899_v30  ;;  %v665_v36 = vadd.f32 %v664_v31, %v661_v27  ;;  %v408_v53 = vmul.f32 0.002, %v407_v44 }
  0x8d   :  { %v903_v39 = vadd.f32 %v902_v32, %v901_v34  ;;  %v666_v40 = vrot.slane %v665_v36, 2 }
  0x8f   :  { %v905_v43 = vadd.f32 %v904_v37, %v903_v39  ;;  %v667_v45 = vadd.f32 %v666_v40, %v665_v36 }
  0x91   :  { %v907_v48 = vadd.f32 %v906_v41, %v905_v43  ;;  %v668_v49 = vrot.slane %v667_v45, 1 }
  0x93   :  { %v909_v52 = vadd.f32 %v908_v46, %v907_v48  ;;  %v669_v55 = vadd.f32 %v668_v49, %v667_v45 }
  0x95   :  { %v911_v58 = vadd.f32 %v910_v50, %v909_v52  ;;  %v670_v59 = vmul.f32 0.002, %v669_v55 }
  0x97   :  { %v913_v62 = vadd.f32 %v912_v56, %v911_v58  ;;  %v933_v1 = vmax.f32 %v408_v53, %v670_v59 }
  0x99   :  { %v915_v3 = vadd.f32 %v914_v60, %v913_v62 }
  0x9b   :  { %v917_v6 = vadd.f32 %v916_v0, %v915_v3 }
  0x9d   :  { %v919_v8 = vadd.f32 %v918_v4, %v917_v6 }
  0x9f   :  { %v921_v10 = vadd.f32 %v920_v7, %v919_v8 }
  0xa1   :  { %v923_v11 = vadd.f32 %v922_v9, %v921_v10 }
  0xa3   :  { %v926_v12 = vrot.slane %v923_v11, 4 }
  0xa5   :  { %v927_v13 = vadd.f32 %v926_v12, %v923_v11 }
  0xa7   :  { %v928_v14 = vrot.slane %v927_v13, 2 }
  0xa9   :  { %v929_v15 = vadd.f32 %v928_v14, %v927_v13 }
  0xab   :  { %v930_v16 = vrot.slane %v929_v15, 1 }
  0xad   :  { %v931_v17 = vadd.f32 %v930_v16, %v929_v15 }
  0xaf   :  { %v932_v18 = vmul.f32 0.002, %v931_v17 }
  0xb1   :  { %v934_v19 = vmax.f32 %v933_v1, %v932_v18 }
  0xb3   :  { %v935_v20 = vsub.f32 %v408_v53, %v934_v19  ;;  %v938_v21 = vsub.f32 %v670_v59, %v934_v19  ;;  %v941_v54 = vsub.f32 %v932_v18, %v934_v19 }
  0xb5   :  { %v936_v22 = vmul.f32 1.442695, %v935_v20  ;;  %v939_v23 = vmul.f32 1.442695, %v938_v21  ;;  %v942_v24 = vmul.f32 1.442695, %v941_v54 }
  0xb7   :  { %987 = vpow2.f32 %v936_v22 }
  0xb8   :  { %989 = vpow2.f32 %v939_v23 }
  0xb9   :  { %991 = vpow2.f32 %v942_v24 }
  0xc1   :  { %v988_v25 = vpop.eup %987 }
  0xc2   :  { %v990_v26 = vpop.eup %989 }
  0xc3   :  { %v992_v27 = vpop.eup %991  ;;  %v944_v28 = vadd.f32 %v990_v26, %v988_v25 }
  0xc5   :  { %v945_v29 = vadd.f32 %v992_v27, %v944_v28 }
  0xc7   :  { %993 = vrcp.f32 %v945_v29 }
  0xd1   :  { %v994_v30 = vpop.eup %993 }
  0xd2   :  { %v947_v31 = vmul.f32 %v994_v30, %v988_v25  ;;  %v964_v32 = vmul.f32 %v994_v30, %v992_v27  ;;  %v956_v33 = vmul.f32 %v994_v30, %v990_v26 }
  0xd4   :  { %950 = vperm.xlu0 %985, %v947_v31   ;;  %967 = vperm.xlu1 %986, %v964_v32  }
  0xd8   :  { %959 = vperm.xlu0 %985, %v956_v33  }
 0x153   :  { %v951_v34 = vpop.permute.xlu0 %950  ;;  %v968_v35 = vpop.permute.xlu1 %967 }
 0x154   :  { %955 = vst.msk [vmem:[%s1803_s3] sm:$0x1] %vm954_vm2, %v951_v34  ;;  %971 = vst.msk [vmem:[%s1804_s5] sm:$0x1] %vm954_vm2, %v968_v35 }
 0x157   :  { %v960_v36 = vpop.permute.xlu0 %959 }
 0x158   :  { %963 = vst.msk [vmem:[%s1805_s4] sm:$0x1] %vm954_vm2, %v960_v36 }

// kernel: mmgat_forward.15
= control target key start
LH: loop header
LB: loop body
LE: loop exit
PB: predicated region body
PF: predicated region fallthrough
CT: control target
= control target key end

     0   :  { %s1046_s21 = smov 0   ;;  %s1546_s0 = inlined_call_operand.vmem [shape: f32[1,64], index: 0, kind: input, shape index: {}]   ;;  %s1547_s1 = inlined_call_operand.vmem [shape: f32[1,64], index: 1, kind: input, shape index: {}]   ;;  %s1548_s2 = inlined_call_operand.vmem [shape: f32[1,64], index: 2, kind: input, shape index: {}]   ;;  %s1549_s3 = inlined_call_operand.vmem [shape: f32[512,64], index: 3, kind: input, shape index: {}]   ;;  %s1550_s4 = inlined_call_operand.vmem [shape: f32[512,64], index: 4, kind: input, shape index: {}]   ;;  %s1551_s5 = inlined_call_operand.vmem [shape: f32[512,64], index: 5, kind: input, shape index: {}]   ;;  %s1552_s6 = inlined_call_operand.vmem [shape: f32[512,64], index: 6, kind: output, shape index: {}]  }
   0x1 LB: > { %s913_s22 = sadd.s32 4294967295, %s1009_s21   ;;  %p917_p0 = scmp.ge.s32.totalorder %s1009_s21, 1  ;;  %s1009_s21 = sphi %s1046_s21, %s16_s21  }
   0x2   : > { %p235_p1 = scmp.lt.s32.totalorder %s1009_s21, 3 }
   0x4   : > { %p236_p2 = pnand %p917_p0, %p235_p1 }
   0x5   : > { %s918_s23 = sshll.u32 (!%p236_p2), %s913_s22, 5  ;;  %v1059_v0 = vld [vmem:[%s1546_s0] ss:$0 sm:$0xff] (!%p236_p2)  ;;  %vm608_vm0 = vcmask (!%p236_p2), 523264  }
   0x6   : > { %239 = sbr.rel (%p236_p2) target bundleno = 246 (0xf6), region = 44  ;;  %p276_p3 = scmp.lt.s32.totalorder (!%p236_p2), %s918_s23, 63  ;;  %v1064_v1 = vld [vmem:[%s1547_s1] ss:$0 sm:$0xff] (!%p236_p2) }
   0x7   : > { %v1081_v2 = vld [vmem:[%s1548_s2] ss:$0 sm:$0xff] (!%p236_p2) }
   0xd   : > { %s1554_s23 = smov (!%p276_p3, %s918_s23), 63 }
   0xe   : > { %s1054_s24 = sshll.u32 %s1554_s23, 3 }
   0xf   : > { %s1070_s7 = scalar_lea.vmem %s1549_s3, %s1054_s24  ;;  %s1076_s10 = scalar_lea.vmem %s1550_s4, %s1054_s24 }
  0x10   : > { %s1087_s15 = scalar_lea.vmem %s1551_s5, %s1054_s24  ;;  %v302_v3 = vld [vmem:[%s1070_s7 + $0x10] sm:$0xff]  ;;  %v300_v5 = vld [vmem:[%s1070_s7] sm:$0xff]  ;;  %v303_v15 = vld [vmem:[%s1070_s7 + $0x18] sm:$0xff]  ;;  %s1445_s18 = scalar_lea.vmem %s1552_s6, %s1054_s24 }
  0x11   : > { %v373_v4 = vld [vmem:[%s1076_s10 + $0x10] sm:$0xff]  ;;  %v340_v6 = vmul.f32 %v1059_v0, %v302_v3  ;;  %v338_v9 = vmul.f32 %v1059_v0, %v300_v5  ;;  %v371_v10 = vld [vmem:[%s1076_s10] sm:$0xff]  ;;  %v374_v16 = vld [vmem:[%s1076_s10 + $0x18] sm:$0xff]  ;;  %v341_v19 = vmul.f32 %v1059_v0, %v303_v15 }
  0x12   : > { %v411_v7 = vmul.f32 %v1064_v1, %v373_v4  ;;  %v476_v8 = vld [vmem:[%s1087_s15 + $0x10] sm:$0xff]  ;;  %v474_v11 = vld [vmem:[%s1087_s15] sm:$0xff]  ;;  %v409_v13 = vmul.f32 %v1064_v1, %v371_v10  ;;  %v477_v17 = vld [vmem:[%s1087_s15 + $0x18] sm:$0xff]  ;;  %v412_v20 = vmul.f32 %v1064_v1, %v374_v16 }
  0x13   : > { %v514_v12 = vmul.f32 %v1081_v2, %v476_v8  ;;  %v512_v14 = vmul.f32 %v1081_v2, %v474_v11  ;;  %v515_v21 = vmul.f32 %v1081_v2, %v477_v17  ;;  %v301_v22 = vld [vmem:[%s1070_s7 + $0x8] sm:$0xff]  ;;  %v304_v36 = vld [vmem:[%s1070_s7 + $0x20] sm:$0xff]  ;;  %v307_v43 = vld [vmem:[%s1070_s7 + $0x38] sm:$0xff] }
  0x14   : > { %v443_v18 = vadd.f32 %v411_v7, %v340_v6  ;;  %v372_v23 = vld [vmem:[%s1076_s10 + $0x8] sm:$0xff]  ;;  %v441_v25 = vadd.f32 %v409_v13, %v338_v9  ;;  %v339_v26 = vmul.f32 %v1059_v0, %v301_v22  ;;  %v444_v33 = vadd.f32 %v412_v20, %v341_v19  ;;  %v375_v37 = vld [vmem:[%s1076_s10 + $0x20] sm:$0xff]  ;;  %v378_v48 = vld [vmem:[%s1076_s10 + $0x38] sm:$0xff] }
  0x15   : > { %v475_v24 = vld [vmem:[%s1087_s15 + $0x8] sm:$0xff]  ;;  %v410_v27 = vmul.f32 %v1064_v1, %v372_v23  ;;  %v478_v38 = vld [vmem:[%s1087_s15 + $0x20] sm:$0xff]  ;;  %v342_v42 = vmul.f32 %v1059_v0, %v304_v36  ;;  %v413_v47 = vmul.f32 %v1064_v1, %v375_v37  ;;  %v481_v49 = vld [vmem:[%s1087_s15 + $0x38] sm:$0xff]  ;;  %v345_v53 = vmul.f32 %v1059_v0, %v307_v43 }
  0x16   : > { %v513_v28 = vmul.f32 %v1081_v2, %v475_v24  ;;  %v305_v29 = vld [vmem:[%s1070_s7 + $0x28] sm:$0xff]  ;;  %v1116_v32 = vadd.f32 %v514_v12, %v443_v18  ;;  %v1123_v39 = vadd.f32 %v512_v14, %v441_v25  ;;  %v1130_v45 = vadd.f32 %v515_v21, %v444_v33  ;;  %v306_v54 = vld [vmem:[%s1070_s7 + $0x30] sm:$0xff]  ;;  %v308_v11 = vld [vmem:[%s1070_s7 + $0x40] sm:$0xff] }
  0x17   : > { %v376_v30 = vld [vmem:[%s1076_s10 + $0x28] sm:$0xff]  ;;  %v343_v34 = vmul.f32 %v1059_v0, %v305_v29  ;;  %v442_v40 = vadd.f32 %v410_v27, %v339_v26  ;;  %v516_v52 = vmul.f32 %v1081_v2, %v478_v38  ;;  %v445_v58 = vadd.f32 %v413_v47, %v342_v42  ;;  %v377_v59 = vld [vmem:[%s1076_s10 + $0x30] sm:$0xff]  ;;  %v379_v16 = vld [vmem:[%s1076_s10 + $0x40] sm:$0xff] }
  0x18   : > { %v479_v31 = vld [vmem:[%s1087_s15 + $0x28] sm:$0xff]  ;;  %v414_v35 = vmul.f32 %v1064_v1, %v376_v30  ;;  %v578_v44 = vmul.f32 %v1116_v32, %v1116_v32  ;;  %v576_v50 = vmul.f32 %v1123_v39, %v1123_v39  ;;  %v579_v56 = vmul.f32 %v1130_v45, %v1130_v45  ;;  %v480_v60 = vld [vmem:[%s1087_s15 + $0x30] sm:$0xff]  ;;  %v482_v17 = vld [vmem:[%s1087_s15 + $0x40] sm:$0xff] }
  0x19   : > { %v517_v41 = vmul.f32 %v1081_v2, %v479_v31  ;;  %v1137_v51 = vadd.f32 %v513_v28, %v442_v40  ;;  %v416_v63 = vmul.f32 %v1064_v1, %v378_v48  ;;  %v519_v3 = vmul.f32 %v1081_v2, %v481_v49  ;;  %v309_v4 = vld [vmem:[%s1070_s7 + $0x48] sm:$0xff]  ;;  %v311_v22 = vld [vmem:[%s1070_s7 + $0x58] sm:$0xff]  ;;  %v310_v29 = vld [vmem:[%s1070_s7 + $0x50] sm:$0xff] }
  0x1a   : > { %v446_v46 = vadd.f32 %v414_v35, %v343_v34  ;;  %v615_v55 = vsel %vm608_vm0, %v578_v44, 0.0  ;;  %v609_v61 = vsel %vm608_vm0, %v576_v50, 0.0  ;;  %v380_v5 = vld [vmem:[%s1076_s10 + $0x48] sm:$0xff]  ;;  %v618_v6 = vsel %vm608_vm0, %v579_v56, 0.0  ;;  %v382_v23 = vld [vmem:[%s1076_s10 + $0x58] sm:$0xff]  ;;  %v381_v35 = vld [vmem:[%s1076_s10 + $0x50] sm:$0xff] }
  0x1b   : > { %616 = vadd.xlane.f32.xlu1 %v615_v55  ;;  %v577_v62 = vmul.f32 %v1137_v51, %v1137_v51  ;;  %610 = vadd.xlane.f32.xlu0 %v609_v61  ;;  %v1159_v8 = vadd.f32 %v516_v52, %v445_v58  ;;  %v344_v9 = vmul.f32 %v1059_v0, %v306_v54  ;;  %v483_v10 = vld [vmem:[%s1087_s15 + $0x48] sm:$0xff]  ;;  %v485_v28 = vld [vmem:[%s1087_s15 + $0x58] sm:$0xff]  ;;  %v312_v55 = vld [vmem:[%s1070_s7 + $0x60] sm:$0xff] }
  0x1c   : > { %v1145_v57 = vadd.f32 %v517_v41, %v446_v46  ;;  %v448_v13 = vadd.f32 %v416_v63, %v345_v53  ;;  %v415_v14 = vmul.f32 %v1064_v1, %v377_v59  ;;  %v518_v15 = vmul.f32 %v1081_v2, %v480_v60  ;;  %v484_v41 = vld [vmem:[%s1087_s15 + $0x50] sm:$0xff]  ;;  %v313_v42 = vld [vmem:[%s1070_s7 + $0x68] sm:$0xff]  ;;  %v383_v61 = vld [vmem:[%s1076_s10 + $0x60] sm:$0xff] }
  0x1d   : > { %v612_v12 = vsel %vm608_vm0, %v577_v62, 0.0  ;;  %v580_v19 = vmul.f32 %v1159_v8, %v1159_v8  ;;  %v347_v20 = vmul.f32 %v1059_v0, %v309_v4  ;;  %v418_v21 = vmul.f32 %v1064_v1, %v380_v5  ;;  %v384_v48 = vld [vmem:[%s1076_s10 + $0x68] sm:$0xff]  ;;  %v486_v5 = vld [vmem:[%s1087_s15 + $0x60] sm:$0xff] }
  0x1e   : > { %v581_v7 = vmul.f32 %v1145_v57, %v1145_v57  ;;  %v1176_v24 = vadd.f32 %v519_v3, %v448_v13  ;;  %v447_v25 = vadd.f32 %v415_v14, %v344_v9  ;;  %v521_v26 = vmul.f32 %v1081_v2, %v483_v10  ;;  %v487_v54 = vld [vmem:[%s1087_s15 + $0x68] sm:$0xff] }
  0x1f   : > { %619 = vadd.xlane.f32.xlu1 %v618_v6  ;;  %v346_v27 = vmul.f32 %v1059_v0, %v308_v11  ;;  %613 = vadd.xlane.f32.xlu0 %v612_v12  ;;  %v621_v30 = vsel %vm608_vm0, %v580_v19, 0.0  ;;  %v450_v31 = vadd.f32 %v418_v21, %v347_v20  ;;  %v417_v33 = vmul.f32 %v1064_v1, %v379_v16  ;;  %v315_v6 = vld [vmem:[%s1070_s7 + $0x78] sm:$0xff] }
  0x20   : > { %v624_v18 = vsel %vm608_vm0, %v581_v7, 0.0  ;;  %v520_v34 = vmul.f32 %v1081_v2, %v482_v17  ;;  %v583_v36 = vmul.f32 %v1176_v24, %v1176_v24  ;;  %v1188_v37 = vadd.f32 %v518_v15, %v447_v25  ;;  %v386_v7 = vld [vmem:[%s1076_s10 + $0x78] sm:$0xff]  ;;  %v314_v17 = vld [vmem:[%s1070_s7 + $0x70] sm:$0xff] }
  0x21   : > { %v349_v38 = vmul.f32 %v1059_v0, %v311_v22  ;;  %v420_v40 = vmul.f32 %v1064_v1, %v382_v23  ;;  %v1194_v43 = vadd.f32 %v521_v26, %v450_v31  ;;  %v449_v44 = vadd.f32 %v417_v33, %v346_v27  ;;  %v489_v16 = vld [vmem:[%s1087_s15 + $0x78] sm:$0xff]  ;;  %v488_v23 = vld [vmem:[%s1087_s15 + $0x70] sm:$0xff] }
  0x22   : > { %v523_v46 = vmul.f32 %v1081_v2, %v485_v28  ;;  %v348_v47 = vmul.f32 %v1059_v0, %v310_v29  ;;  %v630_v49 = vsel %vm608_vm0, %v583_v36, 0.0  ;;  %v582_v50 = vmul.f32 %v1188_v37, %v1188_v37  ;;  %v317_v29 = vld [vmem:[%s1070_s7 + $0x88] sm:$0xff] }
  0x23   : > { %625 = vadd.xlane.f32.xlu1 %v624_v18  ;;  %v452_v52 = vadd.f32 %v420_v40, %v349_v38  ;;  %v419_v53 = vmul.f32 %v1064_v1, %v381_v35  ;;  %622 = vadd.xlane.f32.xlu0 %v621_v30  ;;  %v585_v56 = vmul.f32 %v1194_v43, %v1194_v43  ;;  %v385_v18 = vld [vmem:[%s1076_s10 + $0x70] sm:$0xff]  ;;  %v388_v30 = vld [vmem:[%s1076_s10 + $0x88] sm:$0xff]  ;;  %v316_v38 = vld [vmem:[%s1070_s7 + $0x80] sm:$0xff] }
  0x24   : > { %v1207_v58 = vadd.f32 %v520_v34, %v449_v44  ;;  %v522_v59 = vmul.f32 %v1081_v2, %v484_v41  ;;  %v351_v60 = vmul.f32 %v1059_v0, %v313_v42  ;;  %v627_v62 = vsel %vm608_vm0, %v582_v50, 0.0  ;;  %v491_v36 = vld [vmem:[%s1087_s15 + $0x88] sm:$0xff] }
  0x25   : > { %v1213_v63 = vadd.f32 %v523_v46, %v452_v52  ;;  %v451_v3 = vadd.f32 %v419_v53, %v348_v47  ;;  %v422_v4 = vmul.f32 %v1064_v1, %v384_v48  ;;  %v525_v10 = vmul.f32 %v1081_v2, %v487_v54  ;;  %v387_v46 = vld [vmem:[%s1076_s10 + $0x80] sm:$0xff]  ;;  %v319_v53 = vld [vmem:[%s1070_s7 + $0x98] sm:$0xff] }
  0x26   : > { %v584_v9 = vmul.f32 %v1207_v58, %v1207_v58  ;;  %v350_v11 = vmul.f32 %v1059_v0, %v312_v55  ;;  %v421_v15 = vmul.f32 %v1064_v1, %v383_v61  ;;  %v636_v19 = vsel %vm608_vm0, %v585_v56, 0.0  ;;  %v490_v52 = vld [vmem:[%s1087_s15 + $0x80] sm:$0xff]  ;;  %v390_v54 = vld [vmem:[%s1076_s10 + $0x98] sm:$0xff] }
  0x27   : > { %631 = vadd.xlane.f32.xlu1 %v630_v49  ;;  %v587_v12 = vmul.f32 %v1213_v63, %v1213_v63  ;;  %v1225_v13 = vadd.f32 %v522_v59, %v451_v3  ;;  %v454_v14 = vadd.f32 %v422_v4, %v351_v60  ;;  %628 = vadd.xlane.f32.xlu0 %v627_v62 }
  0x28   : > { %v524_v20 = vmul.f32 %v1081_v2, %v486_v5  ;;  %v353_v21 = vmul.f32 %v1059_v0, %v315_v6  ;;  %v424_v22 = vmul.f32 %v1064_v1, %v386_v7  ;;  %v633_v25 = vsel %vm608_vm0, %v584_v9, 0.0  ;;  %v493_v5 = vld [vmem:[%s1087_s15 + $0x98] sm:$0xff]  ;;  %v318_v6 = vld [vmem:[%s1070_s7 + $0x90] sm:$0xff] }
  0x29   : > { %v586_v26 = vmul.f32 %v1225_v13, %v1225_v13  ;;  %v1239_v27 = vadd.f32 %v525_v10, %v454_v14  ;;  %v453_v28 = vadd.f32 %v421_v15, %v350_v11  ;;  %v527_v33 = vmul.f32 %v1081_v2, %v489_v16  ;;  %v389_v7 = vld [vmem:[%s1076_s10 + $0x90] sm:$0xff] }
  0x2a   : > { %v456_v31 = vadd.f32 %v424_v22, %v353_v21  ;;  %v352_v34 = vmul.f32 %v1059_v0, %v314_v17  ;;  %v423_v35 = vmul.f32 %v1064_v1, %v385_v18  ;;  %v642_v40 = vsel %vm608_vm0, %v587_v12, 0.0  ;;  %v492_v14 = vld [vmem:[%s1087_s15 + $0x90] sm:$0xff] }
  0x2b   : > { %637 = vadd.xlane.f32.xlu1 %v636_v19  ;;  %v589_v41 = vmul.f32 %v1239_v27, %v1239_v27  ;;  %v1251_v42 = vadd.f32 %v524_v20, %v453_v28  ;;  %v526_v44 = vmul.f32 %v1081_v2, %v488_v23  ;;  %634 = vadd.xlane.f32.xlu0 %v633_v25  ;;  %v639_v55 = vsel %vm608_vm0, %v586_v26, 0.0  ;;  %v321_v19 = vld [vmem:[%s1070_s7 + $0xa8] sm:$0xff]  ;;  %v320_v28 = vld [vmem:[%s1070_s7 + $0xa0] sm:$0xff] }
  0x2c   : > { %v1255_v47 = vadd.f32 %v527_v33, %v456_v31  ;;  %v455_v48 = vadd.f32 %v423_v35, %v352_v34  ;;  %v355_v49 = vmul.f32 %v1059_v0, %v317_v29  ;;  %v426_v50 = vmul.f32 %v1064_v1, %v388_v30  ;;  %v392_v20 = vld [vmem:[%s1076_s10 + $0xa8] sm:$0xff]  ;;  %v391_v33 = vld [vmem:[%s1076_s10 + $0xa0] sm:$0xff] }
  0x2d   : > { %v588_v56 = vmul.f32 %v1251_v42, %v1251_v42  ;;  %v529_v59 = vmul.f32 %v1081_v2, %v491_v36  ;;  %v354_v60 = vmul.f32 %v1059_v0, %v316_v38  ;;  %v648_v61 = vsel %vm608_vm0, %v589_v41, 0.0  ;;  %v495_v26 = vld [vmem:[%s1087_s15 + $0xa8] sm:$0xff]  ;;  %v323_v41 = vld [vmem:[%s1070_s7 + $0xb8] sm:$0xff] }
  0x2e   : > { %v1268_v62 = vadd.f32 %v526_v44, %v455_v48  ;;  %v458_v3 = vadd.f32 %v426_v50, %v355_v49  ;;  %v425_v4 = vmul.f32 %v1064_v1, %v387_v46  ;;  %v591_v9 = vmul.f32 %v1255_v47, %v1255_v47  ;;  %v394_v44 = vld [vmem:[%s1076_s10 + $0xb8] sm:$0xff] }
  0x2f   : > { %643 = vadd.xlane.f32.xlu1 %v642_v40  ;;  %v528_v10 = vmul.f32 %v1081_v2, %v490_v52  ;;  %v357_v11 = vmul.f32 %v1059_v0, %v319_v53  ;;  %v428_v12 = vmul.f32 %v1064_v1, %v390_v54  ;;  %640 = vadd.xlane.f32.xlu0 %v639_v55  ;;  %v645_v15 = vsel %vm608_vm0, %v588_v56, 0.0  ;;  %v494_v40 = vld [vmem:[%s1087_s15 + $0xa0] sm:$0xff]  ;;  %v497_v56 = vld [vmem:[%s1087_s15 + $0xb8] sm:$0xff] }
  0x30   : > { %v590_v16 = vmul.f32 %v1268_v62, %v1268_v62  ;;  %v1283_v17 = vadd.f32 %v529_v59, %v458_v3  ;;  %v457_v18 = vadd.f32 %v425_v4, %v354_v60  ;;  %v531_v22 = vmul.f32 %v1081_v2, %v493_v5  ;;  %v322_v59 = vld [vmem:[%s1070_s7 + $0xb0] sm:$0xff] }
  0x31   : > { %v460_v21 = vadd.f32 %v428_v12, %v357_v11  ;;  %v356_v23 = vmul.f32 %v1059_v0, %v318_v6  ;;  %v427_v25 = vmul.f32 %v1064_v1, %v389_v7  ;;  %v530_v31 = vmul.f32 %v1081_v2, %v492_v14  ;;  %v393_v60 = vld [vmem:[%s1076_s10 + $0xb0] sm:$0xff]  ;;  %v325_v11 = vld [vmem:[%s1070_s7 + $0xc8] sm:$0xff] }
  0x32   : > { %v593_v29 = vmul.f32 %v1283_v17, %v1283_v17  ;;  %v1294_v30 = vadd.f32 %v528_v10, %v457_v18  ;;  %v359_v36 = vmul.f32 %v1059_v0, %v321_v19  ;;  %v430_v38 = vmul.f32 %v1064_v1, %v392_v20  ;;  %v496_v5 = vld [vmem:[%s1087_s15 + $0xb0] sm:$0xff]  ;;  %v396_v12 = vld [vmem:[%s1076_s10 + $0xc8] sm:$0xff]  ;;  %v324_v20 = vld [vmem:[%s1070_s7 + $0xc0] sm:$0xff] }
  0x33   : > { %649 = vadd.xlane.f32.xlu1 %v648_v61  ;;  %v1298_v34 = vadd.f32 %v531_v22, %v460_v21  ;;  %v459_v35 = vadd.f32 %v427_v25, %v356_v23  ;;  %646 = vadd.xlane.f32.xlu0 %v645_v15  ;;  %v654_v46 = vsel %vm608_vm0, %v591_v9, 0.0  ;;  %v651_v48 = vsel %vm608_vm0, %v590_v16, 0.0  ;;  %v499_v19 = vld [vmem:[%s1087_s15 + $0xc8] sm:$0xff] }
  0x34   : > { %v533_v49 = vmul.f32 %v1081_v2, %v495_v26  ;;  %v358_v50 = vmul.f32 %v1059_v0, %v320_v28  ;;  %v592_v52 = vmul.f32 %v1294_v30, %v1294_v30  ;;  %v462_v54 = vadd.f32 %v430_v38, %v359_v36  ;;  %v395_v26 = vld [vmem:[%s1076_s10 + $0xc0] sm:$0xff]  ;;  %v327_v36 = vld [vmem:[%s1070_s7 + $0xd8] sm:$0xff] }
  0x35   : > { %v1311_v53 = vadd.f32 %v530_v31, %v459_v35  ;;  %v429_v55 = vmul.f32 %v1064_v1, %v391_v33  ;;  %v532_v61 = vmul.f32 %v1081_v2, %v494_v40  ;;  %v361_v3 = vmul.f32 %v1059_v0, %v323_v41  ;;  %v498_v35 = vld [vmem:[%s1087_s15 + $0xc0] sm:$0xff]  ;;  %v398_v38 = vld [vmem:[%s1076_s10 + $0xd8] sm:$0xff] }
  0x36   : > { %v432_v4 = vmul.f32 %v1064_v1, %v394_v44  ;;  %v660_v6 = vsel %vm608_vm0, %v593_v29, 0.0  ;;  %v595_v7 = vmul.f32 %v1298_v34, %v1298_v34  ;;  %v1324_v9 = vadd.f32 %v533_v49, %v462_v54  ;;  %v501_v54 = vld [vmem:[%s1087_s15 + $0xd8] sm:$0xff] }
  0x37   : > { %655 = vadd.xlane.f32.xlu1 %v654_v46  ;;  %v461_v10 = vadd.f32 %v429_v55, %v358_v50  ;;  %652 = vadd.xlane.f32.xlu0 %v651_v48  ;;  %v535_v15 = vmul.f32 %v1081_v2, %v497_v56  ;;  %v360_v16 = vmul.f32 %v1059_v0, %v322_v59  ;;  %v657_v21 = vsel %vm608_vm0, %v592_v52, 0.0  ;;  %v326_v55 = vld [vmem:[%s1070_s7 + $0xd0] sm:$0xff] }
  0x38   : > { %v464_v14 = vadd.f32 %v432_v4, %v361_v3  ;;  %v431_v18 = vmul.f32 %v1064_v1, %v393_v60  ;;  %v594_v22 = vmul.f32 %v1311_v53, %v1311_v53  ;;  %v534_v25 = vmul.f32 %v1081_v2, %v496_v5  ;;  %v397_v56 = vld [vmem:[%s1076_s10 + $0xd0] sm:$0xff] }
  0x39   : > { %v1336_v23 = vadd.f32 %v532_v61, %v461_v10  ;;  %v363_v31 = vmul.f32 %v1059_v0, %v325_v11  ;;  %v434_v33 = vmul.f32 %v1064_v1, %v396_v12  ;;  %v666_v40 = vsel %vm608_vm0, %v595_v7, 0.0  ;;  %v500_v7 = vld [vmem:[%s1087_s15 + $0xd0] sm:$0xff]  ;;  %v329_v10 = vld [vmem:[%s1070_s7 + $0xe8] sm:$0xff] }
  0x3a   : > { %v1340_v28 = vadd.f32 %v535_v15, %v464_v14  ;;  %v463_v29 = vadd.f32 %v431_v18, %v360_v16  ;;  %v597_v41 = vmul.f32 %v1324_v9, %v1324_v9  ;;  %v537_v44 = vmul.f32 %v1081_v2, %v499_v19  ;;  %v400_v11 = vld [vmem:[%s1076_s10 + $0xe8] sm:$0xff]  ;;  %v328_v18 = vld [vmem:[%s1070_s7 + $0xe0] sm:$0xff] }
  0x3b   : > { %661 = vadd.xlane.f32.xlu1 %v660_v6  ;;  %v362_v46 = vmul.f32 %v1059_v0, %v324_v20  ;;  %658 = vadd.xlane.f32.xlu0 %v657_v21  ;;  %v596_v48 = vmul.f32 %v1336_v23, %v1336_v23  ;;  %v466_v50 = vadd.f32 %v434_v33, %v363_v31  ;;  %v663_v59 = vsel %vm608_vm0, %v594_v22, 0.0 }
  0x3c   : > { %v1354_v49 = vadd.f32 %v534_v25, %v463_v29  ;;  %v433_v52 = vmul.f32 %v1064_v1, %v395_v26  ;;  %v536_v60 = vmul.f32 %v1081_v2, %v498_v35  ;;  %v365_v61 = vmul.f32 %v1059_v0, %v327_v36  ;;  %v399_v25 = vld [vmem:[%s1076_s10 + $0xe0] sm:$0xff]  ;;  %v503_v35 = vld [vmem:[%s1087_s15 + $0xe8] sm:$0xff]  ;;  %v331_v36 = vld [vmem:[%s1070_s7 + $0xf8] sm:$0xff] }
  0x3d   : > { %v436_v3 = vmul.f32 %v1064_v1, %v398_v38  ;;  %v599_v4 = vmul.f32 %v1340_v28, %v1340_v28  ;;  %v1366_v5 = vadd.f32 %v537_v44, %v466_v50  ;;  %v539_v14 = vmul.f32 %v1081_v2, %v501_v54  ;;  %v402_v38 = vld [vmem:[%s1076_s10 + $0xf8] sm:$0xff]  ;;  %v502_v44 = vld [vmem:[%s1087_s15 + $0xe0] sm:$0xff]  ;;  %v330_v54 = vld [vmem:[%s1070_s7 + $0xf0] sm:$0xff] }
  0x3e   : > { %v465_v6 = vadd.f32 %v433_v52, %v362_v46  ;;  %v364_v15 = vmul.f32 %v1059_v0, %v326_v55  ;;  %v435_v16 = vmul.f32 %v1064_v1, %v397_v56  ;;  %v672_v19 = vsel %vm608_vm0, %v597_v41, 0.0  ;;  %v401_v55 = vld [vmem:[%s1076_s10 + $0xf0] sm:$0xff] }
  0x3f   : > { %667 = vadd.xlane.f32.xlu1 %v666_v40  ;;  %v468_v12 = vadd.f32 %v436_v3, %v365_v61  ;;  %664 = vadd.xlane.f32.xlu0 %v663_v59  ;;  %v669_v20 = vsel %vm608_vm0, %v596_v48, 0.0  ;;  %v598_v21 = vmul.f32 %v1354_v49, %v1354_v49  ;;  %v538_v29 = vmul.f32 %v1081_v2, %v500_v7 }
  0x40   : > { %v1379_v22 = vadd.f32 %v536_v60, %v465_v6  ;;  %v467_v26 = vadd.f32 %v435_v16, %v364_v15  ;;  %v367_v31 = vmul.f32 %v1059_v0, %v329_v10  ;;  %v438_v33 = vmul.f32 %v1064_v1, %v400_v11  ;;  %v505_v10 = vld [vmem:[%s1087_s15 + $0xf8] sm:$0xff] }
  0x41   : > { %v678_v40 = vsel %vm608_vm0, %v599_v4, 0.0  ;;  %v366_v41 = vmul.f32 %v1059_v0, %v328_v18  ;;  %v601_v46 = vmul.f32 %v1366_v5, %v1366_v5  ;;  %v1395_v50 = vadd.f32 %v539_v14, %v468_v12  ;;  %v504_v14 = vld [vmem:[%s1087_s15 + $0xf0] sm:$0xff] }
  0x42   : > { %v600_v48 = vmul.f32 %v1379_v22, %v1379_v22  ;;  %v437_v52 = vmul.f32 %v1064_v1, %v399_v25  ;;  %v470_v56 = vadd.f32 %v438_v33, %v367_v31  ;;  %v541_v59 = vmul.f32 %v1081_v2, %v503_v35 }
  0x43   : > { %673 = vadd.xlane.f32.xlu1 %v672_v19  ;;  %670 = vadd.xlane.f32.xlu0 %v669_v20  ;;  %v369_v60 = vmul.f32 %v1059_v0, %v331_v36  ;;  %v440_v61 = vmul.f32 %v1064_v1, %v402_v38  ;;  %v675_v3 = vsel %vm608_vm0, %v598_v21, 0.0  ;;  %v1404_v4 = vadd.f32 %v538_v29, %v467_v26 }
  0x44   : > { %v469_v6 = vadd.f32 %v437_v52, %v366_v41  ;;  %v540_v7 = vmul.f32 %v1081_v2, %v502_v44  ;;  %v368_v11 = vmul.f32 %v1059_v0, %v330_v54  ;;  %v439_v12 = vmul.f32 %v1064_v1, %v401_v55 }
  0x45   : > { %v684_v15 = vsel %vm608_vm0, %v601_v46, 0.0  ;;  %v603_v16 = vmul.f32 %v1395_v50, %v1395_v50  ;;  %v681_v18 = vsel %vm608_vm0, %v600_v48, 0.0  ;;  %v1415_v19 = vadd.f32 %v541_v59, %v470_v56 }
  0x46   : > { %v472_v20 = vadd.f32 %v440_v61, %v369_v60  ;;  %v543_v21 = vmul.f32 %v1081_v2, %v505_v10  ;;  %v602_v0 = vmul.f32 %v1404_v4, %v1404_v4  ;;  %v1420_v25 = vadd.f32 %v540_v7, %v469_v6 }
  0x47   : > { %679 = vadd.xlane.f32.xlu1 %v678_v40  ;;  %676 = vadd.xlane.f32.xlu0 %v675_v3  ;;  %v471_v1 = vadd.f32 %v439_v12, %v368_v11  ;;  %v542_v26 = vmul.f32 %v1081_v2, %v504_v14  ;;  %v690_v29 = vsel %vm608_vm0, %v603_v16, 0.0  ;;  %v605_v31 = vmul.f32 %v1415_v19, %v1415_v19 }
  0x48   : > { %v1426_v33 = vadd.f32 %v543_v21, %v472_v20  ;;  %v687_v35 = vsel %vm608_vm0, %v602_v0, 0.0  ;;  %v604_v36 = vmul.f32 %v1420_v25, %v1420_v25 }
  0x49   : > { %v1431_v38 = vadd.f32 %v542_v26, %v471_v1  ;;  %v696_v2 = vsel %vm608_vm0, %v605_v31, 0.0 }
  0x4a   : > { %v607_v40 = vmul.f32 %v1426_v33, %v1426_v33  ;;  %v693_v41 = vsel %vm608_vm0, %v604_v36, 0.0 }
  0x4b   : > { %685 = vadd.xlane.f32.xlu1 %v684_v15  ;;  %682 = vadd.xlane.f32.xlu0 %v681_v18  ;;  %v606_v44 = vmul.f32 %v1431_v38, %v1431_v38 }
  0x4c   : > { %v702_v46 = vsel %vm608_vm0, %v607_v40, 0.0 }
  0x4d   : > { %v699_v48 = vsel %vm608_vm0, %v606_v44, 0.0 }
  0x4f   : > { %691 = vadd.xlane.f32.xlu1 %v690_v29  ;;  %688 = vadd.xlane.f32.xlu0 %v687_v35 }
  0x53   : > { %697 = vadd.xlane.f32.xlu1 %v696_v2  ;;  %694 = vadd.xlane.f32.xlu0 %v693_v41 }
  0x57   : > { %703 = vadd.xlane.f32.xlu1 %v702_v46  ;;  %700 = vadd.xlane.f32.xlu0 %v699_v48 }
  0xa8   : > { %v617_v52 = vpop.xlane.xlu1 %616  ;;  %v611_v55 = vpop.xlane.xlu0 %610 }
  0xa9   : > { %v707_v54 = vmax.f32 %v617_v52, 1e-24  ;;  %v705_v56 = vmax.f32 %v611_v55, 1e-24 }
  0xab   : > { %939 = vrsqrt.f32 %v707_v54 }
  0xac   : > { %941 = vrsqrt.f32 %v705_v56  ;;  %v620_v59 = vpop.xlane.xlu1 %619  ;;  %v614_v61 = vpop.xlane.xlu0 %613 }
  0xad   : > { %v708_v60 = vmax.f32 %v620_v59, 1e-24  ;;  %v706_v3 = vmax.f32 %v614_v61, 1e-24 }
  0xaf   : > { %943 = vrsqrt.f32 %v708_v60 }
  0xb0   : > { %945 = vrsqrt.f32 %v706_v3  ;;  %v626_v6 = vpop.xlane.xlu1 %625  ;;  %v623_v10 = vpop.xlane.xlu0 %622 }
  0xb1   : > { %v710_v7 = vmax.f32 %v626_v6, 1e-24  ;;  %v709_v11 = vmax.f32 %v623_v10, 1e-24 }
  0xb3   : > { %947 = vrsqrt.f32 %v710_v7 }
  0xb4   : > { %949 = vrsqrt.f32 %v709_v11  ;;  %v632_v12 = vpop.xlane.xlu1 %631  ;;  %v629_v16 = vpop.xlane.xlu0 %628 }
  0xb5   : > { %v940_v14 = vpop.eup %939  ;;  %v712_v15 = vmax.f32 %v632_v12, 1e-24  ;;  %v711_v21 = vmax.f32 %v629_v16, 1e-24 }
  0xb6   : > { %v942_v18 = vpop.eup %941  ;;  %v771_v20 = vmul.f32 %v940_v14, %v1116_v32 }
  0xb7   : > { %v769_v0 = vmul.f32 %v942_v18, %v1123_v39  ;;  %951 = vrsqrt.f32 %v712_v15 }
  0xb8   : > { %803 = vst.msk [vmem:[%s1445_s18 + $0x10] sm:$0xff] %vm608_vm0, %v771_v20  ;;  %953 = vrsqrt.f32 %v711_v21  ;;  %v638_v1 = vpop.xlane.xlu1 %637  ;;  %v635_v31 = vpop.xlane.xlu0 %634 }
  0xb9   : > { %v944_v26 = vpop.eup %943  ;;  %801 = vst.msk [vmem:[%s1445_s18] sm:$0xff] %vm608_vm0, %v769_v0  ;;  %v714_v29 = vmax.f32 %v638_v1, 1e-24  ;;  %v713_v32 = vmax.f32 %v635_v31, 1e-24 }
  0xba   : > { %v946_v35 = vpop.eup %945  ;;  %v772_v36 = vmul.f32 %v944_v26, %v1130_v45 }
  0xbb   : > { %v770_v2 = vmul.f32 %v946_v35, %v1137_v51  ;;  %955 = vrsqrt.f32 %v714_v29 }
  0xbc   : > { %804 = vst.msk [vmem:[%s1445_s18 + $0x18] sm:$0xff] %vm608_vm0, %v772_v36  ;;  %957 = vrsqrt.f32 %v713_v32  ;;  %v644_v39 = vpop.xlane.xlu1 %643  ;;  %v641_v44 = vpop.xlane.xlu0 %640 }
  0xbd   : > { %v948_v40 = vpop.eup %947  ;;  %802 = vst.msk [vmem:[%s1445_s18 + $0x8] sm:$0xff] %vm608_vm0, %v770_v2  ;;  %v716_v41 = vmax.f32 %v644_v39, 1e-24  ;;  %v715_v45 = vmax.f32 %v641_v44, 1e-24 }
  0xbe   : > { %v950_v46 = vpop.eup %949  ;;  %v774_v48 = vmul.f32 %v948_v40, %v1145_v57 }
  0xbf   : > { %v773_v52 = vmul.f32 %v950_v46, %v1159_v8  ;;  %959 = vrsqrt.f32 %v716_v41 }
  0xc0   : > { %806 = vst.msk [vmem:[%s1445_s18 + $0x28] sm:$0xff] %vm608_vm0, %v774_v48  ;;  %961 = vrsqrt.f32 %v715_v45  ;;  %v650_v51 = vpop.xlane.xlu1 %649  ;;  %v647_v56 = vpop.xlane.xlu0 %646 }
  0xc1   : > { %v952_v54 = vpop.eup %951  ;;  %805 = vst.msk [vmem:[%s1445_s18 + $0x20] sm:$0xff] %vm608_vm0, %v773_v52  ;;  %v718_v55 = vmax.f32 %v650_v51, 1e-24  ;;  %v717_v57 = vmax.f32 %v647_v56, 1e-24 }
  0xc2   : > { %v954_v59 = vpop.eup %953  ;;  %v776_v60 = vmul.f32 %v952_v54, %v1176_v24 }
  0xc3   : > { %v775_v61 = vmul.f32 %v954_v59, %v1188_v37  ;;  %963 = vrsqrt.f32 %v718_v55 }
  0xc4   : > { %808 = vst.msk [vmem:[%s1445_s18 + $0x38] sm:$0xff] %vm608_vm0, %v776_v60  ;;  %965 = vrsqrt.f32 %v717_v57  ;;  %v656_v8 = vpop.xlane.xlu1 %655  ;;  %v653_v7 = vpop.xlane.xlu0 %652 }
  0xc5   : > { %v956_v3 = vpop.eup %955  ;;  %807 = vst.msk [vmem:[%s1445_s18 + $0x30] sm:$0xff] %vm608_vm0, %v775_v61  ;;  %v720_v6 = vmax.f32 %v656_v8, 1e-24  ;;  %v719_v24 = vmax.f32 %v653_v7, 1e-24 }
  0xc6   : > { %v958_v10 = vpop.eup %957  ;;  %v778_v11 = vmul.f32 %v956_v3, %v1194_v43 }
  0xc7   : > { %v777_v12 = vmul.f32 %v958_v10, %v1207_v58  ;;  %967 = vrsqrt.f32 %v720_v6 }
  0xc8   : > { %810 = vst.msk [vmem:[%s1445_s18 + $0x48] sm:$0xff] %vm608_vm0, %v778_v11  ;;  %969 = vrsqrt.f32 %v719_v24  ;;  %v662_v37 = vpop.xlane.xlu1 %661  ;;  %v659_v16 = vpop.xlane.xlu0 %658 }
  0xc9   : > { %v960_v14 = vpop.eup %959  ;;  %809 = vst.msk [vmem:[%s1445_s18 + $0x40] sm:$0xff] %vm608_vm0, %v777_v12  ;;  %v722_v15 = vmax.f32 %v662_v37, 1e-24  ;;  %v721_v43 = vmax.f32 %v659_v16, 1e-24 }
  0xca   : > { %v962_v18 = vpop.eup %961  ;;  %v780_v20 = vmul.f32 %v960_v14, %v1213_v63 }
  0xcb   : > { %v779_v21 = vmul.f32 %v962_v18, %v1225_v13  ;;  %971 = vrsqrt.f32 %v722_v15 }
  0xcc   : > { %812 = vst.msk [vmem:[%s1445_s18 + $0x58] sm:$0xff] %vm608_vm0, %v780_v20  ;;  %973 = vrsqrt.f32 %v721_v43  ;;  %v668_v58 = vpop.xlane.xlu1 %667  ;;  %v665_v26 = vpop.xlane.xlu0 %664 }
  0xcd   : > { %v964_v0 = vpop.eup %963  ;;  %811 = vst.msk [vmem:[%s1445_s18 + $0x50] sm:$0xff] %vm608_vm0, %v779_v21  ;;  %v724_v1 = vmax.f32 %v668_v58, 1e-24  ;;  %v723_v63 = vmax.f32 %v665_v26, 1e-24 }
  0xce   : > { %v966_v29 = vpop.eup %965  ;;  %v782_v31 = vmul.f32 %v964_v0, %v1239_v27 }
  0xcf   : > { %v781_v35 = vmul.f32 %v966_v29, %v1251_v42  ;;  %975 = vrsqrt.f32 %v724_v1 }
  0xd0   : > { %814 = vst.msk [vmem:[%s1445_s18 + $0x68] sm:$0xff] %vm608_vm0, %v782_v31  ;;  %977 = vrsqrt.f32 %v723_v63  ;;  %v674_v13 = vpop.xlane.xlu1 %673  ;;  %v671_v2 = vpop.xlane.xlu0 %670 }
  0xd1   : > { %v968_v36 = vpop.eup %967  ;;  %813 = vst.msk [vmem:[%s1445_s18 + $0x60] sm:$0xff] %vm608_vm0, %v781_v35  ;;  %v726_v32 = vmax.f32 %v674_v13, 1e-24  ;;  %v725_v27 = vmax.f32 %v671_v2, 1e-24 }
  0xd2   : > { %v970_v39 = vpop.eup %969  ;;  %v784_v40 = vmul.f32 %v968_v36, %v1255_v47 }
  0xd3   : > { %v783_v41 = vmul.f32 %v970_v39, %v1268_v62  ;;  %979 = vrsqrt.f32 %v726_v32 }
  0xd4   : > { %816 = vst.msk [vmem:[%s1445_s18 + $0x78] sm:$0xff] %vm608_vm0, %v784_v40  ;;  %981 = vrsqrt.f32 %v725_v27  ;;  %v680_v42 = vpop.xlane.xlu1 %679  ;;  %v677_v48 = vpop.xlane.xlu0 %676 }
  0xd5   : > { %v972_v44 = vpop.eup %971  ;;  %815 = vst.msk [vmem:[%s1445_s18 + $0x70] sm:$0xff] %vm608_vm0, %v783_v41  ;;  %v728_v46 = vmax.f32 %v680_v42, 1e-24  ;;  %v727_v47 = vmax.f32 %v677_v48, 1e-24 }
  0xd6   : > { %v974_v45 = vpop.eup %973  ;;  %v786_v52 = vmul.f32 %v972_v44, %v1283_v17 }
  0xd7   : > { %v785_v51 = vmul.f32 %v974_v45, %v1294_v30  ;;  %983 = vrsqrt.f32 %v728_v46 }
  0xd8   : > { %818 = vst.msk [vmem:[%s1445_s18 + $0x88] sm:$0xff] %vm608_vm0, %v786_v52  ;;  %985 = vrsqrt.f32 %v727_v47  ;;  %v686_v62 = vpop.xlane.xlu1 %685  ;;  %v683_v56 = vpop.xlane.xlu0 %682 }
  0xd9   : > { %v976_v54 = vpop.eup %975  ;;  %817 = vst.msk [vmem:[%s1445_s18 + $0x80] sm:$0xff] %vm608_vm0, %v785_v51  ;;  %v730_v55 = vmax.f32 %v686_v62, 1e-24  ;;  %v729_v17 = vmax.f32 %v683_v56, 1e-24 }
  0xda   : > { %v978_v59 = vpop.eup %977  ;;  %v788_v60 = vmul.f32 %v976_v54, %v1298_v34 }
  0xdb   : > { %v787_v57 = vmul.f32 %v978_v59, %v1311_v53  ;;  %987 = vrsqrt.f32 %v730_v55 }
  0xdc   : > { %820 = vst.msk [vmem:[%s1445_s18 + $0x98] sm:$0xff] %vm608_vm0, %v788_v60  ;;  %989 = vrsqrt.f32 %v729_v17  ;;  %v692_v30 = vpop.xlane.xlu1 %691  ;;  %v689_v3 = vpop.xlane.xlu0 %688 }
  0xdd   : > { %v980_v61 = vpop.eup %979  ;;  %819 = vst.msk [vmem:[%s1445_s18 + $0x90] sm:$0xff] %vm608_vm0, %v787_v57  ;;  %v732_v8 = vmax.f32 %v692_v30, 1e-24  ;;  %v731_v34 = vmax.f32 %v689_v3, 1e-24 }
  0xde   : > { %v982_v6 = vpop.eup %981  ;;  %v790_v7 = vmul.f32 %v980_v61, %v1324_v9 }
  0xdf   : > { %v789_v10 = vmul.f32 %v982_v6, %v1336_v23  ;;  %991 = vrsqrt.f32 %v732_v8 }
  0xe0   : > { %822 = vst.msk [vmem:[%s1445_s18 + $0xa8] sm:$0xff] %vm608_vm0, %v790_v7  ;;  %993 = vrsqrt.f32 %v731_v34  ;;  %v698_v53 = vpop.xlane.xlu1 %697  ;;  %v695_v12 = vpop.xlane.xlu0 %694 }
  0xe1   : > { %v984_v11 = vpop.eup %983  ;;  %821 = vst.msk [vmem:[%s1445_s18 + $0xa0] sm:$0xff] %vm608_vm0, %v789_v10  ;;  %v734_v24 = vmax.f32 %v698_v53, 1e-24  ;;  %v733_v9 = vmax.f32 %v695_v12, 1e-24 }
  0xe2   : > { %v986_v37 = vpop.eup %985  ;;  %v792_v14 = vmul.f32 %v984_v11, %v1340_v28 }
  0xe3   : > { %v791_v15 = vmul.f32 %v986_v37, %v1354_v49  ;;  %995 = vrsqrt.f32 %v734_v24 }
  0xe4   : > { %824 = vst.msk [vmem:[%s1445_s18 + $0xb8] sm:$0xff] %vm608_vm0, %v792_v14  ;;  %997 = vrsqrt.f32 %v733_v9  ;;  %v704_v23 = vpop.xlane.xlu1 %703  ;;  %v701_v20 = vpop.xlane.xlu0 %700 }
  0xe5   : > { %v988_v16 = vpop.eup %987  ;;  %823 = vst.msk [vmem:[%s1445_s18 + $0xb0] sm:$0xff] %vm608_vm0, %v791_v15  ;;  %v736_v18 = vmax.f32 %v704_v23, 1e-24  ;;  %v735_v21 = vmax.f32 %v701_v20, 1e-24 }
  0xe6   : > { %v990_v43 = vpop.eup %989  ;;  %v794_v28 = vmul.f32 %v988_v16, %v1366_v5 }
  0xe7   : > { %v793_v49 = vmul.f32 %v990_v43, %v1379_v22  ;;  %999 = vrsqrt.f32 %v736_v18 }
  0xe8   : > { %826 = vst.msk [vmem:[%s1445_s18 + $0xc8] sm:$0xff] %vm608_vm0, %v794_v28  ;;  %1001 = vrsqrt.f32 %v735_v21 }
  0xe9   : > { %v992_v58 = vpop.eup %991  ;;  %825 = vst.msk [vmem:[%s1445_s18 + $0xc0] sm:$0xff] %vm608_vm0, %v793_v49 }
  0xea   : > { %v994_v0 = vpop.eup %993  ;;  %v796_v1 = vmul.f32 %v992_v58, %v1395_v50 }
  0xeb   : > { %v795_v26 = vmul.f32 %v994_v0, %v1404_v4 }
  0xec   : > { %828 = vst.msk [vmem:[%s1445_s18 + $0xd8] sm:$0xff] %vm608_vm0, %v796_v1 }
  0xed   : > { %v996_v5 = vpop.eup %995  ;;  %827 = vst.msk [vmem:[%s1445_s18 + $0xd0] sm:$0xff] %vm608_vm0, %v795_v26 }
  0xee   : > { %v998_v22 = vpop.eup %997  ;;  %v798_v29 = vmul.f32 %v996_v5, %v1415_v19 }
  0xef   : > { %v797_v31 = vmul.f32 %v998_v22, %v1420_v25 }
  0xf0   : > { %830 = vst.msk [vmem:[%s1445_s18 + $0xe8] sm:$0xff] %vm608_vm0, %v798_v29 }
  0xf1   : > { %v1000_v63 = vpop.eup %999  ;;  %829 = vst.msk [vmem:[%s1445_s18 + $0xe0] sm:$0xff] %vm608_vm0, %v797_v31 }
  0xf2   : > { %v1002_v35 = vpop.eup %1001  ;;  %v800_v50 = vmul.f32 %v1000_v63, %v1426_v33 }
  0xf3   : > { %v799_v4 = vmul.f32 %v1002_v35, %v1431_v38 }
  0xf4   : > { %832 = vst.msk [vmem:[%s1445_s18 + $0xf8] sm:$0xff] %vm608_vm0, %v800_v50 }
  0xf5   : > { %831 = vst.msk [vmem:[%s1445_s18 + $0xf0] sm:$0xff] %vm608_vm0, %v799_v4 }
  0xf6 PF: > { %s16_s21 = sadd.s32 1, %s1009_s21  }
  0xf7   : > { %p13_p4 = scmp.ge.s32.totalorder %s16_s21, 4  }
  0xf9   :  { %15 = sbr.rel (!%p13_p4) target bundleno = 1 (0x1), region = 80 }

// kernel: mmgat_forward.9
= control target key start
LH: loop header
LB: loop body
LE: loop exit
PB: predicated region body
PF: predicated region fallthrough
CT: control target
= control target key end

     0   :  { %s6919_s0 = inlined_call_operand.vmem [shape: bf16[512,512], index: 0, kind: input, shape index: {}]   ;;  %s6920_s1 = inlined_call_operand.vmem [shape: f32[512,1], index: 1, kind: input, shape index: {}]   ;;  %s6921_s2 = inlined_call_operand.vmem [shape: f32[1,512], index: 2, kind: input, shape index: {}]   ;;  %s6922_s3 = inlined_call_operand.vmem [shape: bf16[512,64], index: 3, kind: input, shape index: {}]   ;;  %s6923_s4 = inlined_call_operand.vmem [shape: f32[512,64], index: 4, kind: input, shape index: {}]   ;;  %s6924_s5 = inlined_call_operand.vmem [shape: f32[1,64], index: 5, kind: input, shape index: {}]   ;;  %s6925_s6 = inlined_call_operand.vmem [shape: bf16[64,16], index: 6, kind: input, shape index: {}]   ;;  %s6926_s7 = inlined_call_operand.vmem [shape: f32[1,16], index: 7, kind: input, shape index: {}]   ;;  %s6927_s8 = inlined_call_operand.vmem [shape: f32[1,16], index: 8, kind: input, shape index: {}]   ;;  %s6928_s9 = inlined_call_operand.vmem [shape: f32[512,64], index: 9, kind: output, shape index: {0}]   ;;  %s6929_s10 = inlined_call_operand.vmem [shape: f32[512,1], index: 10, kind: output, shape index: {1}]  }
   0x1   :  { %7034 = sst [smem:[#allocation84_spill]] %s6919_s0 }
   0x2   :  { %7035 = sst [smem:[#allocation85_spill]] %s6920_s1 }
   0x3   :  { %7036 = sst [smem:[#allocation86_spill]] %s6923_s4 }
   0x4   :  { %s4600_s13 = smov 0   ;;  %s4602_s14 = smov 0  }
   0x5   :  { %s4604_s15 = smov 0   ;;  %s4606_s16 = smov 0  }
   0x6   :  { %s4608_s17 = smov 0   ;;  %s4610_s18 = smov 0  }
   0x7   :  { %s4612_s19 = smov 0  }
   0x8 LB: > { %7037 = sst [smem:[#allocation6_spill]] %s4531_s17  ;;  %s30_s20 = sadd.s32 1, %s4531_s17  ;;  %s4539_s19 = sphi %s4612_s19, %s21_s19   ;;  %s4535_s18 = sphi %s4610_s18, %s7295_s18   ;;  %s4531_s17 = sphi %s4608_s17, %s7294_s17   ;;  %s4527_s16 = sphi %s4606_s16, %s7293_s16   ;;  %s4523_s15 = sphi %s4604_s15, %s7292_s15   ;;  %s4519_s14 = sphi %s4602_s14, %s7297_s14   ;;  %s4515_s13 = sphi %s4600_s13, %s7296_s13  }
   0x9   : > { %7038 = sst [smem:[#allocation7_spill]] %s4535_s18  ;;  %p31_p0 = scmp.ge.s32.totalorder %s30_s20, 2 }
   0xa   : > { %s33_s21 = sadd.s32 1, %s4535_s18  ;;  %p49_p1 = scmp.ne.s32.totalorder %s4519_s14, %s4515_s13 }
   0xb   : > { %p50_p2 = scmp.eq.s32.totalorder %s4539_s19, 0  ;;  %s7299_s20 = smov (%p31_p0, %s30_s20), 0 }
   0xc   : > { %7039 = sst [smem:[#allocation8_spill]] %s7299_s20  ;;  %s7301_s21 = smov (!%p31_p0, %s33_s21), %s4535_s18 }
   0xd   : > { %p51_p3 = por %p50_p2, %p49_p1  ;;  %p35_p4 = scmp.ge.s32.totalorder %s7301_s21, 2 }
   0xe   : > { %s38_s22 = ssub.s32 %s4531_s17, %s7299_s20  ;;  %s42_s25 = sadd.s32 1, %s4519_s14 }
   0xf   : > { %s7303_s21 = smov (%p35_p4, %s7301_s21), 0  ;;  %p3822_p6 = scmp.ge.s32.totalorder %s4539_s19, 4 }
  0x10   : > { %7040 = sst [smem:[#allocation9_spill]] %s7303_s21  ;;  %s37_s23 = ssub.s32 %s4535_s18, %s7303_s21 }
  0x11   : > { %s39_s24 = sor.u32 %s38_s22, %s37_s23  ;;  %327 = sbr.rel (%p3822_p6) target bundleno = 50 (0x32), region = 32 }
  0x12   : > { %p40_p5 = scmp.eq.s32.totalorder %s39_s24, 0 }
  0x14   : > { %s4651_s26 = scalar_select %p40_p5, %s4519_s14, %s42_s25  }
  0x16   : > { %7041 = sst [smem:[#allocation10_spill]] %s4651_s26 }
  0x18   : > { %330 = sbr.rel (!%p51_p3) target bundleno = 50 (0x32), region = 36  ;;  %s332_s27 = sand.u32 (%p51_p3), 1, %s4519_s14  }
  0x19   : > { %s3825_s28 = sshll.u32 (%p51_p3), %s4531_s17, 1  ;;  %s3823_s29 = sshll.u32 (%p51_p3), %s332_s27, 8 }
  0x1a   : > { %s3884_s30 = sshll.u32 (%p51_p3), %s4535_s18, 7  ;;  %s7042_s0 = sld [smem:[#allocation84_spill]] (%p51_p3) }
  0x1b   : > { %s338_s11 = sadd.s32 (%p51_p3), %s3884_s30, %s3825_s28  ;;  %s4665_s23 = scalar_lea.vmem (%p51_p3), [#allocation5], %s3823_s29 }
  0x1c   : > { %s3827_s12 = sshll.u32 (%p51_p3), %s338_s11, 2 }
  0x20   : > { %s4660_s22 = scalar_lea.vmem %s7042_s0, %s3827_s12 }
  0x21   : > { %v430_v0 = vld [vmem:[%s4660_s22] sm:$0xff]  ;;  %v432_v1 = vld [vmem:[%s4660_s22 + $0x10] sm:$0xff] }
  0x22   : > { %v434_v2 = vld [vmem:[%s4660_s22 + $0x20] sm:$0xff]  ;;  %431 = vst [vmem:[%s4665_s23] sm:$0xff] %v430_v0  ;;  %433 = vst [vmem:[%s4665_s23 + $0x8] sm:$0xff] %v432_v1  ;;  %v436_v3 = vld [vmem:[%s4660_s22 + $0x30] sm:$0xff] }
  0x23   : > { %435 = vst [vmem:[%s4665_s23 + $0x10] sm:$0xff] %v434_v2  ;;  %v438_v4 = vld [vmem:[%s4660_s22 + $0x40] sm:$0xff]  ;;  %v440_v5 = vld [vmem:[%s4660_s22 + $0x50] sm:$0xff]  ;;  %437 = vst [vmem:[%s4665_s23 + $0x18] sm:$0xff] %v436_v3 }
  0x24   : > { %439 = vst [vmem:[%s4665_s23 + $0x20] sm:$0xff] %v438_v4  ;;  %441 = vst [vmem:[%s4665_s23 + $0x28] sm:$0xff] %v440_v5  ;;  %v442_v6 = vld [vmem:[%s4660_s22 + $0x60] sm:$0xff]  ;;  %v444_v7 = vld [vmem:[%s4660_s22 + $0x70] sm:$0xff] }
  0x25   : > { %v446_v8 = vld [vmem:[%s4660_s22 + $0x80] sm:$0xff]  ;;  %443 = vst [vmem:[%s4665_s23 + $0x30] sm:$0xff] %v442_v6  ;;  %445 = vst [vmem:[%s4665_s23 + $0x38] sm:$0xff] %v444_v7  ;;  %v448_v9 = vld [vmem:[%s4660_s22 + $0x90] sm:$0xff] }
  0x26   : > { %447 = vst [vmem:[%s4665_s23 + $0x40] sm:$0xff] %v446_v8  ;;  %v450_v10 = vld [vmem:[%s4660_s22 + $0xa0] sm:$0xff]  ;;  %v452_v11 = vld [vmem:[%s4660_s22 + $0xb0] sm:$0xff]  ;;  %449 = vst [vmem:[%s4665_s23 + $0x48] sm:$0xff] %v448_v9 }
  0x27   : > { %451 = vst [vmem:[%s4665_s23 + $0x50] sm:$0xff] %v450_v10  ;;  %453 = vst [vmem:[%s4665_s23 + $0x58] sm:$0xff] %v452_v11  ;;  %v454_v12 = vld [vmem:[%s4660_s22 + $0xc0] sm:$0xff]  ;;  %v456_v13 = vld [vmem:[%s4660_s22 + $0xd0] sm:$0xff] }
  0x28   : > { %v458_v14 = vld [vmem:[%s4660_s22 + $0xe0] sm:$0xff]  ;;  %455 = vst [vmem:[%s4665_s23 + $0x60] sm:$0xff] %v454_v12  ;;  %457 = vst [vmem:[%s4665_s23 + $0x68] sm:$0xff] %v456_v13  ;;  %v460_v15 = vld [vmem:[%s4660_s22 + $0xf0] sm:$0xff] }
  0x29   : > { %459 = vst [vmem:[%s4665_s23 + $0x70] sm:$0xff] %v458_v14  ;;  %v462_v16 = vld [vmem:[%s4660_s22 + $0x100] sm:$0xff]  ;;  %v464_v17 = vld [vmem:[%s4660_s22 + $0x110] sm:$0xff]  ;;  %461 = vst [vmem:[%s4665_s23 + $0x78] sm:$0xff] %v460_v15 }
  0x2a   : > { %463 = vst [vmem:[%s4665_s23 + $0x80] sm:$0xff] %v462_v16  ;;  %465 = vst [vmem:[%s4665_s23 + $0x88] sm:$0xff] %v464_v17  ;;  %v466_v18 = vld [vmem:[%s4660_s22 + $0x120] sm:$0xff]  ;;  %v468_v19 = vld [vmem:[%s4660_s22 + $0x130] sm:$0xff] }
  0x2b   : > { %v470_v20 = vld [vmem:[%s4660_s22 + $0x140] sm:$0xff]  ;;  %467 = vst [vmem:[%s4665_s23 + $0x90] sm:$0xff] %v466_v18  ;;  %469 = vst [vmem:[%s4665_s23 + $0x98] sm:$0xff] %v468_v19  ;;  %v472_v21 = vld [vmem:[%s4660_s22 + $0x150] sm:$0xff] }
  0x2c   : > { %471 = vst [vmem:[%s4665_s23 + $0xa0] sm:$0xff] %v470_v20  ;;  %v474_v22 = vld [vmem:[%s4660_s22 + $0x160] sm:$0xff]  ;;  %v476_v23 = vld [vmem:[%s4660_s22 + $0x170] sm:$0xff]  ;;  %473 = vst [vmem:[%s4665_s23 + $0xa8] sm:$0xff] %v472_v21 }
  0x2d   : > { %475 = vst [vmem:[%s4665_s23 + $0xb0] sm:$0xff] %v474_v22  ;;  %477 = vst [vmem:[%s4665_s23 + $0xb8] sm:$0xff] %v476_v23  ;;  %v478_v24 = vld [vmem:[%s4660_s22 + $0x180] sm:$0xff]  ;;  %v480_v25 = vld [vmem:[%s4660_s22 + $0x190] sm:$0xff] }
  0x2e   : > { %v482_v26 = vld [vmem:[%s4660_s22 + $0x1a0] sm:$0xff]  ;;  %479 = vst [vmem:[%s4665_s23 + $0xc0] sm:$0xff] %v478_v24  ;;  %481 = vst [vmem:[%s4665_s23 + $0xc8] sm:$0xff] %v480_v25  ;;  %v484_v27 = vld [vmem:[%s4660_s22 + $0x1b0] sm:$0xff] }
  0x2f   : > { %483 = vst [vmem:[%s4665_s23 + $0xd0] sm:$0xff] %v482_v26  ;;  %v486_v28 = vld [vmem:[%s4660_s22 + $0x1c0] sm:$0xff]  ;;  %v488_v29 = vld [vmem:[%s4660_s22 + $0x1d0] sm:$0xff]  ;;  %485 = vst [vmem:[%s4665_s23 + $0xd8] sm:$0xff] %v484_v27 }
  0x30   : > { %487 = vst [vmem:[%s4665_s23 + $0xe0] sm:$0xff] %v486_v28  ;;  %489 = vst [vmem:[%s4665_s23 + $0xe8] sm:$0xff] %v488_v29  ;;  %v490_v30 = vld [vmem:[%s4660_s22 + $0x1e0] sm:$0xff]  ;;  %v492_v31 = vld [vmem:[%s4660_s22 + $0x1f0] sm:$0xff] }
  0x31   : > { %491 = vst [vmem:[%s4665_s23 + $0xf0] sm:$0xff] %v490_v30  ;;  %493 = vst [vmem:[%s4665_s23 + $0xf8] sm:$0xff] %v492_v31 }
  0x32 PF: > { %p3828_p7 = scmp.ge.s32.totalorder %s4539_s19, 1  ;;  %p533_p8 = scmp.lt.s32.totalorder %s4539_s19, 5 }
  0x34   : > { %p534_p9 = pnand %p3828_p7, %p533_p8 }
  0x36   : > { %537 = sbr.rel (%p534_p9) target bundleno = 1444 (0x5a4), region = 90 }
  0x3d   : > { %s540_s20 = sand.u32 1, %s4515_s13   ;;  %s3830_s21 = sshll.u32 %s4527_s16, 5 }
  0x3e   : > { %s3829_s24 = sshll.u32 %s540_s20, 8  ;;  %p604_p10 = scmp.lt.s32.totalorder %s3830_s21, 63 }
  0x3f   : > { %s3832_s25 = sshll.u32 %s4523_s15, 1  ;;  %s3833_s27 = sshll.u32 %s4523_s15, 5 }
  0x40   : > { %s7305_s21 = smov (!%p604_p10, %s3830_s21), 63  ;;  %p610_p11 = scmp.lt.s32.totalorder %s3832_s25, 3 }
  0x41   : > { %s3831_s28 = sshll.u32 %s7305_s21, 3  ;;  %p615_p12 = scmp.lt.s32.totalorder %s3833_s27, 63 }
  0x42   : > { %s7043_s1 = sld [smem:[#allocation85_spill]]  ;;  %s7044_s4 = sld [smem:[#allocation86_spill]] }
  0x43   : > { %s7307_s25 = smov (!%p610_p11, %s3832_s25), 3  ;;  %s7309_s27 = smov (!%p615_p12, %s3833_s27), 63 }
  0x44   : > { %s612_s20 = scalar_lea.vmem %s6921_s2, %s7307_s25  ;;  %s4753_s18 = scalar_lea.vmem %s6928_s9, %s3831_s28 }
  0x45   : > { %s3834_s29 = sshll.u32 %s7309_s27, 2  ;;  %s4758_s12 = scalar_lea.vmem %s6929_s10, %s3831_s28 }
  0x46   : > { %s4763_s17 = scalar_lea.vmem %s6922_s3, %s3834_s29  ;;  %s4765_s26 = scalar_lea.vmem [#allocation5], %s3829_s24 }
  0x47   : > { %p3841_p13 = scmp.ne.s32.totalorder %s4523_s15, 0 }
  0x48   : > { %s4737_s11 = scalar_lea.vmem %s7043_s1, %s3831_s28  ;;  %s4742_s23 = scalar_lea.vmem %s7044_s4, %s3831_s28  ;;  %vm643_vm0 = vcmask (!%p3841_p13), 7168   ;;  %vm708_vm1 = vcmask (!%p3841_p13), 523264   ;;  %v4541_v32 = vmov (!%p3841_p13), -inf   ;;  %v4542_v33 = vmov (!%p3841_p13), 0.0  }
  0x49   : > { %642 = sbr.rel (%p3841_p13) target bundleno = 121 (0x79), region = 98  ;;  %644 = vst.msk [vmem:[#allocation2] sm:$0xff] (!%p3841_p13), %vm643_vm0, %v4541_v32  ;;  %645 = vst.msk [vmem:[#allocation2 + $0x8] sm:$0xff] (!%p3841_p13), %vm643_vm0, %v4541_v32 }
  0x4a   : > { %646 = vst.msk [vmem:[#allocation2 + $0x10] sm:$0xff] (!%p3841_p13), %vm643_vm0, %v4541_v32  ;;  %647 = vst.msk [vmem:[#allocation2 + $0x18] sm:$0xff] (!%p3841_p13), %vm643_vm0, %v4541_v32 }
  0x4b   : > { %648 = vst.msk [vmem:[#allocation2 + $0x20] sm:$0xff] (!%p3841_p13), %vm643_vm0, %v4541_v32  ;;  %649 = vst.msk [vmem:[#allocation2 + $0x28] sm:$0xff] (!%p3841_p13), %vm643_vm0, %v4541_v32 }
  0x4c   : > { %650 = vst.msk [vmem:[#allocation2 + $0x30] sm:$0xff] (!%p3841_p13), %vm643_vm0, %v4541_v32  ;;  %651 = vst.msk [vmem:[#allocation2 + $0x38] sm:$0xff] (!%p3841_p13), %vm643_vm0, %v4541_v32 }
  0x4d   : > { %652 = vst.msk [vmem:[#allocation2 + $0x40] sm:$0xff] (!%p3841_p13), %vm643_vm0, %v4541_v32  ;;  %653 = vst.msk [vmem:[#allocation2 + $0x48] sm:$0xff] (!%p3841_p13), %vm643_vm0, %v4541_v32 }
  0x4e   : > { %654 = vst.msk [vmem:[#allocation2 + $0x50] sm:$0xff] (!%p3841_p13), %vm643_vm0, %v4541_v32  ;;  %655 = vst.msk [vmem:[#allocation2 + $0x58] sm:$0xff] (!%p3841_p13), %vm643_vm0, %v4541_v32 }
  0x4f   : > { %656 = vst.msk [vmem:[#allocation2 + $0x60] sm:$0xff] (!%p3841_p13), %vm643_vm0, %v4541_v32  ;;  %657 = vst.msk [vmem:[#allocation2 + $0x68] sm:$0xff] (!%p3841_p13), %vm643_vm0, %v4541_v32 }
  0x50   : > { %658 = vst.msk [vmem:[#allocation2 + $0x70] sm:$0xff] %vm643_vm0, %v4541_v32  ;;  %659 = vst.msk [vmem:[#allocation2 + $0x78] sm:$0xff] %vm643_vm0, %v4541_v32 }
  0x51   : > { %660 = vst.msk [vmem:[#allocation2 + $0x80] sm:$0xff] %vm643_vm0, %v4541_v32  ;;  %661 = vst.msk [vmem:[#allocation2 + $0x88] sm:$0xff] %vm643_vm0, %v4541_v32 }
  0x52   : > { %662 = vst.msk [vmem:[#allocation2 + $0x90] sm:$0xff] %vm643_vm0, %v4541_v32  ;;  %663 = vst.msk [vmem:[#allocation2 + $0x98] sm:$0xff] %vm643_vm0, %v4541_v32 }
  0x53   : > { %664 = vst.msk [vmem:[#allocation2 + $0xa0] sm:$0xff] %vm643_vm0, %v4541_v32  ;;  %665 = vst.msk [vmem:[#allocation2 + $0xa8] sm:$0xff] %vm643_vm0, %v4541_v32 }
  0x54   : > { %666 = vst.msk [vmem:[#allocation2 + $0xb0] sm:$0xff] %vm643_vm0, %v4541_v32  ;;  %667 = vst.msk [vmem:[#allocation2 + $0xb8] sm:$0xff] %vm643_vm0, %v4541_v32 }
  0x55   : > { %668 = vst.msk [vmem:[#allocation2 + $0xc0] sm:$0xff] %vm643_vm0, %v4541_v32  ;;  %669 = vst.msk [vmem:[#allocation2 + $0xc8] sm:$0xff] %vm643_vm0, %v4541_v32 }
  0x56   : > { %670 = vst.msk [vmem:[#allocation2 + $0xd0] sm:$0xff] %vm643_vm0, %v4541_v32  ;;  %671 = vst.msk [vmem:[#allocation2 + $0xd8] sm:$0xff] %vm643_vm0, %v4541_v32 }
  0x57   : > { %672 = vst.msk [vmem:[#allocation2 + $0xe0] sm:$0xff] %vm643_vm0, %v4541_v32  ;;  %673 = vst.msk [vmem:[#allocation2 + $0xe8] sm:$0xff] %vm643_vm0, %v4541_v32 }
  0x58   : > { %674 = vst.msk [vmem:[#allocation2 + $0xf0] sm:$0xff] %vm643_vm0, %v4541_v32  ;;  %675 = vst.msk [vmem:[#allocation2 + $0xf8] sm:$0xff] %vm643_vm0, %v4541_v32 }
  0x59   : > { %676 = vst.msk [vmem:[#allocation3] sm:$0xff] %vm643_vm0, %v4542_v33  ;;  %677 = vst.msk [vmem:[#allocation3 + $0x8] sm:$0xff] %vm643_vm0, %v4542_v33 }
  0x5a   : > { %678 = vst.msk [vmem:[#allocation3 + $0x10] sm:$0xff] %vm643_vm0, %v4542_v33  ;;  %679 = vst.msk [vmem:[#allocation3 + $0x18] sm:$0xff] %vm643_vm0, %v4542_v33 }
  0x5b   : > { %680 = vst.msk [vmem:[#allocation3 + $0x20] sm:$0xff] %vm643_vm0, %v4542_v33  ;;  %681 = vst.msk [vmem:[#allocation3 + $0x28] sm:$0xff] %vm643_vm0, %v4542_v33 }
  0x5c   : > { %682 = vst.msk [vmem:[#allocation3 + $0x30] sm:$0xff] %vm643_vm0, %v4542_v33  ;;  %683 = vst.msk [vmem:[#allocation3 + $0x38] sm:$0xff] %vm643_vm0, %v4542_v33 }
  0x5d   : > { %684 = vst.msk [vmem:[#allocation3 + $0x40] sm:$0xff] %vm643_vm0, %v4542_v33  ;;  %685 = vst.msk [vmem:[#allocation3 + $0x48] sm:$0xff] %vm643_vm0, %v4542_v33 }
  0x5e   : > { %686 = vst.msk [vmem:[#allocation3 + $0x50] sm:$0xff] %vm643_vm0, %v4542_v33  ;;  %687 = vst.msk [vmem:[#allocation3 + $0x58] sm:$0xff] %vm643_vm0, %v4542_v33 }
  0x5f   : > { %688 = vst.msk [vmem:[#allocation3 + $0x60] sm:$0xff] %vm643_vm0, %v4542_v33  ;;  %689 = vst.msk [vmem:[#allocation3 + $0x68] sm:$0xff] %vm643_vm0, %v4542_v33 }
  0x60   : > { %690 = vst.msk [vmem:[#allocation3 + $0x70] sm:$0xff] %vm643_vm0, %v4542_v33  ;;  %691 = vst.msk [vmem:[#allocation3 + $0x78] sm:$0xff] %vm643_vm0, %v4542_v33 }
  0x61   : > { %692 = vst.msk [vmem:[#allocation3 + $0x80] sm:$0xff] %vm643_vm0, %v4542_v33  ;;  %693 = vst.msk [vmem:[#allocation3 + $0x88] sm:$0xff] %vm643_vm0, %v4542_v33 }
  0x62   : > { %694 = vst.msk [vmem:[#allocation3 + $0x90] sm:$0xff] %vm643_vm0, %v4542_v33  ;;  %695 = vst.msk [vmem:[#allocation3 + $0x98] sm:$0xff] %vm643_vm0, %v4542_v33 }
  0x63   : > { %696 = vst.msk [vmem:[#allocation3 + $0xa0] sm:$0xff] %vm643_vm0, %v4542_v33  ;;  %697 = vst.msk [vmem:[#allocation3 + $0xa8] sm:$0xff] %vm643_vm0, %v4542_v33 }
  0x64   : > { %698 = vst.msk [vmem:[#allocation3 + $0xb0] sm:$0xff] %vm643_vm0, %v4542_v33  ;;  %699 = vst.msk [vmem:[#allocation3 + $0xb8] sm:$0xff] %vm643_vm0, %v4542_v33 }
  0x65   : > { %700 = vst.msk [vmem:[#allocation3 + $0xc0] sm:$0xff] %vm643_vm0, %v4542_v33  ;;  %701 = vst.msk [vmem:[#allocation3 + $0xc8] sm:$0xff] %vm643_vm0, %v4542_v33 }
  0x66   : > { %702 = vst.msk [vmem:[#allocation3 + $0xd0] sm:$0xff] %vm643_vm0, %v4542_v33  ;;  %703 = vst.msk [vmem:[#allocation3 + $0xd8] sm:$0xff] %vm643_vm0, %v4542_v33 }
  0x67   : > { %704 = vst.msk [vmem:[#allocation3 + $0xe0] sm:$0xff] %vm643_vm0, %v4542_v33  ;;  %705 = vst.msk [vmem:[#allocation3 + $0xe8] sm:$0xff] %vm643_vm0, %v4542_v33 }
  0x68   : > { %706 = vst.msk [vmem:[#allocation3 + $0xf0] sm:$0xff] %vm643_vm0, %v4542_v33  ;;  %707 = vst.msk [vmem:[#allocation3 + $0xf8] sm:$0xff] %vm643_vm0, %v4542_v33 }
  0x69   : > { %709 = vst.msk [vmem:[#allocation4] sm:$0xff] %vm708_vm1, %v4542_v33  ;;  %710 = vst.msk [vmem:[#allocation4 + $0x8] sm:$0xff] %vm708_vm1, %v4542_v33 }
  0x6a   : > { %711 = vst.msk [vmem:[#allocation4 + $0x10] sm:$0xff] %vm708_vm1, %v4542_v33  ;;  %712 = vst.msk [vmem:[#allocation4 + $0x18] sm:$0xff] %vm708_vm1, %v4542_v33 }
  0x6b   : > { %713 = vst.msk [vmem:[#allocation4 + $0x20] sm:$0xff] %vm708_vm1, %v4542_v33  ;;  %714 = vst.msk [vmem:[#allocation4 + $0x28] sm:$0xff] %vm708_vm1, %v4542_v33 }
  0x6c   : > { %715 = vst.msk [vmem:[#allocation4 + $0x30] sm:$0xff] %vm708_vm1, %v4542_v33  ;;  %716 = vst.msk [vmem:[#allocation4 + $0x38] sm:$0xff] %vm708_vm1, %v4542_v33 }
  0x6d   : > { %717 = vst.msk [vmem:[#allocation4 + $0x40] sm:$0xff] %vm708_vm1, %v4542_v33  ;;  %718 = vst.msk [vmem:[#allocation4 + $0x48] sm:$0xff] %vm708_vm1, %v4542_v33 }
  0x6e   : > { %719 = vst.msk [vmem:[#allocation4 + $0x50] sm:$0xff] %vm708_vm1, %v4542_v33  ;;  %720 = vst.msk [vmem:[#allocation4 + $0x58] sm:$0xff] %vm708_vm1, %v4542_v33 }
  0x6f   : > { %721 = vst.msk [vmem:[#allocation4 + $0x60] sm:$0xff] %vm708_vm1, %v4542_v33  ;;  %722 = vst.msk [vmem:[#allocation4 + $0x68] sm:$0xff] %vm708_vm1, %v4542_v33 }
  0x70   : > { %723 = vst.msk [vmem:[#allocation4 + $0x70] sm:$0xff] %vm708_vm1, %v4542_v33  ;;  %724 = vst.msk [vmem:[#allocation4 + $0x78] sm:$0xff] %vm708_vm1, %v4542_v33 }
  0x71   : > { %725 = vst.msk [vmem:[#allocation4 + $0x80] sm:$0xff] %vm708_vm1, %v4542_v33  ;;  %726 = vst.msk [vmem:[#allocation4 + $0x88] sm:$0xff] %vm708_vm1, %v4542_v33 }
  0x72   : > { %727 = vst.msk [vmem:[#allocation4 + $0x90] sm:$0xff] %vm708_vm1, %v4542_v33  ;;  %728 = vst.msk [vmem:[#allocation4 + $0x98] sm:$0xff] %vm708_vm1, %v4542_v33 }
  0x73   : > { %729 = vst.msk [vmem:[#allocation4 + $0xa0] sm:$0xff] %vm708_vm1, %v4542_v33  ;;  %730 = vst.msk [vmem:[#allocation4 + $0xa8] sm:$0xff] %vm708_vm1, %v4542_v33 }
  0x74   : > { %731 = vst.msk [vmem:[#allocation4 + $0xb0] sm:$0xff] %vm708_vm1, %v4542_v33  ;;  %732 = vst.msk [vmem:[#allocation4 + $0xb8] sm:$0xff] %vm708_vm1, %v4542_v33 }
  0x75   : > { %733 = vst.msk [vmem:[#allocation4 + $0xc0] sm:$0xff] %vm708_vm1, %v4542_v33  ;;  %734 = vst.msk [vmem:[#allocation4 + $0xc8] sm:$0xff] %vm708_vm1, %v4542_v33 }
  0x76   : > { %735 = vst.msk [vmem:[#allocation4 + $0xd0] sm:$0xff] %vm708_vm1, %v4542_v33  ;;  %736 = vst.msk [vmem:[#allocation4 + $0xd8] sm:$0xff] %vm708_vm1, %v4542_v33 }
  0x77   : > { %737 = vst.msk [vmem:[#allocation4 + $0xe0] sm:$0xff] %vm708_vm1, %v4542_v33  ;;  %738 = vst.msk [vmem:[#allocation4 + $0xe8] sm:$0xff] %vm708_vm1, %v4542_v33 }
  0x78   : > { %739 = vst.msk [vmem:[#allocation4 + $0xf0] sm:$0xff] %vm708_vm1, %v4542_v33  ;;  %740 = vst.msk [vmem:[#allocation4 + $0xf8] sm:$0xff] %vm708_vm1, %v4542_v33 }
  0x79 PF: > { %v743_v34 = vld [vmem:[%s4737_s11 + $0x10] sm:$0xff]  ;;  %v741_v35 = vld [vmem:[%s4737_s11] sm:$0xff]  ;;  %v4543_v36 = vmov 0   ;;  %v744_v37 = vld [vmem:[%s4737_s11 + $0x18] sm:$0xff]  ;;  %v935_v3 = vlaneseq  ;;  %vm2097_vm2 = vcmask 7168   ;;  %vm2707_vm3 = vcmask 523264  }
  0x7a   : > { %4142 = vset.pattern.permute.xlu1 %v4543_v36  ;;  %4141 = vset.pattern.permute.xlu0 %v4543_v36  ;;  %v742_v38 = vld [vmem:[%s4737_s11 + $0x8] sm:$0xff]  ;;  %v745_v40 = vld [vmem:[%s4737_s11 + $0x20] sm:$0xff]  ;;  %v748_v41 = vld [vmem:[%s4737_s11 + $0x38] sm:$0xff]  ;;  %p3858_p0 = scmp.ne.s32.totalorder %s4523_s15, 1 }
  0x7b   : > { %786 = vperm.xlu1 %4142, %v743_v34   ;;  %776 = vperm.xlu0 %4141, %v741_v35   ;;  %v746_v39 = vld [vmem:[%s4737_s11 + $0x28] sm:$0xff]  ;;  %v747_v42 = vld [vmem:[%s4737_s11 + $0x30] sm:$0xff]  ;;  %v749_v44 = vld [vmem:[%s4737_s11 + $0x40] sm:$0xff]  ;;  %v936_v4 = vshrl.u32 %v935_v3, 7  ;;  %vm3534_vm4 = vcmask (!%p3858_p0), 130048  }
  0x7c   : > { %v750_v43 = vld [vmem:[%s4737_s11 + $0x48] sm:$0xff]  ;;  %v752_v45 = vld [vmem:[%s4737_s11 + $0x58] sm:$0xff]  ;;  %v751_v46 = vld [vmem:[%s4737_s11 + $0x50] sm:$0xff] }
  0x7d   : > { %v754_v47 = vld [vmem:[%s4737_s11 + $0x68] sm:$0xff]  ;;  %v753_v48 = vld [vmem:[%s4737_s11 + $0x60] sm:$0xff]  ;;  %v756_v49 = vld [vmem:[%s4737_s11 + $0x78] sm:$0xff]  ;;  %v937_v5 = vsub.s32 0, %v936_v4  ;;  %v941_v6 = vsub.s32 1, %v936_v4 }
  0x7e   : > { %v755_v50 = vld [vmem:[%s4737_s11 + $0x70] sm:$0xff]  ;;  %v758_v51 = vld [vmem:[%s4737_s11 + $0x88] sm:$0xff]  ;;  %v757_v52 = vld [vmem:[%s4737_s11 + $0x80] sm:$0xff] }
  0x7f   : > { %791 = vperm.xlu1 %4142, %v744_v37   ;;  %781 = vperm.xlu0 %4141, %v742_v38   ;;  %v760_v53 = vld [vmem:[%s4737_s11 + $0x98] sm:$0xff]  ;;  %v759_v54 = vld [vmem:[%s4737_s11 + $0x90] sm:$0xff]  ;;  %v762_v55 = vld [vmem:[%s4737_s11 + $0xa8] sm:$0xff] }
  0x80   : > { %v761_v56 = vld [vmem:[%s4737_s11 + $0xa0] sm:$0xff]  ;;  %v764_v57 = vld [vmem:[%s4737_s11 + $0xb8] sm:$0xff]  ;;  %v763_v58 = vld [vmem:[%s4737_s11 + $0xb0] sm:$0xff] }
  0x81   : > { %v766_v59 = vld [vmem:[%s4737_s11 + $0xc8] sm:$0xff]  ;;  %v765_v60 = vld [vmem:[%s4737_s11 + $0xc0] sm:$0xff]  ;;  %v768_v61 = vld [vmem:[%s4737_s11 + $0xd8] sm:$0xff] }
  0x82   : > { %v767_v62 = vld [vmem:[%s4737_s11 + $0xd0] sm:$0xff]  ;;  %v770_v63 = vld [vmem:[%s4737_s11 + $0xe8] sm:$0xff]  ;;  %v769_v0 = vld [vmem:[%s4737_s11 + $0xe0] sm:$0xff] }
  0x83   : > { %801 = vperm.xlu1 %4142, %v746_v39   ;;  %796 = vperm.xlu0 %4141, %v745_v40   ;;  %v772_v1 = vld [vmem:[%s4737_s11 + $0xf8] sm:$0xff]  ;;  %v771_v2 = vld [vmem:[%s4737_s11 + $0xf0] sm:$0xff]  ;;  %v773_v7 = vld [vmem:[%s612_s20] sm:$0x3] }
  0x84   : > { %v4965_v8 = vrot.slane %v773_v7, %v937_v5  ;;  %v4967_v9 = vrot.slane %v773_v7, %v941_v6  ;;  %v1137_v15 = vld [vmem:[%s4765_s26] sm:$0xff]  ;;  %v1138_v23 = vld [vmem:[%s4765_s26 + $0x8] sm:$0xff]  ;;  %v1139_v30 = vld [vmem:[%s4765_s26 + $0x10] sm:$0xff] }
  0x85   : > { %v1169_v21 = vunpack.c.l.bf16 %v1137_v15  ;;  %v1170_v22 = vunpack.c.h.bf16 %v1137_v15  ;;  %v1171_v32 = vunpack.c.l.bf16 %v1138_v23  ;;  %v1172_v38 = vunpack.c.h.bf16 %v1138_v23  ;;  %v4989_v39 = vld [vmem:[%s4765_s26 + $0x18] sm:$0xff]  ;;  %v5036_v4 = vld [vmem:[%s4765_s26 + $0x80] sm:$0xff]  ;;  %v5043_v7 = vld [vmem:[%s4765_s26 + $0x88] sm:$0xff] }
  0x86   : > { %v5040_v6 = vld [vmem:[%s4765_s26 + $0x58] sm:$0xff]  ;;  %v5126_v5 = vld [vmem:[%s4765_s26 + $0x68] sm:$0xff] }
  0x87   : > { %811 = vperm.xlu1 %4142, %v748_v41   ;;  %806 = vperm.xlu0 %4141, %v747_v42   ;;  %v1173_v41 = vunpack.c.l.bf16 %v1139_v30  ;;  %v1174_v42 = vunpack.c.h.bf16 %v1139_v30  ;;  %7052 = vst [vmem:[#allocation18_spill] sm:$0xff] %v5040_v6  ;;  %7056 = vst [vmem:[#allocation22_spill] sm:$0xff] %v5126_v5  ;;  %v5160_v30 = vld [vmem:[%s4765_s26 + $0xe0] sm:$0xff] }
  0x88   : > { %7059 = vst [vmem:[#allocation25_spill] sm:$0xff] %v5160_v30 }
  0x8b   : > { %821 = vperm.xlu1 %4142, %v750_v43   ;;  %816 = vperm.xlu0 %4141, %v749_v44   ;;  %v4992_v43 = vld [vmem:[%s4765_s26 + $0x20] sm:$0xff] }
  0x8c   : > { %v7069_v5 = vunpack.c.h.bf16 %v4992_v43 }
  0x8f   : > { %831 = vperm.xlu1 %4142, %v752_v45   ;;  %826 = vperm.xlu0 %4141, %v751_v46  }
  0x93   : > { %841 = vperm.xlu1 %4142, %v754_v47   ;;  %836 = vperm.xlu0 %4141, %v753_v48   ;;  %v4997_v48 = vld [vmem:[%s4765_s26 + $0x28] sm:$0xff] }
  0x97   : > { %851 = vperm.xlu1 %4142, %v756_v49   ;;  %846 = vperm.xlu0 %4141, %v755_v50   ;;  %v5000_v49 = vld [vmem:[%s4765_s26 + $0x30] sm:$0xff] }
  0x9b   : > { %861 = vperm.xlu1 %4142, %v758_v51   ;;  %856 = vperm.xlu0 %4141, %v757_v52  }
  0x9f   : > { %871 = vperm.xlu1 %4142, %v760_v53   ;;  %866 = vperm.xlu0 %4141, %v759_v54  }
  0xa3   : > { %881 = vperm.xlu1 %4142, %v762_v55   ;;  %876 = vperm.xlu0 %4141, %v761_v56  }
  0xa7   : > { %891 = vperm.xlu1 %4142, %v764_v57   ;;  %886 = vperm.xlu0 %4141, %v763_v58   ;;  %v5014_v57 = vld [vmem:[%s4765_s26 + $0x38] sm:$0xff]  ;;  %v5017_v58 = vld [vmem:[%s4765_s26 + $0x40] sm:$0xff] }
  0xab   : > { %901 = vperm.xlu1 %4142, %v766_v59   ;;  %896 = vperm.xlu0 %4141, %v765_v60  }
  0xaf   : > { %911 = vperm.xlu1 %4142, %v768_v61   ;;  %906 = vperm.xlu0 %4141, %v767_v62  }
  0xb3   : > { %921 = vperm.xlu1 %4142, %v770_v63   ;;  %916 = vperm.xlu0 %4141, %v769_v0   ;;  %v5024_v63 = vld [vmem:[%s4765_s26 + $0x48] sm:$0xff]  ;;  %v5027_v0 = vld [vmem:[%s4765_s26 + $0x50] sm:$0xff] }
  0xb4   : > { %7049 = vst [vmem:[#allocation15_spill] sm:$0xff] %v5027_v0 }
  0xb7   : > { %931 = vperm.xlu1 %4142, %v772_v1   ;;  %926 = vperm.xlu0 %4141, %v771_v2  }
  0xfa   : > { %v787_v10 = vpop.permute.xlu1 %786  ;;  %v777_v11 = vpop.permute.xlu0 %776 }
  0xfb   : > { %v949_v12 = vadd.f32 %v4965_v8, %v787_v10  ;;  %v945_v13 = vadd.f32 %v4965_v8, %v777_v11  ;;  %v946_v14 = vadd.f32 %v4967_v9, %v777_v11  ;;  %v950_v16 = vadd.f32 %v4967_v9, %v787_v10  ;;  %v5123_v10 = vld [vmem:[%s4765_s26 + $0xd0] sm:$0xff] }
  0xfc   : > { %7055 = vst [vmem:[#allocation21_spill] sm:$0xff] %v5123_v10 }
  0xfd   : > { %v1009_v17 = vmul.f32 0.2, %v945_v13  ;;  %v1010_v18 = vmul.f32 0.2, %v946_v14  ;;  %v1013_v24 = vmul.f32 0.2, %v949_v12 }
  0xfe   : > { %v4974_v19 = vpop.permute.xlu1 %791  ;;  %v782_v20 = vpop.permute.xlu0 %781  ;;  %v1014_v27 = vmul.f32 0.2, %v950_v16 }
  0xff   : > { %v947_v25 = vadd.f32 %v4965_v8, %v782_v20  ;;  %v948_v26 = vadd.f32 %v4967_v9, %v782_v20  ;;  %v1073_v28 = vmax.f32 %v945_v13, %v1009_v17  ;;  %v1074_v29 = vmax.f32 %v946_v14, %v1010_v18  ;;  %v5050_v14 = vld [vmem:[%s4765_s26 + $0x60] sm:$0xff]  ;;  %v5057_v17 = vld [vmem:[%s4765_s26 + $0x90] sm:$0xff] }
 0x100   : > { %v1077_v40 = vmax.f32 %v949_v12, %v1013_v24  ;;  %v1078_v47 = vmax.f32 %v950_v16, %v1014_v27  ;;  %7053 = vst [vmem:[#allocation19_spill] sm:$0xff] %v5050_v14  ;;  %v5133_v20 = vld [vmem:[%s4765_s26 + $0x70] sm:$0xff] }
 0x101   : > { %v1011_v31 = vmul.f32 0.2, %v947_v25  ;;  %v1012_v33 = vmul.f32 0.2, %v948_v26  ;;  %v4984_v36 = vadd.f32 %v1169_v21, %v1073_v28  ;;  %v4986_v37 = vadd.f32 %v1170_v22, %v1074_v29  ;;  %7057 = vst [vmem:[#allocation23_spill] sm:$0xff] %v5133_v20  ;;  %v5178_v29 = vld [vmem:[%s4765_s26 + $0xe8] sm:$0xff] }
 0x102   : > { %v4980_v34 = vpop.permute.xlu1 %801  ;;  %v4982_v35 = vpop.permute.xlu0 %796  ;;  %v5031_v2 = vadd.f32 %v1173_v41, %v1077_v40  ;;  %v5033_v3 = vadd.f32 %v1174_v42, %v1078_v47  ;;  %v5088_v42 = vld [vmem:[%s4765_s26 + $0xb0] sm:$0xff]  ;;  %v5157_v40 = vld [vmem:[%s4765_s26 + $0xd8] sm:$0xff]  ;;  %7060 = vst [vmem:[#allocation26_spill] sm:$0xff] %v5178_v29 }
 0x103   : > { %7045 = vst [vmem:[#allocation11_spill] sm:$0xff] %v4984_v36  ;;  %7046 = vst [vmem:[#allocation12_spill] sm:$0xff] %v4986_v37  ;;  %v1329_v44 = vmax.f32 %v4984_v36, %v4986_v37  ;;  %v1075_v45 = vmax.f32 %v947_v25, %v1011_v31  ;;  %v1076_v46 = vmax.f32 %v948_v26, %v1012_v33  ;;  %v5066_v25 = vld [vmem:[%s4765_s26 + $0x98] sm:$0xff]  ;;  %v5075_v31 = vld [vmem:[%s4765_s26 + $0xa0] sm:$0xff] }
 0x104   : > { %7050 = vst [vmem:[#allocation16_spill] sm:$0xff] %v5031_v2  ;;  %7051 = vst [vmem:[#allocation17_spill] sm:$0xff] %v5033_v3  ;;  %v1335_v28 = vmax.f32 %v5031_v2, %v5033_v3  ;;  %v5100_v47 = vadd.f32 %v4965_v8, %v4982_v35  ;;  %v954_v11 = vadd.f32 %v4967_v9, %v4982_v35  ;;  %v7065_v3 = vunpack.c.h.bf16 %v4989_v39 }
 0x105   : > { %1330 = vmax.xlane.f32.xlu0 %v1329_v44  ;;  %v5007_v53 = vadd.f32 %v1171_v32, %v1075_v45  ;;  %v5009_v54 = vadd.f32 %v1172_v38, %v1076_v46  ;;  %v5078_v32 = vld [vmem:[%s4765_s26 + $0xa8] sm:$0xff]  ;;  %v5083_v38 = vadd.f32 %v4965_v8, %v4974_v19  ;;  %v5091_v44 = vld [vmem:[%s4765_s26 + $0xb8] sm:$0xff]  ;;  %v5096_v46 = vadd.f32 %v4967_v9, %v4974_v19  ;;  %v5109_v45 = vld [vmem:[%s4765_s26 + $0xc0] sm:$0xff] }
 0x106   : > { %v5003_v51 = vpop.permute.xlu1 %811  ;;  %v5005_v52 = vpop.permute.xlu0 %806  ;;  %v5112_v19 = vld [vmem:[%s4765_s26 + $0xc8] sm:$0xff]  ;;  %v1017_v13 = vmul.f32 0.2, %v5100_v47  ;;  %v5150_v35 = vadd.f32 %v4965_v8, %v4980_v34  ;;  %v5154_v41 = vadd.f32 %v4967_v9, %v4980_v34  ;;  %7058 = vst [vmem:[#allocation24_spill] sm:$0xff] %v5157_v40  ;;  %v1018_v24 = vmul.f32 0.2, %v954_v11 }
 0x107   : > { %7047 = vst [vmem:[#allocation13_spill] sm:$0xff] %v5007_v53  ;;  %7048 = vst [vmem:[#allocation14_spill] sm:$0xff] %v5009_v54  ;;  %v1332_v1 = vmax.f32 %v5007_v53, %v5009_v54  ;;  %v1015_v62 = vmul.f32 0.2, %v5083_v38  ;;  %v1016_v12 = vmul.f32 0.2, %v5096_v46  ;;  %v5166_v27 = vadd.f32 %v4965_v8, %v5003_v51 }
 0x108   : > { %7054 = vst [vmem:[#allocation20_spill] sm:$0xff] %v5112_v19  ;;  %v5170_v61 = vadd.f32 %v4967_v9, %v5003_v51  ;;  %v5174_v34 = vadd.f32 %v4965_v8, %v5005_v52  ;;  %v5182_v18 = vadd.f32 %v4967_v9, %v5005_v52  ;;  %v1081_v60 = vmax.f32 %v5100_v47, %v1017_v13 }
 0x109   : > { %1333 = vmax.xlane.f32.xlu1 %v1332_v1  ;;  %v1079_v21 = vmax.f32 %v5083_v38, %v1015_v62  ;;  %v1080_v51 = vmax.f32 %v5096_v46, %v1016_v12  ;;  %v1019_v55 = vmul.f32 0.2, %v5150_v35  ;;  %v5196_v52 = vmul.f32 0.2, %v5154_v41 }
 0x10a   : > { %v5052_v15 = vpop.permute.xlu1 %821  ;;  %v5054_v16 = vpop.permute.xlu0 %816  ;;  %v5201_v12 = vmul.f32 0.2, %v5166_v27  ;;  %v5204_v13 = vmul.f32 0.2, %v5170_v61  ;;  %v5207_v46 = vmul.f32 0.2, %v5174_v34  ;;  %v7063_v47 = vunpack.c.l.bf16 %v4989_v39 }
 0x10b   : > { %v5214_v62 = vmul.f32 0.2, %v5182_v18  ;;  %v5218_v59 = vadd.f32 %v7065_v3, %v1080_v51  ;;  %v1082_v2 = vmax.f32 %v954_v11, %v1018_v24  ;;  %v7067_v54 = vunpack.c.l.bf16 %v4992_v43 }
 0x10c   : > { %v5211_v38 = vadd.f32 %v7063_v47, %v1079_v21  ;;  %v5230_v29 = vadd.f32 %v4965_v8, %v5052_v15  ;;  %v5234_v39 = vadd.f32 %v4967_v9, %v5052_v15 }
 0x10d   : > { %1336 = vmax.xlane.f32.xlu1 %v1335_v28  ;;  %7066 = vst [vmem:[#allocation30_spill] sm:$0xff] %v5218_v59  ;;  %v5222_v53 = vadd.f32 %v7067_v54, %v1081_v60  ;;  %v5238_v54 = vadd.f32 %v4965_v8, %v5054_v16  ;;  %v1083_v60 = vmax.f32 %v5150_v35, %v1019_v55 }
 0x10e   : > { %v5102_v1 = vpop.permute.xlu1 %831  ;;  %v5104_v33 = vpop.permute.xlu0 %826  ;;  %7064 = vst [vmem:[#allocation29_spill] sm:$0xff] %v5211_v38  ;;  %v5249_v30 = vadd.f32 %v7069_v5, %v1082_v2  ;;  %v1084_v55 = vmax.f32 %v5154_v41, %v5196_v52  ;;  %v5258_v15 = vmul.f32 0.2, %v5230_v29  ;;  %v5261_v43 = vmul.f32 0.2, %v5234_v39 }
 0x10f   : > { %7068 = vst [vmem:[#allocation31_spill] sm:$0xff] %v5222_v53  ;;  %v7071_v5 = vunpack.c.l.bf16 %v4997_v48 }
 0x110   : > { %7070 = vst [vmem:[#allocation32_spill] sm:$0xff] %v5249_v30 }
 0x111   : > { %v5265_v41 = vadd.f32 %v7071_v5, %v1083_v60  ;;  %v7076_v60 = vunpack.c.l.bf16 %v5043_v7 }
 0x112   : > { %v5139_v22 = vpop.permute.xlu1 %841  ;;  %v5141_v26 = vpop.permute.xlu0 %836 }
 0x113   : > { %7072 = vst [vmem:[#allocation33_spill] sm:$0xff] %v5265_v41 }
 0x116   : > { %v5184_v28 = vpop.permute.xlu1 %851  ;;  %v5186_v23 = vpop.permute.xlu0 %846 }
 0x117   : > { %7061 = vst [vmem:[#allocation27_spill] sm:$0xff] %v5184_v28  ;;  %7062 = vst [vmem:[#allocation28_spill] sm:$0xff] %v5186_v23 }
 0x11a   : > { %v862_v56 = vpop.permute.xlu1 %861  ;;  %v857_v50 = vpop.permute.xlu0 %856 }
 0x11b   : > { %v979_v37 = vadd.f32 %v4965_v8, %v862_v56  ;;  %v980_v36 = vadd.f32 %v4967_v9, %v862_v56  ;;  %v977_v21 = vadd.f32 %v4965_v8, %v857_v50  ;;  %v978_v47 = vadd.f32 %v4967_v9, %v857_v50 }
 0x11c   : > { %v5243_v56 = vadd.f32 %v4967_v9, %v5054_v16 }
 0x11d   : > { %v1043_v3 = vmul.f32 0.2, %v979_v37  ;;  %v1044_v50 = vmul.f32 0.2, %v980_v36  ;;  %v1041_v11 = vmul.f32 0.2, %v977_v21 }
 0x11e   : > { %v1042_v24 = vmul.f32 0.2, %v978_v47  ;;  %v872_v51 = vpop.permute.xlu1 %871  ;;  %v867_v20 = vpop.permute.xlu0 %866 }
 0x11f   : > { %v983_v35 = vadd.f32 %v4965_v8, %v872_v51  ;;  %v984_v16 = vadd.f32 %v4967_v9, %v872_v51  ;;  %v981_v40 = vadd.f32 %v4965_v8, %v867_v20  ;;  %v982_v28 = vadd.f32 %v4967_v9, %v867_v20 }
 0x120   : > { %v1105_v14 = vmax.f32 %v977_v21, %v1041_v11  ;;  %v1106_v6 = vmax.f32 %v978_v47, %v1042_v24  ;;  %v1107_v10 = vmax.f32 %v979_v37, %v1043_v3  ;;  %v1108_v19 = vmax.f32 %v980_v36, %v1044_v50 }
 0x121   : > { %v1045_v2 = vmul.f32 0.2, %v981_v40  ;;  %v1047_v52 = vmul.f32 0.2, %v983_v35  ;;  %v1046_v51 = vmul.f32 0.2, %v982_v28  ;;  %v7073_v20 = vunpack.c.l.bf16 %v5036_v4 }
 0x122   : > { %v877_v23 = vpop.permute.xlu0 %876  ;;  %v7074_v36 = vunpack.c.h.bf16 %v5036_v4  ;;  %v1048_v47 = vmul.f32 0.2, %v984_v16  ;;  %v882_v3 = vpop.permute.xlu1 %881  ;;  %v5279_v24 = vadd.f32 %v7076_v60, %v1107_v10  ;;  %v1085_v10 = vmax.f32 %v5174_v34, %v5207_v46 }
 0x123   : > { %v5269_v21 = vadd.f32 %v7073_v20, %v1105_v14  ;;  %v985_v50 = vadd.f32 %v4965_v8, %v877_v23  ;;  %v986_v11 = vadd.f32 %v4967_v9, %v877_v23  ;;  %v7077_v14 = vunpack.c.h.bf16 %v5043_v7 }
 0x124   : > { %v5273_v37 = vadd.f32 %v7074_v36, %v1106_v6  ;;  %v1109_v4 = vmax.f32 %v981_v40, %v1045_v2  ;;  %v1110_v6 = vmax.f32 %v982_v28, %v1046_v51  ;;  %v5288_v36 = vmul.f32 0.2, %v5238_v54 }
 0x125   : > { %v5285_v20 = vadd.f32 %v7077_v14, %v1108_v19  ;;  %v1049_v0 = vmul.f32 0.2, %v985_v50  ;;  %v1341_v23 = vmax.f32 %v5222_v53, %v5249_v30  ;;  %v5295_v60 = vadd.f32 %v4965_v8, %v882_v3 }
 0x126   : > { %7075 = vst [vmem:[#allocation34_spill] sm:$0xff] %v5273_v37  ;;  %v1377_v5 = vmax.f32 %v5269_v21, %v5273_v37  ;;  %v1050_v37 = vmul.f32 0.2, %v986_v11  ;;  %v887_v7 = vpop.permute.xlu0 %886  ;;  %v7079_v19 = vunpack.c.l.bf16 %v5057_v17  ;;  %v7081_v28 = vunpack.c.h.bf16 %v5057_v17 }
 0x127   : > { %7078 = vst [vmem:[#allocation35_spill] sm:$0xff] %v5285_v20  ;;  %v988_v51 = vadd.f32 %v4967_v9, %v882_v3  ;;  %v5307_v14 = vadd.f32 %v4965_v8, %v887_v7  ;;  %v1380_v34 = vmax.f32 %v5279_v24, %v5285_v20  ;;  %v1111_v46 = vmax.f32 %v983_v35, %v1047_v52 }
 0x128   : > { %1378 = vmax.xlane.f32.xlu0 %v1377_v5  ;;  %v5299_v40 = vadd.f32 %v7079_v19, %v1109_v4  ;;  %v5303_v2 = vadd.f32 %v7081_v28, %v1110_v6  ;;  %v990_v5 = vadd.f32 %v4967_v9, %v887_v7  ;;  %v1112_v4 = vmax.f32 %v984_v16, %v1048_v47 }
 0x129   : > { %v1113_v19 = vmax.f32 %v985_v50, %v1049_v0  ;;  %v5316_v17 = vadd.f32 %v4965_v8, %v5102_v1  ;;  %v1114_v6 = vmax.f32 %v986_v11, %v1050_v37  ;;  %v7083_v3 = vunpack.c.h.bf16 %v4997_v48 }
 0x12a   : > { %7080 = vst [vmem:[#allocation36_spill] sm:$0xff] %v5299_v40  ;;  %7082 = vst [vmem:[#allocation37_spill] sm:$0xff] %v5303_v2  ;;  %v1383_v30 = vmax.f32 %v5299_v40, %v5303_v2  ;;  %v1086_v53 = vmax.f32 %v5182_v18, %v5214_v62  ;;  %v5325_v35 = vmul.f32 0.2, %v5243_v56  ;;  %v5329_v52 = vadd.f32 %v4967_v9, %v5102_v1  ;;  %v892_v62 = vpop.permute.xlu1 %891  ;;  %v897_v50 = vpop.permute.xlu0 %896 }
 0x12b   : > { %v5320_v28 = vadd.f32 %v7083_v3, %v1084_v55  ;;  %v5333_v0 = vadd.f32 %v4965_v8, %v5104_v33  ;;  %v5337_v16 = vadd.f32 %v4967_v9, %v5104_v33  ;;  %v1051_v48 = vmul.f32 0.2, %v5295_v60 }
 0x12c   : > { %1381 = vmax.xlane.f32.xlu0 %v1380_v34  ;;  %1384 = vmax.xlane.f32.xlu1 %v1383_v30  ;;  %v1052_v18 = vmul.f32 0.2, %v988_v51  ;;  %v1053_v55 = vmul.f32 0.2, %v5307_v14  ;;  %v7085_v37 = vunpack.c.l.bf16 %v5066_v25  ;;  %v1054_v47 = vmul.f32 0.2, %v990_v5 }
 0x12d   : > { %7084 = vst [vmem:[#allocation38_spill] sm:$0xff] %v5320_v28  ;;  %v7087_v11 = vunpack.c.h.bf16 %v5066_v25  ;;  %v7089_v33 = vunpack.c.l.bf16 %v5075_v31  ;;  %v7091_v30 = vunpack.c.h.bf16 %v5075_v31  ;;  %v1344_v2 = vmax.f32 %v5265_v41, %v5320_v28 }
 0x12e   : > { %v5343_v1 = vadd.f32 %v7085_v37, %v1111_v46  ;;  %v7093_v46 = vunpack.c.l.bf16 %v5000_v49  ;;  %v7095_v40 = vunpack.c.h.bf16 %v5000_v49  ;;  %v5373_v31 = vmul.f32 0.2, %v5329_v52 }
 0x12f   : > { %v5347_v7 = vadd.f32 %v7087_v11, %v1112_v4  ;;  %v5351_v34 = vadd.f32 %v7089_v33, %v1113_v19  ;;  %v5355_v3 = vadd.f32 %v7091_v30, %v1114_v6  ;;  %v1087_v4 = vmax.f32 %v5166_v27, %v5201_v12 }
 0x130   : > { %7086 = vst [vmem:[#allocation39_spill] sm:$0xff] %v5343_v1  ;;  %v5361_v37 = vadd.f32 %v7093_v46, %v1085_v10  ;;  %v5365_v25 = vadd.f32 %v7095_v40, %v1086_v53  ;;  %v5370_v19 = vmul.f32 0.2, %v5316_v17  ;;  %v5376_v6 = vadd.f32 %v4965_v8, %v892_v62  ;;  %1342 = vmax.xlane.f32.xlu1 %v1341_v23 }
 0x131   : > { %7088 = vst [vmem:[#allocation40_spill] sm:$0xff] %v5347_v7  ;;  %7090 = vst [vmem:[#allocation41_spill] sm:$0xff] %v5351_v34  ;;  %v5379_v11 = vadd.f32 %v4967_v9, %v892_v62  ;;  %v7097_v49 = vmax.f32 %v5211_v38, %v5218_v59  ;;  %v5385_v53 = vadd.f32 %v4965_v8, %v897_v50  ;;  %v5970_v59 = vld [vmem:[#allocation2 + $0xe8] sm:$0xff] }
 0x132   : > { %7092 = vst [vmem:[#allocation42_spill] sm:$0xff] %v5355_v3  ;;  %7094 = vst [vmem:[#allocation43_spill] sm:$0xff] %v5361_v37  ;;  %v5388_v27 = vadd.f32 %v4967_v9, %v897_v50  ;;  %v1115_v12 = vmax.f32 %v5295_v60, %v1051_v48  ;;  %v1116_v10 = vmax.f32 %v988_v51, %v1052_v18  ;;  %v7098_v50 = vunpack.c.l.bf16 %v5014_v57 }
 0x133   : > { %7096 = vst [vmem:[#allocation44_spill] sm:$0xff] %v5365_v25  ;;  %1339 = vmax.xlane.f32.xlu0 %v7097_v49  ;;  %v1386_v40 = vmax.f32 %v5343_v1, %v5347_v7  ;;  %v1389_v62 = vmax.f32 %v5351_v34, %v5355_v3  ;;  %v1117_v33 = vmax.f32 %v5307_v14, %v1053_v55  ;;  %v1029_v51 = vmul.f32 0.2, %v5333_v0  ;;  %v5952_v7 = vld [vmem:[#allocation2 + $0x70] sm:$0xff]  ;;  %v5954_v1 = vld [vmem:[#allocation2 + $0x68] sm:$0xff] }
 0x134   : > { %v1118_v30 = vmax.f32 %v990_v5, %v1054_v47  ;;  %v1347_v23 = vmax.f32 %v5361_v37, %v5365_v25  ;;  %v1088_v46 = vmax.f32 %v5170_v61, %v5204_v13  ;;  %v5402_v49 = vadd.f32 %v7098_v50, %v1087_v4  ;;  %v5931_v25 = vld [vmem:[#allocation2 + $0xe0] sm:$0xff]  ;;  %v5933_v37 = vld [vmem:[#allocation2 + $0xd8] sm:$0xff] }
 0x135   : > { %v1089_v60 = vmax.f32 %v5238_v54, %v5288_v36  ;;  %v5409_v48 = vadd.f32 %v4965_v8, %v5139_v22  ;;  %v5413_v14 = vadd.f32 %v4967_v9, %v5139_v22  ;;  %1390 = vmax.xlane.f32.xlu1 %v1389_v62  ;;  %v1090_v61 = vmax.f32 %v5243_v56, %v5325_v35  ;;  %v902_v54 = vpop.permute.xlu1 %901 }
 0x136   : > { %7099 = vst [vmem:[#allocation45_spill] sm:$0xff] %v5402_v49  ;;  %v1055_v13 = vmul.f32 0.2, %v5376_v6  ;;  %v1056_v5 = vmul.f32 0.2, %v5379_v11  ;;  %v7100_v36 = vunpack.c.l.bf16 %v5078_v32  ;;  %v7102_v55 = vunpack.c.h.bf16 %v5078_v32 }
 0x137   : > { %1387 = vmax.xlane.f32.xlu0 %v1386_v40  ;;  %v1057_v22 = vmul.f32 0.2, %v5385_v53  ;;  %v1058_v4 = vmul.f32 0.2, %v5388_v27  ;;  %v907_v40 = vpop.permute.xlu0 %906  ;;  %v7104_v56 = vunpack.c.l.bf16 %v5088_v42  ;;  %v7106_v62 = vunpack.c.h.bf16 %v5088_v42 }
 0x138   : > { %v5421_v18 = vadd.f32 %v7100_v36, %v1115_v12  ;;  %v5425_v47 = vadd.f32 %v7102_v55, %v1116_v10  ;;  %v5439_v12 = vadd.f32 %v4965_v8, %v5141_v26  ;;  %v5443_v32 = vadd.f32 %v4967_v9, %v5141_v26 }
 0x139   : > { %v5431_v35 = vadd.f32 %v7104_v56, %v1117_v33  ;;  %v5435_v50 = vadd.f32 %v7106_v62, %v1118_v30  ;;  %v7108_v10 = vunpack.c.h.bf16 %v5014_v57  ;;  %v7110_v55 = vunpack.c.l.bf16 %v5017_v58  ;;  %1348 = vmax.xlane.f32.xlu1 %v1347_v23 }
 0x13a   : > { %7101 = vst [vmem:[#allocation46_spill] sm:$0xff] %v5421_v18  ;;  %7103 = vst [vmem:[#allocation47_spill] sm:$0xff] %v5425_v47  ;;  %v1030_v42 = vmul.f32 0.2, %v5337_v16  ;;  %v5455_v30 = vadd.f32 %v4965_v8, %v902_v54  ;;  %v5458_v56 = vadd.f32 %v4967_v9, %v902_v54  ;;  %v7112_v26 = vunpack.c.h.bf16 %v5017_v58 }
 0x13b   : > { %7105 = vst [vmem:[#allocation48_spill] sm:$0xff] %v5431_v35  ;;  %7107 = vst [vmem:[#allocation49_spill] sm:$0xff] %v5435_v50  ;;  %v5447_v36 = vadd.f32 %v7108_v10, %v1088_v46  ;;  %v5451_v33 = vadd.f32 %v7110_v55, %v1089_v60  ;;  %1345 = vmax.xlane.f32.xlu0 %v1344_v2  ;;  %v5465_v57 = vadd.f32 %v4965_v8, %v907_v40 }
 0x13c   : > { %v5462_v62 = vadd.f32 %v7112_v26, %v1090_v61  ;;  %v5468_v46 = vadd.f32 %v4967_v9, %v907_v40  ;;  %v1392_v60 = vmax.f32 %v5421_v18, %v5425_v47  ;;  %v1119_v10 = vmax.f32 %v5376_v6, %v1055_v13 }
 0x13d   : > { %7109 = vst [vmem:[#allocation50_spill] sm:$0xff] %v5447_v36  ;;  %7111 = vst [vmem:[#allocation51_spill] sm:$0xff] %v5451_v33  ;;  %v1395_v54 = vmax.f32 %v5431_v35, %v5435_v50  ;;  %v1120_v2 = vmax.f32 %v5379_v11, %v1056_v5  ;;  %v1121_v58 = vmax.f32 %v5385_v53, %v1057_v22  ;;  %v5479_v61 = vmul.f32 0.2, %v5409_v48  ;;  %v5915_v50 = vld [vmem:[#allocation2 + $0x58] sm:$0xff] }
 0x13e   : > { %7113 = vst [vmem:[#allocation52_spill] sm:$0xff] %v5462_v62  ;;  %v1122_v23 = vmax.f32 %v5388_v27, %v1058_v4  ;;  %v1091_v40 = vmax.f32 %v5230_v29, %v5258_v15  ;;  %v1092_v55 = vmax.f32 %v5234_v39, %v5261_v43  ;;  %v1093_v6 = vmax.f32 %v5333_v0, %v1029_v51  ;;  %v912_v29 = vpop.permute.xlu1 %911  ;;  %v917_v0 = vpop.permute.xlu0 %916 }
 0x13f   : > { %v5487_v13 = vmul.f32 0.2, %v5413_v14  ;;  %v1059_v11 = vmul.f32 0.2, %v5455_v30  ;;  %1393 = vmax.xlane.f32.xlu0 %v1392_v60  ;;  %1396 = vmax.xlane.f32.xlu1 %v1395_v54  ;;  %v1350_v53 = vmax.f32 %v5402_v49, %v5447_v36  ;;  %v1094_v27 = vmax.f32 %v5337_v16, %v1030_v42  ;;  %v5913_v49 = vld [vmem:[#allocation2 + $0x60] sm:$0xff] }
 0x140   : > { %v1060_v5 = vmul.f32 0.2, %v5458_v56  ;;  %v1061_v15 = vmul.f32 0.2, %v5465_v57  ;;  %v1062_v39 = vmul.f32 0.2, %v5468_v46  ;;  %v1353_v43 = vmax.f32 %v5451_v33, %v5462_v62 }
 0x141   : > { %v7114_v51 = vunpack.c.l.bf16 %v5091_v44  ;;  %v7116_v4 = vunpack.c.h.bf16 %v5091_v44  ;;  %v7118_v16 = vunpack.c.l.bf16 %v5109_v45  ;;  %v7120_v60 = vunpack.c.h.bf16 %v5109_v45  ;;  %v7126_v44 = vld [vmem:[#allocation15_spill] sm:$0xff] }
 0x142   : > { %v1033_v36 = vmul.f32 0.2, %v5439_v12  ;;  %v7122_v62 = vunpack.c.l.bf16 %v5024_v63  ;;  %v5529_v45 = vadd.f32 %v4965_v8, %v912_v29 }
 0x143   : > { %v5500_v22 = vadd.f32 %v7114_v51, %v1119_v10  ;;  %v5504_v26 = vadd.f32 %v7116_v4, %v1120_v2  ;;  %v5508_v42 = vadd.f32 %v7118_v16, %v1121_v58  ;;  %v5512_v54 = vadd.f32 %v7120_v60, %v1122_v23  ;;  %1351 = vmax.xlane.f32.xlu0 %v1350_v53  ;;  %v7131_v60 = vld [vmem:[#allocation28_spill] sm:$0xff] }
 0x144   : > { %v5517_v33 = vadd.f32 %v7122_v62, %v1091_v40  ;;  %v7124_v10 = vunpack.c.h.bf16 %v5024_v63  ;;  %v7127_v2 = vunpack.c.l.bf16 %v7126_v44  ;;  %v1034_v58 = vmul.f32 0.2, %v5443_v32  ;;  %1354 = vmax.xlane.f32.xlu1 %v1353_v43 }
 0x145   : > { %7115 = vst [vmem:[#allocation53_spill] sm:$0xff] %v5500_v22  ;;  %7117 = vst [vmem:[#allocation54_spill] sm:$0xff] %v5504_v26  ;;  %v5532_v23 = vadd.f32 %v4967_v9, %v912_v29  ;;  %v7129_v62 = vunpack.c.h.bf16 %v7126_v44  ;;  %v5539_v63 = vadd.f32 %v4965_v8, %v917_v0  ;;  %v1124_v16 = vmax.f32 %v5458_v56, %v1060_v5 }
 0x146   : > { %7119 = vst [vmem:[#allocation55_spill] sm:$0xff] %v5508_v42  ;;  %7121 = vst [vmem:[#allocation56_spill] sm:$0xff] %v5512_v54  ;;  %v5521_v51 = vadd.f32 %v7124_v10, %v1092_v55  ;;  %v5525_v4 = vadd.f32 %v7127_v2, %v1093_v6  ;;  %v5542_v55 = vadd.f32 %v4967_v9, %v917_v0 }
 0x147   : > { %7123 = vst [vmem:[#allocation57_spill] sm:$0xff] %v5517_v33  ;;  %v5536_v40 = vadd.f32 %v7129_v62, %v1094_v27  ;;  %v1123_v6 = vmax.f32 %v5455_v30, %v1059_v11  ;;  %v1398_v29 = vmax.f32 %v5500_v22, %v5504_v26  ;;  %v1401_v53 = vmax.f32 %v5508_v42, %v5512_v54  ;;  %v5897_v42 = vld [vmem:[#allocation2 + $0xd0] sm:$0xff]  ;;  %v5899_v26 = vld [vmem:[#allocation2 + $0xc8] sm:$0xff] }
 0x148   : > { %7125 = vst [vmem:[#allocation58_spill] sm:$0xff] %v5521_v51  ;;  %7128 = vst [vmem:[#allocation15_spill] sm:$0xff] %v5525_v4  ;;  %v1125_v43 = vmax.f32 %v5465_v57, %v1061_v15  ;;  %v1126_v27 = vmax.f32 %v5468_v46, %v1062_v39  ;;  %v5554_v10 = vadd.f32 %v4965_v8, %v7131_v60  ;;  %v1063_v57 = vmul.f32 0.2, %v5529_v45  ;;  %v7132_v15 = vld [vmem:[#allocation20_spill] sm:$0xff] }
 0x149   : > { %7130 = vst [vmem:[#allocation59_spill] sm:$0xff] %v5536_v40  ;;  %v1095_v0 = vmax.f32 %v5316_v17, %v5370_v19  ;;  %v1096_v30 = vmax.f32 %v5329_v52, %v5373_v31  ;;  %v1097_v56 = vmax.f32 %v5439_v12, %v1033_v36  ;;  %v5563_v11 = vadd.f32 %v4967_v9, %v7131_v60  ;;  %v922_v19 = vpop.permute.xlu1 %921  ;;  %v927_v12 = vpop.permute.xlu0 %926 }
 0x14a   : > { %1399 = vmax.xlane.f32.xlu0 %v1398_v29  ;;  %1402 = vmax.xlane.f32.xlu1 %v1401_v53  ;;  %v1356_v46 = vmax.f32 %v5517_v33, %v5521_v51  ;;  %v1359_v5 = vmax.f32 %v5525_v4, %v5536_v40  ;;  %v1064_v17 = vmul.f32 0.2, %v5532_v23  ;;  %v1065_v52 = vmul.f32 0.2, %v5539_v63  ;;  %v7137_v29 = vld [vmem:[#allocation21_spill] sm:$0xff]  ;;  %v7142_v33 = vld [vmem:[#allocation18_spill] sm:$0xff] }
 0x14b   : > { %v1066_v31 = vmul.f32 0.2, %v5542_v55  ;;  %v1098_v36 = vmax.f32 %v5443_v32, %v1034_v58  ;;  %v7133_v39 = vunpack.c.l.bf16 %v7132_v15  ;;  %v7135_v2 = vunpack.c.h.bf16 %v7132_v15 }
 0x14c   : > { %v7138_v53 = vunpack.c.l.bf16 %v7137_v29  ;;  %v7140_v40 = vunpack.c.h.bf16 %v7137_v29  ;;  %v1037_v51 = vmul.f32 0.2, %v5554_v10  ;;  %v7143_v32 = vunpack.c.l.bf16 %v7142_v33 }
 0x14d   : > { %v5576_v44 = vadd.f32 %v7133_v39, %v1123_v6  ;;  %v5580_v62 = vadd.f32 %v7135_v2, %v1124_v16  ;;  %v7145_v6 = vunpack.c.h.bf16 %v7142_v33  ;;  %v7147_v16 = vld [vmem:[#allocation19_spill] sm:$0xff]  ;;  %v1003_v29 = vadd.f32 %v4965_v8, %v922_v19 }
 0x14e   : > { %v5584_v60 = vadd.f32 %v7138_v53, %v1125_v43  ;;  %v5588_v4 = vadd.f32 %v7140_v40, %v1126_v27  ;;  %v5593_v58 = vadd.f32 %v7143_v32, %v1095_v0  ;;  %v7148_v15 = vunpack.c.l.bf16 %v7147_v16  ;;  %1357 = vmax.xlane.f32.xlu0 %v1356_v46  ;;  %1360 = vmax.xlane.f32.xlu1 %v1359_v5  ;;  %v7152_v5 = vld [vmem:[#allocation27_spill] sm:$0xff] }
 0x14f   : > { %7134 = vst [vmem:[#allocation28_spill] sm:$0xff] %v5576_v44  ;;  %7136 = vst [vmem:[#allocation20_spill] sm:$0xff] %v5580_v62  ;;  %v5597_v39 = vadd.f32 %v7145_v6, %v1096_v30  ;;  %v1038_v43 = vmul.f32 0.2, %v5563_v11  ;;  %v1004_v40 = vadd.f32 %v4967_v9, %v922_v19  ;;  %v1005_v27 = vadd.f32 %v4965_v8, %v927_v12 }
 0x150   : > { %7139 = vst [vmem:[#allocation21_spill] sm:$0xff] %v5584_v60  ;;  %7141 = vst [vmem:[#allocation60_spill] sm:$0xff] %v5588_v4  ;;  %v5601_v2 = vadd.f32 %v7148_v15, %v1097_v56  ;;  %v1006_v0 = vadd.f32 %v4967_v9, %v927_v12  ;;  %v7150_v33 = vunpack.c.h.bf16 %v7147_v16  ;;  %v1127_v56 = vmax.f32 %v5529_v45, %v1063_v57  ;;  %v1167_v57 = vld [vmem:[%s4765_s26 + $0xf0] sm:$0xff]  ;;  %v932_v15 = vpop.permute.xlu1 %931 }
 0x151   : > { %7144 = vst [vmem:[#allocation18_spill] sm:$0xff] %v5593_v58  ;;  %7146 = vst [vmem:[#allocation61_spill] sm:$0xff] %v5597_v39  ;;  %v1128_v53 = vmax.f32 %v5532_v23, %v1064_v17  ;;  %v1404_v32 = vmax.f32 %v5576_v44, %v5580_v62  ;;  %v1407_v19 = vmax.f32 %v5584_v60, %v5588_v4  ;;  %v1067_v17 = vmul.f32 0.2, %v1003_v29  ;;  %v7158_v4 = vld [vmem:[#allocation25_spill] sm:$0xff]  ;;  %v5881_v60 = vld [vmem:[#allocation2 + $0x48] sm:$0xff] }
 0x152   : > { %7149 = vst [vmem:[#allocation19_spill] sm:$0xff] %v5601_v2  ;;  %v5610_v30 = vadd.f32 %v7150_v33, %v1098_v36  ;;  %v1129_v6 = vmax.f32 %v5539_v63, %v1065_v52  ;;  %v1130_v46 = vmax.f32 %v5542_v55, %v1066_v31  ;;  %v975_v12 = vadd.f32 %v4965_v8, %v7152_v5  ;;  %v7153_v52 = vld [vmem:[#allocation24_spill] sm:$0xff] }
 0x153   : > { %v976_v36 = vadd.f32 %v4967_v9, %v7152_v5  ;;  %v1362_v45 = vmax.f32 %v5593_v58, %v5597_v39  ;;  %v1099_v23 = vmax.f32 %v5409_v48, %v5479_v61  ;;  %v1068_v16 = vmul.f32 0.2, %v1004_v40  ;;  %1405 = vmax.xlane.f32.xlu0 %v1404_v32  ;;  %1408 = vmax.xlane.f32.xlu1 %v1407_v19 }
 0x154   : > { %7151 = vst [vmem:[#allocation62_spill] sm:$0xff] %v5610_v30  ;;  %v1069_v33 = vmul.f32 0.2, %v1005_v27  ;;  %v1100_v63 = vmax.f32 %v5413_v14, %v5487_v13  ;;  %v1070_v55 = vmul.f32 0.2, %v1006_v0  ;;  %v7154_v31 = vunpack.c.l.bf16 %v7153_v52 }
 0x155   : > { %v7156_v39 = vunpack.c.h.bf16 %v7153_v52  ;;  %v1101_v48 = vmax.f32 %v5554_v10, %v1037_v51  ;;  %v1365_v61 = vmax.f32 %v5601_v2, %v5610_v30  ;;  %v7159_v32 = vunpack.c.l.bf16 %v7158_v4  ;;  %v7163_v30 = vld [vmem:[#allocation22_spill] sm:$0xff] }
 0x156   : > { %v5633_v5 = vadd.f32 %v7154_v31, %v1127_v56  ;;  %v7161_v14 = vunpack.c.h.bf16 %v7158_v4  ;;  %v1102_v56 = vmax.f32 %v5563_v11, %v1038_v43  ;;  %v1039_v31 = vmul.f32 0.2, %v975_v12  ;;  %v7168_v43 = vld [vmem:[#allocation23_spill] sm:$0xff] }
 0x157   : > { %v5637_v58 = vadd.f32 %v7156_v39, %v1128_v53  ;;  %v5644_v19 = vadd.f32 %v7159_v32, %v1129_v6  ;;  %v1007_v39 = vadd.f32 %v4965_v8, %v932_v15  ;;  %v1229_v53 = vunpack.c.l.bf16 %v1167_v57  ;;  %1363 = vmax.xlane.f32.xlu0 %v1362_v45  ;;  %1366 = vmax.xlane.f32.xlu1 %v1365_v61 }
 0x158   : > { %7155 = vst [vmem:[#allocation27_spill] sm:$0xff] %v5633_v5  ;;  %v5648_v13 = vadd.f32 %v7161_v14, %v1130_v46  ;;  %v1230_v52 = vunpack.c.h.bf16 %v1167_v57  ;;  %v1040_v51 = vmul.f32 0.2, %v976_v36  ;;  %v1008_v10 = vadd.f32 %v4967_v9, %v932_v15  ;;  %v1152_v9 = vld [vmem:[%s4765_s26 + $0x78] sm:$0xff] }
 0x159   : > { %7157 = vst [vmem:[#allocation24_spill] sm:$0xff] %v5637_v58  ;;  %7160 = vst [vmem:[#allocation25_spill] sm:$0xff] %v5644_v19  ;;  %v7164_v6 = vunpack.c.l.bf16 %v7163_v30  ;;  %v7166_v4 = vunpack.c.h.bf16 %v7163_v30  ;;  %v1410_v11 = vmax.f32 %v5633_v5, %v5637_v58  ;;  %v7169_v8 = vunpack.c.l.bf16 %v7168_v43  ;;  %v5879_v5 = vld [vmem:[#allocation2 + $0x50] sm:$0xff] }
 0x15a   : > { %7162 = vst [vmem:[#allocation63_spill] sm:$0xff] %v5648_v13  ;;  %v1131_v57 = vmax.f32 %v1003_v29, %v1067_v17  ;;  %v1132_v2 = vmax.f32 %v1004_v40, %v1068_v16  ;;  %v1413_v45 = vmax.f32 %v5644_v19, %v5648_v13  ;;  %v1133_v30 = vmax.f32 %v1005_v27, %v1069_v33  ;;  %v7173_v40 = vld [vmem:[#allocation26_spill] sm:$0xff]  ;;  %v5863_v13 = vld [vmem:[#allocation2 + $0xc0] sm:$0xff] }
 0x15b   : > { %v5655_v32 = vadd.f32 %v7164_v6, %v1099_v23  ;;  %v5659_v46 = vadd.f32 %v7166_v4, %v1100_v63  ;;  %v5665_v14 = vadd.f32 %v7169_v8, %v1101_v48  ;;  %v7171_v23 = vunpack.c.h.bf16 %v7168_v43  ;;  %1411 = vmax.xlane.f32.xlu0 %v1410_v11  ;;  %v1168_v8 = vld [vmem:[%s4765_s26 + $0xf8] sm:$0xff] }
 0x15c   : > { %v1134_v63 = vmax.f32 %v1006_v0, %v1070_v55  ;;  %v1071_v61 = vmul.f32 0.2, %v1007_v39  ;;  %v1072_v6 = vmul.f32 0.2, %v1008_v10  ;;  %1414 = vmax.xlane.f32.xlu1 %v1413_v45  ;;  %v1199_v4 = vunpack.c.l.bf16 %v1152_v9  ;;  %v5865_v19 = vld [vmem:[#allocation2 + $0xb8] sm:$0xff] }
 0x15d   : > { %7165 = vst [vmem:[#allocation22_spill] sm:$0xff] %v5655_v32  ;;  %7167 = vst [vmem:[#allocation64_spill] sm:$0xff] %v5659_v46  ;;  %v5672_v15 = vadd.f32 %v7171_v23, %v1102_v56  ;;  %v1200_v48 = vunpack.c.h.bf16 %v1152_v9  ;;  %v1368_v29 = vmax.f32 %v5655_v32, %v5659_v46  ;;  %v7174_v17 = vunpack.c.l.bf16 %v7173_v40 }
 0x15e   : > { %7170 = vst [vmem:[#allocation23_spill] sm:$0xff] %v5665_v14  ;;  %v7176_v43 = vunpack.c.h.bf16 %v7173_v40  ;;  %v1103_v27 = vmax.f32 %v975_v12, %v1039_v31  ;;  %v5686_v33 = vadd.f32 %v1229_v53, %v1133_v30  ;;  %v5688_v55 = vadd.f32 %v1230_v52, %v1134_v63  ;;  %v4144_v63 = vld [vmem:[%s4763_s17] sm:$0xff]  }
 0x15f   : > { %7172 = vst [vmem:[#allocation65_spill] sm:$0xff] %v5672_v15  ;;  %v5678_v16 = vadd.f32 %v7174_v17, %v1131_v57  ;;  %v1371_v0 = vmax.f32 %v5665_v14, %v5672_v15  ;;  %v1104_v11 = vmax.f32 %v976_v36, %v1040_v51  ;;  %1369 = vmax.xlane.f32.xlu0 %v1368_v29  ;;  %v1232_v12 = vunpack.c.h.bf16 %v1168_v8  ;;  %v5718_v17 = vld [vmem:[#allocation2 + $0x8] sm:$0xff]  ;;  %v5847_v15 = vld [vmem:[#allocation2 + $0x38] sm:$0xff] }
 0x160   : > { %v5682_v56 = vadd.f32 %v7176_v43, %v1132_v2  ;;  %7178 = vst [vmem:[#allocation67_spill] sm:$0xff] %v5686_v33  ;;  %7179 = vst [vmem:[#allocation68_spill] sm:$0xff] %v5688_v55  ;;  %v5693_v9 = vadd.f32 %v1199_v4, %v1103_v27  ;;  %v1231_v2 = vunpack.c.l.bf16 %v1168_v8  ;;  %v1419_v31 = vmax.f32 %v5686_v33, %v5688_v55  ;;  %v4147_v4 = vld [vmem:[%s4763_s17 + $0x50] sm:$0xff]   ;;  %v5831_v33 = vld [vmem:[#allocation2 + $0xa8] sm:$0xff] }
 0x161   : > { %7175 = vst [vmem:[#allocation26_spill] sm:$0xff] %v5678_v16  ;;  %1372 = vmax.xlane.f32.xlu1 %v1371_v0  ;;  %v5697_v53 = vadd.f32 %v1200_v48, %v1104_v11  ;;  %v1135_v52 = vmax.f32 %v1007_v39, %v1071_v61  ;;  %v1136_v36 = vmax.f32 %v1008_v10, %v1072_v6  ;;  %v4143_v39 = vld [vmem:[%s4763_s17 + $0x40] sm:$0xff]   ;;  %v4145_v10 = vld [vmem:[%s4763_s17 + $0x48] sm:$0xff]   ;;  %v4148_v48 = vld [vmem:[%s4763_s17 + $0x10] sm:$0xff]  }
 0x162   : > { %7177 = vst [vmem:[#allocation66_spill] sm:$0xff] %v5682_v56  ;;  %v1416_v57 = vmax.f32 %v5678_v16, %v5682_v56  ;;  %7180 = vst [vmem:[#allocation69_spill] sm:$0xff] %v5693_v9  ;;  %3885 = vmatprep.subr.bf16.mxu0 %v4143_v39  ;;  %4057 = vmatprep.subr.bf16.mxu1 %v4143_v39  ;;  %v4146_v61 = vld [vmem:[%s4763_s17 + $0x8] sm:$0xff]   ;;  %v5711_v6 = vld [vmem:[#allocation2] sm:$0xff] }
 0x163   : > { %7181 = vst [vmem:[#allocation70_spill] sm:$0xff] %v5697_v53  ;;  %v1374_v51 = vmax.f32 %v5693_v9, %v5697_v53  ;;  %v5701_v45 = vadd.f32 %v1231_v2, %v1135_v52  ;;  %v5703_v23 = vadd.f32 %v1232_v12, %v1136_v36  ;;  %3886 = vmatpush3.bf16.msra.mxu0 %v4144_v63  ;;  %v5728_v11 = vld [vmem:[#allocation2 + $0x10] sm:$0xff]  ;;  %v4149_v2 = vld [vmem:[%s4763_s17 + $0x58] sm:$0xff]   ;;  %v4151_v36 = vld [vmem:[%s4763_s17 + $0x60] sm:$0xff]  }
 0x164   : > { %1417 = vmax.xlane.f32.xlu0 %v1416_v57  ;;  %4065 = vmatpush3.bf16.msra.mxu1 %v4144_v63  ;;  %v4150_v12 = vld [vmem:[%s4763_s17 + $0x18] sm:$0xff]   ;;  %v4154_v39 = vld [vmem:[%s4763_s17 + $0x28] sm:$0xff]   ;;  %v4155_v63 = vld [vmem:[%s4763_s17 + $0x70] sm:$0xff]  }
 0x165   : > { %1420 = vmax.xlane.f32.xlu1 %v1419_v31  ;;  %7182 = vst [vmem:[#allocation71_spill] sm:$0xff] %v5701_v45  ;;  %7183 = vst [vmem:[#allocation72_spill] sm:$0xff] %v5703_v23  ;;  %v1422_v30 = vmax.f32 %v5701_v45, %v5703_v23  ;;  %3887 = vmatprep.subr.bf16.mxu0 %v4145_v10  ;;  %v5795_v52 = vld [vmem:[#allocation2 + $0x98] sm:$0xff]  ;;  %v5809_v8 = vld [vmem:[#allocation2 + $0x30] sm:$0xff] }
 0x166   : > { %4058 = vmatprep.subr.bf16.mxu1 %v4145_v10  ;;  %v4156_v10 = vld [vmem:[%s4763_s17 + $0x30] sm:$0xff]   ;;  %v5811_v23 = vld [vmem:[#allocation2 + $0x28] sm:$0xff]  ;;  %v5845_v16 = vld [vmem:[#allocation2 + $0x40] sm:$0xff] }
 0x167   : > { %3888 = vmatpush3.bf16.msra.mxu0 %v4146_v61  ;;  %v5829_v55 = vld [vmem:[#allocation2 + $0xb0] sm:$0xff] }
 0x168   : > { %1375 = vmax.xlane.f32.xlu0 %v1374_v51  ;;  %4066 = vmatpush3.bf16.msra.mxu1 %v4146_v61  ;;  %v4152_v51 = vld [vmem:[%s4763_s17 + $0x20] sm:$0xff]   ;;  %v4157_v61 = vld [vmem:[%s4763_s17 + $0x78] sm:$0xff]  }
 0x169   : > { %3889 = vmatprep.subr.bf16.mxu0 %v4147_v4  ;;  %4059 = vmatprep.subr.bf16.mxu1 %v4147_v4  ;;  %v4158_v4 = vld [vmem:[%s4763_s17 + $0x38] sm:$0xff]  }
 0x16b   : > { %3890 = vmatpush3.bf16.msra.mxu0 %v4148_v48 }
 0x16c   : > { %1423 = vmax.xlane.f32.xlu0 %v1422_v30  ;;  %4067 = vmatpush3.bf16.msra.mxu1 %v4148_v48  ;;  %v4153_v30 = vld [vmem:[%s4763_s17 + $0x68] sm:$0xff]   ;;  %v5753_v48 = vld [vmem:[#allocation2 + $0x80] sm:$0xff] }
 0x16d   : > { %3891 = vmatprep.subr.bf16.mxu0 %v4149_v2  ;;  %4060 = vmatprep.subr.bf16.mxu1 %v4149_v2  ;;  %v5760_v2 = vld [vmem:[#allocation2 + $0x88] sm:$0xff] }
 0x16f   : > { %3892 = vmatpush3.bf16.msra.mxu0 %v4150_v12 }
 0x170   : > { %4068 = vmatpush3.bf16.msra.mxu1 %v4150_v12  ;;  %3893 = vmatprep.subr.bf16.mxu0 %v4151_v36  ;;  %v5793_v12 = vld [vmem:[#allocation2 + $0xa0] sm:$0xff] }
 0x171   : > { %4061 = vmatprep.subr.bf16.mxu1 %v4151_v36 }
 0x173   : > { %3894 = vmatpush3.bf16.msra.mxu0 %v4152_v51 }
 0x174   : > { %4069 = vmatpush3.bf16.msra.mxu1 %v4152_v51  ;;  %3895 = vmatprep.subr.bf16.mxu0 %v4153_v30 }
 0x175   : > { %4062 = vmatprep.subr.bf16.mxu1 %v4153_v30 }
 0x177   : > { %3896 = vmatpush3.bf16.msra.mxu0 %v4154_v39 }
 0x178   : > { %3897 = vmatprep.subr.bf16.mxu0 %v4155_v63  ;;  %4070 = vmatpush3.bf16.msra.mxu1 %v4154_v39 }
 0x179   : > { %4063 = vmatprep.subr.bf16.mxu1 %v4155_v63  ;;  %v5773_v63 = vld [vmem:[#allocation2 + $0x20] sm:$0xff] }
 0x17b   : > { %3898 = vmatpush3.bf16.msra.mxu0 %v4156_v10 }
 0x17c   : > { %3899 = vmatprep.subr.bf16.mxu0 %v4157_v61  ;;  %4071 = vmatpush3.bf16.msra.mxu1 %v4156_v10  ;;  %v5775_v10 = vld [vmem:[#allocation2 + $0x18] sm:$0xff] }
 0x17d   : > { %4064 = vmatprep.subr.bf16.mxu1 %v4157_v61 }
 0x17f   : > { %3900 = vmatpush3.bf16.msra.mxu0 %v4158_v4 }
 0x180   : > { %4072 = vmatpush3.bf16.msra.mxu1 %v4158_v4 }
 0x192   : > { %v1331_v29 = vpop.xlane.xlu0 %1330 }
 0x193   : > { %v5716_v40 = vmax.f32 %v5711_v6, %v1331_v29 }
 0x195   : > { %2740 = vst.msk [vmem:[#allocation2] sm:$0xff] %vm2097_vm2, %v5716_v40  ;;  %1555 = vperm.xlu1 %4142, %v5716_v40   ;;  %v7185_v38 = vsub.f32 %v5711_v6, %v5716_v40  ;;  %v5987_v6 = vld [vmem:[#allocation2 + $0x78] sm:$0xff] }
 0x196   : > { %v1334_v27 = vpop.xlane.xlu1 %1333 }
 0x197   : > { %v5726_v0 = vmax.f32 %v5718_v17, %v1334_v27  ;;  %v1489_v20 = vmul.f32 1.442695, %v7185_v38 }
 0x199   : > { %2741 = vst.msk [vmem:[#allocation2 + $0x8] sm:$0xff] %vm2097_vm2, %v5726_v0  ;;  %1560 = vperm.xlu0 %4141, %v5726_v0  }
 0x19a   : > { %v1337_v57 = vpop.xlane.xlu1 %1336 }
 0x19b   : > { %v5738_v31 = vmax.f32 %v5728_v11, %v1337_v57  ;;  %v5758_v57 = vld [vmem:[#allocation2 + $0x90] sm:$0xff] }
 0x19d   : > { %2742 = vst.msk [vmem:[#allocation2 + $0x10] sm:$0xff] %vm2097_vm2, %v5738_v31  ;;  %1565 = vperm.xlu0 %4141, %v5738_v31   ;;  %v7186_v40 = vsub.f32 %v5728_v11, %v5738_v31 }
 0x1b5   : > { %v1379_v29 = vpop.xlane.xlu0 %1378 }
 0x1b6   : > { %v5756_v27 = vmax.f32 %v5753_v48, %v1379_v29 }
 0x1b8   : > { %2756 = vst.msk [vmem:[#allocation2 + $0x80] sm:$0xff] %vm2097_vm2, %v5756_v27  ;;  %1635 = vperm.xlu1 %4142, %v5756_v27  }
 0x1b9   : > { %v1385_v36 = vpop.xlane.xlu1 %1384  ;;  %v1382_v51 = vpop.xlane.xlu0 %1381 }
 0x1ba   : > { %v5768_v30 = vmax.f32 %v5758_v57, %v1385_v36  ;;  %v5771_v39 = vmax.f32 %v5760_v2, %v1382_v51 }
 0x1bc   : > { %2758 = vst.msk [vmem:[#allocation2 + $0x90] sm:$0xff] %vm2097_vm2, %v5768_v30  ;;  %2757 = vst.msk [vmem:[#allocation2 + $0x88] sm:$0xff] %vm2097_vm2, %v5771_v39  ;;  %1645 = vperm.xlu0 %4141, %v5768_v30   ;;  %1640 = vperm.xlu1 %4142, %v5771_v39  }
 0x1bd   : > { %v1343_v29 = vpop.xlane.xlu1 %1342 }
 0x1be   : > { %v5788_v51 = vmax.f32 %v5773_v63, %v1343_v29 }
 0x1c0   : > { %v1340_v36 = vpop.xlane.xlu0 %1339  ;;  %2744 = vst.msk [vmem:[#allocation2 + $0x20] sm:$0xff] %vm2097_vm2, %v5788_v51  ;;  %1575 = vperm.xlu0 %4141, %v5788_v51  }
 0x1c1   : > { %v5791_v61 = vmax.f32 %v5775_v10, %v1340_v36 }
 0x1c2   : > { %v1391_v4 = vpop.xlane.xlu1 %1390 }
 0x1c3   : > { %2743 = vst.msk [vmem:[#allocation2 + $0x18] sm:$0xff] %vm2097_vm2, %v5791_v61  ;;  %1570 = vperm.xlu1 %4142, %v5791_v61   ;;  %v5804_v43 = vmax.f32 %v5793_v12, %v1391_v4 }
 0x1c4   : > { %v1388_v29 = vpop.xlane.xlu0 %1387 }
 0x1c5   : > { %v5807_v36 = vmax.f32 %v5795_v52, %v1388_v29  ;;  %2760 = vst.msk [vmem:[#allocation2 + $0xa0] sm:$0xff] %vm2097_vm2, %v5804_v43  ;;  %1655 = vperm.xlu0 %4141, %v5804_v43  }
 0x1c6   : > { %v1349_v4 = vpop.xlane.xlu1 %1348 }
 0x1c7   : > { %2759 = vst.msk [vmem:[#allocation2 + $0x98] sm:$0xff] %vm2097_vm2, %v5807_v36  ;;  %1650 = vperm.xlu1 %4142, %v5807_v36   ;;  %v5824_v9 = vmax.f32 %v5809_v8, %v1349_v4 }
 0x1c8   : > { %v1346_v29 = vpop.xlane.xlu0 %1345 }
 0x1c9   : > { %v5827_v45 = vmax.f32 %v5811_v23, %v1346_v29  ;;  %2746 = vst.msk [vmem:[#allocation2 + $0x30] sm:$0xff] %vm2097_vm2, %v5824_v9  ;;  %1585 = vperm.xlu0 %4141, %v5824_v9  }
 0x1cb   : > { %2745 = vst.msk [vmem:[#allocation2 + $0x28] sm:$0xff] %vm2097_vm2, %v5827_v45  ;;  %1580 = vperm.xlu1 %4142, %v5827_v45  }
 0x1cc   : > { %v1397_v53 = vpop.xlane.xlu1 %1396  ;;  %v1394_v4 = vpop.xlane.xlu0 %1393 }
 0x1cd   : > { %v5840_v56 = vmax.f32 %v5829_v55, %v1397_v53  ;;  %v5843_v29 = vmax.f32 %v5831_v33, %v1394_v4 }
 0x1cf   : > { %2762 = vst.msk [vmem:[#allocation2 + $0xb0] sm:$0xff] %vm2097_vm2, %v5840_v56  ;;  %2761 = vst.msk [vmem:[#allocation2 + $0xa8] sm:$0xff] %vm2097_vm2, %v5843_v29  ;;  %1665 = vperm.xlu0 %4141, %v5840_v56   ;;  %1660 = vperm.xlu1 %4142, %v5843_v29  }
 0x1d0   : > { %v1352_v4 = vpop.xlane.xlu0 %1351 }
 0x1d1   : > { %v1355_v53 = vpop.xlane.xlu1 %1354  ;;  %v5861_v32 = vmax.f32 %v5847_v15, %v1352_v4 }
 0x1d2   : > { %v5858_v46 = vmax.f32 %v5845_v16, %v1355_v53 }
 0x1d3   : > { %2747 = vst.msk [vmem:[#allocation2 + $0x38] sm:$0xff] %vm2097_vm2, %v5861_v32  ;;  %1590 = vperm.xlu1 %4142, %v5861_v32  }
 0x1d4   : > { %2748 = vst.msk [vmem:[#allocation2 + $0x40] sm:$0xff] %vm2097_vm2, %v5858_v46  ;;  %1595 = vperm.xlu0 %4141, %v5858_v46  }
 0x1d7   : > { %v1403_v14 = vpop.xlane.xlu1 %1402  ;;  %v1400_v53 = vpop.xlane.xlu0 %1399 }
 0x1d8   : > { %v5874_v58 = vmax.f32 %v5863_v13, %v1403_v14  ;;  %v5877_v4 = vmax.f32 %v5865_v19, %v1400_v53 }
 0x1da   : > { %2764 = vst.msk [vmem:[#allocation2 + $0xc0] sm:$0xff] %vm2097_vm2, %v5874_v58  ;;  %2763 = vst.msk [vmem:[#allocation2 + $0xb8] sm:$0xff] %vm2097_vm2, %v5877_v4  ;;  %1675 = vperm.xlu0 %4141, %v5874_v58   ;;  %1670 = vperm.xlu1 %4142, %v5877_v4  }
 0x1db   : > { %v1361_v14 = vpop.xlane.xlu1 %1360  ;;  %v1358_v53 = vpop.xlane.xlu0 %1357 }
 0x1dc   : > { %v5892_v44 = vmax.f32 %v5879_v5, %v1361_v14  ;;  %v5895_v54 = vmax.f32 %v5881_v60, %v1358_v53 }
 0x1de   : > { %2750 = vst.msk [vmem:[#allocation2 + $0x50] sm:$0xff] %vm2097_vm2, %v5892_v44  ;;  %2749 = vst.msk [vmem:[#allocation2 + $0x48] sm:$0xff] %vm2097_vm2, %v5895_v54  ;;  %1605 = vperm.xlu0 %4141, %v5892_v44   ;;  %1600 = vperm.xlu1 %4142, %v5895_v54  }
 0x1e0   : > { %v1409_v62 = vpop.xlane.xlu1 %1408  ;;  %v1406_v14 = vpop.xlane.xlu0 %1405 }
 0x1e1   : > { %v5908_v22 = vmax.f32 %v5897_v42, %v1409_v62  ;;  %v5911_v53 = vmax.f32 %v5899_v26, %v1406_v14 }
 0x1e3   : > { %2766 = vst.msk [vmem:[#allocation2 + $0xd0] sm:$0xff] %vm2097_vm2, %v5908_v22  ;;  %2765 = vst.msk [vmem:[#allocation2 + $0xc8] sm:$0xff] %vm2097_vm2, %v5911_v53  ;;  %1685 = vperm.xlu0 %4141, %v5908_v22   ;;  %1680 = vperm.xlu1 %4142, %v5911_v53  }
 0x1e4   : > { %v1367_v62 = vpop.xlane.xlu1 %1366  ;;  %v1364_v14 = vpop.xlane.xlu0 %1363 }
 0x1e5   : > { %v5926_v47 = vmax.f32 %v5913_v49, %v1367_v62  ;;  %v5929_v18 = vmax.f32 %v5915_v50, %v1364_v14  ;;  %v7184_v62 = vsub.f32 %v5718_v17, %v5726_v0  ;;  %v1461_v14 = vsub.f32 %v5773_v63, %v5788_v51 }
 0x1e7   : > { %2752 = vst.msk [vmem:[#allocation2 + $0x60] sm:$0xff] %vm2097_vm2, %v5926_v47  ;;  %2751 = vst.msk [vmem:[#allocation2 + $0x58] sm:$0xff] %vm2097_vm2, %v5929_v18  ;;  %1615 = vperm.xlu0 %4141, %v5926_v47   ;;  %1610 = vperm.xlu1 %4142, %v5929_v18   ;;  %v1491_v35 = vmul.f32 1.442695, %v7184_v62  ;;  %v5968_v62 = vld [vmem:[#allocation2 + $0xf0] sm:$0xff] }
 0x1e8   : > { %v1412_v41 = vpop.xlane.xlu0 %1411 }
 0x1e9   : > { %v1415_v28 = vpop.xlane.xlu1 %1414  ;;  %v5950_v34 = vmax.f32 %v5933_v37, %v1412_v41  ;;  %4159 = vpow2.f32 %v1491_v35  ;;  %v1463_v41 = vsub.f32 %v5809_v8, %v5824_v9  ;;  %v1465_v9 = vsub.f32 %v5845_v16, %v5858_v46 }
 0x1ea   : > { %v5947_v3 = vmax.f32 %v5931_v25, %v1415_v28  ;;  %v1497_v28 = vmul.f32 1.442695, %v1461_v14  ;;  %v1467_v16 = vsub.f32 %v5879_v5, %v5892_v44  ;;  %v1469_v5 = vsub.f32 %v5913_v49, %v5926_v47 }
 0x1eb   : > { %2767 = vst.msk [vmem:[#allocation2 + $0xd8] sm:$0xff] %vm2097_vm2, %v5950_v34  ;;  %1690 = vperm.xlu1 %4142, %v5950_v34   ;;  %v1501_v35 = vmul.f32 1.442695, %v1463_v41 }
 0x1ec   : > { %2768 = vst.msk [vmem:[#allocation2 + $0xe0] sm:$0xff] %vm2097_vm2, %v5947_v3  ;;  %1695 = vperm.xlu0 %4141, %v5947_v3   ;;  %v1370_v0 = vpop.xlane.xlu0 %1369  ;;  %4161 = vpow2.f32 %v1497_v28  ;;  %v1460_v28 = vsub.f32 %v5775_v10, %v5791_v61  ;;  %v6009_v61 = vld [vmem:[#allocation2 + $0xf8] sm:$0xff]  ;;  %v1509_v44 = vmul.f32 1.442695, %v1467_v16  ;;  %v1513_v49 = vmul.f32 1.442695, %v1469_v5 }
 0x1ed   : > { %v5966_v51 = vmax.f32 %v5954_v1, %v1370_v0  ;;  %4163 = vpow2.f32 %v1489_v20  ;;  %v1493_v0 = vmul.f32 1.442695, %v7186_v40  ;;  %v1505_v20 = vmul.f32 1.442695, %v1465_v9 }
 0x1ee   : > { %v1373_v17 = vpop.xlane.xlu1 %1372  ;;  %4165 = vpow2.f32 %v1501_v35  ;;  %v1495_v41 = vmul.f32 1.442695, %v1460_v28 }
 0x1ef   : > { %v1439_v63 = vmax.f32 %v5952_v7, %v1373_v17  ;;  %2753 = vst.msk [vmem:[#allocation2 + $0x68] sm:$0xff] %vm2097_vm2, %v5966_v51  ;;  %1620 = vperm.xlu1 %4142, %v5966_v51   ;;  %4167 = vpow2.f32 %v1493_v0  ;;  %v1470_v5 = vsub.f32 %v5954_v1, %v5966_v51 }
 0x1f0   : > { %4169 = vpow2.f32 %v1505_v20 }
 0x1f1   : > { %2754 = vst.msk [vmem:[#allocation2 + $0x70] sm:$0xff] %vm2097_vm2, %v1439_v63  ;;  %1625 = vperm.xlu0 %4141, %v1439_v63   ;;  %v1418_v14 = vpop.xlane.xlu0 %1417  ;;  %4171 = vpow2.f32 %v1495_v41  ;;  %v1471_v47 = vsub.f32 %v5952_v7, %v1439_v63  ;;  %v7187_v7 = vsub.f32 %v5753_v48, %v5756_v27 }
 0x1f2   : > { %v1421_v8 = vpop.xlane.xlu1 %1420  ;;  %v5985_v38 = vmax.f32 %v5970_v59, %v1418_v14  ;;  %4173 = vpow2.f32 %v1509_v44  ;;  %v7188_v44 = vsub.f32 %v5758_v57, %v5768_v30  ;;  %v1479_v57 = vsub.f32 %v5829_v55, %v5840_v56 }
 0x1f3   : > { %v5982_v17 = vmax.f32 %v5968_v62, %v1421_v8  ;;  %v6007_v10 = vpop.eup %4159  ;;  %v1462_v8 = vsub.f32 %v5811_v23, %v5827_v45  ;;  %v1464_v23 = vsub.f32 %v5847_v15, %v5861_v32  ;;  %v1466_v15 = vsub.f32 %v5881_v60, %v5895_v54 }
 0x1f4   : > { %2769 = vst.msk [vmem:[#allocation2 + $0xe8] sm:$0xff] %vm2097_vm2, %v5985_v38  ;;  %1700 = vperm.xlu1 %4142, %v5985_v38   ;;  %v1517_v20 = vmul.f32 1.442695, %v1471_v47  ;;  %v1521_v63 = vmul.f32 1.442695, %v7187_v7  ;;  %v1481_v56 = vsub.f32 %v5863_v13, %v5874_v58  ;;  %v7196_v7 = vsub.f32 %v5831_v33, %v5843_v29  ;;  %v7201_v33 = vld [vmem:[#allocation12_spill] sm:$0xff] }
 0x1f5   : > { %2770 = vst.msk [vmem:[#allocation2 + $0xf0] sm:$0xff] %vm2097_vm2, %v5982_v17  ;;  %1705 = vperm.xlu0 %4141, %v5982_v17   ;;  %v1376_v11 = vpop.xlane.xlu0 %1375  ;;  %v1499_v45 = vmul.f32 1.442695, %v1462_v8  ;;  %v1503_v32 = vmul.f32 1.442695, %v1464_v23  ;;  %v1468_v8 = vsub.f32 %v5915_v50, %v5929_v18 }
 0x1f6   : > { %v6005_v31 = vmax.f32 %v5987_v6, %v1376_v11  ;;  %v6022_v14 = vpop.eup %4161  ;;  %v1507_v41 = vmul.f32 1.442695, %v1466_v15  ;;  %v1525_v48 = vmul.f32 1.442695, %v7188_v44  ;;  %v1515_v30 = vmul.f32 1.442695, %v1470_v5 }
 0x1f7   : > { %v6033_v0 = vpop.eup %4163  ;;  %4175 = vpow2.f32 %v1499_v45  ;;  %v1511_v27 = vmul.f32 1.442695, %v1468_v8  ;;  %v1537_v47 = vmul.f32 1.442695, %v1481_v56  ;;  %v7194_v15 = vsub.f32 %v5795_v52, %v5807_v36  ;;  %v7200_v44 = vld [vmem:[#allocation11_spill] sm:$0xff] }
 0x1f8   : > { %2755 = vst.msk [vmem:[#allocation2 + $0x78] sm:$0xff] %vm2097_vm2, %v6005_v31  ;;  %1630 = vperm.xlu1 %4142, %v6005_v31   ;;  %v6035_v28 = vpop.eup %4165  ;;  %4177 = vpow2.f32 %v1513_v49  ;;  %v1472_v1 = vsub.f32 %v5987_v6, %v6005_v31  ;;  %v1533_v49 = vmul.f32 1.442695, %v1479_v57  ;;  %v7192_v6 = vsub.f32 %v5760_v2, %v5771_v39 }
 0x1f9   : > { %2169 = vperm.xlu0 %4141, %v6007_v10   ;;  %v1424_v35 = vpop.xlane.xlu0 %1423  ;;  %v6041_v16 = vpop.eup %4167  ;;  %4179 = vpow2.f32 %v1503_v32  ;;  %v1483_v32 = vsub.f32 %v5897_v42, %v5908_v22  ;;  %v1527_v2 = vmul.f32 1.442695, %v7194_v15 }
 0x1fa   : > { %v6020_v9 = vmax.f32 %v6009_v61, %v1424_v35  ;;  %v6043_v11 = vpop.eup %4169  ;;  %4181 = vpow2.f32 %v1517_v20  ;;  %v7189_v35 = vsub.f32 %v5793_v12, %v5804_v43  ;;  %v1519_v55 = vmul.f32 1.442695, %v1472_v1 }
 0x1fb   : > { %v6052_v54 = vpop.eup %4171  ;;  %4183 = vpow2.f32 %v1521_v63  ;;  %v1523_v31 = vmul.f32 1.442695, %v7192_v6  ;;  %v1541_v39 = vmul.f32 1.442695, %v1483_v32  ;;  %v1485_v20 = vsub.f32 %v5931_v25, %v5947_v3 }
 0x1fc   : > { %2771 = vst.msk [vmem:[#allocation2 + $0xf8] sm:$0xff] %vm2097_vm2, %v6020_v9  ;;  %1710 = vperm.xlu1 %4142, %v6020_v9   ;;  %v6054_v60 = vpop.eup %4173  ;;  %4185 = vpow2.f32 %v1507_v41  ;;  %v1529_v45 = vmul.f32 1.442695, %v7189_v35  ;;  %v1531_v63 = vmul.f32 1.442695, %v7196_v7  ;;  %v7199_v25 = vsub.f32 %v5865_v19, %v5877_v4 }
 0x1fd   : > { %2184 = vperm.xlu0 %4141, %v6022_v14   ;;  %4187 = vpow2.f32 %v1525_v48  ;;  %v1545_v52 = vmul.f32 1.442695, %v1485_v20  ;;  %v1486_v32 = vsub.f32 %v5970_v59, %v5985_v38 }
 0x1fe   : > { %4189 = vpow2.f32 %v1511_v27  ;;  %v1535_v8 = vmul.f32 1.442695, %v7199_v25  ;;  %v7202_v27 = vsub.f32 %v5899_v26, %v5911_v53  ;;  %v1484_v26 = vsub.f32 %v5933_v37, %v5950_v34 }
 0x1ff   : > { %4191 = vpow2.f32 %v1529_v45  ;;  %v1547_v37 = vmul.f32 1.442695, %v1486_v32  ;;  %v7219_v32 = vld [vmem:[#allocation36_spill] sm:$0xff] }
 0x200   : > { %2164 = vperm.xlu1 %4142, %v6033_v0   ;;  %4193 = vpow2.f32 %v1515_v30  ;;  %v1539_v5 = vmul.f32 1.442695, %v7202_v27  ;;  %v7205_v30 = vld [vmem:[#allocation13_spill] sm:$0xff] }
 0x201   : > { %2194 = vperm.xlu0 %4141, %v6035_v28   ;;  %v6063_v18 = vpop.eup %4175  ;;  %4195 = vpow2.f32 %v1533_v49  ;;  %v7206_v49 = vld [vmem:[#allocation14_spill] sm:$0xff] }
 0x202   : > { %v6065_v50 = vpop.eup %4177  ;;  %4197 = vpow2.f32 %v1519_v55 }
 0x203   : > { %v6076_v51 = vpop.eup %4179  ;;  %4199 = vpow2.f32 %v1523_v31 }
 0x204   : > { %2174 = vperm.xlu1 %4142, %v6041_v16   ;;  %v6078_v23 = vpop.eup %4181  ;;  %4201 = vpow2.f32 %v1537_v47  ;;  %v1543_v47 = vmul.f32 1.442695, %v1484_v26 }
 0x205   : > { %2204 = vperm.xlu0 %4141, %v6043_v11   ;;  %7190 = vst [vmem:[#allocation73_spill] sm:$0xff] %v6078_v23  ;;  %v6084_v43 = vpop.eup %4183  ;;  %4203 = vpow2.f32 %v1527_v2 }
 0x206   : > { %7191 = vst [vmem:[#allocation74_spill] sm:$0xff] %v6084_v43  ;;  %v6086_v12 = vpop.eup %4185  ;;  %4205 = vpow2.f32 %v1541_v39 }
 0x207   : > { %v6095_v58 = vpop.eup %4187  ;;  %4207 = vpow2.f32 %v1531_v63 }
 0x208   : > { %2179 = vperm.xlu1 %4142, %v6052_v54   ;;  %7193 = vst [vmem:[#allocation75_spill] sm:$0xff] %v6095_v58  ;;  %v6097_v13 = vpop.eup %4189  ;;  %4209 = vpow2.f32 %v1545_v52 }
 0x209   : > { %2214 = vperm.xlu0 %4141, %v6054_v60   ;;  %v6106_v22 = vpop.eup %4191  ;;  %4211 = vpow2.f32 %v1535_v8  ;;  %v7214_v8 = vld [vmem:[#allocation16_spill] sm:$0xff] }
 0x20a   : > { %7195 = vst [vmem:[#allocation76_spill] sm:$0xff] %v6106_v22  ;;  %v6108_v42 = vpop.eup %4193  ;;  %4213 = vpow2.f32 %v1539_v5 }
 0x20b   : > { %v6115_v36 = vpop.eup %4195 }
 0x20c   : > { %2189 = vperm.xlu1 %4142, %v6063_v18   ;;  %7197 = vst [vmem:[#allocation77_spill] sm:$0xff] %v6115_v36  ;;  %v6117_v41 = vpop.eup %4197 }
 0x20d   : > { %2224 = vperm.xlu0 %4141, %v6065_v50   ;;  %7198 = vst [vmem:[#allocation78_spill] sm:$0xff] %v6117_v41  ;;  %v6129_v35 = vpop.eup %4199 }
 0x20e   : > { %7203 = vst [vmem:[#allocation11_spill] sm:$0xff] %v6129_v35  ;;  %v6131_v57 = vpop.eup %4201 }
 0x20f   : > { %7204 = vst [vmem:[#allocation12_spill] sm:$0xff] %v6131_v57  ;;  %v6139_v53 = vpop.eup %4203 }
 0x210   : > { %2199 = vperm.xlu1 %4142, %v6076_v51   ;;  %7207 = vst [vmem:[#allocation13_spill] sm:$0xff] %v6139_v53  ;;  %v6141_v31 = vpop.eup %4205 }
 0x211   : > { %2234 = vperm.xlu0 %4141, %v6078_v23   ;;  %7208 = vst [vmem:[#allocation14_spill] sm:$0xff] %v6141_v31  ;;  %v6147_v15 = vpop.eup %4207 }
 0x212   : > { %7209 = vst [vmem:[#allocation79_spill] sm:$0xff] %v6147_v15  ;;  %v6149_v34 = vpop.eup %4209 }
 0x213   : > { %7210 = vst [vmem:[#allocation80_spill] sm:$0xff] %v6149_v34  ;;  %v6153_v2 = vpop.eup %4211 }
 0x214   : > { %2209 = vperm.xlu1 %4142, %v6086_v12   ;;  %v1556_v3 = vpop.permute.xlu1 %1555  ;;  %7211 = vst [vmem:[#allocation81_spill] sm:$0xff] %v6153_v2  ;;  %v6155_v39 = vpop.eup %4213 }
 0x215   : > { %2244 = vperm.xlu0 %4141, %v6084_v43   ;;  %v1713_v48 = vsub.f32 %v7200_v44, %v1556_v3  ;;  %v1714_v29 = vsub.f32 %v7201_v33, %v1556_v3  ;;  %7212 = vst [vmem:[#allocation82_spill] sm:$0xff] %v6155_v39 }
 0x217   : > { %v1777_v45 = vmul.f32 1.442695, %v1713_v48  ;;  %v1779_v19 = vmul.f32 1.442695, %v1714_v29  ;;  %v7215_v48 = vld [vmem:[#allocation17_spill] sm:$0xff] }
 0x218   : > { %2219 = vperm.xlu1 %4142, %v6097_v13   ;;  %v1561_v4 = vpop.permute.xlu0 %1560 }
 0x219   : > { %2254 = vperm.xlu0 %4141, %v6095_v58   ;;  %v1715_v1 = vsub.f32 %v7205_v30, %v1561_v4  ;;  %v1716_v56 = vsub.f32 %v7206_v49, %v1561_v4  ;;  %4215 = vpow2.f32 %v1777_v45  ;;  %v7217_v4 = vld [vmem:[#allocation34_spill] sm:$0xff] }
 0x21a   : > { %4217 = vpow2.f32 %v1779_v19 }
 0x21b   : > { %v1781_v55 = vmul.f32 1.442695, %v1715_v1  ;;  %v1783_v6 = vmul.f32 1.442695, %v1716_v56 }
 0x21c   : > { %2229 = vperm.xlu1 %4142, %v6108_v42   ;;  %v1566_v52 = vpop.permute.xlu0 %1565 }
 0x21d   : > { %2264 = vperm.xlu0 %4141, %v6106_v22   ;;  %4219 = vpow2.f32 %v1781_v55  ;;  %v1717_v44 = vsub.f32 %v7214_v8, %v1566_v52  ;;  %v1718_v33 = vsub.f32 %v7215_v48, %v1566_v52 }
 0x21e   : > { %4221 = vpow2.f32 %v1783_v6  ;;  %v7218_v6 = vld [vmem:[#allocation35_spill] sm:$0xff] }
 0x21f   : > { %4223 = vpow2.f32 %v1543_v47  ;;  %v1785_v27 = vmul.f32 1.442695, %v1717_v44  ;;  %v1787_v5 = vmul.f32 1.442695, %v1718_v33 }
 0x220   : > { %2239 = vperm.xlu1 %4142, %v6117_v41   ;;  %4225 = vpow2.f32 %v1547_v37 }
 0x221   : > { %2274 = vperm.xlu0 %4141, %v6115_v36   ;;  %4227 = vpow2.f32 %v1785_v27  ;;  %v7221_v27 = vld [vmem:[#allocation29_spill] sm:$0xff] }
 0x222   : > { %4229 = vpow2.f32 %v1787_v5 }
 0x223   : > { %v4216_v20 = vpop.eup %4215 }
 0x224   : > { %2249 = vperm.xlu1 %4142, %v6129_v35   ;;  %v4218_v7 = vpop.eup %4217 }
 0x225   : > { %2284 = vperm.xlu0 %4141, %v6131_v57   ;;  %v7254_v57 = vld [vmem:[#allocation61_spill] sm:$0xff] }
 0x227   : > { %v6158_v59 = vpop.eup %4219 }
 0x228   : > { %2259 = vperm.xlu1 %4142, %v6139_v53   ;;  %v6160_v38 = vpop.eup %4221  ;;  %v2354_v63 = vpack.c.bf16 %v6158_v59, %v4216_v20 }
 0x229   : > { %2294 = vperm.xlu0 %4141, %v6141_v31   ;;  %v2355_v3 = vpack.c.bf16 %v6160_v38, %v4218_v7  ;;  %v6165_v25 = vpop.eup %4223 }
 0x22a   : > { %7213 = vst [vmem:[#allocation83_spill] sm:$0xff] %v6165_v25  ;;  %v6170_v29 = vpop.eup %4225 }
 0x22b   : > { %2546 = vmatprep.mubr.bf16.mxu0 %v2355_v3  ;;  %7216 = vst [vmem:[#allocation16_spill] sm:$0xff] %v6170_v29 }
 0x22c   : > { %2269 = vperm.xlu1 %4142, %v6147_v15   ;;  %2547 = vmatmul.mubr.bf16.vlgmr.msra.gmra.mrb[0].mxu0 %v2354_v63  ;;  %v7220_v63 = vld [vmem:[#allocation37_spill] sm:$0xff] }
 0x22d   : > { %2304 = vperm.xlu0 %4141, %v6149_v34  }
 0x230   : > { %2279 = vperm.xlu1 %4142, %v6153_v2  }
 0x234   : > { %2289 = vperm.xlu1 %4142, %v6155_v39  }
 0x237   : > { %v1636_v45 = vpop.permute.xlu1 %1635 }
 0x238   : > { %2299 = vperm.xlu1 %4142, %v6165_v25   ;;  %v1745_v19 = vsub.f32 %v5269_v21, %v1636_v45  ;;  %v1746_v30 = vsub.f32 %v7217_v4, %v1636_v45  ;;  %v7222_v45 = vld [vmem:[#allocation30_spill] sm:$0xff] }
 0x23a   : > { %v1841_v1 = vmul.f32 1.442695, %v1745_v19  ;;  %v1843_v49 = vmul.f32 1.442695, %v1746_v30  ;;  %v6182_v30 = vpop.eup %4227 }
 0x23b   : > { %v1641_v56 = vpop.permute.xlu1 %1640  ;;  %v1646_v26 = vpop.permute.xlu0 %1645 }
 0x23c   : > { %2309 = vperm.xlu1 %4142, %v6170_v29   ;;  %v1747_v55 = vsub.f32 %v5279_v24, %v1641_v56  ;;  %v1748_v47 = vsub.f32 %v7218_v6, %v1641_v56  ;;  %v1749_v37 = vsub.f32 %v7219_v32, %v1646_v26  ;;  %v1750_v52 = vsub.f32 %v7220_v63, %v1646_v26  ;;  %v7223_v24 = vld [vmem:[#allocation31_spill] sm:$0xff]  ;;  %v7224_v56 = vld [vmem:[#allocation32_spill] sm:$0xff] }
 0x23d   : > { %4231 = vpow2.f32 %v1841_v1  ;;  %v1969_v1 = vadd.f32 %v4218_v7, %v4216_v20  ;;  %v7228_v20 = vld [vmem:[#allocation42_spill] sm:$0xff] }
 0x23e   : > { %v1845_v3 = vmul.f32 1.442695, %v1747_v55  ;;  %v1847_v8 = vmul.f32 1.442695, %v1748_v47  ;;  %v1849_v44 = vmul.f32 1.442695, %v1749_v37  ;;  %4233 = vpow2.f32 %v1843_v49  ;;  %v6185_v55 = vpop.eup %4229 }
 0x23f   : > { %v1851_v21 = vmul.f32 1.442695, %v1750_v52  ;;  %v1576_v33 = vpop.permute.xlu0 %1575  ;;  %v7225_v52 = vld [vmem:[#allocation39_spill] sm:$0xff] }
 0x240   : > { %4235 = vpow2.f32 %v1845_v3  ;;  %v1721_v4 = vsub.f32 %v7223_v24, %v1576_v33  ;;  %v1722_v26 = vsub.f32 %v7224_v56, %v1576_v33 }
 0x241   : > { %4237 = vpow2.f32 %v1847_v8  ;;  %v7227_v8 = vld [vmem:[#allocation41_spill] sm:$0xff] }
 0x242   : > { %v1571_v48 = vpop.permute.xlu1 %1570  ;;  %4239 = vpow2.f32 %v1849_v44  ;;  %v1793_v47 = vmul.f32 1.442695, %v1721_v4  ;;  %v1795_v32 = vmul.f32 1.442695, %v1722_v26  ;;  %v1975_v44 = vadd.f32 %v6185_v55, %v6182_v30  ;;  %v7229_v26 = vld [vmem:[#allocation33_spill] sm:$0xff] }
 0x243   : > { %v1719_v5 = vsub.f32 %v7221_v27, %v1571_v48  ;;  %v1720_v19 = vsub.f32 %v7222_v45, %v1571_v48  ;;  %4241 = vpow2.f32 %v1851_v21  ;;  %v7226_v48 = vld [vmem:[#allocation40_spill] sm:$0xff] }
 0x244   : > { %v1656_v63 = vpop.permute.xlu0 %1655 }
 0x245   : > { %v1789_v49 = vmul.f32 1.442695, %v1719_v5  ;;  %v1791_v6 = vmul.f32 1.442695, %v1720_v19  ;;  %v1753_v45 = vsub.f32 %v7227_v8, %v1656_v63  ;;  %v1754_v7 = vsub.f32 %v7228_v20, %v1656_v63 }
 0x246   : > { %v1651_v37 = vpop.permute.xlu1 %1650 }
 0x247   : > { %4243 = vpow2.f32 %v1789_v49  ;;  %v1751_v3 = vsub.f32 %v7225_v52, %v1651_v37  ;;  %v1752_v27 = vsub.f32 %v7226_v48, %v1651_v37  ;;  %v1857_v5 = vmul.f32 1.442695, %v1753_v45  ;;  %v6193_v56 = vpop.eup %4231  ;;  %v7230_v49 = vld [vmem:[#allocation38_spill] sm:$0xff]  ;;  %v7231_v37 = vld [vmem:[#allocation43_spill] sm:$0xff] }
 0x248   : > { %4245 = vpow2.f32 %v1791_v6  ;;  %v1859_v19 = vmul.f32 1.442695, %v1754_v7  ;;  %v1586_v4 = vpop.permute.xlu0 %1585  ;;  %v6198_v52 = vpop.eup %4233 }
 0x249   : > { %4247 = vpow2.f32 %v1793_v47  ;;  %v1853_v33 = vmul.f32 1.442695, %v1751_v3  ;;  %v1855_v21 = vmul.f32 1.442695, %v1752_v27  ;;  %v1725_v63 = vsub.f32 %v7231_v37, %v1586_v4  ;;  %v7232_v47 = vld [vmem:[#allocation44_spill] sm:$0xff] }
 0x24a   : > { %4249 = vpow2.f32 %v1795_v32  ;;  %v1581_v24 = vpop.permute.xlu1 %1580  ;;  %v1726_v3 = vsub.f32 %v7232_v47, %v1586_v4  ;;  %v4236_v48 = vpop.eup %4235  ;;  %v7235_v4 = vld [vmem:[#allocation48_spill] sm:$0xff] }
 0x24b   : > { %4251 = vpow2.f32 %v1853_v33  ;;  %v1724_v6 = vsub.f32 %v7230_v49, %v1581_v24  ;;  %v1801_v8 = vmul.f32 1.442695, %v1725_v63  ;;  %v4238_v45 = vpop.eup %4237  ;;  %v2370_v33 = vpack.c.bf16 %v4236_v48, %v6193_v56 }
 0x24c   : > { %1970 = vadd.xlane.f32.xlu0 %v1969_v1  ;;  %v1723_v1 = vsub.f32 %v7229_v26, %v1581_v24  ;;  %4253 = vpow2.f32 %v1855_v21  ;;  %v1803_v20 = vmul.f32 1.442695, %v1726_v3  ;;  %v6202_v24 = vpop.eup %4239  ;;  %v7233_v26 = vld [vmem:[#allocation46_spill] sm:$0xff]  ;;  %v7234_v21 = vld [vmem:[#allocation47_spill] sm:$0xff]  ;;  %v6211_v63 = vadd.f32 %v4238_v45, %v4236_v48 }
 0x24d   : > { %4255 = vpow2.f32 %v1857_v5  ;;  %v1799_v27 = vmul.f32 1.442695, %v1724_v6  ;;  %v6207_v5 = vpop.eup %4241 }
 0x24e   : > { %v1797_v32 = vmul.f32 1.442695, %v1723_v1  ;;  %4257 = vpow2.f32 %v1859_v19  ;;  %v1661_v7 = vpop.permute.xlu1 %1660  ;;  %v7236_v1 = vld [vmem:[#allocation49_spill] sm:$0xff]  ;;  %v2371_v19 = vpack.c.bf16 %v4238_v45, %v6198_v52  ;;  %v7238_v45 = vld [vmem:[#allocation50_spill] sm:$0xff] }
 0x24f   : > { %v1755_v49 = vsub.f32 %v7233_v26, %v1661_v7  ;;  %v1756_v37 = vsub.f32 %v7234_v21, %v1661_v7 }
 0x250   : > { %1976 = vadd.xlane.f32.xlu0 %v1975_v44  ;;  %v1666_v44 = vpop.permute.xlu0 %1665  ;;  %4259 = vpow2.f32 %v1797_v32  ;;  %2610 = vmatprep.mubr.bf16.mxu1 %v2371_v19 }
 0x251   : > { %v1757_v47 = vsub.f32 %v7235_v4, %v1666_v44  ;;  %4261 = vpow2.f32 %v1799_v27  ;;  %v1758_v6 = vsub.f32 %v7236_v1, %v1666_v44  ;;  %v4244_v3 = vpop.eup %4243  ;;  %v1861_v46 = vmul.f32 1.442695, %v1755_v49  ;;  %2611 = vmatmul.mubr.bf16.vlgmr.msra.gmra.mrb[0].mxu1 %v2370_v33  ;;  %v7237_v44 = vld [vmem:[#allocation45_spill] sm:$0xff] }
 0x252   : > { %4263 = vpow2.f32 %v1801_v8  ;;  %v1863_v40 = vmul.f32 1.442695, %v1756_v37  ;;  %v4246_v29 = vpop.eup %4245  ;;  %v1591_v7 = vpop.permute.xlu1 %1590  ;;  %v2356_v4 = vpack.c.bf16 %v4244_v3, %v6182_v30  ;;  %v7239_v8 = vld [vmem:[#allocation51_spill] sm:$0xff] }
 0x253   : > { %v1865_v32 = vmul.f32 1.442695, %v1757_v47  ;;  %4265 = vpow2.f32 %v1803_v20  ;;  %v1867_v26 = vmul.f32 1.442695, %v1758_v6  ;;  %v6214_v27 = vpop.eup %4247  ;;  %v1727_v48 = vsub.f32 %v7237_v44, %v1591_v7  ;;  %v7240_v20 = vld [vmem:[#allocation52_spill] sm:$0xff] }
 0x254   : > { %v1596_v21 = vpop.permute.xlu0 %1595  ;;  %4267 = vpow2.f32 %v1861_v46  ;;  %v1728_v1 = vsub.f32 %v7238_v45, %v1591_v7  ;;  %v6219_v37 = vpop.eup %4249  ;;  %v2357_v6 = vpack.c.bf16 %v4246_v29, %v6185_v55  ;;  %v1978_v19 = vadd.f32 %v4246_v29, %v4244_v3  ;;  %v7241_v29 = vld [vmem:[#allocation53_spill] sm:$0xff]  ;;  %v7242_v3 = vld [vmem:[#allocation54_spill] sm:$0xff] }
 0x255   : > { %v1729_v49 = vsub.f32 %v7239_v8, %v1596_v21  ;;  %4269 = vpow2.f32 %v1863_v40  ;;  %v1730_v47 = vsub.f32 %v7240_v20, %v1596_v21  ;;  %v6223_v25 = vpop.eup %4251  ;;  %v1805_v30 = vmul.f32 1.442695, %v1727_v48  ;;  %v7243_v48 = vld [vmem:[#allocation55_spill] sm:$0xff] }
 0x256   : > { %4271 = vpow2.f32 %v1865_v32  ;;  %v1807_v46 = vmul.f32 1.442695, %v1728_v1  ;;  %v6225_v34 = vpop.eup %4253  ;;  %2554 = vmatprep.mubr.bf16.mxu0 %v2357_v6  ;;  %1979 = vadd.xlane.f32.xlu0 %v1978_v19  ;;  %v2372_v40 = vpack.c.bf16 %v6223_v25, %v6202_v24 }
 0x257   : > { %v1809_v33 = vmul.f32 1.442695, %v1729_v49  ;;  %4273 = vpow2.f32 %v1867_v26  ;;  %v1811_v7 = vmul.f32 1.442695, %v1730_v47  ;;  %v6229_v21 = vpop.eup %4255  ;;  %2555 = vmatmul.mubr.bf16.gmra.mrb[4].mxu0 %v2356_v4  ;;  %v7244_v26 = vld [vmem:[#allocation56_spill] sm:$0xff]  ;;  %v2373_v20 = vpack.c.bf16 %v6225_v34, %v6207_v5 }
 0x258   : > { %4275 = vpow2.f32 %v1805_v30  ;;  %v6234_v8 = vpop.eup %4257  ;;  %v1972_v47 = vadd.f32 %v6160_v38, %v6158_v59  ;;  %v7245_v59 = vld [vmem:[#allocation57_spill] sm:$0xff] }
 0x259   : > { %v1671_v44 = vpop.permute.xlu1 %1670  ;;  %v1676_v45 = vpop.permute.xlu0 %1675  ;;  %4277 = vpow2.f32 %v1807_v46  ;;  %2618 = vmatprep.mubr.bf16.mxu1 %v2373_v20 }
 0x25a   : > { %v1759_v55 = vsub.f32 %v7241_v29, %v1671_v44  ;;  %v1760_v32 = vsub.f32 %v7242_v3, %v1671_v44  ;;  %v1761_v1 = vsub.f32 %v7243_v48, %v1676_v45  ;;  %v1762_v49 = vsub.f32 %v7244_v26, %v1676_v45  ;;  %v4260_v6 = vpop.eup %4259  ;;  %2619 = vmatmul.mubr.bf16.gmra.mrb[4].mxu1 %v2372_v40 }
 0x25b   : > { %4279 = vpow2.f32 %v1809_v33  ;;  %v4262_v29 = vpop.eup %4261  ;;  %v2358_v46 = vpack.c.bf16 %v4260_v6, %v6214_v27  ;;  %v1981_v45 = vadd.f32 %v6219_v37, %v6214_v27  ;;  %v7246_v33 = vld [vmem:[#allocation58_spill] sm:$0xff] }
 0x25c   : > { %v1869_v4 = vmul.f32 1.442695, %v1759_v55  ;;  %v1871_v19 = vmul.f32 1.442695, %v1760_v32  ;;  %v1873_v30 = vmul.f32 1.442695, %v1761_v1  ;;  %4281 = vpow2.f32 %v1811_v7  ;;  %v6244_v26 = vpop.eup %4263 }
 0x25d   : > { %v1875_v44 = vmul.f32 1.442695, %v1762_v49  ;;  %v1601_v3 = vpop.permute.xlu1 %1600  ;;  %v1606_v48 = vpop.permute.xlu0 %1605  ;;  %v7247_v32 = vld [vmem:[#allocation15_spill] sm:$0xff]  ;;  %v1984_v39 = vadd.f32 %v4262_v29, %v4260_v6  ;;  %v2359_v31 = vpack.c.bf16 %v4262_v29, %v6219_v37  ;;  %v7249_v37 = vld [vmem:[#allocation28_spill] sm:$0xff] }
 0x25e   : > { %4283 = vpow2.f32 %v1869_v4  ;;  %v1731_v38 = vsub.f32 %v7245_v59, %v1601_v3  ;;  %v1732_v55 = vsub.f32 %v7246_v33, %v1601_v3  ;;  %v1733_v1 = vsub.f32 %v7247_v32, %v1606_v48  ;;  %v6249_v7 = vpop.eup %4265  ;;  %v7248_v49 = vld [vmem:[#allocation59_spill] sm:$0xff]  ;;  %v7250_v29 = vld [vmem:[#allocation20_spill] sm:$0xff] }
 0x25f   : > { %4285 = vpow2.f32 %v1871_v19  ;;  %v1734_v20 = vsub.f32 %v7248_v49, %v1606_v48  ;;  %v6253_v27 = vpop.eup %4267  ;;  %1985 = vadd.xlane.f32.xlu0 %v1984_v39  ;;  %2562 = vmatprep.mubr.bf16.mxu0 %v2359_v31  ;;  %v7252_v31 = vld [vmem:[#allocation60_spill] sm:$0xff] }
 0x260   : > { %1973 = vadd.xlane.f32.xlu1 %v1972_v47  ;;  %4287 = vpow2.f32 %v1873_v30  ;;  %v1813_v4 = vmul.f32 1.442695, %v1731_v38  ;;  %v1815_v40 = vmul.f32 1.442695, %v1732_v55  ;;  %v1817_v2 = vmul.f32 1.442695, %v1733_v1  ;;  %v6255_v59 = vpop.eup %4269  ;;  %2563 = vmatmul.mubr.bf16.gmra.mrb[8].mxu0 %v2358_v46 }
 0x261   : > { %4289 = vpow2.f32 %v1875_v44  ;;  %v1819_v3 = vmul.f32 1.442695, %v1734_v20  ;;  %v2374_v19 = vpack.c.bf16 %v6253_v27, %v6229_v21  ;;  %v6259_v6 = vpop.eup %4271  ;;  %v7251_v38 = vld [vmem:[#allocation21_spill] sm:$0xff]  ;;  %v2375_v32 = vpack.c.bf16 %v6255_v59, %v6234_v8 }
 0x262   : > { %v1681_v47 = vpop.permute.xlu1 %1680  ;;  %v1686_v33 = vpop.permute.xlu0 %1685  ;;  %4291 = vpow2.f32 %v1813_v4  ;;  %v1987_v1 = vadd.f32 %v6249_v7, %v6244_v26 }
 0x263   : > { %v1763_v30 = vsub.f32 %v7249_v37, %v1681_v47  ;;  %v1764_v48 = vsub.f32 %v7250_v29, %v1681_v47  ;;  %v1765_v55 = vsub.f32 %v7251_v38, %v1686_v33  ;;  %v6264_v44 = vpop.eup %4273  ;;  %4293 = vpow2.f32 %v1815_v40  ;;  %2626 = vmatprep.mubr.bf16.mxu1 %v2375_v32  ;;  %v7253_v38 = vld [vmem:[#allocation18_spill] sm:$0xff] }
 0x264   : > { %1982 = vadd.xlane.f32.xlu1 %v1981_v45  ;;  %v1766_v39 = vsub.f32 %v7252_v31, %v1686_v33  ;;  %v4276_v49 = vpop.eup %4275  ;;  %4295 = vpow2.f32 %v1817_v2  ;;  %2627 = vmatmul.mubr.bf16.gmra.mrb[8].mxu1 %v2374_v19  ;;  %v7255_v2 = vld [vmem:[#allocation19_spill] sm:$0xff] }
 0x265   : > { %v1877_v46 = vmul.f32 1.442695, %v1763_v30  ;;  %v1879_v20 = vmul.f32 1.442695, %v1764_v48  ;;  %v1881_v4 = vmul.f32 1.442695, %v1765_v55  ;;  %v4278_v47 = vpop.eup %4277  ;;  %4297 = vpow2.f32 %v1819_v3 }
 0x266   : > { %v1883_v37 = vmul.f32 1.442695, %v1766_v39  ;;  %v1611_v45 = vpop.permute.xlu1 %1610  ;;  %v1616_v29 = vpop.permute.xlu0 %1615  ;;  %v2360_v40 = vpack.c.bf16 %v4276_v49, %v6244_v26  ;;  %v7256_v3 = vld [vmem:[#allocation62_spill] sm:$0xff]  ;;  %v1990_v39 = vadd.f32 %v4278_v47, %v4276_v49  ;;  %v2361_v32 = vpack.c.bf16 %v4278_v47, %v6249_v7  ;;  %v7258_v47 = vld [vmem:[#allocation24_spill] sm:$0xff] }
 0x267   : > { %v6272_v33 = vpop.eup %4279  ;;  %4299 = vpow2.f32 %v1877_v46  ;;  %v1735_v31 = vsub.f32 %v7253_v38, %v1611_v45  ;;  %v1736_v15 = vsub.f32 %v7254_v57, %v1611_v45  ;;  %v1737_v30 = vsub.f32 %v7255_v2, %v1616_v29  ;;  %v7259_v38 = vld [vmem:[#allocation25_spill] sm:$0xff]  ;;  %v7260_v2 = vld [vmem:[#allocation63_spill] sm:$0xff] }
 0x268   : > { %1988 = vadd.xlane.f32.xlu1 %v1987_v1  ;;  %v4282_v48 = vpop.eup %4281  ;;  %4301 = vpow2.f32 %v1879_v20  ;;  %v1738_v55 = vsub.f32 %v7256_v3, %v1616_v29  ;;  %1991 = vadd.xlane.f32.xlu0 %v1990_v39 }
 0x269   : > { %v6279_v36 = vpop.eup %4283  ;;  %4303 = vpow2.f32 %v1881_v4  ;;  %v1821_v26 = vmul.f32 1.442695, %v1735_v31  ;;  %v1823_v46 = vmul.f32 1.442695, %v1736_v15  ;;  %v1825_v19 = vmul.f32 1.442695, %v1737_v30  ;;  %2570 = vmatprep.mubr.bf16.mxu0 %v2361_v32 }
 0x26a   : > { %v6281_v53 = vpop.eup %4285  ;;  %4305 = vpow2.f32 %v1883_v37  ;;  %v1827_v57 = vmul.f32 1.442695, %v1738_v55  ;;  %v1691_v1 = vpop.permute.xlu1 %1690  ;;  %v1993_v20 = vadd.f32 %v4282_v48, %v6272_v33  ;;  %v2376_v49 = vpack.c.bf16 %v6279_v36, %v6259_v6  ;;  %2571 = vmatmul.mubr.bf16.gmra.mrb[12].mxu0 %v2360_v40  ;;  %v7257_v4 = vld [vmem:[#allocation27_spill] sm:$0xff] }
 0x26b   : > { %v1696_v45 = vpop.permute.xlu0 %1695  ;;  %v6286_v7 = vpop.eup %4287  ;;  %4307 = vpow2.f32 %v1821_v26  ;;  %v1767_v15 = vsub.f32 %v7257_v4, %v1691_v1  ;;  %v1768_v29 = vsub.f32 %v7258_v47, %v1691_v1  ;;  %v2377_v3 = vpack.c.bf16 %v6281_v53, %v6264_v44 }
 0x26c   : > { %v1769_v37 = vsub.f32 %v7259_v38, %v1696_v45  ;;  %v6291_v31 = vpop.eup %4289  ;;  %4309 = vpow2.f32 %v1823_v46  ;;  %v1770_v30 = vsub.f32 %v7260_v2, %v1696_v45  ;;  %1994 = vadd.xlane.f32.xlu1 %v1993_v20  ;;  %v7261_v45 = vld [vmem:[#allocation22_spill] sm:$0xff]  ;;  %v7262_v2 = vld [vmem:[#allocation64_spill] sm:$0xff] }
 0x26d   : > { %v4292_v55 = vpop.eup %4291  ;;  %4311 = vpow2.f32 %v1825_v19  ;;  %v1885_v39 = vmul.f32 1.442695, %v1767_v15  ;;  %v1887_v32 = vmul.f32 1.442695, %v1768_v29  ;;  %2634 = vmatprep.mubr.bf16.mxu1 %v2377_v3  ;;  %v7263_v19 = vld [vmem:[#allocation23_spill] sm:$0xff] }
 0x26e   : > { %v1889_v40 = vmul.f32 1.442695, %v1769_v37  ;;  %v4294_v26 = vpop.eup %4293  ;;  %4313 = vpow2.f32 %v1827_v57  ;;  %v1891_v4 = vmul.f32 1.442695, %v1770_v30  ;;  %v1621_v1 = vpop.permute.xlu1 %1620  ;;  %v2362_v38 = vpack.c.bf16 %v4292_v55, %v6272_v33  ;;  %2635 = vmatmul.mubr.bf16.gmra.mrb[12].mxu1 %v2376_v49  ;;  %v7264_v37 = vld [vmem:[#allocation65_spill] sm:$0xff] }
 0x26f   : > { %v6297_v46 = vpop.eup %4295  ;;  %4315 = vpow2.f32 %v1885_v39  ;;  %v1739_v20 = vsub.f32 %v7261_v45, %v1621_v1  ;;  %v1740_v22 = vsub.f32 %v7262_v2, %v1621_v1  ;;  %v1996_v30 = vadd.f32 %v4294_v26, %v4292_v55 }
 0x270   : > { %v1626_v47 = vpop.permute.xlu0 %1625  ;;  %v4298_v29 = vpop.eup %4297  ;;  %4317 = vpow2.f32 %v1887_v32  ;;  %v2363_v3 = vpack.c.bf16 %v4294_v26, %v4282_v48  ;;  %v7265_v48 = vld [vmem:[#allocation26_spill] sm:$0xff] }
 0x271   : > { %v1741_v15 = vsub.f32 %v7263_v19, %v1626_v47  ;;  %v1742_v57 = vsub.f32 %v7264_v37, %v1626_v47  ;;  %v6303_v35 = vpop.eup %4299  ;;  %4319 = vpow2.f32 %v1889_v40  ;;  %v1829_v33 = vmul.f32 1.442695, %v1739_v20  ;;  %1997 = vadd.xlane.f32.xlu0 %v1996_v30  ;;  %v7266_v40 = vld [vmem:[#allocation66_spill] sm:$0xff]  ;;  %v7267_v37 = vld [vmem:[#allocation67_spill] sm:$0xff]  ;;  %v7268_v30 = vld [vmem:[#allocation68_spill] sm:$0xff] }
 0x272   : > { %v1831_v58 = vmul.f32 1.442695, %v1740_v22  ;;  %v6305_v39 = vpop.eup %4301  ;;  %4321 = vpow2.f32 %v1891_v4  ;;  %2578 = vmatprep.mubr.bf16.mxu0 %v2363_v3  ;;  %v1999_v1 = vadd.f32 %v4298_v29, %v6297_v46  ;;  %v2378_v22 = vpack.c.bf16 %v6303_v35, %v6286_v7 }
 0x273   : > { %v1833_v41 = vmul.f32 1.442695, %v1741_v15  ;;  %v1835_v49 = vmul.f32 1.442695, %v1742_v57  ;;  %v1701_v45 = vpop.permute.xlu1 %1700  ;;  %v6308_v2 = vpop.eup %4303  ;;  %4323 = vpow2.f32 %v1829_v33  ;;  %2579 = vmatmul.mubr.bf16.gmra.mrb[16].mxu0 %v2362_v38  ;;  %v2379_v4 = vpack.c.bf16 %v6305_v39, %v6291_v31 }
 0x274   : > { %v1706_v32 = vpop.permute.xlu0 %1705  ;;  %v1771_v55 = vsub.f32 %v7265_v48, %v1701_v45  ;;  %v1772_v26 = vsub.f32 %v7266_v40, %v1701_v45  ;;  %v6314_v47 = vpop.eup %4305  ;;  %4325 = vpow2.f32 %v1831_v58  ;;  %2000 = vadd.xlane.f32.xlu1 %v1999_v1  ;;  %v7269_v58 = vld [vmem:[#allocation69_spill] sm:$0xff]  ;;  %v7270_v48 = vld [vmem:[#allocation70_spill] sm:$0xff] }
 0x275   : > { %v4308_v20 = vpop.eup %4307  ;;  %4327 = vpow2.f32 %v1833_v41  ;;  %v1773_v38 = vsub.f32 %v7267_v37, %v1706_v32  ;;  %v1774_v3 = vsub.f32 %v7268_v30, %v1706_v32  ;;  %2642 = vmatprep.mubr.bf16.mxu1 %v2379_v4 }
 0x276   : > { %v1893_v19 = vmul.f32 1.442695, %v1771_v55  ;;  %v1895_v15 = vmul.f32 1.442695, %v1772_v26  ;;  %v4310_v57 = vpop.eup %4309  ;;  %4329 = vpow2.f32 %v1835_v49  ;;  %2643 = vmatmul.mubr.bf16.gmra.mrb[16].mxu1 %v2378_v22  ;;  %v2364_v43 = vpack.c.bf16 %v4308_v20, %v6297_v46  ;;  %v7271_v46 = vld [vmem:[#allocation71_spill] sm:$0xff] }
 0x277   : > { %v1631_v33 = vpop.permute.xlu1 %1630  ;;  %v4312_v45 = vpop.eup %4311  ;;  %v2002_v55 = vadd.f32 %v4310_v57, %v4308_v20  ;;  %v2365_v26 = vpack.c.bf16 %v4310_v57, %v4298_v29  ;;  %v1897_v49 = vmul.f32 1.442695, %v1773_v38  ;;  %v7272_v29 = vld [vmem:[#allocation72_spill] sm:$0xff] }
 0x278   : > { %4331 = vpow2.f32 %v1893_v19  ;;  %v1743_v1 = vsub.f32 %v7269_v58, %v1631_v33  ;;  %v1744_v40 = vsub.f32 %v7270_v48, %v1631_v33  ;;  %v4314_v41 = vpop.eup %4313  ;;  %v1899_v19 = vmul.f32 1.442695, %v1774_v3 }
 0x279   : > { %4333 = vpow2.f32 %v1895_v15  ;;  %v6323_v37 = vpop.eup %4315  ;;  %v2005_v4 = vadd.f32 %v4314_v41, %v4312_v45  ;;  %2003 = vadd.xlane.f32.xlu0 %v2002_v55  ;;  %2586 = vmatprep.mubr.bf16.mxu0 %v2365_v26 }
 0x27a   : > { %v1837_v23 = vmul.f32 1.442695, %v1743_v1  ;;  %v1839_v32 = vmul.f32 1.442695, %v1744_v40  ;;  %v6325_v30 = vpop.eup %4317  ;;  %v2380_v38 = vpack.c.bf16 %v6323_v37, %v6308_v2 }
 0x27b   : > { %v1711_v22 = vpop.permute.xlu1 %1710  ;;  %v6327_v58 = vpop.eup %4319  ;;  %2006 = vadd.xlane.f32.xlu1 %v2005_v4  ;;  %2587 = vmatmul.mubr.bf16.gmra.mrb[20].mxu0 %v2364_v43  ;;  %v2381_v3 = vpack.c.bf16 %v6325_v30, %v6314_v47 }
 0x27c   : > { %4335 = vpow2.f32 %v1837_v23  ;;  %v1775_v20 = vsub.f32 %v7271_v46, %v1711_v22  ;;  %v1776_v15 = vsub.f32 %v7272_v29, %v1711_v22  ;;  %v6333_v57 = vpop.eup %4321  ;;  %v6342_v29 = vpop.permute.xlu0 %2169 }
 0x27d   : > { %4337 = vpow2.f32 %v1839_v32  ;;  %v4324_v33 = vpop.eup %4323  ;;  %2650 = vmatprep.mubr.bf16.mxu1 %v2381_v3 }
 0x27e   : > { %4339 = vpow2.f32 %v1897_v49  ;;  %v1901_v1 = vmul.f32 1.442695, %v1775_v20  ;;  %v1903_v48 = vmul.f32 1.442695, %v1776_v15  ;;  %v4326_v23 = vpop.eup %4325  ;;  %2651 = vmatmul.mubr.bf16.gmra.mrb[20].mxu1 %v2380_v38  ;;  %v2366_v55 = vpack.c.bf16 %v4324_v33, %v4312_v45 }
 0x27f   : > { %4341 = vpow2.f32 %v1899_v19  ;;  %v4328_v43 = vpop.eup %4327  ;;  %v2008_v40 = vadd.f32 %v4326_v23, %v4324_v33  ;;  %v2367_v4 = vpack.c.bf16 %v4326_v23, %v4314_v41  ;;  %v2017_v45 = vadd.f32 %v6198_v52, %v6193_v56 }
 0x280   : > { %4343 = vpow2.f32 %v1901_v1  ;;  %v4330_v26 = vpop.eup %4329  ;;  %v2023_v23 = vadd.f32 %v6207_v5, %v6202_v24  ;;  %v2026_v24 = vadd.f32 %v6225_v34, %v6223_v25  ;;  %v2038_v34 = vadd.f32 %v6281_v53, %v6279_v36 }
 0x281   : > { %4345 = vpow2.f32 %v1903_v48  ;;  %2009 = vadd.xlane.f32.xlu0 %v2008_v40  ;;  %v2011_v32 = vadd.f32 %v4330_v26, %v4328_v43  ;;  %2594 = vmatprep.mubr.bf16.mxu0 %v2367_v4  ;;  %v2035_v4 = vadd.f32 %v6264_v44, %v6259_v6  ;;  %v2047_v25 = vadd.f32 %v6314_v47, %v6308_v2 }
 0x282   : > { %v6337_v22 = vpop.eup %4331  ;;  %v2053_v44 = vadd.f32 %v6333_v57, %v6327_v58  ;;  %v2050_v36 = vadd.f32 %v6325_v30, %v6323_v37 }
 0x283   : > { %v4334_v46 = vpop.eup %4333  ;;  %2012 = vadd.xlane.f32.xlu1 %v2011_v32  ;;  %2595 = vmatmul.mubr.bf16.gmra.mrb[24].mxu0 %v2366_v55  ;;  %v2382_v19 = vpack.c.bf16 %v6337_v22, %v6327_v58  ;;  %v6348_v55 = vpop.permute.xlu0 %2184 }
 0x284   : > { %v2383_v49 = vpack.c.bf16 %v4334_v46, %v6333_v57  ;;  %v2056_v2 = vadd.f32 %v4334_v46, %v6337_v22 }
 0x286   : > { %v4336_v20 = vpop.eup %4335  ;;  %2658 = vmatprep.mubr.bf16.mxu1 %v2383_v49  ;;  %v7274_v49 = vsub.f32 %v5968_v62, %v5982_v17 }
 0x287   : > { %v4338_v41 = vpop.eup %4337  ;;  %2018 = vadd.xlane.f32.xlu1 %v2017_v45  ;;  %2659 = vmatmul.mubr.bf16.gmra.mrb[24].mxu1 %v2382_v19  ;;  %v2368_v3 = vpack.c.bf16 %v4336_v20, %v4328_v43  ;;  %v2029_v43 = vadd.f32 %v6234_v8, %v6229_v21  ;;  %v6357_v5 = vpop.permute.xlu0 %2194  ;;  %v2041_v21 = vadd.f32 %v6291_v31, %v6286_v7 }
 0x288   : > { %v4340_v15 = vpop.eup %4339  ;;  %v2014_v38 = vadd.f32 %v4338_v41, %v4336_v20  ;;  %v2369_v1 = vpack.c.bf16 %v4338_v41, %v4330_v26  ;;  %v6353_v26 = vpop.permute.xlu1 %2164  ;;  %v1549_v22 = vmul.f32 1.442695, %v7274_v49 }
 0x289   : > { %v4342_v33 = vpop.eup %4341 }
 0x28a   : > { %v4344_v48 = vpop.eup %4343  ;;  %2015 = vadd.xlane.f32.xlu0 %v2014_v38  ;;  %2602 = vmatprep.mubr.bf16.mxu0 %v2369_v1  ;;  %v2059_v7 = vadd.f32 %v4342_v33, %v4340_v15 }
 0x28b   : > { %v4346_v40 = vpop.eup %4345  ;;  %2024 = vadd.xlane.f32.xlu1 %v2023_v23  ;;  %2603 = vmatmul.mubr.bf16.gmra.mrb[28].mxu0 %v2368_v3  ;;  %v2384_v52 = vpack.c.bf16 %v4344_v48, %v4340_v15  ;;  %v6367_v8 = vpop.permute.xlu0 %2204 }
 0x28c   : > { %v2385_v56 = vpack.c.bf16 %v4346_v40, %v4342_v33  ;;  %v6363_v32 = vpop.permute.xlu1 %2174  ;;  %v2062_v58 = vadd.f32 %v4346_v40, %v4344_v48  ;;  %v1905_v48 = vld [vmem:[#allocation3] sm:$0xff] }
 0x28d   : > { %v1937_v40 = vmul.f32 %v6033_v0, %v1905_v48 }
 0x28e   : > { %2021 = vadd.xlane.f32.xlu0 %v6211_v63  ;;  %2666 = vmatprep.mubr.bf16.mxu1 %v2385_v56  ;;  %v2032_v63 = vadd.f32 %v6255_v59, %v6253_v27  ;;  %v2044_v27 = vadd.f32 %v6305_v39, %v6303_v35  ;;  %v7273_v35 = vsub.f32 %v6009_v61, %v6020_v9 }
 0x28f   : > { %2030 = vadd.xlane.f32.xlu1 %v2029_v43  ;;  %2667 = vmatmul.mubr.bf16.gmra.mrb[28].mxu1 %v2384_v52  ;;  %v6377_v59 = vpop.permute.xlu0 %2214  ;;  %v1907_v52 = vld [vmem:[#allocation3 + $0x10] sm:$0xff] }
 0x290   : > { %v6373_v6 = vpop.permute.xlu1 %2179  ;;  %v1551_v39 = vmul.f32 1.442695, %v7273_v35 }
 0x292   : > { %2027 = vadd.xlane.f32.xlu0 %v2026_v24  ;;  %4347 = vpow2.f32 %v1551_v39  ;;  %v1939_v24 = vmul.f32 %v6041_v16, %v1907_v52  ;;  %v1909_v39 = vld [vmem:[#allocation3 + $0x20] sm:$0xff] }
 0x293   : > { %2036 = vadd.xlane.f32.xlu1 %v2035_v4  ;;  %v6385_v31 = vpop.permute.xlu0 %2224  ;;  %4349 = vpow2.f32 %v1549_v22 }
 0x294   : > { %v6383_v53 = vpop.permute.xlu1 %2189 }
 0x296   : > { %2033 = vadd.xlane.f32.xlu0 %v2032_v63 }
 0x297   : > { %2042 = vadd.xlane.f32.xlu1 %v2041_v21  ;;  %v6393_v57 = vpop.permute.xlu0 %2234 }
 0x298   : > { %v6391_v47 = vpop.permute.xlu1 %2199 }
 0x29a   : > { %2039 = vadd.xlane.f32.xlu0 %v2038_v34 }
 0x29b   : > { %2048 = vadd.xlane.f32.xlu1 %v2047_v25  ;;  %v6397_v30 = vpop.permute.xlu0 %2244  ;;  %v1908_v25 = vld [vmem:[#allocation3 + $0x18] sm:$0xff] }
 0x29c   : > { %v6395_v37 = vpop.permute.xlu1 %2209  ;;  %v6404_v61 = vpop.eup %4347 }
 0x29d   : > { %v6413_v45 = vpop.eup %4349 }
 0x29e   : > { %2045 = vadd.xlane.f32.xlu0 %v2044_v27  ;;  %v1940_v27 = vmul.f32 %v6052_v54, %v1908_v25  ;;  %v1941_v54 = vmul.f32 %v6022_v14, %v1909_v39 }
 0x29f   : > { %2054 = vadd.xlane.f32.xlu1 %v2053_v44  ;;  %v6407_v9 = vpop.permute.xlu0 %2254 }
 0x2a0   : > { %v6402_v46 = vpop.permute.xlu1 %2219 }
 0x2a2   : > { %2051 = vadd.xlane.f32.xlu0 %v2050_v36 }
 0x2a3   : > { %2060 = vadd.xlane.f32.xlu1 %v2059_v7  ;;  %v6411_v20 = vpop.permute.xlu0 %2264  ;;  %v1906_v7 = vld [vmem:[#allocation3 + $0x8] sm:$0xff] }
 0x2a4   : > { %v6409_v19 = vpop.permute.xlu1 %2229  ;;  %v1938_v16 = vmul.f32 %v6007_v10, %v1906_v7  ;;  %v1914_v7 = vld [vmem:[#allocation3 + $0x48] sm:$0xff] }
 0x2a6   : > { %2057 = vadd.xlane.f32.xlu0 %v2056_v2  ;;  %v1910_v2 = vld [vmem:[#allocation3 + $0x28] sm:$0xff] }
 0x2a7   : > { %v6418_v62 = vpop.permute.xlu0 %2274  ;;  %v1942_v49 = vmul.f32 %v6063_v18, %v1910_v2 }
 0x2a8   : > { %v6415_v41 = vpop.permute.xlu1 %2239 }
 0x2aa   : > { %2063 = vadd.xlane.f32.xlu0 %v2062_v58 }
 0x2ab   : > { %v6422_v15 = vpop.permute.xlu0 %2284 }
 0x2ac   : > { %v6420_v17 = vpop.permute.xlu1 %2249 }
 0x2af   : > { %v6426_v3 = vpop.permute.xlu0 %2294 }
 0x2b0   : > { %v6424_v38 = vpop.permute.xlu1 %2259 }
 0x2b3   : > { %v6430_v1 = vpop.permute.xlu0 %2304 }
 0x2b4   : > { %2319 = vperm.xlu1 %4142, %v6404_v61   ;;  %v6428_v33 = vpop.permute.xlu1 %2269 }
 0x2b8   : > { %v6432_v23 = vpop.permute.xlu1 %2279 }
 0x2bc   : > { %v6437_v63 = vpop.permute.xlu1 %2289 }
 0x2c0   : > { %2314 = vperm.xlu0 %4141, %v6413_v45   ;;  %v6440_v34 = vpop.permute.xlu1 %2299 }
 0x2c4   : > { %v6443_v0 = vpop.permute.xlu1 %2309 }
 0x2d9   : > { %v1971_v56 = vpop.xlane.xlu0 %1970 }
 0x2da   : > { %v2065_v43 = vadd.f32 %v1971_v56, %v1937_v40  ;;  %v1911_v56 = vld [vmem:[#allocation3 + $0x30] sm:$0xff] }
 0x2db   : > { %v1943_v10 = vmul.f32 %v6035_v28, %v1911_v56  ;;  %v1915_v28 = vld [vmem:[#allocation3 + $0x50] sm:$0xff] }
 0x2dc   : > { %2098 = vst.msk [vmem:[#allocation3] sm:$0xff] %vm2097_vm2, %v2065_v43  ;;  %v1912_v43 = vld [vmem:[#allocation3 + $0x38] sm:$0xff] }
 0x2dd   : > { %v1977_v4 = vpop.xlane.xlu0 %1976  ;;  %v1944_v18 = vmul.f32 %v6076_v51, %v1912_v43 }
 0x2de   : > { %v2067_v21 = vadd.f32 %v1977_v4, %v1939_v24 }
 0x2e0   : > { %2100 = vst.msk [vmem:[#allocation3 + $0x10] sm:$0xff] %vm2097_vm2, %v2067_v21  ;;  %v1913_v21 = vld [vmem:[#allocation3 + $0x40] sm:$0xff] }
 0x2e3   : > { %v1980_v44 = vpop.xlane.xlu0 %1979 }
 0x2e4   : > { %v2068_v36 = vadd.f32 %v1980_v44, %v1940_v27  ;;  %v1945_v27 = vmul.f32 %v6043_v11, %v1913_v21  ;;  %v1917_v11 = vld [vmem:[#allocation3 + $0x60] sm:$0xff] }
 0x2e6   : > { %2101 = vst.msk [vmem:[#allocation3 + $0x18] sm:$0xff] %vm2097_vm2, %v2068_v36 }
 0x2ec   : > { %v1986_v22 = vpop.xlane.xlu0 %1985 }
 0x2ed   : > { %v1974_v35 = vpop.xlane.xlu1 %1973  ;;  %v2070_v48 = vadd.f32 %v1986_v22, %v1942_v49  ;;  %v1916_v49 = vld [vmem:[#allocation3 + $0x58] sm:$0xff] }
 0x2ee   : > { %v2066_v58 = vadd.f32 %v1974_v35, %v1938_v16  ;;  %v1946_v16 = vmul.f32 %v6086_v12, %v1914_v7  ;;  %v1947_v35 = vmul.f32 %v6054_v60, %v1915_v28  ;;  %v1948_v22 = vmul.f32 %v6097_v13, %v1916_v49  ;;  %v2131_v60 = vld [vmem:[#allocation4 + $0x8] sm:$0xff]  ;;  %v7275_v28 = vld [vmem:[#allocation73_spill] sm:$0xff] }
 0x2ef   : > { %2103 = vst.msk [vmem:[#allocation3 + $0x28] sm:$0xff] %vm2097_vm2, %v2070_v48  ;;  %v1923_v49 = vld [vmem:[#allocation3 + $0x90] sm:$0xff] }
 0x2f0   : > { %2099 = vst.msk [vmem:[#allocation3 + $0x8] sm:$0xff] %vm2097_vm2, %v2066_v58 }
 0x2f1   : > { %v1983_v40 = vpop.xlane.xlu1 %1982 }
 0x2f2   : > { %v2069_v52 = vadd.f32 %v1983_v40, %v1941_v54  ;;  %v1949_v54 = vmul.f32 %v6065_v50, %v1917_v11  ;;  %v2130_v40 = vld [vmem:[#allocation4] sm:$0xff]  ;;  %v1919_v50 = vld [vmem:[#allocation3 + $0x70] sm:$0xff] }
 0x2f4   : > { %2102 = vst.msk [vmem:[#allocation3 + $0x20] sm:$0xff] %vm2097_vm2, %v2069_v52 }
 0x2f5   : > { %v1989_v24 = vpop.xlane.xlu1 %1988  ;;  %v1992_v25 = vpop.xlane.xlu0 %1991 }
 0x2f6   : > { %v2071_v4 = vadd.f32 %v1989_v24, %v1943_v10  ;;  %v2072_v14 = vadd.f32 %v1992_v25, %v1944_v18  ;;  %v1918_v24 = vld [vmem:[#allocation3 + $0x68] sm:$0xff]  ;;  %v2323_v25 = vmul.f32 %v6342_v29, %v2131_v60  ;;  %v7276_v29 = vld [vmem:[#allocation74_spill] sm:$0xff]  ;;  %v1925_v60 = vld [vmem:[#allocation3 + $0xa0] sm:$0xff] }
 0x2f8   : > { %2104 = vst.msk [vmem:[#allocation3 + $0x30] sm:$0xff] %vm2097_vm2, %v2071_v4  ;;  %2105 = vst.msk [vmem:[#allocation3 + $0x38] sm:$0xff] %vm2097_vm2, %v2072_v14  ;;  %v2322_v4 = vmul.f32 %v6353_v26, %v2130_v40  ;;  %v1922_v40 = vld [vmem:[#allocation3 + $0x88] sm:$0xff] }
 0x2f9   : > { %v1995_v44 = vpop.xlane.xlu1 %1994 }
 0x2fa   : > { %v2073_v36 = vadd.f32 %v1995_v44, %v1945_v27  ;;  %v1950_v44 = vmul.f32 %v6108_v42, %v1918_v24  ;;  %v7279_v24 = vld [vmem:[#allocation11_spill] sm:$0xff] }
 0x2fc   : > { %2106 = vst.msk [vmem:[#allocation3 + $0x40] sm:$0xff] %vm2097_vm2, %v2073_v36 }
 0x2fe   : > { %v1998_v2 = vpop.xlane.xlu0 %1997 }
 0x2ff   : > { %v2074_v51 = vadd.f32 %v1998_v2, %v1946_v16  ;;  %v3901_v10 = vpop.f32.mrb[0].mxu0  ;;  %v1951_v16 = vmul.f32 %v7275_v28, %v1919_v50 }
 0x300   : > { %v3902_v43 = vpop.f32.mrb[1].mxu0 }
 0x301   : > { %v2001_v39 = vpop.xlane.xlu1 %2000  ;;  %2107 = vst.msk [vmem:[#allocation3 + $0x48] sm:$0xff] %vm2097_vm2, %v2074_v51  ;;  %v3903_v21 = vadd.f32 %v3902_v43, %v3901_v10  ;;  %v3904_v18 = vpop.f32.mrb[2].mxu0 }
 0x302   : > { %v2075_v58 = vadd.f32 %v2001_v39, %v1947_v35  ;;  %v3905_v13 = vpop.f32.mrb[3].mxu0  ;;  %v1921_v35 = vld [vmem:[#allocation3 + $0x80] sm:$0xff]  ;;  %v1920_v39 = vld [vmem:[#allocation3 + $0x78] sm:$0xff] }
 0x303   : > { %v2675_v14 = vadd.f32 %v3903_v21, %v2322_v4  ;;  %v3906_v27 = vadd.f32 %v3905_v13, %v3904_v18  ;;  %v1954_v4 = vmul.f32 %v7279_v24, %v1922_v40  ;;  %v1924_v18 = vld [vmem:[#allocation3 + $0x98] sm:$0xff]  ;;  %v7280_v13 = vld [vmem:[#allocation76_spill] sm:$0xff] }
 0x304   : > { %2108 = vst.msk [vmem:[#allocation3 + $0x50] sm:$0xff] %vm2097_vm2, %v2075_v58  ;;  %v1953_v58 = vmul.f32 %v7276_v29, %v1921_v35  ;;  %v1957_v50 = vmul.f32 %v7280_v13, %v1925_v60  ;;  %v7286_v24 = vld [vmem:[#allocation14_spill] sm:$0xff]  ;;  %v1933_v13 = vld [vmem:[#allocation3 + $0xe0] sm:$0xff] }
 0x305   : > { %2708 = vst.msk [vmem:[#allocation4] sm:$0xff] %vm2707_vm3, %v2675_v14  ;;  %v2676_v7 = vadd.f32 %v3906_v27, %v2323_v25  ;;  %v1927_v27 = vld [vmem:[#allocation3 + $0xb0] sm:$0xff] }
 0x306   : > { %v2004_v48 = vpop.xlane.xlu0 %2003 }
 0x307   : > { %v2076_v12 = vadd.f32 %v2004_v48, %v1948_v22  ;;  %2709 = vst.msk [vmem:[#allocation4 + $0x8] sm:$0xff] %vm2707_vm3, %v2676_v7  ;;  %v7277_v22 = vld [vmem:[#allocation78_spill] sm:$0xff] }
 0x308   : > { %v2007_v56 = vpop.xlane.xlu1 %2006 }
 0x309   : > { %v2077_v52 = vadd.f32 %v2007_v56, %v1949_v54  ;;  %2109 = vst.msk [vmem:[#allocation3 + $0x58] sm:$0xff] %vm2097_vm2, %v2076_v12  ;;  %v1952_v54 = vmul.f32 %v7277_v22, %v1920_v39  ;;  %v7278_v56 = vld [vmem:[#allocation75_spill] sm:$0xff]  ;;  %v7284_v22 = vld [vmem:[#allocation12_spill] sm:$0xff] }
 0x30a   : > { %v1955_v12 = vmul.f32 %v7278_v56, %v1923_v49  ;;  %v1929_v39 = vld [vmem:[#allocation3 + $0xc0] sm:$0xff]  ;;  %v1931_v56 = vld [vmem:[#allocation3 + $0xd0] sm:$0xff] }
 0x30b   : > { %2110 = vst.msk [vmem:[#allocation3 + $0x60] sm:$0xff] %vm2097_vm2, %v2077_v52 }
 0x30e   : > { %v2010_v36 = vpop.xlane.xlu0 %2009 }
 0x30f   : > { %v2078_v26 = vadd.f32 %v2010_v36, %v1950_v44  ;;  %v7281_v36 = vld [vmem:[#allocation13_spill] sm:$0xff] }
 0x310   : > { %v2013_v2 = vpop.xlane.xlu1 %2012  ;;  %v1956_v7 = vmul.f32 %v7281_v36, %v1924_v18 }
 0x311   : > { %v2079_v51 = vadd.f32 %v2013_v2, %v1951_v16  ;;  %2111 = vst.msk [vmem:[#allocation3 + $0x68] sm:$0xff] %vm2097_vm2, %v2078_v26  ;;  %v1926_v16 = vld [vmem:[#allocation3 + $0xa8] sm:$0xff]  ;;  %v7282_v26 = vld [vmem:[#allocation77_spill] sm:$0xff] }
 0x312   : > { %v1959_v2 = vmul.f32 %v7282_v26, %v1927_v27  ;;  %v7288_v26 = vld [vmem:[#allocation80_spill] sm:$0xff] }
 0x313   : > { %2112 = vst.msk [vmem:[#allocation3 + $0x70] sm:$0xff] %vm2097_vm2, %v2079_v51 }
 0x314   : > { %v2019_v42 = vpop.xlane.xlu1 %2018 }
 0x315   : > { %v2081_v11 = vadd.f32 %v2019_v42, %v1953_v58  ;;  %v7283_v58 = vld [vmem:[#allocation79_spill] sm:$0xff] }
 0x316   : > { %v1958_v42 = vmul.f32 %v7283_v58, %v1926_v16 }
 0x317   : > { %v2016_v48 = vpop.xlane.xlu0 %2015  ;;  %2114 = vst.msk [vmem:[#allocation3 + $0x80] sm:$0xff] %vm2097_vm2, %v2081_v11  ;;  %v1928_v11 = vld [vmem:[#allocation3 + $0xb8] sm:$0xff] }
 0x318   : > { %v2080_v52 = vadd.f32 %v2016_v48, %v1952_v54  ;;  %v2025_v10 = vpop.xlane.xlu1 %2024  ;;  %v1961_v54 = vmul.f32 %v7284_v22, %v1929_v39 }
 0x319   : > { %v2083_v43 = vadd.f32 %v2025_v10, %v1955_v12 }
 0x31a   : > { %2113 = vst.msk [vmem:[#allocation3 + $0x78] sm:$0xff] %vm2097_vm2, %v2080_v52  ;;  %v7285_v52 = vld [vmem:[#allocation81_spill] sm:$0xff] }
 0x31b   : > { %v2022_v21 = vpop.xlane.xlu0 %2021  ;;  %2116 = vst.msk [vmem:[#allocation3 + $0x90] sm:$0xff] %vm2097_vm2, %v2083_v43  ;;  %v1960_v10 = vmul.f32 %v7285_v52, %v1928_v11  ;;  %v1930_v43 = vld [vmem:[#allocation3 + $0xc8] sm:$0xff] }
 0x31c   : > { %v2082_v25 = vadd.f32 %v2022_v21, %v1954_v4  ;;  %v2031_v14 = vpop.xlane.xlu1 %2030  ;;  %v1963_v4 = vmul.f32 %v7286_v24, %v1931_v56 }
 0x31d   : > { %v2085_v44 = vadd.f32 %v2031_v14, %v1957_v50  ;;  %v2146_v50 = vld [vmem:[#allocation4 + $0x80] sm:$0xff]  ;;  %v7287_v14 = vld [vmem:[#allocation82_spill] sm:$0xff] }
 0x31e   : > { %2115 = vst.msk [vmem:[#allocation3 + $0x88] sm:$0xff] %vm2097_vm2, %v2082_v25  ;;  %v1962_v27 = vmul.f32 %v7287_v14, %v1930_v43  ;;  %v2133_v43 = vld [vmem:[#allocation4 + $0x18] sm:$0xff] }
 0x31f   : > { %v2028_v28 = vpop.xlane.xlu0 %2027  ;;  %2118 = vst.msk [vmem:[#allocation3 + $0xa0] sm:$0xff] %vm2097_vm2, %v2085_v44 }
 0x320   : > { %v2084_v35 = vadd.f32 %v2028_v28, %v1956_v7  ;;  %v2037_v51 = vpop.xlane.xlu1 %2036  ;;  %v1932_v7 = vld [vmem:[#allocation3 + $0xd8] sm:$0xff]  ;;  %v2147_v28 = vld [vmem:[#allocation4 + $0x88] sm:$0xff] }
 0x321   : > { %v2087_v29 = vadd.f32 %v2037_v51, %v1959_v2  ;;  %v1965_v2 = vmul.f32 %v7288_v26, %v1933_v13  ;;  %v2338_v51 = vmul.f32 %v6397_v30, %v2146_v50  ;;  %v1936_v26 = vld [vmem:[#allocation3 + $0xf8] sm:$0xff] }
 0x322   : > { %2117 = vst.msk [vmem:[#allocation3 + $0x98] sm:$0xff] %vm2097_vm2, %v2084_v35 }
 0x323   : > { %v2034_v49 = vpop.xlane.xlu0 %2033  ;;  %2120 = vst.msk [vmem:[#allocation3 + $0xb0] sm:$0xff] %vm2097_vm2, %v2087_v29 }
 0x324   : > { %v2086_v48 = vadd.f32 %v2034_v49, %v1958_v42  ;;  %v2043_v40 = vpop.xlane.xlu1 %2042  ;;  %v3949_v44 = vpop.f32.mrb[0].mxu1  ;;  %v1935_v42 = vld [vmem:[#allocation3 + $0xf0] sm:$0xff] }
 0x325   : > { %v2089_v12 = vadd.f32 %v2043_v40, %v1961_v54  ;;  %v3950_v16 = vpop.f32.mrb[1].mxu1  ;;  %v2132_v49 = vld [vmem:[#allocation4 + $0x10] sm:$0xff]  ;;  %v7289_v54 = vld [vmem:[#allocation83_spill] sm:$0xff]  ;;  %v2339_v40 = vmul.f32 %v6420_v17, %v2147_v28  ;;  %v1967_v24 = vmul.f32 %v6413_v45, %v1935_v42 }
 0x326   : > { %2119 = vst.msk [vmem:[#allocation3 + $0xa8] sm:$0xff] %vm2097_vm2, %v2086_v48  ;;  %v3951_v39 = vadd.f32 %v3950_v16, %v3949_v44  ;;  %v3952_v58 = vpop.f32.mrb[2].mxu1  ;;  %v1964_v48 = vmul.f32 %v7289_v54, %v1932_v7  ;;  %v7290_v44 = vld [vmem:[#allocation16_spill] sm:$0xff]  ;;  %v2325_v7 = vmul.f32 %v6373_v6, %v2133_v43  ;;  %v2134_v6 = vld [vmem:[#allocation4 + $0x20] sm:$0xff] }
 0x327   : > { %v2040_v60 = vpop.xlane.xlu0 %2039  ;;  %2122 = vst.msk [vmem:[#allocation3 + $0xc0] sm:$0xff] %vm2097_vm2, %v2089_v12  ;;  %v3953_v22 = vpop.f32.mrb[3].mxu1 }
 0x328   : > { %v2088_v21 = vadd.f32 %v2040_v60, %v1960_v10  ;;  %v2049_v18 = vpop.xlane.xlu1 %2048  ;;  %v2691_v56 = vadd.f32 %v3951_v39, %v2338_v51  ;;  %v3954_v12 = vadd.f32 %v3953_v22, %v3952_v58  ;;  %v1934_v60 = vld [vmem:[#allocation3 + $0xe8] sm:$0xff] }
 0x329   : > { %v2091_v25 = vadd.f32 %v2049_v18, %v1963_v4 }
 0x32a   : > { %2121 = vst.msk [vmem:[#allocation3 + $0xb8] sm:$0xff] %vm2097_vm2, %v2088_v21  ;;  %v3907_v52 = vpop.f32.mrb[4].mxu0  ;;  %v2324_v21 = vmul.f32 %v6363_v32, %v2132_v49  ;;  %v2692_v18 = vadd.f32 %v3954_v12, %v2339_v40 }
 0x32b   : > { %v2046_v36 = vpop.xlane.xlu0 %2045  ;;  %2124 = vst.msk [vmem:[#allocation3 + $0xd0] sm:$0xff] %vm2097_vm2, %v2091_v25  ;;  %v3908_v30 = vpop.f32.mrb[5].mxu0  ;;  %v2148_v25 = vld [vmem:[#allocation4 + $0x90] sm:$0xff] }
 0x32c   : > { %v2090_v35 = vadd.f32 %v2046_v36, %v1962_v27  ;;  %v2055_v29 = vpop.xlane.xlu1 %2054  ;;  %2724 = vst.msk [vmem:[#allocation4 + $0x80] sm:$0xff] %vm2707_vm3, %v2691_v56  ;;  %v3909_v13 = vadd.f32 %v3908_v30, %v3907_v52  ;;  %v3910_v17 = vpop.f32.mrb[6].mxu0  ;;  %v1966_v36 = vmul.f32 %v7290_v44, %v1934_v60  ;;  %2725 = vst.msk [vmem:[#allocation4 + $0x88] sm:$0xff] %vm2707_vm3, %v2692_v18 }
 0x32d   : > { %v2093_v11 = vadd.f32 %v2055_v29, %v1965_v2  ;;  %v3911_v27 = vpop.f32.mrb[7].mxu0  ;;  %v3955_v32 = vpop.f32.mrb[4].mxu1  ;;  %v2149_v2 = vld [vmem:[#allocation4 + $0x98] sm:$0xff]  ;;  %v2340_v39 = vmul.f32 %v6407_v9, %v2148_v25  ;;  %v2135_v9 = vld [vmem:[#allocation4 + $0x28] sm:$0xff] }
 0x32e   : > { %2123 = vst.msk [vmem:[#allocation3 + $0xc8] sm:$0xff] %vm2097_vm2, %v2090_v35  ;;  %v2677_v45 = vadd.f32 %v3909_v13, %v2324_v21  ;;  %v3912_v28 = vadd.f32 %v3911_v27, %v3910_v17  ;;  %v3956_v35 = vpop.f32.mrb[5].mxu1  ;;  %v2341_v22 = vmul.f32 %v6424_v38, %v2149_v2  ;;  %v2327_v38 = vmul.f32 %v6383_v53, %v2135_v9  ;;  %v2151_v13 = vld [vmem:[#allocation4 + $0xa8] sm:$0xff]  ;;  %v2136_v27 = vld [vmem:[#allocation4 + $0x30] sm:$0xff] }
 0x32f   : > { %v2052_v10 = vpop.xlane.xlu0 %2051  ;;  %2126 = vst.msk [vmem:[#allocation3 + $0xe0] sm:$0xff] %vm2097_vm2, %v2093_v11  ;;  %v3957_v58 = vadd.f32 %v3956_v35, %v3955_v32  ;;  %v3958_v42 = vpop.f32.mrb[6].mxu1  ;;  %v1968_v11 = vmul.f32 %v6404_v61, %v1936_v26  ;;  %v2152_v35 = vld [vmem:[#allocation4 + $0xb0] sm:$0xff] }
 0x330   : > { %v2092_v4 = vadd.f32 %v2052_v10, %v1964_v48  ;;  %v2061_v50 = vpop.xlane.xlu1 %2060  ;;  %2710 = vst.msk [vmem:[#allocation4 + $0x10] sm:$0xff] %vm2707_vm3, %v2677_v45  ;;  %v2678_v29 = vadd.f32 %v3912_v28, %v2325_v7  ;;  %v3959_v49 = vpop.f32.mrb[7].mxu1  ;;  %v2326_v10 = vmul.f32 %v6348_v55, %v2134_v6  ;;  %v2137_v28 = vld [vmem:[#allocation4 + $0x38] sm:$0xff] }
 0x331   : > { %v2095_v14 = vadd.f32 %v2061_v50, %v1967_v24  ;;  %v2693_v54 = vadd.f32 %v3957_v58, %v2340_v39  ;;  %v3960_v48 = vadd.f32 %v3959_v49, %v3958_v42  ;;  %v2150_v24 = vld [vmem:[#allocation4 + $0xa0] sm:$0xff]  ;;  %v2329_v39 = vmul.f32 %v6391_v47, %v2137_v28  ;;  %v2153_v42 = vld [vmem:[#allocation4 + $0xb8] sm:$0xff] }
 0x332   : > { %2125 = vst.msk [vmem:[#allocation3 + $0xd8] sm:$0xff] %vm2097_vm2, %v2092_v4  ;;  %v2342_v55 = vmul.f32 %v6411_v20, %v2150_v24  ;;  %v2344_v49 = vmul.f32 %v6418_v62, %v2152_v35  ;;  %v2157_v35 = vld [vmem:[#allocation4 + $0xd8] sm:$0xff] }
 0x333   : > { %v2058_v16 = vpop.xlane.xlu0 %2057  ;;  %2128 = vst.msk [vmem:[#allocation3 + $0xf0] sm:$0xff] %vm2097_vm2, %v2095_v14  ;;  %v3913_v40 = vpop.f32.mrb[8].mxu0  ;;  %v2694_v60 = vadd.f32 %v3960_v48, %v2341_v22 }
 0x334   : > { %v2094_v51 = vadd.f32 %v2058_v16, %v1966_v36  ;;  %2711 = vst.msk [vmem:[#allocation4 + $0x18] sm:$0xff] %vm2707_vm3, %v2678_v29  ;;  %v3914_v12 = vpop.f32.mrb[9].mxu0  ;;  %2726 = vst.msk [vmem:[#allocation4 + $0x90] sm:$0xff] %vm2707_vm3, %v2693_v54  ;;  %v2343_v36 = vmul.f32 %v6428_v33, %v2151_v13  ;;  %v2328_v16 = vmul.f32 %v6357_v5, %v2136_v27  ;;  %v2138_v54 = vld [vmem:[#allocation4 + $0x40] sm:$0xff] }
 0x335   : > { %v3915_v43 = vadd.f32 %v3914_v12, %v3913_v40  ;;  %v3916_v30 = vpop.f32.mrb[10].mxu0  ;;  %2727 = vst.msk [vmem:[#allocation4 + $0x98] sm:$0xff] %vm2707_vm3, %v2694_v60  ;;  %v2345_v40 = vmul.f32 %v6432_v23, %v2153_v42  ;;  %v2139_v12 = vld [vmem:[#allocation4 + $0x48] sm:$0xff] }
 0x336   : > { %2127 = vst.msk [vmem:[#allocation3 + $0xe8] sm:$0xff] %vm2097_vm2, %v2094_v51  ;;  %v3917_v61 = vpop.f32.mrb[11].mxu0 }
 0x337   : > { %v2064_v56 = vpop.xlane.xlu0 %2063  ;;  %v2679_v4 = vadd.f32 %v3915_v43, %v2326_v10  ;;  %v3918_v21 = vadd.f32 %v3917_v61, %v3916_v30  ;;  %v3961_v18 = vpop.f32.mrb[8].mxu1  ;;  %v2330_v10 = vmul.f32 %v6367_v8, %v2138_v54  ;;  %v2154_v30 = vld [vmem:[#allocation4 + $0xc0] sm:$0xff]  ;;  %v2331_v61 = vmul.f32 %v6395_v37, %v2139_v12 }
 0x338   : > { %v2096_v52 = vadd.f32 %v2064_v56, %v1968_v11  ;;  %v3962_v50 = vpop.f32.mrb[9].mxu1  ;;  %v2346_v13 = vmul.f32 %v6422_v15, %v2154_v30 }
 0x339   : > { %2712 = vst.msk [vmem:[#allocation4 + $0x20] sm:$0xff] %vm2707_vm3, %v2679_v4  ;;  %v2680_v17 = vadd.f32 %v3918_v21, %v2327_v38  ;;  %v3963_v25 = vadd.f32 %v3962_v50, %v3961_v18  ;;  %v3964_v14 = vpop.f32.mrb[10].mxu1  ;;  %v2155_v21 = vld [vmem:[#allocation4 + $0xc8] sm:$0xff] }
 0x33a   : > { %2129 = vst.msk [vmem:[#allocation3 + $0xf8] sm:$0xff] %vm2097_vm2, %v2096_v52  ;;  %v3965_v44 = vpop.f32.mrb[11].mxu1 }
 0x33b   : > { %2713 = vst.msk [vmem:[#allocation4 + $0x28] sm:$0xff] %vm2707_vm3, %v2680_v17  ;;  %v2695_v53 = vadd.f32 %v3963_v25, %v2342_v55  ;;  %v3966_v7 = vadd.f32 %v3965_v44, %v3964_v14  ;;  %v2140_v17 = vld [vmem:[#allocation4 + $0x50] sm:$0xff]  ;;  %v2347_v14 = vmul.f32 %v6437_v63, %v2155_v21  ;;  %v2145_v21 = vld [vmem:[#allocation4 + $0x78] sm:$0xff] }
 0x33d   : > { %v3919_v45 = vpop.f32.mrb[12].mxu0  ;;  %2728 = vst.msk [vmem:[#allocation4 + $0xa0] sm:$0xff] %vm2707_vm3, %v2695_v53  ;;  %v2696_v20 = vadd.f32 %v3966_v7, %v2343_v36  ;;  %v2141_v36 = vld [vmem:[#allocation4 + $0x58] sm:$0xff]  ;;  %v2332_v7 = vmul.f32 %v6377_v59, %v2140_v17 }
 0x33e   : > { %v3920_v32 = vpop.f32.mrb[13].mxu0 }
 0x33f   : > { %v3921_v26 = vadd.f32 %v3920_v32, %v3919_v45  ;;  %v3922_v2 = vpop.f32.mrb[14].mxu0  ;;  %2729 = vst.msk [vmem:[#allocation4 + $0xa8] sm:$0xff] %vm2707_vm3, %v2696_v20  ;;  %v2156_v32 = vld [vmem:[#allocation4 + $0xd0] sm:$0xff]  ;;  %v2333_v20 = vmul.f32 %v6402_v46, %v2141_v36  ;;  %v2315_v17 = vpop.permute.xlu0 %2314 }
 0x340   : > { %v3923_v51 = vpop.f32.mrb[15].mxu0  ;;  %v2320_v36 = vpop.permute.xlu1 %2319 }
 0x341   : > { %v2681_v33 = vadd.f32 %v3921_v26, %v2328_v16  ;;  %v3924_v29 = vadd.f32 %v3923_v51, %v3922_v2  ;;  %v3967_v58 = vpop.f32.mrb[12].mxu1 }
 0x342   : > { %v3968_v6 = vpop.f32.mrb[13].mxu1 }
 0x343   : > { %2714 = vst.msk [vmem:[#allocation4 + $0x30] sm:$0xff] %vm2707_vm3, %v2681_v33  ;;  %v2682_v5 = vadd.f32 %v3924_v29, %v2329_v39  ;;  %v3969_v11 = vadd.f32 %v3968_v6, %v3967_v58  ;;  %v3970_v22 = vpop.f32.mrb[14].mxu1  ;;  %v2348_v39 = vmul.f32 %v6426_v3, %v2156_v32  ;;  %v2142_v58 = vld [vmem:[#allocation4 + $0x60] sm:$0xff]  ;;  %v2349_v6 = vmul.f32 %v6440_v34, %v2157_v35 }
 0x344   : > { %v3971_v48 = vpop.f32.mrb[15].mxu1  ;;  %v2334_v54 = vmul.f32 %v6385_v31, %v2142_v58  ;;  %v4544_v35 = vmov (!%p3858_p0), 0  }
 0x345   : > { %2715 = vst.msk [vmem:[#allocation4 + $0x38] sm:$0xff] %vm2707_vm3, %v2682_v5  ;;  %v2697_v47 = vadd.f32 %v3969_v11, %v2344_v49  ;;  %v3972_v56 = vadd.f32 %v3971_v48, %v3970_v22  ;;  %v2143_v11 = vld [vmem:[#allocation4 + $0x68] sm:$0xff]  ;;  %4352 = vset.pattern.permute.xlu1 (!%p3858_p0), %v4544_v35  ;;  %4351 = vset.pattern.permute.xlu0 (!%p3858_p0), %v4544_v35 }
 0x346   : > { %v3925_v9 = vpop.f32.mrb[16].mxu0 }
 0x347   : > { %v3926_v52 = vpop.f32.mrb[17].mxu0  ;;  %2730 = vst.msk [vmem:[#allocation4 + $0xb0] sm:$0xff] %vm2707_vm3, %v2697_v47  ;;  %v2698_v62 = vadd.f32 %v3972_v56, %v2345_v40  ;;  %v2158_v47 = vld [vmem:[#allocation4 + $0xe0] sm:$0xff] }
 0x348   : > { %v3927_v60 = vadd.f32 %v3926_v52, %v3925_v9  ;;  %v3928_v43 = vpop.f32.mrb[18].mxu0  ;;  %v2335_v9 = vmul.f32 %v6409_v19, %v2143_v11 }
 0x349   : > { %v3929_v24 = vpop.f32.mrb[19].mxu0  ;;  %2731 = vst.msk [vmem:[#allocation4 + $0xb8] sm:$0xff] %vm2707_vm3, %v2698_v62  ;;  %v3973_v4 = vpop.f32.mrb[16].mxu1 }
 0x34a   : > { %v2683_v23 = vadd.f32 %v3927_v60, %v2330_v10  ;;  %v3930_v38 = vadd.f32 %v3929_v24, %v3928_v43  ;;  %v3974_v18 = vpop.f32.mrb[17].mxu1  ;;  %v2159_v10 = vld [vmem:[#allocation4 + $0xe8] sm:$0xff]  ;;  %v2350_v60 = vmul.f32 %v6430_v1, %v2158_v47  ;;  %v2144_v24 = vld [vmem:[#allocation4 + $0x70] sm:$0xff] }
 0x34b   : > { %v3975_v50 = vadd.f32 %v3974_v18, %v3973_v4  ;;  %v3976_v55 = vpop.f32.mrb[18].mxu1  ;;  %v4355_v47 = vld [vmem:[%s6925_s6 + $0x10] sm:$0xff] (!%p3858_p0)  }
 0x34c   : > { %2716 = vst.msk [vmem:[#allocation4 + $0x40] sm:$0xff] %vm2707_vm3, %v2683_v23  ;;  %v2684_v8 = vadd.f32 %v3930_v38, %v2331_v61  ;;  %v3977_v25 = vpop.f32.mrb[19].mxu1  ;;  %v2351_v23 = vmul.f32 %v6443_v0, %v2159_v10  ;;  %v2831_v10 = vld [vmem:[#allocation3 + $0xb8] sm:$0xff] (!%p3858_p0) }
 0x34d   : > { %v2699_v37 = vadd.f32 %v3975_v50, %v2346_v13  ;;  %v3978_v27 = vadd.f32 %v3977_v25, %v3976_v55  ;;  %v2336_v13 = vmul.f32 %v6393_v57, %v2144_v24  ;;  %v2160_v55 = vld [vmem:[#allocation4 + $0xf0] sm:$0xff]  ;;  %v2816_v24 = vld [vmem:[#allocation3 + $0x40] sm:$0xff] (!%p3858_p0) }
 0x34e   : > { %2717 = vst.msk [vmem:[#allocation4 + $0x48] sm:$0xff] %vm2707_vm3, %v2684_v8  ;;  %v3931_v44 = vpop.f32.mrb[20].mxu0 }
 0x34f   : > { %v3932_v53 = vpop.f32.mrb[21].mxu0  ;;  %2732 = vst.msk [vmem:[#allocation4 + $0xc0] sm:$0xff] %vm2707_vm3, %v2699_v37  ;;  %v2700_v15 = vadd.f32 %v3978_v27, %v2347_v14  ;;  %v2337_v14 = vmul.f32 %v6415_v41, %v2145_v21  ;;  %v2819_v21 = vld [vmem:[#allocation3 + $0x58] sm:$0xff] (!%p3858_p0) }
 0x350   : > { %v3933_v45 = vadd.f32 %v3932_v53, %v3931_v44  ;;  %v3934_v28 = vpop.f32.mrb[22].mxu0  ;;  %v2161_v44 = vld [vmem:[#allocation4 + $0xf8] sm:$0xff] }
 0x351   : > { %v3935_v16 = vpop.f32.mrb[23].mxu0  ;;  %2733 = vst.msk [vmem:[#allocation4 + $0xc8] sm:$0xff] %vm2707_vm3, %v2700_v15  ;;  %v3979_v2 = vpop.f32.mrb[20].mxu1  ;;  %v2353_v32 = vmul.f32 %v2320_v36, %v2161_v44  ;;  %v2836_v36 = vld [vmem:[#allocation3 + $0xe0] sm:$0xff] (!%p3858_p0) }
 0x352   : > { %v2685_v63 = vadd.f32 %v3933_v45, %v2332_v7  ;;  %v3936_v26 = vadd.f32 %v3935_v16, %v3934_v28  ;;  %v3980_v51 = vpop.f32.mrb[21].mxu1  ;;  %v2352_v7 = vmul.f32 %v2315_v17, %v2160_v55  ;;  %v2834_v55 = vld [vmem:[#allocation3 + $0xd0] sm:$0xff] (!%p3858_p0) }
 0x353   : > { %v3981_v33 = vadd.f32 %v3980_v51, %v3979_v2  ;;  %v3982_v29 = vpop.f32.mrb[22].mxu1  ;;  %v2825_v2 = vld [vmem:[#allocation3 + $0x88] sm:$0xff] (!%p3858_p0) }
 0x354   : > { %2718 = vst.msk [vmem:[#allocation4 + $0x50] sm:$0xff] %vm2707_vm3, %v2685_v63  ;;  %v2686_v59 = vadd.f32 %v3936_v26, %v2333_v20  ;;  %v3983_v42 = vpop.f32.mrb[23].mxu1  ;;  %v2824_v63 = vld [vmem:[#allocation3 + $0x80] sm:$0xff] (!%p3858_p0)  ;;  %v2809_v51 = vld [vmem:[#allocation3 + $0x8] sm:$0xff] (!%p3858_p0) }
 0x355   : > { %v2701_v46 = vadd.f32 %v3981_v33, %v2348_v39  ;;  %v3984_v49 = vadd.f32 %v3983_v42, %v3982_v29  ;;  %v2808_v26 = vld [vmem:[#allocation3] sm:$0xff] (!%p3858_p0)  ;;  %4357 = vrcp.f32 (!%p3858_p0), %v2824_v63  ;;  %v2811_v39 = vld [vmem:[#allocation3 + $0x18] sm:$0xff] (!%p3858_p0)  ;;  %v2826_v29 = vld [vmem:[#allocation3 + $0x90] sm:$0xff] (!%p3858_p0) }
 0x356   : > { %2719 = vst.msk [vmem:[#allocation4 + $0x58] sm:$0xff] %vm2707_vm3, %v2686_v59  ;;  %v3937_v5 = vpop.f32.mrb[24].mxu0  ;;  %4359 = vrcp.f32 (!%p3858_p0), %v2808_v26  ;;  %v2810_v59 = vld [vmem:[#allocation3 + $0x10] sm:$0xff] (!%p3858_p0)  ;;  %v2827_v33 = vld [vmem:[#allocation3 + $0x98] sm:$0xff] (!%p3858_p0)  ;;  %v2813_v42 = vld [vmem:[#allocation3 + $0x28] sm:$0xff] (!%p3858_p0) }
 0x357   : > { %v3938_v22 = vpop.f32.mrb[25].mxu0  ;;  %2734 = vst.msk [vmem:[#allocation4 + $0xd0] sm:$0xff] %vm2707_vm3, %v2701_v46  ;;  %v2702_v3 = vadd.f32 %v3984_v49, %v2349_v6  ;;  %4361 = vrcp.f32 (!%p3858_p0), %v2825_v2  ;;  %v2812_v46 = vld [vmem:[#allocation3 + $0x20] sm:$0xff] (!%p3858_p0) }
 0x358   : > { %v3939_v48 = vadd.f32 %v3938_v22, %v3937_v5  ;;  %v3940_v40 = vpop.f32.mrb[26].mxu0  ;;  %4363 = vrcp.f32 (!%p3858_p0), %v2809_v51  ;;  %v4353_v49 = vld [vmem:[%s6925_s6] sm:$0xff] (!%p3858_p0)   ;;  %v4354_v22 = vld [vmem:[%s6925_s6 + $0x8] sm:$0xff] (!%p3858_p0)  }
 0x359   : > { %v3941_v56 = vpop.f32.mrb[27].mxu0  ;;  %2735 = vst.msk [vmem:[#allocation4 + $0xd8] sm:$0xff] %vm2707_vm3, %v2702_v3  ;;  %4365 = vrcp.f32 (!%p3858_p0), %v2811_v39  ;;  %4017 = vmatprep.subr.bf16.mxu0 (!%p3858_p0), %v4353_v49  ;;  %4073 = vmatprep.subr.bf16.mxu1 (!%p3858_p0), %v4353_v49  ;;  %v2792_v39 = vld [vmem:[#allocation4 + $0x80] sm:$0xff] (!%p3858_p0) }
 0x35a   : > { %v2687_v34 = vadd.f32 %v3939_v48, %v2334_v54  ;;  %v3942_v12 = vadd.f32 %v3941_v56, %v3940_v40  ;;  %v3985_v52 = vpop.f32.mrb[24].mxu1  ;;  %4367 = vrcp.f32 (!%p3858_p0), %v2810_v59  ;;  %4018 = vmatpush3.bf16.msra.mxu0 (!%p3858_p0), %v4353_v49  ;;  %4077 = vmatpush3.bf16.msra.mxu1 (!%p3858_p0), %v4353_v49  ;;  %v2829_v54 = vld [vmem:[#allocation3 + $0xa8] sm:$0xff] (!%p3858_p0)  ;;  %v2828_v48 = vld [vmem:[#allocation3 + $0xa0] sm:$0xff] (!%p3858_p0)  ;;  %v2815_v56 = vld [vmem:[#allocation3 + $0x38] sm:$0xff] (!%p3858_p0) }
 0x35b   : > { %v3986_v62 = vpop.f32.mrb[25].mxu1  ;;  %4369 = vrcp.f32 (!%p3858_p0), %v2827_v33  ;;  %4019 = vmatprep.subr.bf16.mxu0 (!%p3858_p0), %v4354_v22  ;;  %4074 = vmatprep.subr.bf16.mxu1 (!%p3858_p0), %v4354_v22  ;;  %v2776_v59 = vld [vmem:[#allocation4] sm:$0xff] (!%p3858_p0) }
 0x35c   : > { %2720 = vst.msk [vmem:[#allocation4 + $0x60] sm:$0xff] %vm2707_vm3, %v2687_v34  ;;  %v2688_v31 = vadd.f32 %v3942_v12, %v2335_v9  ;;  %v3987_v43 = vadd.f32 %v3986_v62, %v3985_v52  ;;  %v3988_v30 = vpop.f32.mrb[26].mxu1  ;;  %4371 = vrcp.f32 (!%p3858_p0), %v2826_v29  ;;  %v2814_v34 = vld [vmem:[#allocation3 + $0x30] sm:$0xff] (!%p3858_p0)  ;;  %v4356_v52 = vld [vmem:[%s6925_s6 + $0x18] sm:$0xff] (!%p3858_p0)   ;;  %v6582_v33 = vld [vmem:[%s6924_s5] ss:$0 sm:$0xff] (!%p3858_p0) }
 0x35d   : > { %v3989_v61 = vpop.f32.mrb[27].mxu1  ;;  %4373 = vrcp.f32 (!%p3858_p0), %v2813_v42  ;;  %v3119_v49 = vld [vmem:[%s4742_s23 + $0x80] sm:$0xff] (!%p3858_p0) }
 0x35e   : > { %2721 = vst.msk [vmem:[#allocation4 + $0x68] sm:$0xff] %vm2707_vm3, %v2688_v31  ;;  %v2703_v19 = vadd.f32 %v3987_v43, %v2350_v60  ;;  %v3990_v38 = vadd.f32 %v3989_v61, %v3988_v30  ;;  %v3943_v4 = vpop.f32.mrb[28].mxu0  ;;  %4375 = vrcp.f32 (!%p3858_p0), %v2812_v46  ;;  %4020 = vmatpush3.bf16.msra.mxu0 (!%p3858_p0), %v4354_v22  ;;  %4078 = vmatpush3.bf16.msra.mxu1 (!%p3858_p0), %v4354_v22  ;;  %v2830_v60 = vld [vmem:[#allocation3 + $0xb0] sm:$0xff] (!%p3858_p0)  ;;  %v2817_v43 = vld [vmem:[#allocation3 + $0x48] sm:$0xff] (!%p3858_p0)  ;;  %v3103_v22 = vld [vmem:[%s4742_s23] sm:$0xff] (!%p3858_p0) }
 0x35f   : > { %v3944_v18 = vpop.f32.mrb[29].mxu0  ;;  %v4358_v58 = vpop.eup (!%p3858_p0), %4357  ;;  %4377 = vrcp.f32 (!%p3858_p0), %v2829_v54  ;;  %4021 = vmatprep.subr.bf16.mxu0 (!%p3858_p0), %v4355_v47  ;;  %4075 = vmatprep.subr.bf16.mxu1 (!%p3858_p0), %v4355_v47  ;;  %v2793_v46 = vld [vmem:[#allocation4 + $0x88] sm:$0xff] (!%p3858_p0) }
 0x360   : > { %2736 = vst.msk [vmem:[#allocation4 + $0xe0] sm:$0xff] %vm2707_vm3, %v2703_v19  ;;  %v2704_v1 = vadd.f32 %v3990_v38, %v2351_v23  ;;  %v3945_v8 = vadd.f32 %v3944_v18, %v3943_v4  ;;  %v3946_v50 = vpop.f32.mrb[30].mxu0  ;;  %v4360_v6 = vpop.eup (!%p3858_p0), %4359  ;;  %2954 = vperm.xlu1 (!%p3858_p0), %4352, %v4358_v58   ;;  %4379 = vrcp.f32 (!%p3858_p0), %v2828_v48  ;;  %v2833_v23 = vld [vmem:[#allocation3 + $0xc8] sm:$0xff] (!%p3858_p0)  ;;  %v2832_v38 = vld [vmem:[#allocation3 + $0xc0] sm:$0xff] (!%p3858_p0) }
 0x361   : > { %v3947_v25 = vpop.f32.mrb[31].mxu0  ;;  %v4362_v5 = vpop.eup (!%p3858_p0), %4361  ;;  %2874 = vperm.xlu0 (!%p3858_p0), %4351, %v4360_v6   ;;  %4381 = vrcp.f32 (!%p3858_p0), %v2815_v56 }
 0x362   : > { %2737 = vst.msk [vmem:[#allocation4 + $0xe8] sm:$0xff] %vm2707_vm3, %v2704_v1  ;;  %v2689_v0 = vadd.f32 %v3945_v8, %v2336_v13  ;;  %v3948_v37 = vadd.f32 %v3947_v25, %v3946_v50  ;;  %v3991_v27 = vpop.f32.mrb[28].mxu1  ;;  %v4364_v11 = vpop.eup (!%p3858_p0), %4363  ;;  %4022 = vmatpush3.bf16.msra.mxu0 (!%p3858_p0), %v4355_v47  ;;  %4079 = vmatpush3.bf16.msra.mxu1 (!%p3858_p0), %v4355_v47  ;;  %4383 = vrcp.f32 (!%p3858_p0), %v2814_v34  ;;  %v2818_v13 = vld [vmem:[#allocation3 + $0x50] sm:$0xff] (!%p3858_p0)  ;;  %v2835_v8 = vld [vmem:[#allocation3 + $0xd8] sm:$0xff] (!%p3858_p0)  ;;  %v2821_v25 = vld [vmem:[#allocation3 + $0x68] sm:$0xff] (!%p3858_p0) }
 0x363   : > { %v3992_v53 = vpop.f32.mrb[29].mxu1  ;;  %v4366_v3 = vpop.eup (!%p3858_p0), %4365  ;;  %4023 = vmatprep.subr.bf16.mxu0 (!%p3858_p0), %v4356_v52  ;;  %4076 = vmatprep.subr.bf16.mxu1 (!%p3858_p0), %v4356_v52  ;;  %4385 = vrcp.f32 (!%p3858_p0), %v2831_v10  ;;  %v2778_v10 = vld [vmem:[#allocation4 + $0x10] sm:$0xff] (!%p3858_p0) }
 0x364   : > { %2722 = vst.msk [vmem:[#allocation4 + $0x70] sm:$0xff] %vm2707_vm3, %v2689_v0  ;;  %v2690_v57 = vadd.f32 %v3948_v37, %v2337_v14  ;;  %v3993_v15 = vadd.f32 %v3992_v53, %v3991_v27  ;;  %v3994_v45 = vpop.f32.mrb[30].mxu1  ;;  %2775 = sbr.rel (%p3858_p0) target bundleno = 1444 (0x5a4), region = 102  ;;  %2959 = vperm.xlu1 (!%p3858_p0), %4352, %v4362_v5   ;;  %v4368_v40 = vpop.eup (!%p3858_p0), %4367  ;;  %4387 = vrcp.f32 (!%p3858_p0), %v2830_v60  ;;  %v2820_v0 = vld [vmem:[#allocation3 + $0x60] sm:$0xff] (!%p3858_p0)  ;;  %v2837_v27 = vld [vmem:[#allocation3 + $0xe8] sm:$0xff] (!%p3858_p0) }
 0x365   : > { %v3995_v28 = vpop.f32.mrb[31].mxu1  ;;  %2879 = vperm.xlu0 (!%p3858_p0), %4351, %v4364_v11   ;;  %v4370_v9 = vpop.eup (!%p3858_p0), %4369  ;;  %4389 = vrcp.f32 (!%p3858_p0), %v2817_v43  ;;  %v2777_v11 = vld [vmem:[#allocation4 + $0x8] sm:$0xff] (!%p3858_p0) }
 0x366   : > { %2723 = vst.msk [vmem:[#allocation4 + $0x78] sm:$0xff] %vm2707_vm3, %v2690_v57  ;;  %v2705_v16 = vadd.f32 %v3993_v15, %v2352_v7  ;;  %v3996_v41 = vadd.f32 %v3995_v28, %v3994_v45  ;;  %v4372_v12 = vpop.eup (!%p3858_p0), %4371  ;;  %4024 = vmatpush3.bf16.msra.mxu0 (!%p3858_p0), %v4356_v52  ;;  %4080 = vmatpush3.bf16.msra.mxu1 (!%p3858_p0), %v4356_v52  ;;  %4391 = vrcp.f32 (!%p3858_p0), %v2816_v24  ;;  %v2823_v7 = vld [vmem:[#allocation3 + $0x78] sm:$0xff] (!%p3858_p0)  ;;  %v2822_v15 = vld [vmem:[#allocation3 + $0x70] sm:$0xff] (!%p3858_p0) }
 0x367   : > { %v4374_v62 = vpop.eup (!%p3858_p0), %4373  ;;  %4393 = vrcp.f32 (!%p3858_p0), %v2833_v23  ;;  %v2839_v28 = vld [vmem:[#allocation3 + $0xf8] sm:$0xff] (!%p3858_p0) }
 0x368   : > { %2738 = vst.msk [vmem:[#allocation4 + $0xf0] sm:$0xff] %vm2707_vm3, %v2705_v16  ;;  %v2706_v20 = vadd.f32 %v3996_v41, %v2353_v32  ;;  %2889 = vperm.xlu1 (!%p3858_p0), %4352, %v4366_v3   ;;  %v4376_v31 = vpop.eup (!%p3858_p0), %4375  ;;  %4395 = vrcp.f32 (!%p3858_p0), %v2832_v38  ;;  %v2838_v16 = vld [vmem:[#allocation3 + $0xf0] sm:$0xff] (!%p3858_p0) }
 0x369   : > { %2884 = vperm.xlu0 (!%p3858_p0), %4351, %v4368_v40   ;;  %v4378_v30 = vpop.eup (!%p3858_p0), %4377  ;;  %4397 = vrcp.f32 (!%p3858_p0), %v2819_v21  ;;  %v3105_v21 = vld [vmem:[%s4742_s23 + $0x10] sm:$0xff] (!%p3858_p0) }
 0x36a   : > { %2739 = vst.msk [vmem:[#allocation4 + $0xf8] sm:$0xff] %vm2707_vm3, %v2706_v20  ;;  %v4380_v61 = vpop.eup (!%p3858_p0), %4379  ;;  %4399 = vrcp.f32 (!%p3858_p0), %v2818_v13 }
 0x36b   : > { %v4382_v19 = vpop.eup %4381  ;;  %4401 = vrcp.f32 %v2835_v8 }
 0x36c   : > { %2969 = vperm.xlu1 %4352, %v4370_v9   ;;  %v4384_v4 = vpop.eup %4383  ;;  %4403 = vrcp.f32 %v2834_v55  ;;  %v2779_v9 = vld [vmem:[#allocation4 + $0x18] sm:$0xff] }
 0x36d   : > { %2964 = vperm.xlu0 %4351, %v4372_v12   ;;  %v4386_v18 = vpop.eup %4385  ;;  %4405 = vrcp.f32 %v2821_v25  ;;  %v3120_v12 = vld [vmem:[%s4742_s23 + $0x88] sm:$0xff] }
 0x36e   : > { %v4388_v1 = vpop.eup %4387  ;;  %4407 = vrcp.f32 %v2820_v0  ;;  %v3122_v0 = vld [vmem:[%s4742_s23 + $0x98] sm:$0xff] }
 0x36f   : > { %v4390_v50 = vpop.eup %4389  ;;  %4409 = vrcp.f32 %v2837_v27  ;;  %v2781_v27 = vld [vmem:[#allocation4 + $0x28] sm:$0xff] }
 0x370   : > { %2899 = vperm.xlu1 %4352, %v4374_v62   ;;  %v4392_v17 = vpop.eup %4391  ;;  %4411 = vrcp.f32 %v2836_v36  ;;  %v3104_v62 = vld [vmem:[%s4742_s23 + $0x8] sm:$0xff]  ;;  %v3121_v36 = vld [vmem:[%s4742_s23 + $0x90] sm:$0xff] }
 0x371   : > { %2894 = vperm.xlu0 %4351, %v4376_v31   ;;  %v4394_v14 = vpop.eup %4393  ;;  %4413 = vrcp.f32 %v2823_v7 }
 0x372   : > { %v4396_v37 = vpop.eup %4395  ;;  %4415 = vrcp.f32 %v2822_v15 }
 0x373   : > { %v4398_v44 = vpop.eup %4397  ;;  %4417 = vrcp.f32 %v2839_v28 }
 0x374   : > { %2979 = vperm.xlu1 %4352, %v4378_v30   ;;  %v4400_v53 = vpop.eup %4399  ;;  %4419 = vrcp.f32 %v2838_v16 }
 0x375   : > { %2974 = vperm.xlu0 %4351, %v4380_v61   ;;  %v4402_v57 = vpop.eup %4401  ;;  %v3106_v61 = vld [vmem:[%s4742_s23 + $0x18] sm:$0xff] }
 0x376   : > { %v4404_v45 = vpop.eup %4403 }
 0x377   : > { %v4406_v32 = vpop.eup %4405 }
 0x378   : > { %2909 = vperm.xlu1 %4352, %v4382_v19   ;;  %v4408_v41 = vpop.eup %4407  ;;  %v2795_v19 = vld [vmem:[#allocation4 + $0x98] sm:$0xff] }
 0x379   : > { %2904 = vperm.xlu0 %4351, %v4384_v4   ;;  %v4410_v20 = vpop.eup %4409 }
 0x37a   : > { %v4412_v63 = vpop.eup %4411 }
 0x37b   : > { %v4414_v26 = vpop.eup %4413 }
 0x37c   : > { %2989 = vperm.xlu1 %4352, %v4386_v18   ;;  %v4416_v2 = vpop.eup %4415  ;;  %v2794_v18 = vld [vmem:[#allocation4 + $0x90] sm:$0xff] }
 0x37d   : > { %2984 = vperm.xlu0 %4351, %v4388_v1   ;;  %v4418_v35 = vpop.eup %4417 }
 0x37e   : > { %v4420_v51 = vpop.eup %4419 }
 0x380   : > { %2919 = vperm.xlu1 %4352, %v4390_v50  }
 0x381   : > { %2914 = vperm.xlu0 %4351, %v4392_v17  }
 0x384   : > { %2999 = vperm.xlu1 %4352, %v4394_v14  }
 0x385   : > { %2994 = vperm.xlu0 %4351, %v4396_v37  }
 0x388   : > { %2929 = vperm.xlu1 %4352, %v4398_v44  }
 0x389   : > { %2924 = vperm.xlu0 %4351, %v4400_v53   ;;  %v2780_v53 = vld [vmem:[#allocation4 + $0x20] sm:$0xff] }
 0x38c   : > { %3009 = vperm.xlu1 %4352, %v4402_v57  }
 0x38d   : > { %3004 = vperm.xlu0 %4351, %v4404_v45  }
 0x390   : > { %2939 = vperm.xlu1 %4352, %v4406_v32  }
 0x391   : > { %2934 = vperm.xlu0 %4351, %v4408_v41   ;;  %v3108_v41 = vld [vmem:[%s4742_s23 + $0x28] sm:$0xff] }
 0x394   : > { %3019 = vperm.xlu1 %4352, %v4410_v20  }
 0x395   : > { %3014 = vperm.xlu0 %4351, %v4412_v63   ;;  %v2797_v63 = vld [vmem:[#allocation4 + $0xa8] sm:$0xff] }
 0x398   : > { %2949 = vperm.xlu1 %4352, %v4414_v26  }
 0x399   : > { %2944 = vperm.xlu0 %4351, %v4416_v2   ;;  %v3107_v2 = vld [vmem:[%s4742_s23 + $0x20] sm:$0xff] }
 0x39c   : > { %3029 = vperm.xlu1 %4352, %v4418_v35   ;;  %v2796_v35 = vld [vmem:[#allocation4 + $0xa0] sm:$0xff] }
 0x39d   : > { %3024 = vperm.xlu0 %4351, %v4420_v51  }
 0x3df   : > { %v2955_v29 = vpop.permute.xlu1 %2954 }
 0x3e0   : > { %v3048_v58 = vmul.f32 %v2955_v29, %v2792_v39  ;;  %v2875_v42 = vpop.permute.xlu0 %2874 }
 0x3e1   : > { %v3032_v6 = vmul.f32 %v2875_v42, %v2776_v59 }
 0x3e2   : > { %v3087_v5 = vadd.f32 %v6582_v33, %v3048_v58 }
 0x3e3   : > { %v3071_v54 = vadd.f32 %v6582_v33, %v3032_v6  ;;  %v2960_v3 = vpop.permute.xlu1 %2959 }
 0x3e4   : > { %v3049_v48 = vmul.f32 %v2960_v3, %v2793_v46  ;;  %v2880_v40 = vpop.permute.xlu0 %2879  ;;  %v3151_v47 = vadd.f32 %v3119_v49, %v3087_v5  ;;  %v3124_v46 = vld [vmem:[%s4742_s23 + $0xa8] sm:$0xff]  ;;  %v2783_v5 = vld [vmem:[#allocation4 + $0x38] sm:$0xff] }
 0x3e5   : > { %v3033_v56 = vmul.f32 %v2880_v40, %v2777_v11  ;;  %v3135_v34 = vadd.f32 %v3103_v22, %v3071_v54  ;;  %v3123_v22 = vld [vmem:[%s4742_s23 + $0xa0] sm:$0xff]  ;;  %v2782_v54 = vld [vmem:[#allocation4 + $0x30] sm:$0xff] }
 0x3e6   : > { %v3088_v52 = vadd.f32 %v6582_v33, %v3049_v48  ;;  %3183 = vst.msk [vmem:[%s4753_s18 + $0x80] sm:$0xff] %vm2707_vm3, %v3151_v47 }
 0x3e7   : > { %v3072_v60 = vadd.f32 %v6582_v33, %v3033_v56  ;;  %v2890_v31 = vpop.permute.xlu1 %2889  ;;  %3167 = vst.msk [vmem:[%s4753_s18] sm:$0xff] %vm2707_vm3, %v3135_v34 }
 0x3e8   : > { %v3035_v43 = vmul.f32 %v2890_v31, %v2779_v9  ;;  %v2885_v30 = vpop.permute.xlu0 %2884  ;;  %v3152_v24 = vadd.f32 %v3120_v12, %v3088_v52  ;;  %v3110_v12 = vld [vmem:[%s4742_s23 + $0x38] sm:$0xff]  ;;  %v2798_v31 = vld [vmem:[#allocation4 + $0xb0] sm:$0xff] }
 0x3e9   : > { %v3034_v23 = vmul.f32 %v2885_v30, %v2778_v10  ;;  %v3136_v38 = vadd.f32 %v3104_v62, %v3072_v60  ;;  %v2799_v10 = vld [vmem:[#allocation4 + $0xb8] sm:$0xff]  ;;  %v3109_v60 = vld [vmem:[%s4742_s23 + $0x30] sm:$0xff] }
 0x3ea   : > { %v3074_v4 = vadd.f32 %v6582_v33, %v3035_v43  ;;  %3184 = vst.msk [vmem:[%s4753_s18 + $0x88] sm:$0xff] %vm2707_vm3, %v3152_v24  ;;  %v3207_v13 = vpack.c.bf16 %v3152_v24, %v3151_v47 }
 0x3eb   : > { %v3073_v1 = vadd.f32 %v6582_v33, %v3034_v23  ;;  %v2970_v8 = vpop.permute.xlu1 %2969  ;;  %3168 = vst.msk [vmem:[%s4753_s18 + $0x8] sm:$0xff] %vm2707_vm3, %v3136_v38  ;;  %v3199_v50 = vpack.c.bf16 %v3136_v38, %v3135_v34 }
 0x3ec   : > { %v3138_v55 = vadd.f32 %v3106_v61, %v3074_v4  ;;  %v3051_v17 = vmul.f32 %v2970_v8, %v2795_v19  ;;  %v2965_v25 = vpop.permute.xlu0 %2964  ;;  %4041 = vmatprep.mubr.msk.bf16.mxu1 %vm2707_vm3, %v3207_v13  ;;  %v3126_v4 = vld [vmem:[%s4742_s23 + $0xb8] sm:$0xff]  ;;  %v2784_v8 = vld [vmem:[#allocation4 + $0x40] sm:$0xff] }
 0x3ed   : > { %v3137_v14 = vadd.f32 %v3105_v21, %v3073_v1  ;;  %v3050_v37 = vmul.f32 %v2965_v25, %v2794_v18  ;;  %4025 = vmatprep.mubr.msk.bf16.mxu0 %vm2707_vm3, %v3199_v50  ;;  %v2785_v18 = vld [vmem:[#allocation4 + $0x48] sm:$0xff]  ;;  %v3125_v1 = vld [vmem:[%s4742_s23 + $0xb0] sm:$0xff] }
 0x3ee   : > { %3170 = vst.msk [vmem:[%s4753_s18 + $0x18] sm:$0xff] %vm2707_vm3, %v3138_v55  ;;  %v3090_v44 = vadd.f32 %v6582_v33, %v3051_v17 }
 0x3ef   : > { %3169 = vst.msk [vmem:[%s4753_s18 + $0x10] sm:$0xff] %vm2707_vm3, %v3137_v14  ;;  %v3089_v7 = vadd.f32 %v6582_v33, %v3050_v37  ;;  %v2900_v57 = vpop.permute.xlu1 %2899  ;;  %v3200_v15 = vpack.c.bf16 %v3138_v55, %v3137_v14 }
 0x3f0   : > { %v3154_v45 = vadd.f32 %v3122_v0, %v3090_v44  ;;  %v3037_v28 = vmul.f32 %v2900_v57, %v2781_v27  ;;  %v2895_v32 = vpop.permute.xlu0 %2894  ;;  %v3112_v27 = vld [vmem:[%s4742_s23 + $0x48] sm:$0xff]  ;;  %v2800_v57 = vld [vmem:[#allocation4 + $0xc0] sm:$0xff] }
 0x3f1   : > { %v3153_v16 = vadd.f32 %v3121_v36, %v3089_v7  ;;  %v3036_v20 = vmul.f32 %v2895_v32, %v2780_v53  ;;  %4026 = vmatmul.mubr.msk.bf16.vlgmr.msra.gmra.mrb[0].mxu0 %vm2707_vm3, %v3200_v15  ;;  %v2801_v36 = vld [vmem:[#allocation4 + $0xc8] sm:$0xff]  ;;  %v3111_v7 = vld [vmem:[%s4742_s23 + $0x40] sm:$0xff] }
 0x3f2   : > { %3186 = vst.msk [vmem:[%s4753_s18 + $0x98] sm:$0xff] %vm2707_vm3, %v3154_v45  ;;  %v3076_v26 = vadd.f32 %v6582_v33, %v3037_v28 }
 0x3f3   : > { %3185 = vst.msk [vmem:[%s4753_s18 + $0x90] sm:$0xff] %vm2707_vm3, %v3153_v16  ;;  %v3075_v51 = vadd.f32 %v6582_v33, %v3036_v20  ;;  %v2980_v39 = vpop.permute.xlu1 %2979  ;;  %v3208_v59 = vpack.c.bf16 %v3154_v45, %v3153_v16 }
 0x3f4   : > { %v3140_v29 = vadd.f32 %v3108_v41, %v3076_v26  ;;  %v3053_v58 = vmul.f32 %v2980_v39, %v2797_v63  ;;  %v2975_v42 = vpop.permute.xlu0 %2974  ;;  %v3128_v63 = vld [vmem:[%s4742_s23 + $0xc8] sm:$0xff]  ;;  %v2786_v39 = vld [vmem:[#allocation4 + $0x50] sm:$0xff] }
 0x3f5   : > { %v3139_v6 = vadd.f32 %v3107_v2, %v3075_v51  ;;  %v3052_v49 = vmul.f32 %v2975_v42, %v2796_v35  ;;  %4042 = vmatmul.mubr.msk.bf16.vlgmr.msra.gmra.mrb[0].mxu1 %vm2707_vm3, %v3208_v59  ;;  %v2787_v2 = vld [vmem:[#allocation4 + $0x58] sm:$0xff]  ;;  %v3127_v51 = vld [vmem:[%s4742_s23 + $0xc0] sm:$0xff] }
 0x3f6   : > { %3172 = vst.msk [vmem:[%s4753_s18 + $0x28] sm:$0xff] %vm2707_vm3, %v3140_v29  ;;  %v3092_v11 = vadd.f32 %v6582_v33, %v3053_v58 }
 0x3f7   : > { %3171 = vst.msk [vmem:[%s4753_s18 + $0x20] sm:$0xff] %vm2707_vm3, %v3139_v6  ;;  %v3091_v3 = vadd.f32 %v6582_v33, %v3052_v49  ;;  %v2910_v48 = vpop.permute.xlu1 %2909  ;;  %v3201_v40 = vpack.c.bf16 %v3140_v29, %v3139_v6 }
 0x3f8   : > { %v3156_v47 = vadd.f32 %v3124_v46, %v3092_v11  ;;  %v3039_v56 = vmul.f32 %v2910_v48, %v2783_v5  ;;  %v2905_v9 = vpop.permute.xlu0 %2904  ;;  %v3114_v5 = vld [vmem:[%s4742_s23 + $0x58] sm:$0xff]  ;;  %v2802_v48 = vld [vmem:[#allocation4 + $0xd0] sm:$0xff] }
 0x3f9   : > { %v3155_v34 = vadd.f32 %v3123_v22, %v3091_v3  ;;  %v3038_v52 = vmul.f32 %v2905_v9, %v2782_v54  ;;  %4029 = vmatprep.mubr.msk.bf16.mxu0 %vm2707_vm3, %v3201_v40  ;;  %v2803_v22 = vld [vmem:[#allocation4 + $0xd8] sm:$0xff]  ;;  %v3113_v3 = vld [vmem:[%s4742_s23 + $0x50] sm:$0xff] }
 0x3fa   : > { %3188 = vst.msk [vmem:[%s4753_s18 + $0xa8] sm:$0xff] %vm2707_vm3, %v3156_v47  ;;  %v3078_v62 = vadd.f32 %v6582_v33, %v3039_v56 }
 0x3fb   : > { %3187 = vst.msk [vmem:[%s4753_s18 + $0xa0] sm:$0xff] %vm2707_vm3, %v3155_v34  ;;  %v3077_v43 = vadd.f32 %v6582_v33, %v3038_v52  ;;  %v2990_v30 = vpop.permute.xlu1 %2989  ;;  %v3209_v24 = vpack.c.bf16 %v3156_v47, %v3155_v34 }
 0x3fc   : > { %v3142_v61 = vadd.f32 %v3110_v12, %v3078_v62  ;;  %v3055_v23 = vmul.f32 %v2990_v30, %v2799_v10  ;;  %v2985_v19 = vpop.permute.xlu0 %2984  ;;  %v3130_v10 = vld [vmem:[%s4742_s23 + $0xd8] sm:$0xff]  ;;  %v2788_v30 = vld [vmem:[#allocation4 + $0x60] sm:$0xff] }
 0x3fd   : > { %v3141_v38 = vadd.f32 %v3109_v60, %v3077_v43  ;;  %v3054_v21 = vmul.f32 %v2985_v19, %v2798_v31  ;;  %4045 = vmatprep.mubr.msk.bf16.mxu1 %vm2707_vm3, %v3209_v24  ;;  %v2789_v60 = vld [vmem:[#allocation4 + $0x68] sm:$0xff]  ;;  %v3129_v43 = vld [vmem:[%s4742_s23 + $0xd0] sm:$0xff] }
 0x3fe   : > { %3174 = vst.msk [vmem:[%s4753_s18 + $0x38] sm:$0xff] %vm2707_vm3, %v3142_v61  ;;  %v3094_v13 = vadd.f32 %v6582_v33, %v3055_v23 }
 0x3ff   : > { %3173 = vst.msk [vmem:[%s4753_s18 + $0x30] sm:$0xff] %vm2707_vm3, %v3141_v38  ;;  %v3093_v50 = vadd.f32 %v6582_v33, %v3054_v21  ;;  %v2920_v55 = vpop.permute.xlu1 %2919  ;;  %v3202_v17 = vpack.c.bf16 %v3142_v61, %v3141_v38 }
 0x400   : > { %v3158_v25 = vadd.f32 %v3126_v4, %v3094_v13  ;;  %v3041_v14 = vmul.f32 %v2920_v55, %v2785_v18  ;;  %v2915_v0 = vpop.permute.xlu0 %2914  ;;  %v3116_v18 = vld [vmem:[%s4742_s23 + $0x68] sm:$0xff]  ;;  %v2804_v55 = vld [vmem:[#allocation4 + $0xe0] sm:$0xff] }
 0x401   : > { %v3157_v37 = vadd.f32 %v3125_v1, %v3093_v50  ;;  %v3040_v44 = vmul.f32 %v2915_v0, %v2784_v8  ;;  %4030 = vmatmul.mubr.msk.bf16.gmra.mrb[4].mxu0 %vm2707_vm3, %v3202_v17  ;;  %v2805_v1 = vld [vmem:[#allocation4 + $0xe8] sm:$0xff]  ;;  %v3115_v50 = vld [vmem:[%s4742_s23 + $0x60] sm:$0xff] }
 0x402   : > { %3190 = vst.msk [vmem:[%s4753_s18 + $0xb8] sm:$0xff] %vm2707_vm3, %v3158_v25  ;;  %v3080_v53 = vadd.f32 %v6582_v33, %v3041_v14 }
 0x403   : > { %3189 = vst.msk [vmem:[%s4753_s18 + $0xb0] sm:$0xff] %vm2707_vm3, %v3157_v37  ;;  %v3079_v15 = vadd.f32 %v6582_v33, %v3040_v44  ;;  %v3000_v45 = vpop.permute.xlu1 %2999  ;;  %v3210_v28 = vpack.c.bf16 %v3158_v25, %v3157_v37 }
 0x404   : > { %v3144_v32 = vadd.f32 %v3112_v27, %v3080_v53  ;;  %v3057_v16 = vmul.f32 %v3000_v45, %v2801_v36  ;;  %v2995_v41 = vpop.permute.xlu0 %2994  ;;  %v3132_v36 = vld [vmem:[%s4742_s23 + $0xe8] sm:$0xff]  ;;  %v2790_v45 = vld [vmem:[#allocation4 + $0x70] sm:$0xff] }
 0x405   : > { %v3143_v20 = vadd.f32 %v3111_v7, %v3079_v15  ;;  %v3056_v26 = vmul.f32 %v2995_v41, %v2800_v57  ;;  %4046 = vmatmul.mubr.msk.bf16.gmra.mrb[4].mxu1 %vm2707_vm3, %v3210_v28  ;;  %v2791_v7 = vld [vmem:[#allocation4 + $0x78] sm:$0xff]  ;;  %v3131_v15 = vld [vmem:[%s4742_s23 + $0xe0] sm:$0xff] }
 0x406   : > { %3176 = vst.msk [vmem:[%s4753_s18 + $0x48] sm:$0xff] %vm2707_vm3, %v3144_v32  ;;  %v3096_v35 = vadd.f32 %v6582_v33, %v3057_v16 }
 0x407   : > { %3175 = vst.msk [vmem:[%s4753_s18 + $0x40] sm:$0xff] %vm2707_vm3, %v3143_v20  ;;  %v3095_v59 = vadd.f32 %v6582_v33, %v3056_v26  ;;  %v2930_v29 = vpop.permute.xlu1 %2929  ;;  %v3203_v58 = vpack.c.bf16 %v3144_v32, %v3143_v20 }
 0x408   : > { %v3160_v42 = vadd.f32 %v3128_v63, %v3096_v35  ;;  %v3043_v6 = vmul.f32 %v2930_v29, %v2787_v2  ;;  %v2925_v46 = vpop.permute.xlu0 %2924  ;;  %v3118_v2 = vld [vmem:[%s4742_s23 + $0x78] sm:$0xff]  ;;  %v2806_v29 = vld [vmem:[#allocation4 + $0xf0] sm:$0xff] }
 0x409   : > { %v3159_v49 = vadd.f32 %v3127_v51, %v3095_v59  ;;  %v3042_v11 = vmul.f32 %v2925_v46, %v2786_v39  ;;  %4033 = vmatprep.mubr.msk.bf16.mxu0 %vm2707_vm3, %v3203_v58  ;;  %v2807_v51 = vld [vmem:[#allocation4 + $0xf8] sm:$0xff]  ;;  %v3117_v59 = vld [vmem:[%s4742_s23 + $0x70] sm:$0xff] }
 0x40a   : > { %3192 = vst.msk [vmem:[%s4753_s18 + $0xc8] sm:$0xff] %vm2707_vm3, %v3160_v42  ;;  %v3082_v54 = vadd.f32 %v6582_v33, %v3043_v6 }
 0x40b   : > { %3191 = vst.msk [vmem:[%s4753_s18 + $0xc0] sm:$0xff] %vm2707_vm3, %v3159_v49  ;;  %v3081_v40 = vadd.f32 %v6582_v33, %v3042_v11  ;;  %v3010_v47 = vpop.permute.xlu1 %3009  ;;  %v3211_v56 = vpack.c.bf16 %v3160_v42, %v3159_v49 }
 0x40c   : > { %v3146_v9 = vadd.f32 %v3114_v5, %v3082_v54  ;;  %v3059_v34 = vmul.f32 %v3010_v47, %v2803_v22  ;;  %v3005_v12 = vpop.permute.xlu0 %3004  ;;  %v3134_v22 = vld [vmem:[%s4742_s23 + $0xf8] sm:$0xff] }
 0x40d   : > { %v3145_v52 = vadd.f32 %v3113_v3, %v3081_v40  ;;  %v3058_v62 = vmul.f32 %v3005_v12, %v2802_v48  ;;  %4049 = vmatprep.mubr.msk.bf16.mxu1 %vm2707_vm3, %v3211_v56  ;;  %v3133_v48 = vld [vmem:[%s4742_s23 + $0xf0] sm:$0xff]  ;;  %v6731_v12 = vld [vmem:[%s6926_s7] ss:$0 sm:$0xff] }
 0x40e   : > { %3178 = vst.msk [vmem:[%s4753_s18 + $0x58] sm:$0xff] %vm2707_vm3, %v3146_v9  ;;  %v3098_v31 = vadd.f32 %v6582_v33, %v3059_v34 }
 0x40f   : > { %3177 = vst.msk [vmem:[%s4753_s18 + $0x50] sm:$0xff] %vm2707_vm3, %v3145_v52  ;;  %v3097_v24 = vadd.f32 %v6582_v33, %v3058_v62  ;;  %v2940_v61 = vpop.permute.xlu1 %2939  ;;  %v3204_v23 = vpack.c.bf16 %v3146_v9, %v3145_v52 }
 0x410   : > { %v3162_v19 = vadd.f32 %v3130_v10, %v3098_v31  ;;  %v3045_v38 = vmul.f32 %v2940_v61, %v2789_v60  ;;  %v2935_v4 = vpop.permute.xlu0 %2934 }
 0x411   : > { %v3161_v21 = vadd.f32 %v3129_v43, %v3097_v24  ;;  %v3044_v13 = vmul.f32 %v2935_v4, %v2788_v30  ;;  %4034 = vmatmul.mubr.msk.bf16.gmra.mrb[8].mxu0 %vm2707_vm3, %v3204_v23 }
 0x412   : > { %3194 = vst.msk [vmem:[%s4753_s18 + $0xd8] sm:$0xff] %vm2707_vm3, %v3162_v19  ;;  %v3084_v8 = vadd.f32 %v6582_v33, %v3045_v38 }
 0x413   : > { %3193 = vst.msk [vmem:[%s4753_s18 + $0xd0] sm:$0xff] %vm2707_vm3, %v3161_v21  ;;  %v3083_v17 = vadd.f32 %v6582_v33, %v3044_v13  ;;  %v3020_v25 = vpop.permute.xlu1 %3019  ;;  %v3212_v14 = vpack.c.bf16 %v3162_v19, %v3161_v21  ;;  %v6744_v13 = vld [vmem:[%s6927_s8] ss:$0 sm:$0xff] }
 0x414   : > { %v3148_v0 = vadd.f32 %v3116_v18, %v3084_v8  ;;  %v3061_v37 = vmul.f32 %v3020_v25, %v2805_v1  ;;  %v3015_v27 = vpop.permute.xlu0 %3014 }
 0x415   : > { %v3147_v44 = vadd.f32 %v3115_v50, %v3083_v17  ;;  %v3060_v53 = vmul.f32 %v3015_v27, %v2804_v55  ;;  %4050 = vmatmul.mubr.msk.bf16.gmra.mrb[8].mxu1 %vm2707_vm3, %v3212_v14 }
 0x416   : > { %3180 = vst.msk [vmem:[%s4753_s18 + $0x68] sm:$0xff] %vm2707_vm3, %v3148_v0  ;;  %v3100_v57 = vadd.f32 %v6582_v33, %v3061_v37 }
 0x417   : > { %3179 = vst.msk [vmem:[%s4753_s18 + $0x60] sm:$0xff] %vm2707_vm3, %v3147_v44  ;;  %v3099_v28 = vadd.f32 %v6582_v33, %v3060_v53  ;;  %v2950_v32 = vpop.permute.xlu1 %2949  ;;  %v3205_v16 = vpack.c.bf16 %v3148_v0, %v3147_v44 }
 0x418   : > { %v3164_v41 = vadd.f32 %v3132_v36, %v3100_v57  ;;  %v3047_v20 = vmul.f32 %v2950_v32, %v2791_v7  ;;  %v2945_v63 = vpop.permute.xlu0 %2944 }
 0x419   : > { %v3163_v26 = vadd.f32 %v3131_v15, %v3099_v28  ;;  %v3046_v35 = vmul.f32 %v2945_v63, %v2790_v45  ;;  %4037 = vmatprep.mubr.msk.bf16.mxu0 %vm2707_vm3, %v3205_v16 }
 0x41a   : > { %3196 = vst.msk [vmem:[%s4753_s18 + $0xe8] sm:$0xff] %vm2707_vm3, %v3164_v41  ;;  %v3086_v39 = vadd.f32 %v6582_v33, %v3047_v20 }
 0x41b   : > { %3195 = vst.msk [vmem:[%s4753_s18 + $0xe0] sm:$0xff] %vm2707_vm3, %v3163_v26  ;;  %v3085_v58 = vadd.f32 %v6582_v33, %v3046_v35  ;;  %v3030_v42 = vpop.permute.xlu1 %3029  ;;  %v3213_v6 = vpack.c.bf16 %v3164_v41, %v3163_v26 }
 0x41c   : > { %v3150_v46 = vadd.f32 %v3118_v2, %v3086_v39  ;;  %v3063_v49 = vmul.f32 %v3030_v42, %v2807_v51  ;;  %v3025_v5 = vpop.permute.xlu0 %3024 }
 0x41d   : > { %v3149_v11 = vadd.f32 %v3117_v59, %v3085_v58  ;;  %v3062_v54 = vmul.f32 %v3025_v5, %v2806_v29  ;;  %4053 = vmatprep.mubr.msk.bf16.mxu1 %vm2707_vm3, %v3213_v6 }
 0x41e   : > { %3182 = vst.msk [vmem:[%s4753_s18 + $0x78] sm:$0xff] %vm2707_vm3, %v3150_v46  ;;  %v3102_v3 = vadd.f32 %v6582_v33, %v3063_v49 }
 0x41f   : > { %3181 = vst.msk [vmem:[%s4753_s18 + $0x70] sm:$0xff] %vm2707_vm3, %v3149_v11  ;;  %v3101_v40 = vadd.f32 %v6582_v33, %v3062_v54  ;;  %v3206_v47 = vpack.c.bf16 %v3150_v46, %v3149_v11 }
 0x420   : > { %v3166_v56 = vadd.f32 %v3134_v22, %v3102_v3 }
 0x421   : > { %v3165_v9 = vadd.f32 %v3133_v48, %v3101_v40  ;;  %4038 = vmatmul.mubr.msk.bf16.gmra.mrb[12].mxu0 %vm2707_vm3, %v3206_v47 }
 0x422   : > { %3198 = vst.msk [vmem:[%s4753_s18 + $0xf8] sm:$0xff] %vm2707_vm3, %v3166_v56 }
 0x423   : > { %3197 = vst.msk [vmem:[%s4753_s18 + $0xf0] sm:$0xff] %vm2707_vm3, %v3165_v9  ;;  %v3214_v34 = vpack.c.bf16 %v3166_v56, %v3165_v9 }
 0x425   : > { %4054 = vmatmul.mubr.msk.bf16.gmra.mrb[12].mxu1 %vm2707_vm3, %v3214_v34 }
 0x4c4   : > { %v4027_v52 = vpop.f32.mrb[0].mxu0 }
 0x4c5   : > { %v3345_v33 = vadd.f32 %v4027_v52, %v6731_v12  ;;  %v3336_v10 = vpop.f32.mrb[1].mxu0 }
 0x4c6   : > { %v3337_v62 = vadd.f32 %v6731_v12, %v3336_v10  ;;  %v4028_v60 = vpop.f32.mrb[2].mxu0 }
 0x4c7   : > { %4421 = vtanh.f32 %v3345_v33  ;;  %v3348_v31 = vadd.f32 %v4028_v60, %v6731_v12  ;;  %v3339_v43 = vpop.f32.mrb[3].mxu0 }
 0x4c8   : > { %4423 = vtanh.f32 %v3337_v62  ;;  %v4043_v30 = vpop.f32.mrb[0].mxu1  ;;  %v3340_v23 = vadd.f32 %v6731_v12, %v3339_v43 }
 0x4c9   : > { %v3409_v24 = vadd.f32 %v4043_v30, %v6731_v12  ;;  %v3400_v61 = vpop.f32.mrb[1].mxu1  ;;  %4425 = vtanh.f32 %v3348_v31 }
 0x4ca   : > { %v3401_v19 = vadd.f32 %v6731_v12, %v3400_v61  ;;  %v4044_v38 = vpop.f32.mrb[2].mxu1 }
 0x4cb   : > { %4427 = vtanh.f32 %v3409_v24  ;;  %v3412_v4 = vadd.f32 %v4044_v38, %v6731_v12  ;;  %v3403_v21 = vpop.f32.mrb[3].mxu1 }
 0x4cc   : > { %4429 = vtanh.f32 %v3401_v19  ;;  %v3404_v18 = vadd.f32 %v6731_v12, %v3403_v21 }
 0x4cd   : > { %4431 = vtanh.f32 %v3340_v23 }
 0x4ce   : > { %4433 = vtanh.f32 %v3412_v4 }
 0x4cf   : > { %4435 = vtanh.f32 %v3404_v18 }
 0x4d1   : > { %v4422_v1 = vpop.eup %4421 }
 0x4d2   : > { %v4424_v8 = vpop.eup %4423  ;;  %v3504_v50 = vmul.f32 %v4422_v1, %v6744_v13 }
 0x4d3   : > { %v4426_v55 = vpop.eup %4425  ;;  %v3502_v14 = vmul.f32 %v4424_v8, %v6744_v13 }
 0x4d4   : > { %v4031_v17 = vpop.f32.mrb[4].mxu0  ;;  %v3541_v25 = vsel %vm3534_vm4, %v3504_v50, 0.0  ;;  %v3505_v20 = vmul.f32 %v4426_v55, %v6744_v13 }
 0x4d5   : > { %v4428_v0 = vpop.eup %4427  ;;  %v3361_v37 = vadd.f32 %v4031_v17, %v6731_v12  ;;  %3542 = vadd.xlane.f32.xlu0 %v3541_v25  ;;  %v3352_v27 = vpop.f32.mrb[5].mxu0  ;;  %v3535_v16 = vsel %vm3534_vm4, %v3502_v14, 0.0 }
 0x4d6   : > { %v4430_v44 = vpop.eup %4429  ;;  %v3353_v36 = vadd.f32 %v6731_v12, %v3352_v27  ;;  %v4032_v53 = vpop.f32.mrb[6].mxu0  ;;  %v3520_v7 = vmul.f32 %v4428_v0, %v6744_v13  ;;  %v3544_v42 = vsel %vm3534_vm4, %v3505_v20, 0.0 }
 0x4d7   : > { %4437 = vtanh.f32 %v3361_v37  ;;  %v3364_v57 = vadd.f32 %v4032_v53, %v6731_v12  ;;  %v3355_v15 = vpop.f32.mrb[7].mxu0  ;;  %v4432_v45 = vpop.eup %4431  ;;  %v3518_v41 = vmul.f32 %v4430_v44, %v6744_v13 }
 0x4d8   : > { %v4047_v28 = vpop.f32.mrb[4].mxu1  ;;  %v3589_v32 = vsel %vm3534_vm4, %v3520_v7, 0.0  ;;  %v4434_v63 = vpop.eup %4433  ;;  %v3356_v35 = vadd.f32 %v6731_v12, %v3355_v15  ;;  %v3503_v6 = vmul.f32 %v4432_v45, %v6744_v13 }
 0x4d9   : > { %4439 = vtanh.f32 %v3364_v57  ;;  %v3425_v26 = vadd.f32 %v4047_v28, %v6731_v12  ;;  %3590 = vadd.xlane.f32.xlu1 %v3589_v32  ;;  %v3416_v2 = vpop.f32.mrb[5].mxu1  ;;  %3536 = vadd.xlane.f32.xlu0 %v3535_v16  ;;  %v3583_v58 = vsel %vm3534_vm4, %v3518_v41, 0.0  ;;  %v3521_v46 = vmul.f32 %v4434_v63, %v6744_v13  ;;  %v4436_v49 = vpop.eup %4435 }
 0x4da   : > { %4441 = vtanh.f32 %v3353_v36  ;;  %v4048_v51 = vpop.f32.mrb[6].mxu1  ;;  %v3417_v39 = vadd.f32 %v6731_v12, %v3416_v2  ;;  %v3538_v11 = vsel %vm3534_vm4, %v3503_v6, 0.0  ;;  %v3519_v54 = vmul.f32 %v4436_v49, %v6744_v13 }
 0x4db   : > { %4443 = vtanh.f32 %v3425_v26  ;;  %v3428_v59 = vadd.f32 %v4048_v51, %v6731_v12  ;;  %v3419_v29 = vpop.f32.mrb[7].mxu1  ;;  %v3592_v22 = vsel %vm3534_vm4, %v3521_v46, 0.0 }
 0x4dc   : > { %v3420_v5 = vadd.f32 %v6731_v12, %v3419_v29  ;;  %v3586_v34 = vsel %vm3534_vm4, %v3519_v54, 0.0 }
 0x4dd   : > { %4445 = vtanh.f32 %v3428_v59  ;;  %3584 = vadd.xlane.f32.xlu1 %v3583_v58  ;;  %3545 = vadd.xlane.f32.xlu0 %v3544_v42 }
 0x4de   : > { %4447 = vtanh.f32 %v3356_v35 }
 0x4df   : > { %4449 = vtanh.f32 %v3417_v39 }
 0x4e0   : > { %4451 = vtanh.f32 %v3420_v5 }
 0x4e1   : > { %v4438_v3 = vpop.eup %4437  ;;  %3539 = vadd.xlane.f32.xlu1 %v3538_v11  ;;  %3593 = vadd.xlane.f32.xlu0 %v3592_v22 }
 0x4e2   : > { %v3508_v48 = vmul.f32 %v4438_v3, %v6744_v13 }
 0x4e3   : > { %v4440_v40 = vpop.eup %4439 }
 0x4e4   : > { %v4442_v47 = vpop.eup %4441  ;;  %v4035_v56 = vpop.f32.mrb[8].mxu0  ;;  %v3553_v9 = vsel %vm3534_vm4, %v3508_v48, 0.0  ;;  %v3509_v52 = vmul.f32 %v4440_v40, %v6744_v13 }
 0x4e5   : > { %v4444_v33 = vpop.eup %4443  ;;  %v3377_v10 = vadd.f32 %v4035_v56, %v6731_v12  ;;  %v3368_v62 = vpop.f32.mrb[9].mxu0  ;;  %3554 = vadd.xlane.f32.xlu1 %v3553_v9  ;;  %3587 = vadd.xlane.f32.xlu0 %v3586_v34  ;;  %v3506_v21 = vmul.f32 %v4442_v47, %v6744_v13 }
 0x4e6   : > { %v3369_v60 = vadd.f32 %v6731_v12, %v3368_v62  ;;  %v4036_v31 = vpop.f32.mrb[10].mxu0  ;;  %v3524_v43 = vmul.f32 %v4444_v33, %v6744_v13  ;;  %v3556_v4 = vsel %vm3534_vm4, %v3509_v52, 0.0 }
 0x4e7   : > { %v4446_v30 = vpop.eup %4445  ;;  %4453 = vtanh.f32 %v3377_v10  ;;  %v3380_v24 = vadd.f32 %v4036_v31, %v6731_v12  ;;  %v3371_v61 = vpop.f32.mrb[11].mxu0  ;;  %v3547_v37 = vsel %vm3534_vm4, %v3506_v21, 0.0 }
 0x4e8   : > { %v4448_v23 = vpop.eup %4447  ;;  %v4051_v19 = vpop.f32.mrb[8].mxu1  ;;  %v3601_v38 = vsel %vm3534_vm4, %v3524_v43, 0.0  ;;  %v3525_v18 = vmul.f32 %v4446_v30, %v6744_v13  ;;  %v3372_v55 = vadd.f32 %v6731_v12, %v3371_v61 }
 0x4e9   : > { %v4450_v1 = vpop.eup %4449  ;;  %4455 = vtanh.f32 %v3380_v24  ;;  %v3441_v8 = vadd.f32 %v4051_v19, %v6731_v12  ;;  %v3432_v50 = vpop.f32.mrb[9].mxu1  ;;  %3602 = vadd.xlane.f32.xlu1 %v3601_v38  ;;  %3557 = vadd.xlane.f32.xlu0 %v3556_v4  ;;  %v3507_v36 = vmul.f32 %v4448_v23, %v6744_v13 }
 0x4ea   : > { %4457 = vtanh.f32 %v3369_v60  ;;  %v4052_v17 = vpop.f32.mrb[10].mxu1  ;;  %v3433_v25 = vadd.f32 %v6731_v12, %v3432_v50  ;;  %v3604_v27 = vsel %vm3534_vm4, %v3525_v18, 0.0  ;;  %v3522_v44 = vmul.f32 %v4450_v1, %v6744_v13  ;;  %v4452_v53 = vpop.eup %4451 }
 0x4eb   : > { %4459 = vtanh.f32 %v3441_v8  ;;  %v3444_v14 = vadd.f32 %v4052_v17, %v6731_v12  ;;  %v3435_v0 = vpop.f32.mrb[11].mxu1  ;;  %v3550_v15 = vsel %vm3534_vm4, %v3507_v36, 0.0  ;;  %v3523_v45 = vmul.f32 %v4452_v53, %v6744_v13 }
 0x4ec   : > { %v3436_v7 = vadd.f32 %v6731_v12, %v3435_v0  ;;  %v3595_v57 = vsel %vm3534_vm4, %v3522_v44, 0.0 }
 0x4ed   : > { %4461 = vtanh.f32 %v3444_v14  ;;  %3548 = vadd.xlane.f32.xlu1 %v3547_v37  ;;  %3605 = vadd.xlane.f32.xlu0 %v3604_v27  ;;  %v3598_v26 = vsel %vm3534_vm4, %v3523_v45, 0.0 }
 0x4ee   : > { %4463 = vtanh.f32 %v3372_v55 }
 0x4ef   : > { %4465 = vtanh.f32 %v3433_v25 }
 0x4f0   : > { %4467 = vtanh.f32 %v3436_v7 }
 0x4f1   : > { %v4454_v28 = vpop.eup %4453  ;;  %3596 = vadd.xlane.f32.xlu1 %v3595_v57  ;;  %3551 = vadd.xlane.f32.xlu0 %v3550_v15 }
 0x4f2   : > { %v3512_v32 = vmul.f32 %v4454_v28, %v6744_v13 }
 0x4f3   : > { %v4456_v16 = vpop.eup %4455 }
 0x4f4   : > { %v4458_v41 = vpop.eup %4457  ;;  %v4039_v20 = vpop.f32.mrb[12].mxu0  ;;  %v3565_v63 = vsel %vm3534_vm4, %v3512_v32, 0.0  ;;  %v3513_v2 = vmul.f32 %v4456_v16, %v6744_v13 }
 0x4f5   : > { %v4460_v35 = vpop.eup %4459  ;;  %v3393_v51 = vadd.f32 %v4039_v20, %v6731_v12  ;;  %v3384_v39 = vpop.f32.mrb[13].mxu0  ;;  %3566 = vadd.xlane.f32.xlu1 %v3565_v63  ;;  %3599 = vadd.xlane.f32.xlu0 %v3598_v26  ;;  %v3510_v5 = vmul.f32 %v4458_v41, %v6744_v13 }
 0x4f6   : > { %v3385_v59 = vadd.f32 %v6731_v12, %v3384_v39  ;;  %v4040_v29 = vpop.f32.mrb[14].mxu0  ;;  %v3528_v58 = vmul.f32 %v4460_v35, %v6744_v13  ;;  %v3568_v49 = vsel %vm3534_vm4, %v3513_v2, 0.0 }
 0x4f7   : > { %v4462_v42 = vpop.eup %4461  ;;  %4469 = vtanh.f32 %v3393_v51  ;;  %v3396_v6 = vadd.f32 %v4040_v29, %v6731_v12  ;;  %v3387_v46 = vpop.f32.mrb[15].mxu0  ;;  %v3559_v10 = vsel %vm3534_vm4, %v3510_v5, 0.0 }
 0x4f8   : > { %v4464_v11 = vpop.eup %4463  ;;  %4471 = vtanh.f32 %v3385_v59  ;;  %v3388_v22 = vadd.f32 %v6731_v12, %v3387_v46  ;;  %v4055_v54 = vpop.f32.mrb[12].mxu1  ;;  %v3613_v3 = vsel %vm3534_vm4, %v3528_v58, 0.0  ;;  %v3529_v48 = vmul.f32 %v4462_v42, %v6744_v13 }
 0x4f9   : > { %v4466_v40 = vpop.eup %4465  ;;  %4473 = vtanh.f32 %v3396_v6  ;;  %v3448_v47 = vpop.f32.mrb[13].mxu1  ;;  %3614 = vadd.xlane.f32.xlu1 %v3613_v3  ;;  %3569 = vadd.xlane.f32.xlu0 %v3568_v49  ;;  %v3457_v56 = vadd.f32 %v4055_v54, %v6731_v12  ;;  %v3511_v62 = vmul.f32 %v4464_v11, %v6744_v13 }
 0x4fa   : > { %v3449_v9 = vadd.f32 %v6731_v12, %v3448_v47  ;;  %v4056_v34 = vpop.f32.mrb[14].mxu1  ;;  %4475 = vtanh.f32 %v3388_v22  ;;  %v3616_v31 = vsel %vm3534_vm4, %v3529_v48, 0.0  ;;  %v3526_v43 = vmul.f32 %v4466_v40, %v6744_v13  ;;  %v4468_v30 = vpop.eup %4467 }
 0x4fb   : > { %v3460_v52 = vadd.f32 %v4056_v34, %v6731_v12  ;;  %v3451_v33 = vpop.f32.mrb[15].mxu1  ;;  %v3562_v61 = vsel %vm3534_vm4, %v3511_v62, 0.0  ;;  %v3527_v23 = vmul.f32 %v4468_v30, %v6744_v13 }
 0x4fc   : > { %4477 = vtanh.f32 %v3449_v9  ;;  %v3452_v60 = vadd.f32 %v6731_v12, %v3451_v33  ;;  %v3607_v24 = vsel %vm3534_vm4, %v3526_v43, 0.0 }
 0x4fd   : > { %4479 = vtanh.f32 %v3460_v52  ;;  %3560 = vadd.xlane.f32.xlu1 %v3559_v10  ;;  %3617 = vadd.xlane.f32.xlu0 %v3616_v31  ;;  %v3610_v1 = vsel %vm3534_vm4, %v3527_v23, 0.0 }
 0x4fe   : > { %4481 = vtanh.f32 %v3457_v56 }
 0x4ff   : > { %4483 = vtanh.f32 %v3452_v60 }
 0x501   : > { %v4470_v19 = vpop.eup %4469  ;;  %3608 = vadd.xlane.f32.xlu1 %v3607_v24  ;;  %3563 = vadd.xlane.f32.xlu0 %v3562_v61 }
 0x502   : > { %v4472_v12 = vpop.eup %4471  ;;  %v3516_v38 = vmul.f32 %v4470_v19, %v6744_v13 }
 0x503   : > { %v4474_v4 = vpop.eup %4473  ;;  %v3514_v21 = vmul.f32 %v4472_v12, %v6744_v13 }
 0x504   : > { %v3577_v18 = vsel %vm3534_vm4, %v3516_v38, 0.0  ;;  %v3517_v8 = vmul.f32 %v4474_v4, %v6744_v13  ;;  %v4476_v50 = vpop.eup %4475 }
 0x505   : > { %3578 = vadd.xlane.f32.xlu1 %v3577_v18  ;;  %3611 = vadd.xlane.f32.xlu0 %v3610_v1  ;;  %v3571_v25 = vsel %vm3534_vm4, %v3514_v21, 0.0  ;;  %v3515_v27 = vmul.f32 %v4476_v50, %v6744_v13 }
 0x506   : > { %v4478_v55 = vpop.eup %4477  ;;  %v3580_v0 = vsel %vm3534_vm4, %v3517_v8, 0.0 }
 0x507   : > { %v4480_v17 = vpop.eup %4479  ;;  %v3530_v37 = vmul.f32 %v4478_v55, %v6744_v13  ;;  %v3574_v57 = vsel %vm3534_vm4, %v3515_v27, 0.0 }
 0x508   : > { %v4482_v14 = vpop.eup %4481  ;;  %v3533_v44 = vmul.f32 %v4480_v17, %v6744_v13 }
 0x509   : > { %v4484_v36 = vpop.eup %4483  ;;  %3572 = vadd.xlane.f32.xlu1 %v3571_v25  ;;  %3581 = vadd.xlane.f32.xlu0 %v3580_v0  ;;  %v3619_v7 = vsel %vm3534_vm4, %v3530_v37, 0.0  ;;  %v3532_v15 = vmul.f32 %v4482_v14, %v6744_v13 }
 0x50a   : > { %v3628_v53 = vsel %vm3534_vm4, %v3533_v44, 0.0  ;;  %v3531_v45 = vmul.f32 %v4484_v36, %v6744_v13 }
 0x50b   : > { %v3625_v28 = vsel %vm3534_vm4, %v3532_v15, 0.0 }
 0x50c   : > { %v3622_v32 = vsel %vm3534_vm4, %v3531_v45, 0.0 }
 0x50d   : > { %3620 = vadd.xlane.f32.xlu1 %v3619_v7  ;;  %3575 = vadd.xlane.f32.xlu0 %v3574_v57 }
 0x511   : > { %3626 = vadd.xlane.f32.xlu1 %v3625_v28  ;;  %3623 = vadd.xlane.f32.xlu0 %v3622_v32 }
 0x515   : > { %3629 = vadd.xlane.f32.xlu0 %v3628_v53 }
 0x562   : > { %v3543_v16 = vpop.xlane.xlu0 %3542 }
 0x563   : > { %3633 = vst.msk [vmem:[%s4758_s12 + $0x10] sm:$0xff] %vm2097_vm2, %v3543_v16 }
 0x566   : > { %v3591_v41 = vpop.xlane.xlu1 %3590  ;;  %v3537_v13 = vpop.xlane.xlu0 %3536 }
 0x567   : > { %3649 = vst.msk [vmem:[%s4758_s12 + $0x90] sm:$0xff] %vm2097_vm2, %v3591_v41  ;;  %3631 = vst.msk [vmem:[%s4758_s12] sm:$0xff] %vm2097_vm2, %v3537_v13 }
 0x56a   : > { %v3585_v20 = vpop.xlane.xlu1 %3584  ;;  %v3546_v63 = vpop.xlane.xlu0 %3545 }
 0x56b   : > { %3647 = vst.msk [vmem:[%s4758_s12 + $0x80] sm:$0xff] %vm2097_vm2, %v3585_v20  ;;  %3634 = vst.msk [vmem:[%s4758_s12 + $0x18] sm:$0xff] %vm2097_vm2, %v3546_v63 }
 0x56e   : > { %v3540_v26 = vpop.xlane.xlu1 %3539  ;;  %v3594_v2 = vpop.xlane.xlu0 %3593 }
 0x56f   : > { %3632 = vst.msk [vmem:[%s4758_s12 + $0x8] sm:$0xff] %vm2097_vm2, %v3540_v26  ;;  %3650 = vst.msk [vmem:[%s4758_s12 + $0x98] sm:$0xff] %vm2097_vm2, %v3594_v2 }
 0x572   : > { %v3555_v35 = vpop.xlane.xlu1 %3554  ;;  %v3588_v51 = vpop.xlane.xlu0 %3587 }
 0x573   : > { %3637 = vst.msk [vmem:[%s4758_s12 + $0x30] sm:$0xff] %vm2097_vm2, %v3555_v35  ;;  %3648 = vst.msk [vmem:[%s4758_s12 + $0x88] sm:$0xff] %vm2097_vm2, %v3588_v51 }
 0x576   : > { %v3603_v39 = vpop.xlane.xlu1 %3602  ;;  %v3558_v59 = vpop.xlane.xlu0 %3557 }
 0x577   : > { %3653 = vst.msk [vmem:[%s4758_s12 + $0xb0] sm:$0xff] %vm2097_vm2, %v3603_v39  ;;  %3638 = vst.msk [vmem:[%s4758_s12 + $0x38] sm:$0xff] %vm2097_vm2, %v3558_v59 }
 0x57a   : > { %v3549_v29 = vpop.xlane.xlu1 %3548  ;;  %v3606_v58 = vpop.xlane.xlu0 %3605 }
 0x57b   : > { %3635 = vst.msk [vmem:[%s4758_s12 + $0x20] sm:$0xff] %vm2097_vm2, %v3549_v29  ;;  %3654 = vst.msk [vmem:[%s4758_s12 + $0xb8] sm:$0xff] %vm2097_vm2, %v3606_v58 }
 0x57e   : > { %v3597_v42 = vpop.xlane.xlu1 %3596  ;;  %v3552_v6 = vpop.xlane.xlu0 %3551 }
 0x57f   : > { %3651 = vst.msk [vmem:[%s4758_s12 + $0xa0] sm:$0xff] %vm2097_vm2, %v3597_v42  ;;  %3636 = vst.msk [vmem:[%s4758_s12 + $0x28] sm:$0xff] %vm2097_vm2, %v3552_v6 }
 0x582   : > { %v3567_v46 = vpop.xlane.xlu1 %3566  ;;  %v3600_v49 = vpop.xlane.xlu0 %3599 }
 0x583   : > { %3641 = vst.msk [vmem:[%s4758_s12 + $0x50] sm:$0xff] %vm2097_vm2, %v3567_v46  ;;  %3652 = vst.msk [vmem:[%s4758_s12 + $0xa8] sm:$0xff] %vm2097_vm2, %v3600_v49 }
 0x586   : > { %v3615_v5 = vpop.xlane.xlu1 %3614  ;;  %v3570_v11 = vpop.xlane.xlu0 %3569 }
 0x587   : > { %3657 = vst.msk [vmem:[%s4758_s12 + $0xd0] sm:$0xff] %vm2097_vm2, %v3615_v5  ;;  %3642 = vst.msk [vmem:[%s4758_s12 + $0x58] sm:$0xff] %vm2097_vm2, %v3570_v11 }
 0x58a   : > { %v3561_v22 = vpop.xlane.xlu1 %3560  ;;  %v3618_v54 = vpop.xlane.xlu0 %3617 }
 0x58b   : > { %3639 = vst.msk [vmem:[%s4758_s12 + $0x40] sm:$0xff] %vm2097_vm2, %v3561_v22  ;;  %3658 = vst.msk [vmem:[%s4758_s12 + $0xd8] sm:$0xff] %vm2097_vm2, %v3618_v54 }
 0x58e   : > { %v3609_v3 = vpop.xlane.xlu1 %3608  ;;  %v3564_v48 = vpop.xlane.xlu0 %3563 }
 0x58f   : > { %3655 = vst.msk [vmem:[%s4758_s12 + $0xc0] sm:$0xff] %vm2097_vm2, %v3609_v3  ;;  %3640 = vst.msk [vmem:[%s4758_s12 + $0x48] sm:$0xff] %vm2097_vm2, %v3564_v48 }
 0x592   : > { %v3579_v40 = vpop.xlane.xlu1 %3578  ;;  %v3612_v47 = vpop.xlane.xlu0 %3611 }
 0x593   : > { %3645 = vst.msk [vmem:[%s4758_s12 + $0x70] sm:$0xff] %vm2097_vm2, %v3579_v40  ;;  %3656 = vst.msk [vmem:[%s4758_s12 + $0xc8] sm:$0xff] %vm2097_vm2, %v3612_v47 }
 0x596   : > { %v3573_v56 = vpop.xlane.xlu1 %3572  ;;  %v3582_v9 = vpop.xlane.xlu0 %3581 }
 0x597   : > { %3643 = vst.msk [vmem:[%s4758_s12 + $0x60] sm:$0xff] %vm2097_vm2, %v3573_v56  ;;  %3646 = vst.msk [vmem:[%s4758_s12 + $0x78] sm:$0xff] %vm2097_vm2, %v3582_v9 }
 0x59a   : > { %v3621_v34 = vpop.xlane.xlu1 %3620  ;;  %v3576_v52 = vpop.xlane.xlu0 %3575 }
 0x59b   : > { %3659 = vst.msk [vmem:[%s4758_s12 + $0xe0] sm:$0xff] %vm2097_vm2, %v3621_v34  ;;  %3644 = vst.msk [vmem:[%s4758_s12 + $0x68] sm:$0xff] %vm2097_vm2, %v3576_v52 }
 0x59e   : > { %v3627_v33 = vpop.xlane.xlu1 %3626  ;;  %v3624_v10 = vpop.xlane.xlu0 %3623 }
 0x59f   : > { %3661 = vst.msk [vmem:[%s4758_s12 + $0xf0] sm:$0xff] %vm2097_vm2, %v3627_v33  ;;  %3660 = vst.msk [vmem:[%s4758_s12 + $0xe8] sm:$0xff] %vm2097_vm2, %v3624_v10 }
 0x5a2   : > { %v3630_v62 = vpop.xlane.xlu0 %3629 }
 0x5a3   : > { %3662 = vst.msk [vmem:[%s4758_s12 + $0xf8] sm:$0xff] %vm2097_vm2, %v3630_v62 }
 0x5a4 PF: > { %s21_s19 = sadd.s32 1, %s4539_s19   ;;  %s7291_s21 = sld [smem:[#allocation10_spill]] }
 0x5a5   : > { %p18_p1 = scmp.ge.s32.totalorder %s21_s19, 6   ;;  %s7292_s15 = sld [smem:[#allocation6_spill]] }
 0x5a6   : > { %s7293_s16 = sld [smem:[#allocation7_spill]]  ;;  %s7294_s17 = sld [smem:[#allocation8_spill]] }
 0x5a7   : > { %s7295_s18 = sld [smem:[#allocation9_spill]]  ;;  %s7296_s13 = smov %s4519_s14 }
 0x5a8   :  { %20 = sbr.rel (!%p18_p1) target bundleno = 8 (0x8), region = 161 }
 0x5aa   : > { %s7297_s14 = smov %s7291_s21 }

</bundles_post_ra>
